<compile_context>
chip_gen: v5e
topology: v5e:2x2
jax: 0.10.0
libtpu: 0.0.40
codegen_flags: <defaults>
</compile_context>

<pallas_src>
import jax
import jax.numpy as jnp
from jax.experimental import pallas as pl
from jax.experimental.pallas import tpu as pltpu

EXPANSION = 1          # BasicBlock.expansion
BN_EPS = 1e-5

_MM_PARAMS = pltpu.CompilerParams(
    dimension_semantics=("parallel",),          # M tiles shard across v7x's two TensorCores
    vmem_limit_bytes=32 * 1024 * 1024,          # large tiles + v5e's 16 MiB default scoped limit
)
_EW_PARAMS = pltpu.CompilerParams(dimension_semantics=("parallel",))


# ------------------------------ tiling helpers ------------------------------

def _tiling(m):
    """Pick (lane tile, padded length).

    Minimise grid steps first (per-step overhead dominates these small matmuls),
    prefer an even step count (v7x: 2 TCs on the "parallel" axis), then minimise
    padding, then prefer the larger tile."""
    best = None
    for t in (2048, 1024, 512, 256, 128):
        steps = -(-m // t)
        mp = steps * t
        key = ((steps + 1) // 2, steps % 2, mp, -t)
        if best is None or key < best[0]:
            best = (key, t, mp)
    return best[1], best[2]


def _mm_tile(tile, cout):
    """Cap the matmul grid tile so the f32 accumulator stays <= 256 KiB
    (review: Cout=64 x 2048 f32 would spill / saturate the vst slots, worst on v6e)."""
    t = tile
    while cout * t * 4 > (256 << 10) and t % 256 == 0:
        t //= 2
    return t


def _ew_tile(c, mp):
    """Whole-slab lane tile for the elementwise kernels (slabs here are tiny);
    only sub-divide if a slab would not fit comfortably in scoped VMEM."""
    t = mp
    while c * t * 2 * 6 > (8 << 20) and t % 256 == 0:
        t //= 2
    return t


# ------------------------------ Pallas kernels ------------------------------

def _mm_kernel(a_ref, w_ref, o_ref):
    # o[Cout, TM] = w[Cout, K] @ a[K, TM]   (bf16 operands, f32 accumulation on the MXU)
    o_ref[...] = jnp.dot(w_ref[...], a_ref[...],
                         preferred_element_type=jnp.float32).astype(o_ref.dtype)


def _mm_stats_kernel(a_ref, w_ref, o_ref, st_ref):
    # Conv matmul + fused per-tile BatchNorm partial statistics, packed into a single
    # output block: rows [0:C) hold the sum, rows [C:2C) the sum of squares.
    acc = jnp.dot(w_ref[...], a_ref[...], preferred_element_type=jnp.float32)
    o_ref[...] = acc.astype(o_ref.dtype)
    c = acc.shape[0]
    st_ref[0, 0:c, :] = jnp.sum(acc, axis=1, keepdims=True)
    st_ref[0, c:2 * c, :] = jnp.sum(acc * acc, axis=1, keepdims=True)


def _bn_act_kernel(x_ref, s_ref, b_ref, o_ref):
    # y = relu(x * scale + shift), per-channel affine precomputed from batch stats.
    y = x_ref[...].astype(jnp.float32) * s_ref[...] + b_ref[...]
    o_ref[...] = jnp.maximum(y, 0.0).astype(o_ref.dtype)


def _bn_add_act_kernel(x_ref, r_ref, xs_ref, xb_ref, rs_ref, rb_ref, o_ref):
    # Fused BasicBlock tail: bn2(main) + bn_sc(shortcut) (or identity) + add + ReLU.
    y = x_ref[...].astype(jnp.float32) * xs_ref[...] + xb_ref[...]
    r = r_ref[...].astype(jnp.float32) * rs_ref[...] + rb_ref[...]
    o_ref[...] = jnp.maximum(y + r, 0.0).astype(o_ref.dtype)


# ------------------------------ Pallas wrappers ------------------------------

def matmul_cm(a, w, tile, with_stats, out_dtype=jnp.bfloat16):
    """a: [K, Mp] bf16 (lane-dense), w: [Cout, K] bf16 -> [Cout, Mp]
    (+ packed BN partials (nt, 2*Cout, 1) when with_stats)."""
    K, Mp = a.shape
    Cout, K2 = w.shape
    assert K == K2 and Mp % tile == 0
    t = _mm_tile(tile, Cout)
    grid = (Mp // t,)
    a_spec = pl.BlockSpec((K, t), lambda i: (0, i))
    w_spec = pl.BlockSpec((Cout, K), lambda i: (0, 0))
    o_spec = pl.BlockSpec((Cout, t), lambda i: (0, i))
    if not with_stats:
        return pl.pallas_call(
            _mm_kernel,
            out_shape=jax.ShapeDtypeStruct((Cout, Mp), out_dtype),
            grid=grid,
            in_specs=[a_spec, w_spec],
            out_specs=o_spec,
            compiler_params=_MM_PARAMS,
        )(a, w)
    nt = Mp // t
    return pl.pallas_call(
        _mm_stats_kernel,
        out_shape=(jax.ShapeDtypeStruct((Cout, Mp), out_dtype),
                   jax.ShapeDtypeStruct((nt, 2 * Cout, 1), jnp.float32)),
        grid=grid,
        in_specs=[a_spec, w_spec],
        out_specs=(o_spec, pl.BlockSpec((1, 2 * Cout, 1), lambda i: (i, 0, 0))),
        compiler_params=_MM_PARAMS,
    )(a, w)


def bn_act(x, scale, shift, rows=None):
    """relu(x*scale+shift) on the first `rows` channels of x (whole-slab grid)."""
    Ct, Mp = x.shape
    C = Ct if rows is None else rows
    t = _ew_tile(C, Mp)
    big = pl.BlockSpec((C, t), lambda i: (0, i))
    small = pl.BlockSpec((C, 1), lambda i: (0, 0))
    return pl.pallas_call(
        _bn_act_kernel,
        out_shape=jax.ShapeDtypeStruct((C, Mp), jnp.bfloat16),
        grid=(Mp // t,),
        in_specs=[big, small, small],
        out_specs=big,
        compiler_params=_EW_PARAMS,
    )(x, scale, shift)


def bn_add_act(x, r, xs, xb, rs, rb, r_row_block=0):
    """Fused tail: relu(x*xs+xb + r*rs+rb).  `r_row_block` selects which C-row block of r
    to read (lets the fused conv1+shortcut output be consumed without an XLA slice copy)."""
    C, Mp = x.shape
    t = _ew_tile(C, Mp)
    big = pl.BlockSpec((C, t), lambda i: (0, i))
    r_spec = pl.BlockSpec((C, t), lambda i: (r_row_block, i))
    small = pl.BlockSpec((C, 1), lambda i: (0, 0))
    return pl.pallas_call(
        _bn_add_act_kernel,
        out_shape=jax.ShapeDtypeStruct((C, Mp), jnp.bfloat16),
        grid=(Mp // t,),
        in_specs=[big, r_spec, small, small, small, small],
        out_specs=big,
        compiler_params=_EW_PARAMS,
    )(x, r, xs, xb, rs, rb)


# --------------------------- XLA glue (patches, stats) ---------------------------

def im2col_cm(x4, stride):
    """x4: [C, N, H, W] bf16 -> channel-major patch matrix [9C, Mp] bf16 (zero-padded tail).
    TODO(synk): replace with in-kernel 9-tap accumulation (see header) to avoid this HBM slab."""
    C, N, H, W = x4.shape
    Ho = (H - 1) // stride + 1
    Wo = (W - 1) // stride + 1
    xp = jnp.pad(x4, ((0, 0), (0, 0), (1, 1), (1, 1)))
    cols = []
    for kh in range(3):
        for kw in range(3):
            cols.append(jax.lax.slice(
                xp,
                (0, 0, kh, kw),
                (C, N, kh + (Ho - 1) * stride + 1, kw + (Wo - 1) * stride + 1),
                (1, 1, stride, stride)))
    pat = jnp.stack(cols, axis=0)                       # [9, C, N, Ho, Wo]
    M = N * Ho * Wo
    tile, Mp = _tiling(M)
    pat = pat.reshape(9 * C, M)
    pat = jnp.pad(pat, ((0, 0), (0, Mp - M))).astype(jnp.bfloat16)
    return pat, Ho, Wo, M, Mp, tile


def bn_scale_shift(ssum, ssq, count, gamma, beta):
    """Finalise per-channel batch-norm affine from per-tile partial sums (tiny XLA op)."""
    s = jnp.sum(ssum, axis=0)
    q = jnp.sum(ssq, axis=0)
    mean = s / count
    var = jnp.maximum(q / count - mean * mean, 0.0)     # biased variance (PyTorch BN)
    inv = jax.lax.rsqrt(var + BN_EPS)
    scale = (gamma * inv).astype(jnp.float32).reshape(-1, 1)
    shift = (beta - mean * gamma * inv).astype(jnp.float32).reshape(-1, 1)
    return scale, shift


# --------------------------------- ResNet model ---------------------------------

def basic_block(x_slab, dims, bp, stride):
    """PyTorch BasicBlock: relu(bn1(conv1(x))); bn2(conv2(.)) + shortcut(x); relu.
    The 1x1 shortcut conv (when present) is pre-fused into conv1's weight along Cout."""
    N, H, W, M = dims
    Cin = x_slab.shape[0]
    planes = bp['bn1_g'].shape[0]
    has_sc = 'sc_bn_g' in bp
    cout1 = bp['conv1_w'].shape[0]              # planes, or 2*planes with fused shortcut

    x4 = x_slab[:, :M].reshape(Cin, N, H, W)

    # conv1 (3x3, stride) [+ fused 1x1 shortcut rows] + fused BN partial stats
    pat1, Ho, Wo, M1, Mp1, t1 = im2col_cm(x4, stride)
    y1, st1 = matmul_cm(pat1, bp['conv1_w'], t1, with_stats=True)
    s1, b1 = bn_scale_shift(st1[:, 0:planes, 0], st1[:, cout1:cout1 + planes, 0],
                            float(M1), bp['bn1_g'], bp['bn1_b'])

    # bn1 + relu (whole-slab elementwise kernel), main-path rows only
    row_split_ok = (planes % 8 == 0)            # sublane-aligned row-blocked access
    if has_sc and not row_split_ok:
        y_main, y_sc, r_blk = y1[:planes], y1[planes:], 0
    else:
        y_main, y_sc, r_blk = y1, y1, (1 if has_sc else 0)
    h = bn_act(y_main, s1, b1, rows=planes)

    # conv2 (3x3, stride 1) + fused BN partial stats
    h4 = h[:, :M1].reshape(planes, N, Ho, Wo)
    pat2, _, _, M2, Mp2, t2 = im2col_cm(h4, 1)
    y2, st2 = matmul_cm(pat2, bp['conv2_w'], t2, with_stats=True)
    s2, b2 = bn_scale_shift(st2[:, 0:planes, 0], st2[:, planes:2 * planes, 0],
                            float(M2), bp['bn2_g'], bp['bn2_b'])

    # fused tail: bn2 + (shortcut BN | identity) + residual add + ReLU
    if has_sc:
        rs, rb = bn_scale_shift(st1[:, planes:cout1, 0], st1[:, cout1 + planes:, 0],
                                float(M1), bp['sc_bn_g'], bp['sc_bn_b'])
        out = bn_add_act(y2, y_sc, s2, b2, rs, rb, r_row_block=r_blk)
    else:
        ones = jnp.ones((planes, 1), jnp.float32)
        zeros = jnp.zeros((planes, 1), jnp.float32)
        out = bn_add_act(y2, x_slab, s2, b2, ones, zeros, r_row_block=0)

    return out, (N, Ho, Wo, M2)


def resnet_forward(params, x_nchw, num_blocks, taskcla):
    bsz = x_nchw.shape[0]
    x = x_nchw.reshape(bsz, 3, 84, 84).astype(jnp.bfloat16)
    x4 = jnp.transpose(x, (1, 0, 2, 3))               # NCHW -> channel-major [C, N, H, W]

    # stem: conv3x3(3, nf, stride=2) + BN(batch stats) + ReLU
    pat, Ho, Wo, M, Mp, tile = im2col_cm(x4, 2)
    y, st = matmul_cm(pat, params['conv1_w'], tile, with_stats=True)
    nf0 = params['bn1_g'].shape[0]
    sc, sh = bn_scale_shift(st[:, 0:nf0, 0], st[:, nf0:2 * nf0, 0], float(M),
                            params['bn1_g'], params['bn1_b'])
    out = bn_act(y, sc, sh)
    dims = (bsz, Ho, Wo, M)

    layer_strides = [[s0] + [1] * (num_blocks[li] - 1)
                     for li, s0 in enumerate((1, 2, 2, 2))]
    for li, blocks in enumerate(params['layers']):
        for bi, bp in enumerate(blocks):
            out, dims = basic_block(out, dims, bp, layer_strides[li][bi])

    # avg_pool2d(out, 2) + flatten in PyTorch NCHW order (tiny -> XLA glue)
    N, H, W, M = dims
    C = out.shape[0]
    x4f = out[:, :M].reshape(C, N, H, W).astype(jnp.float32)
    Hp, Wp = H // 2, W // 2
    pooled = x4f[:, :, :Hp * 2, :Wp * 2].reshape(C, N, Hp, 2, Wp, 2).mean(axis=(3, 5))
    feat = jnp.transpose(pooled, (1, 0, 2, 3)).reshape(N, -1)      # [N, C*Hp*Wp]

    # merged per-task linear heads
    w_all = params['linear_all']
    if N >= 256:
        tile_h, Np = _tiling(N)
        a = jnp.pad(feat.T, ((0, 0), (0, Np - N))).astype(jnp.bfloat16)
        logits = matmul_cm(a, w_all, tile_h, with_stats=False,
                           out_dtype=jnp.float32)[:, :N].T
    else:
        # tiny batch: padding N -> 128 lanes + a custom call is slower than plain XLA here
        logits = jnp.dot(feat, w_all.T.astype(jnp.float32),
                         preferred_element_type=jnp.float32)

    ys, off = [], 0
    for (_, n) in taskcla:
        ys.append(logits[:, off:off + n])
        off += n
    return ys


# --------------------------- deterministic parameter init ---------------------------

def init_params(key, num_blocks, taskcla, nf):
    keys = iter(jax.random.split(key, 256))

    def conv3x3_w(cin, cout):
        std = (2.0 / (9 * cin)) ** 0.5
        w = std * jax.random.normal(next(keys), (cout, 3, 3, cin), jnp.float32)
        return w.reshape(cout, 9 * cin).astype(jnp.bfloat16)   # K order = (kh, kw, cin)

    def conv1x1_w(cin, cout):
        std = (2.0 / cin) ** 0.5
        w = std * jax.random.normal(next(keys), (cout, cin), jnp.float32)
        return w.astype(jnp.bfloat16)

    params = {
        'conv1_w': conv3x3_w(3, nf),
        'bn1_g': jnp.ones((nf,), jnp.float32),
        'bn1_b': jnp.zeros((nf,), jnp.float32),
    }

    in_planes = nf
    layers = []
    for li, (mult, stride0) in enumerate(zip([1, 2, 4, 8], [1, 2, 2, 2])):
        planes = nf * mult
        strides = [stride0] + [1] * (num_blocks[li] - 1)
        blocks = []
        for s in strides:
            bp = {
                'conv1_w': conv3x3_w(in_planes, planes),
                'bn1_g': jnp.ones((planes,), jnp.float32),
                'bn1_b': jnp.zeros((planes,), jnp.float32),
                'conv2_w': conv3x3_w(planes, planes),
                'bn2_g': jnp.ones((planes,), jnp.float32),
                'bn2_b': jnp.zeros((planes,), jnp.float32),
            }
            if s != 1 or in_planes != planes * EXPANSION:
                # Fuse the 1x1 shortcut into conv1's matmul: zero-embed at the centre-tap
                # K rows (tap index 4 of the (kh, kw, cin) ordering) and concat along Cout.
                sc_w = conv1x1_w(in_planes, planes)
                sc_emb = jnp.zeros((planes, 9 * in_planes), jnp.bfloat16)
                sc_emb = sc_emb.at[:, 4 * in_planes:5 * in_planes].set(sc_w)
                bp['conv1_w'] = jnp.concatenate([bp['conv1_w'], sc_emb], axis=0)
                bp['sc_bn_g'] = jnp.ones((planes,), jnp.float32)
                bp['sc_bn_b'] = jnp.zeros((planes,), jnp.float32)
            blocks.append(bp)
            in_planes = planes * EXPANSION
        layers.append(blocks)
    params['layers'] = layers

    in_features = nf * 8 * EXPANSION * 9
    lin_std = 1.0 / (in_features ** 0.5)
    heads = [lin_std * jax.random.normal(next(keys), (n, in_features), jnp.float32)
             for (_, n) in taskcla]
    params['linear_all'] = jnp.concatenate(heads, axis=0).astype(jnp.bfloat16)
    return params


# ---------------------------------------- main ----------------------------------------

if __name__ == "__main__":
    key = jax.random.PRNGKey(0)
    pkey, xkey = jax.random.split(key)

    nf = 8                         # small width (module parameter)
    num_blocks = (1, 1, 1, 1)      # small depth (module parameter)
    taskcla = ((0, 5), (1, 3))     # two tiny task heads

    params = init_params(pkey, num_blocks, taskcla, nf)

    # forward() hard-codes x.view(bsz, 3, 84, 84), so spatial size must be 84x84
    x = jax.random.normal(xkey, (2, 3, 84, 84), jnp.float32)   # NCHW, like PyTorch

    fwd = jax.jit(resnet_forward, static_argnums=(2, 3))
    ys = fwd(params, x, num_blocks, taskcla)
    ys = [jax.block_until_ready(y) for y in ys]

    assert len(ys) == len(taskcla)
    assert ys[0].shape == (2, 5) and ys[1].shape == (2, 3)
    assert all(bool(jnp.all(jnp.isfinite(y))) for y in ys)
    print("KERNEL_OK")
</pallas_src>

<mosaic_0001>
module attributes {stable_mosaic.version = 11 : i64} {
  func.func @_mm_stats_kernel(%arg0: i32, %arg1: memref<27x2048xbf16, #tpu.memory_space<vmem>>, %arg2: memref<8x27xbf16, #tpu.memory_space<vmem>>, %arg3: memref<8x2048xbf16, #tpu.memory_space<vmem>>, %arg4: memref<1x16x1xf32, #tpu.memory_space<vmem>>) attributes {dimension_semantics = [#tpu.dimension_semantics<parallel>], iteration_bounds = array<i64: 2>, scalar_prefetch = 0 : i64, scratch_operands = 0 : i64, tpu.core_type = #tpu.core_type<tc>, window_params = [{transform_indices = @transform_0, window_bounds = array<i64: 27, 2048>}, {pipeline_mode = #tpu.pipeline_mode<synchronous>, transform_indices = @transform_1, window_bounds = array<i64: 8, 27>}, {transform_indices = @transform_2, window_bounds = array<i64: 8, 2048>}, {transform_indices = @transform_3, window_bounds = array<i64: 1, 16, 1>}]} {
    %c0 = arith.constant 0 : index
    %c0_0 = arith.constant 0 : index
    %0 = vector.load %arg2[%c0, %c0_0] : memref<8x27xbf16, #tpu.memory_space<vmem>>, vector<8x27xbf16>
    %c0_1 = arith.constant 0 : index
    %c0_2 = arith.constant 0 : index
    %1 = vector.load %arg1[%c0_1, %c0_2] : memref<27x2048xbf16, #tpu.memory_space<vmem>>, vector<27x2048xbf16>
    %cst = arith.constant dense<0.000000e+00> : vector<8x2048xf32>
    %2 = tpu.matmul %0, %1, %cst {dimension_numbers = #tpu.dot_dimension_numbers<[1], [0], [0], [1], [0, 0, 1, 1], [], []>} : vector<8x27xbf16>, vector<27x2048xbf16>, vector<8x2048xf32> -> vector<8x2048xf32>
    %3 = arith.truncf %2 : vector<8x2048xf32> to vector<8x2048xbf16>
    %c0_3 = arith.constant 0 : index
    %c0_4 = arith.constant 0 : index
    %4 = vector.load %arg3[%c0_3, %c0_4] : memref<8x2048xbf16, #tpu.memory_space<vmem>>, vector<8x2048xbf16>
    tpu.vector_store %arg3[%c0_3, %c0_4], %3 {strides = array<i32>} : memref<8x2048xbf16, #tpu.memory_space<vmem>>, vector<8x2048xbf16>,
    %cst_5 = arith.constant dense<0.000000e+00> : vector<8xf32>
    %5 = vector.multi_reduction <add>, %2, %cst_5 [1] : vector<8x2048xf32> to vector<8xf32>
    %6 = vector.shape_cast %5 : vector<8xf32> to vector<8x1xf32>
    %c0_6 = arith.constant 0 : index
    %c0_7 = arith.constant 0 : index
    %c0_8 = arith.constant 0 : index
    %7 = vector.load %arg4[%c0_6, %c0_7, %c0_8] : memref<1x16x1xf32, #tpu.memory_space<vmem>>, vector<1x8x1xf32>
    %8 = vector.shape_cast %7 : vector<1x8x1xf32> to vector<8x1xf32>
    %9 = vector.shape_cast %6 : vector<8x1xf32> to vector<1x8x1xf32>
    tpu.vector_store %arg4[%c0_6, %c0_7, %c0_8], %9 {strides = array<i32>} : memref<1x16x1xf32, #tpu.memory_space<vmem>>, vector<1x8x1xf32>,
    %10 = arith.mulf %2, %2 : vector<8x2048xf32>
    %cst_9 = arith.constant dense<0.000000e+00> : vector<8xf32>
    %11 = vector.multi_reduction <add>, %10, %cst_9 [1] : vector<8x2048xf32> to vector<8xf32>
    %12 = vector.shape_cast %11 : vector<8xf32> to vector<8x1xf32>
    %c0_10 = arith.constant 0 : index
    %c8 = arith.constant 8 : index
    %c0_11 = arith.constant 0 : index
    %13 = vector.load %arg4[%c0_10, %c8, %c0_11] : memref<1x16x1xf32, #tpu.memory_space<vmem>>, vector<1x8x1xf32>
    %14 = vector.shape_cast %13 : vector<1x8x1xf32> to vector<8x1xf32>
    %15 = vector.shape_cast %12 : vector<8x1xf32> to vector<1x8x1xf32>
    tpu.vector_store %arg4[%c0_10, %c8, %c0_11], %15 {strides = array<i32>} : memref<1x16x1xf32, #tpu.memory_space<vmem>>, vector<1x8x1xf32>,
    return
  }
  func.func @transform_0(%arg0: i32) -> (i32, i32) {
    %c0_i32 = arith.constant 0 : i32
    %c0_i32_0 = arith.constant 0 : i32
    return %c0_i32, %arg0 : i32, i32
  }
  func.func @transform_1(%arg0: i32) -> (i32, i32) {
    %c0_i32 = arith.constant 0 : i32
    %c0_i32_0 = arith.constant 0 : i32
    %c0_i32_1 = arith.constant 0 : i32
    return %c0_i32, %c0_i32_0 : i32, i32
  }
  func.func @transform_2(%arg0: i32) -> (i32, i32) {
    %c0_i32 = arith.constant 0 : i32
    %c0_i32_0 = arith.constant 0 : i32
    return %c0_i32, %arg0 : i32, i32
  }
  func.func @transform_3(%arg0: i32) -> (i32, i32, i32) {
    %c0_i32 = arith.constant 0 : i32
    %c0_i32_0 = arith.constant 0 : i32
    %c0_i32_1 = arith.constant 0 : i32
    return %arg0, %c0_i32, %c0_i32_0 : i32, i32, i32
  }
}

module attributes {stable_mosaic.version = 11 : i64} {
  func.func @_bn_act_kernel(%arg0: i32, %arg1: memref<8x4096xbf16, #tpu.memory_space<vmem>>, %arg2: memref<8x1xf32, #tpu.memory_space<vmem>>, %arg3: memref<8x1xf32, #tpu.memory_space<vmem>>, %arg4: memref<8x4096xbf16, #tpu.memory_space<vmem>>) attributes {dimension_semantics = [#tpu.dimension_semantics<parallel>], iteration_bounds = array<i64: 1>, scalar_prefetch = 0 : i64, scratch_operands = 0 : i64, tpu.core_type = #tpu.core_type<tc>, window_params = [{transform_indices = @transform_0, window_bounds = array<i64: 8, 4096>}, {pipeline_mode = #tpu.pipeline_mode<synchronous>, transform_indices = @transform_1, window_bounds = array<i64: 8, 1>}, {pipeline_mode = #tpu.pipeline_mode<synchronous>, transform_indices = @transform_2, window_bounds = array<i64: 8, 1>}, {transform_indices = @transform_3, window_bounds = array<i64: 8, 4096>}]} {
    %c0 = arith.constant 0 : index
    %c0_0 = arith.constant 0 : index
    %0 = vector.load %arg1[%c0, %c0_0] : memref<8x4096xbf16, #tpu.memory_space<vmem>>, vector<8x4096xbf16>
    %1 = arith.extf %0 : vector<8x4096xbf16> to vector<8x4096xf32>
    %c0_1 = arith.constant 0 : index
    %c0_2 = arith.constant 0 : index
    %2 = vector.load %arg2[%c0_1, %c0_2] : memref<8x1xf32, #tpu.memory_space<vmem>>, vector<8x1xf32>
    %3 = vector.broadcast %2 : vector<8x1xf32> to vector<8x4096xf32>
    %4 = arith.mulf %1, %3 : vector<8x4096xf32>
    %c0_3 = arith.constant 0 : index
    %c0_4 = arith.constant 0 : index
    %5 = vector.load %arg3[%c0_3, %c0_4] : memref<8x1xf32, #tpu.memory_space<vmem>>, vector<8x1xf32>
    %6 = vector.broadcast %5 : vector<8x1xf32> to vector<8x4096xf32>
    %7 = arith.addf %4, %6 : vector<8x4096xf32>
    %cst = arith.constant 0.000000e+00 : f32
    %8 = vector.broadcast %cst : f32 to vector<8x4096xf32>
    %9 = arith.maximumf %7, %8 : vector<8x4096xf32>
    %10 = arith.truncf %9 : vector<8x4096xf32> to vector<8x4096xbf16>
    %c0_5 = arith.constant 0 : index
    %c0_6 = arith.constant 0 : index
    %11 = vector.load %arg4[%c0_5, %c0_6] : memref<8x4096xbf16, #tpu.memory_space<vmem>>, vector<8x4096xbf16>
    tpu.vector_store %arg4[%c0_5, %c0_6], %10 {strides = array<i32>} : memref<8x4096xbf16, #tpu.memory_space<vmem>>, vector<8x4096xbf16>,
    return
  }
  func.func @transform_0(%arg0: i32) -> (i32, i32) {
    %c0_i32 = arith.constant 0 : i32
    %c0_i32_0 = arith.constant 0 : i32
    return %c0_i32, %arg0 : i32, i32
  }
  func.func @transform_1(%arg0: i32) -> (i32, i32) {
    %c0_i32 = arith.constant 0 : i32
    %c0_i32_0 = arith.constant 0 : i32
    %c0_i32_1 = arith.constant 0 : i32
    return %c0_i32, %c0_i32_0 : i32, i32
  }
  func.func @transform_2(%arg0: i32) -> (i32, i32) {
    %c0_i32 = arith.constant 0 : i32
    %c0_i32_0 = arith.constant 0 : i32
    %c0_i32_1 = arith.constant 0 : i32
    return %c0_i32, %c0_i32_0 : i32, i32
  }
  func.func @transform_3(%arg0: i32) -> (i32, i32) {
    %c0_i32 = arith.constant 0 : i32
    %c0_i32_0 = arith.constant 0 : i32
    return %c0_i32, %arg0 : i32, i32
  }
}

module attributes {stable_mosaic.version = 11 : i64} {
  func.func @_mm_stats_kernel(%arg0: i32, %arg1: memref<72x2048xbf16, #tpu.memory_space<vmem>>, %arg2: memref<8x72xbf16, #tpu.memory_space<vmem>>, %arg3: memref<8x2048xbf16, #tpu.memory_space<vmem>>, %arg4: memref<1x16x1xf32, #tpu.memory_space<vmem>>) attributes {dimension_semantics = [#tpu.dimension_semantics<parallel>], iteration_bounds = array<i64: 2>, scalar_prefetch = 0 : i64, scratch_operands = 0 : i64, tpu.core_type = #tpu.core_type<tc>, window_params = [{transform_indices = @transform_0, window_bounds = array<i64: 72, 2048>}, {pipeline_mode = #tpu.pipeline_mode<synchronous>, transform_indices = @transform_1, window_bounds = array<i64: 8, 72>}, {transform_indices = @transform_2, window_bounds = array<i64: 8, 2048>}, {transform_indices = @transform_3, window_bounds = array<i64: 1, 16, 1>}]} {
    %c0 = arith.constant 0 : index
    %c0_0 = arith.constant 0 : index
    %0 = vector.load %arg2[%c0, %c0_0] : memref<8x72xbf16, #tpu.memory_space<vmem>>, vector<8x72xbf16>
    %c0_1 = arith.constant 0 : index
    %c0_2 = arith.constant 0 : index
    %1 = vector.load %arg1[%c0_1, %c0_2] : memref<72x2048xbf16, #tpu.memory_space<vmem>>, vector<72x2048xbf16>
    %cst = arith.constant dense<0.000000e+00> : vector<8x2048xf32>
    %2 = tpu.matmul %0, %1, %cst {dimension_numbers = #tpu.dot_dimension_numbers<[1], [0], [0], [1], [0, 0, 1, 1], [], []>} : vector<8x72xbf16>, vector<72x2048xbf16>, vector<8x2048xf32> -> vector<8x2048xf32>
    %3 = arith.truncf %2 : vector<8x2048xf32> to vector<8x2048xbf16>
    %c0_3 = arith.constant 0 : index
    %c0_4 = arith.constant 0 : index
    %4 = vector.load %arg3[%c0_3, %c0_4] : memref<8x2048xbf16, #tpu.memory_space<vmem>>, vector<8x2048xbf16>
    tpu.vector_store %arg3[%c0_3, %c0_4], %3 {strides = array<i32>} : memref<8x2048xbf16, #tpu.memory_space<vmem>>, vector<8x2048xbf16>,
    %cst_5 = arith.constant dense<0.000000e+00> : vector<8xf32>
    %5 = vector.multi_reduction <add>, %2, %cst_5 [1] : vector<8x2048xf32> to vector<8xf32>
    %6 = vector.shape_cast %5 : vector<8xf32> to vector<8x1xf32>
    %c0_6 = arith.constant 0 : index
    %c0_7 = arith.constant 0 : index
    %c0_8 = arith.constant 0 : index
    %7 = vector.load %arg4[%c0_6, %c0_7, %c0_8] : memref<1x16x1xf32, #tpu.memory_space<vmem>>, vector<1x8x1xf32>
    %8 = vector.shape_cast %7 : vector<1x8x1xf32> to vector<8x1xf32>
    %9 = vector.shape_cast %6 : vector<8x1xf32> to vector<1x8x1xf32>
    tpu.vector_store %arg4[%c0_6, %c0_7, %c0_8], %9 {strides = array<i32>} : memref<1x16x1xf32, #tpu.memory_space<vmem>>, vector<1x8x1xf32>,
    %10 = arith.mulf %2, %2 : vector<8x2048xf32>
    %cst_9 = arith.constant dense<0.000000e+00> : vector<8xf32>
    %11 = vector.multi_reduction <add>, %10, %cst_9 [1] : vector<8x2048xf32> to vector<8xf32>
    %12 = vector.shape_cast %11 : vector<8xf32> to vector<8x1xf32>
    %c0_10 = arith.constant 0 : index
    %c8 = arith.constant 8 : index
    %c0_11 = arith.constant 0 : index
    %13 = vector.load %arg4[%c0_10, %c8, %c0_11] : memref<1x16x1xf32, #tpu.memory_space<vmem>>, vector<1x8x1xf32>
    %14 = vector.shape_cast %13 : vector<1x8x1xf32> to vector<8x1xf32>
    %15 = vector.shape_cast %12 : vector<8x1xf32> to vector<1x8x1xf32>
    tpu.vector_store %arg4[%c0_10, %c8, %c0_11], %15 {strides = array<i32>} : memref<1x16x1xf32, #tpu.memory_space<vmem>>, vector<1x8x1xf32>,
    return
  }
  func.func @transform_0(%arg0: i32) -> (i32, i32) {
    %c0_i32 = arith.constant 0 : i32
    %c0_i32_0 = arith.constant 0 : i32
    return %c0_i32, %arg0 : i32, i32
  }
  func.func @transform_1(%arg0: i32) -> (i32, i32) {
    %c0_i32 = arith.constant 0 : i32
    %c0_i32_0 = arith.constant 0 : i32
    %c0_i32_1 = arith.constant 0 : i32
    return %c0_i32, %c0_i32_0 : i32, i32
  }
  func.func @transform_2(%arg0: i32) -> (i32, i32) {
    %c0_i32 = arith.constant 0 : i32
    %c0_i32_0 = arith.constant 0 : i32
    return %c0_i32, %arg0 : i32, i32
  }
  func.func @transform_3(%arg0: i32) -> (i32, i32, i32) {
    %c0_i32 = arith.constant 0 : i32
    %c0_i32_0 = arith.constant 0 : i32
    %c0_i32_1 = arith.constant 0 : i32
    return %arg0, %c0_i32, %c0_i32_0 : i32, i32, i32
  }
}

module attributes {stable_mosaic.version = 11 : i64} {
  func.func @_bn_add_act_kernel(%arg0: i32, %arg1: memref<8x4096xbf16, #tpu.memory_space<vmem>>, %arg2: memref<8x4096xbf16, #tpu.memory_space<vmem>>, %arg3: memref<8x1xf32, #tpu.memory_space<vmem>>, %arg4: memref<8x1xf32, #tpu.memory_space<vmem>>, %arg5: memref<8x1xf32, #tpu.memory_space<vmem>>, %arg6: memref<8x1xf32, #tpu.memory_space<vmem>>, %arg7: memref<8x4096xbf16, #tpu.memory_space<vmem>>) attributes {dimension_semantics = [#tpu.dimension_semantics<parallel>], iteration_bounds = array<i64: 1>, scalar_prefetch = 0 : i64, scratch_operands = 0 : i64, tpu.core_type = #tpu.core_type<tc>, window_params = [{transform_indices = @transform_0, window_bounds = array<i64: 8, 4096>}, {transform_indices = @transform_1, window_bounds = array<i64: 8, 4096>}, {pipeline_mode = #tpu.pipeline_mode<synchronous>, transform_indices = @transform_2, window_bounds = array<i64: 8, 1>}, {pipeline_mode = #tpu.pipeline_mode<synchronous>, transform_indices = @transform_3, window_bounds = array<i64: 8, 1>}, {pipeline_mode = #tpu.pipeline_mode<synchronous>, transform_indices = @transform_4, window_bounds = array<i64: 8, 1>}, {pipeline_mode = #tpu.pipeline_mode<synchronous>, transform_indices = @transform_5, window_bounds = array<i64: 8, 1>}, {transform_indices = @transform_6, window_bounds = array<i64: 8, 4096>}]} {
    %c0 = arith.constant 0 : index
    %c0_0 = arith.constant 0 : index
    %0 = vector.load %arg1[%c0, %c0_0] : memref<8x4096xbf16, #tpu.memory_space<vmem>>, vector<8x4096xbf16>
    %1 = arith.extf %0 : vector<8x4096xbf16> to vector<8x4096xf32>
    %c0_1 = arith.constant 0 : index
    %c0_2 = arith.constant 0 : index
    %2 = vector.load %arg3[%c0_1, %c0_2] : memref<8x1xf32, #tpu.memory_space<vmem>>, vector<8x1xf32>
    %3 = vector.broadcast %2 : vector<8x1xf32> to vector<8x4096xf32>
    %4 = arith.mulf %1, %3 : vector<8x4096xf32>
    %c0_3 = arith.constant 0 : index
    %c0_4 = arith.constant 0 : index
    %5 = vector.load %arg4[%c0_3, %c0_4] : memref<8x1xf32, #tpu.memory_space<vmem>>, vector<8x1xf32>
    %6 = vector.broadcast %5 : vector<8x1xf32> to vector<8x4096xf32>
    %7 = arith.addf %4, %6 : vector<8x4096xf32>
    %c0_5 = arith.constant 0 : index
    %c0_6 = arith.constant 0 : index
    %8 = vector.load %arg2[%c0_5, %c0_6] : memref<8x4096xbf16, #tpu.memory_space<vmem>>, vector<8x4096xbf16>
    %9 = arith.extf %8 : vector<8x4096xbf16> to vector<8x4096xf32>
    %c0_7 = arith.constant 0 : index
    %c0_8 = arith.constant 0 : index
    %10 = vector.load %arg5[%c0_7, %c0_8] : memref<8x1xf32, #tpu.memory_space<vmem>>, vector<8x1xf32>
    %11 = vector.broadcast %10 : vector<8x1xf32> to vector<8x4096xf32>
    %12 = arith.mulf %9, %11 : vector<8x4096xf32>
    %c0_9 = arith.constant 0 : index
    %c0_10 = arith.constant 0 : index
    %13 = vector.load %arg6[%c0_9, %c0_10] : memref<8x1xf32, #tpu.memory_space<vmem>>, vector<8x1xf32>
    %14 = vector.broadcast %13 : vector<8x1xf32> to vector<8x4096xf32>
    %15 = arith.addf %12, %14 : vector<8x4096xf32>
    %16 = arith.addf %7, %15 : vector<8x4096xf32>
    %cst = arith.constant 0.000000e+00 : f32
    %17 = vector.broadcast %cst : f32 to vector<8x4096xf32>
    %18 = arith.maximumf %16, %17 : vector<8x4096xf32>
    %19 = arith.truncf %18 : vector<8x4096xf32> to vector<8x4096xbf16>
    %c0_11 = arith.constant 0 : index
    %c0_12 = arith.constant 0 : index
    %20 = vector.load %arg7[%c0_11, %c0_12] : memref<8x4096xbf16, #tpu.memory_space<vmem>>, vector<8x4096xbf16>
    tpu.vector_store %arg7[%c0_11, %c0_12], %19 {strides = array<i32>} : memref<8x4096xbf16, #tpu.memory_space<vmem>>, vector<8x4096xbf16>,
    return
  }
  func.func @transform_0(%arg0: i32) -> (i32, i32) {
    %c0_i32 = arith.constant 0 : i32
    %c0_i32_0 = arith.constant 0 : i32
    return %c0_i32, %arg0 : i32, i32
  }
  func.func @transform_1(%arg0: i32) -> (i32, i32) {
    %c0_i32 = arith.constant 0 : i32
    %c0_i32_0 = arith.constant 0 : i32
    return %c0_i32, %arg0 : i32, i32
  }
  func.func @transform_2(%arg0: i32) -> (i32, i32) {
    %c0_i32 = arith.constant 0 : i32
    %c0_i32_0 = arith.constant 0 : i32
    %c0_i32_1 = arith.constant 0 : i32
    return %c0_i32, %c0_i32_0 : i32, i32
  }
  func.func @transform_3(%arg0: i32) -> (i32, i32) {
    %c0_i32 = arith.constant 0 : i32
    %c0_i32_0 = arith.constant 0 : i32
    %c0_i32_1 = arith.constant 0 : i32
    return %c0_i32, %c0_i32_0 : i32, i32
  }
  func.func @transform_4(%arg0: i32) -> (i32, i32) {
    %c0_i32 = arith.constant 0 : i32
    %c0_i32_0 = arith.constant 0 : i32
    %c0_i32_1 = arith.constant 0 : i32
    return %c0_i32, %c0_i32_0 : i32, i32
  }
  func.func @transform_5(%arg0: i32) -> (i32, i32) {
    %c0_i32 = arith.constant 0 : i32
    %c0_i32_0 = arith.constant 0 : i32
    %c0_i32_1 = arith.constant 0 : i32
    return %c0_i32, %c0_i32_0 : i32, i32
  }
  func.func @transform_6(%arg0: i32) -> (i32, i32) {
    %c0_i32 = arith.constant 0 : i32
    %c0_i32_0 = arith.constant 0 : i32
    return %c0_i32, %arg0 : i32, i32
  }
}

module attributes {stable_mosaic.version = 11 : i64} {
  func.func @_mm_stats_kernel(%arg0: i32, %arg1: memref<72x512xbf16, #tpu.memory_space<vmem>>, %arg2: memref<32x72xbf16, #tpu.memory_space<vmem>>, %arg3: memref<32x512xbf16, #tpu.memory_space<vmem>>, %arg4: memref<1x64x1xf32, #tpu.memory_space<vmem>>) attributes {dimension_semantics = [#tpu.dimension_semantics<parallel>], iteration_bounds = array<i64: 2>, scalar_prefetch = 0 : i64, scratch_operands = 0 : i64, tpu.core_type = #tpu.core_type<tc>, window_params = [{transform_indices = @transform_0, window_bounds = array<i64: 72, 512>}, {pipeline_mode = #tpu.pipeline_mode<synchronous>, transform_indices = @transform_1, window_bounds = array<i64: 32, 72>}, {transform_indices = @transform_2, window_bounds = array<i64: 32, 512>}, {transform_indices = @transform_3, window_bounds = array<i64: 1, 64, 1>}]} {
    %c0 = arith.constant 0 : index
    %c0_0 = arith.constant 0 : index
    %0 = vector.load %arg2[%c0, %c0_0] : memref<32x72xbf16, #tpu.memory_space<vmem>>, vector<32x72xbf16>
    %c0_1 = arith.constant 0 : index
    %c0_2 = arith.constant 0 : index
    %1 = vector.load %arg1[%c0_1, %c0_2] : memref<72x512xbf16, #tpu.memory_space<vmem>>, vector<72x512xbf16>
    %cst = arith.constant dense<0.000000e+00> : vector<32x512xf32>
    %2 = tpu.matmul %0, %1, %cst {dimension_numbers = #tpu.dot_dimension_numbers<[1], [0], [0], [1], [0, 0, 1, 1], [], []>} : vector<32x72xbf16>, vector<72x512xbf16>, vector<32x512xf32> -> vector<32x512xf32>
    %3 = arith.truncf %2 : vector<32x512xf32> to vector<32x512xbf16>
    %c0_3 = arith.constant 0 : index
    %c0_4 = arith.constant 0 : index
    %4 = vector.load %arg3[%c0_3, %c0_4] : memref<32x512xbf16, #tpu.memory_space<vmem>>, vector<32x512xbf16>
    tpu.vector_store %arg3[%c0_3, %c0_4], %3 {strides = array<i32>} : memref<32x512xbf16, #tpu.memory_space<vmem>>, vector<32x512xbf16>,
    %cst_5 = arith.constant dense<0.000000e+00> : vector<32xf32>
    %5 = vector.multi_reduction <add>, %2, %cst_5 [1] : vector<32x512xf32> to vector<32xf32>
    %6 = vector.shape_cast %5 : vector<32xf32> to vector<32x1xf32>
    %c0_6 = arith.constant 0 : index
    %c0_7 = arith.constant 0 : index
    %c0_8 = arith.constant 0 : index
    %7 = vector.load %arg4[%c0_6, %c0_7, %c0_8] : memref<1x64x1xf32, #tpu.memory_space<vmem>>, vector<1x32x1xf32>
    %8 = vector.shape_cast %7 : vector<1x32x1xf32> to vector<32x1xf32>
    %9 = vector.shape_cast %6 : vector<32x1xf32> to vector<1x32x1xf32>
    tpu.vector_store %arg4[%c0_6, %c0_7, %c0_8], %9 {strides = array<i32>} : memref<1x64x1xf32, #tpu.memory_space<vmem>>, vector<1x32x1xf32>,
    %10 = arith.mulf %2, %2 : vector<32x512xf32>
    %cst_9 = arith.constant dense<0.000000e+00> : vector<32xf32>
    %11 = vector.multi_reduction <add>, %10, %cst_9 [1] : vector<32x512xf32> to vector<32xf32>
    %12 = vector.shape_cast %11 : vector<32xf32> to vector<32x1xf32>
    %c0_10 = arith.constant 0 : index
    %c32 = arith.constant 32 : index
    %c0_11 = arith.constant 0 : index
    %13 = vector.load %arg4[%c0_10, %c32, %c0_11] : memref<1x64x1xf32, #tpu.memory_space<vmem>>, vector<1x32x1xf32>
    %14 = vector.shape_cast %13 : vector<1x32x1xf32> to vector<32x1xf32>
    %15 = vector.shape_cast %12 : vector<32x1xf32> to vector<1x32x1xf32>
    tpu.vector_store %arg4[%c0_10, %c32, %c0_11], %15 {strides = array<i32>} : memref<1x64x1xf32, #tpu.memory_space<vmem>>, vector<1x32x1xf32>,
    return
  }
  func.func @transform_0(%arg0: i32) -> (i32, i32) {
    %c0_i32 = arith.constant 0 : i32
    %c0_i32_0 = arith.constant 0 : i32
    return %c0_i32, %arg0 : i32, i32
  }
  func.func @transform_1(%arg0: i32) -> (i32, i32) {
    %c0_i32 = arith.constant 0 : i32
    %c0_i32_0 = arith.constant 0 : i32
    %c0_i32_1 = arith.constant 0 : i32
    return %c0_i32, %c0_i32_0 : i32, i32
  }
  func.func @transform_2(%arg0: i32) -> (i32, i32) {
    %c0_i32 = arith.constant 0 : i32
    %c0_i32_0 = arith.constant 0 : i32
    return %c0_i32, %arg0 : i32, i32
  }
  func.func @transform_3(%arg0: i32) -> (i32, i32, i32) {
    %c0_i32 = arith.constant 0 : i32
    %c0_i32_0 = arith.constant 0 : i32
    %c0_i32_1 = arith.constant 0 : i32
    return %arg0, %c0_i32, %c0_i32_0 : i32, i32, i32
  }
}

module attributes {stable_mosaic.version = 11 : i64} {
  func.func @_bn_act_kernel(%arg0: i32, %arg1: memref<16x1024xbf16, #tpu.memory_space<vmem>>, %arg2: memref<16x1xf32, #tpu.memory_space<vmem>>, %arg3: memref<16x1xf32, #tpu.memory_space<vmem>>, %arg4: memref<16x1024xbf16, #tpu.memory_space<vmem>>) attributes {dimension_semantics = [#tpu.dimension_semantics<parallel>], iteration_bounds = array<i64: 1>, scalar_prefetch = 0 : i64, scratch_operands = 0 : i64, tpu.core_type = #tpu.core_type<tc>, window_params = [{transform_indices = @transform_0, window_bounds = array<i64: 16, 1024>}, {pipeline_mode = #tpu.pipeline_mode<synchronous>, transform_indices = @transform_1, window_bounds = array<i64: 16, 1>}, {pipeline_mode = #tpu.pipeline_mode<synchronous>, transform_indices = @transform_2, window_bounds = array<i64: 16, 1>}, {transform_indices = @transform_3, window_bounds = array<i64: 16, 1024>}]} {
    %c0 = arith.constant 0 : index
    %c0_0 = arith.constant 0 : index
    %0 = vector.load %arg1[%c0, %c0_0] : memref<16x1024xbf16, #tpu.memory_space<vmem>>, vector<16x1024xbf16>
    %1 = arith.extf %0 : vector<16x1024xbf16> to vector<16x1024xf32>
    %c0_1 = arith.constant 0 : index
    %c0_2 = arith.constant 0 : index
    %2 = vector.load %arg2[%c0_1, %c0_2] : memref<16x1xf32, #tpu.memory_space<vmem>>, vector<16x1xf32>
    %3 = vector.broadcast %2 : vector<16x1xf32> to vector<16x1024xf32>
    %4 = arith.mulf %1, %3 : vector<16x1024xf32>
    %c0_3 = arith.constant 0 : index
    %c0_4 = arith.constant 0 : index
    %5 = vector.load %arg3[%c0_3, %c0_4] : memref<16x1xf32, #tpu.memory_space<vmem>>, vector<16x1xf32>
    %6 = vector.broadcast %5 : vector<16x1xf32> to vector<16x1024xf32>
    %7 = arith.addf %4, %6 : vector<16x1024xf32>
    %cst = arith.constant 0.000000e+00 : f32
    %8 = vector.broadcast %cst : f32 to vector<16x1024xf32>
    %9 = arith.maximumf %7, %8 : vector<16x1024xf32>
    %10 = arith.truncf %9 : vector<16x1024xf32> to vector<16x1024xbf16>
    %c0_5 = arith.constant 0 : index
    %c0_6 = arith.constant 0 : index
    %11 = vector.load %arg4[%c0_5, %c0_6] : memref<16x1024xbf16, #tpu.memory_space<vmem>>, vector<16x1024xbf16>
    tpu.vector_store %arg4[%c0_5, %c0_6], %10 {strides = array<i32>} : memref<16x1024xbf16, #tpu.memory_space<vmem>>, vector<16x1024xbf16>,
    return
  }
  func.func @transform_0(%arg0: i32) -> (i32, i32) {
    %c0_i32 = arith.constant 0 : i32
    %c0_i32_0 = arith.constant 0 : i32
    return %c0_i32, %arg0 : i32, i32
  }
  func.func @transform_1(%arg0: i32) -> (i32, i32) {
    %c0_i32 = arith.constant 0 : i32
    %c0_i32_0 = arith.constant 0 : i32
    %c0_i32_1 = arith.constant 0 : i32
    return %c0_i32, %c0_i32_0 : i32, i32
  }
  func.func @transform_2(%arg0: i32) -> (i32, i32) {
    %c0_i32 = arith.constant 0 : i32
    %c0_i32_0 = arith.constant 0 : i32
    %c0_i32_1 = arith.constant 0 : i32
    return %c0_i32, %c0_i32_0 : i32, i32
  }
  func.func @transform_3(%arg0: i32) -> (i32, i32) {
    %c0_i32 = arith.constant 0 : i32
    %c0_i32_0 = arith.constant 0 : i32
    return %c0_i32, %arg0 : i32, i32
  }
}

module attributes {stable_mosaic.version = 11 : i64} {
  func.func @_mm_stats_kernel(%arg0: i32, %arg1: memref<144x512xbf16, #tpu.memory_space<vmem>>, %arg2: memref<16x144xbf16, #tpu.memory_space<vmem>>, %arg3: memref<16x512xbf16, #tpu.memory_space<vmem>>, %arg4: memref<1x32x1xf32, #tpu.memory_space<vmem>>) attributes {dimension_semantics = [#tpu.dimension_semantics<parallel>], iteration_bounds = array<i64: 2>, scalar_prefetch = 0 : i64, scratch_operands = 0 : i64, tpu.core_type = #tpu.core_type<tc>, window_params = [{transform_indices = @transform_0, window_bounds = array<i64: 144, 512>}, {pipeline_mode = #tpu.pipeline_mode<synchronous>, transform_indices = @transform_1, window_bounds = array<i64: 16, 144>}, {transform_indices = @transform_2, window_bounds = array<i64: 16, 512>}, {transform_indices = @transform_3, window_bounds = array<i64: 1, 32, 1>}]} {
    %c0 = arith.constant 0 : index
    %c0_0 = arith.constant 0 : index
    %0 = vector.load %arg2[%c0, %c0_0] : memref<16x144xbf16, #tpu.memory_space<vmem>>, vector<16x144xbf16>
    %c0_1 = arith.constant 0 : index
    %c0_2 = arith.constant 0 : index
    %1 = vector.load %arg1[%c0_1, %c0_2] : memref<144x512xbf16, #tpu.memory_space<vmem>>, vector<144x512xbf16>
    %cst = arith.constant dense<0.000000e+00> : vector<16x512xf32>
    %2 = tpu.matmul %0, %1, %cst {dimension_numbers = #tpu.dot_dimension_numbers<[1], [0], [0], [1], [0, 0, 1, 1], [], []>} : vector<16x144xbf16>, vector<144x512xbf16>, vector<16x512xf32> -> vector<16x512xf32>
    %3 = arith.truncf %2 : vector<16x512xf32> to vector<16x512xbf16>
    %c0_3 = arith.constant 0 : index
    %c0_4 = arith.constant 0 : index
    %4 = vector.load %arg3[%c0_3, %c0_4] : memref<16x512xbf16, #tpu.memory_space<vmem>>, vector<16x512xbf16>
    tpu.vector_store %arg3[%c0_3, %c0_4], %3 {strides = array<i32>} : memref<16x512xbf16, #tpu.memory_space<vmem>>, vector<16x512xbf16>,
    %cst_5 = arith.constant dense<0.000000e+00> : vector<16xf32>
    %5 = vector.multi_reduction <add>, %2, %cst_5 [1] : vector<16x512xf32> to vector<16xf32>
    %6 = vector.shape_cast %5 : vector<16xf32> to vector<16x1xf32>
    %c0_6 = arith.constant 0 : index
    %c0_7 = arith.constant 0 : index
    %c0_8 = arith.constant 0 : index
    %7 = vector.load %arg4[%c0_6, %c0_7, %c0_8] : memref<1x32x1xf32, #tpu.memory_space<vmem>>, vector<1x16x1xf32>
    %8 = vector.shape_cast %7 : vector<1x16x1xf32> to vector<16x1xf32>
    %9 = vector.shape_cast %6 : vector<16x1xf32> to vector<1x16x1xf32>
    tpu.vector_store %arg4[%c0_6, %c0_7, %c0_8], %9 {strides = array<i32>} : memref<1x32x1xf32, #tpu.memory_space<vmem>>, vector<1x16x1xf32>,
    %10 = arith.mulf %2, %2 : vector<16x512xf32>
    %cst_9 = arith.constant dense<0.000000e+00> : vector<16xf32>
    %11 = vector.multi_reduction <add>, %10, %cst_9 [1] : vector<16x512xf32> to vector<16xf32>
    %12 = vector.shape_cast %11 : vector<16xf32> to vector<16x1xf32>
    %c0_10 = arith.constant 0 : index
    %c16 = arith.constant 16 : index
    %c0_11 = arith.constant 0 : index
    %13 = vector.load %arg4[%c0_10, %c16, %c0_11] : memref<1x32x1xf32, #tpu.memory_space<vmem>>, vector<1x16x1xf32>
    %14 = vector.shape_cast %13 : vector<1x16x1xf32> to vector<16x1xf32>
    %15 = vector.shape_cast %12 : vector<16x1xf32> to vector<1x16x1xf32>
    tpu.vector_store %arg4[%c0_10, %c16, %c0_11], %15 {strides = array<i32>} : memref<1x32x1xf32, #tpu.memory_space<vmem>>, vector<1x16x1xf32>,
    return
  }
  func.func @transform_0(%arg0: i32) -> (i32, i32) {
    %c0_i32 = arith.constant 0 : i32
    %c0_i32_0 = arith.constant 0 : i32
    return %c0_i32, %arg0 : i32, i32
  }
  func.func @transform_1(%arg0: i32) -> (i32, i32) {
    %c0_i32 = arith.constant 0 : i32
    %c0_i32_0 = arith.constant 0 : i32
    %c0_i32_1 = arith.constant 0 : i32
    return %c0_i32, %c0_i32_0 : i32, i32
  }
  func.func @transform_2(%arg0: i32) -> (i32, i32) {
    %c0_i32 = arith.constant 0 : i32
    %c0_i32_0 = arith.constant 0 : i32
    return %c0_i32, %arg0 : i32, i32
  }
  func.func @transform_3(%arg0: i32) -> (i32, i32, i32) {
    %c0_i32 = arith.constant 0 : i32
    %c0_i32_0 = arith.constant 0 : i32
    %c0_i32_1 = arith.constant 0 : i32
    return %arg0, %c0_i32, %c0_i32_0 : i32, i32, i32
  }
}

module attributes {stable_mosaic.version = 11 : i64} {
  func.func @_bn_add_act_kernel(%arg0: i32, %arg1: memref<16x1024xbf16, #tpu.memory_space<vmem>>, %arg2: memref<16x1024xbf16, #tpu.memory_space<vmem>>, %arg3: memref<16x1xf32, #tpu.memory_space<vmem>>, %arg4: memref<16x1xf32, #tpu.memory_space<vmem>>, %arg5: memref<16x1xf32, #tpu.memory_space<vmem>>, %arg6: memref<16x1xf32, #tpu.memory_space<vmem>>, %arg7: memref<16x1024xbf16, #tpu.memory_space<vmem>>) attributes {dimension_semantics = [#tpu.dimension_semantics<parallel>], iteration_bounds = array<i64: 1>, scalar_prefetch = 0 : i64, scratch_operands = 0 : i64, tpu.core_type = #tpu.core_type<tc>, window_params = [{transform_indices = @transform_0, window_bounds = array<i64: 16, 1024>}, {transform_indices = @transform_1, window_bounds = array<i64: 16, 1024>}, {pipeline_mode = #tpu.pipeline_mode<synchronous>, transform_indices = @transform_2, window_bounds = array<i64: 16, 1>}, {pipeline_mode = #tpu.pipeline_mode<synchronous>, transform_indices = @transform_3, window_bounds = array<i64: 16, 1>}, {pipeline_mode = #tpu.pipeline_mode<synchronous>, transform_indices = @transform_4, window_bounds = array<i64: 16, 1>}, {pipeline_mode = #tpu.pipeline_mode<synchronous>, transform_indices = @transform_5, window_bounds = array<i64: 16, 1>}, {transform_indices = @transform_6, window_bounds = array<i64: 16, 1024>}]} {
    %c0 = arith.constant 0 : index
    %c0_0 = arith.constant 0 : index
    %0 = vector.load %arg1[%c0, %c0_0] : memref<16x1024xbf16, #tpu.memory_space<vmem>>, vector<16x1024xbf16>
    %1 = arith.extf %0 : vector<16x1024xbf16> to vector<16x1024xf32>
    %c0_1 = arith.constant 0 : index
    %c0_2 = arith.constant 0 : index
    %2 = vector.load %arg3[%c0_1, %c0_2] : memref<16x1xf32, #tpu.memory_space<vmem>>, vector<16x1xf32>
    %3 = vector.broadcast %2 : vector<16x1xf32> to vector<16x1024xf32>
    %4 = arith.mulf %1, %3 : vector<16x1024xf32>
    %c0_3 = arith.constant 0 : index
    %c0_4 = arith.constant 0 : index
    %5 = vector.load %arg4[%c0_3, %c0_4] : memref<16x1xf32, #tpu.memory_space<vmem>>, vector<16x1xf32>
    %6 = vector.broadcast %5 : vector<16x1xf32> to vector<16x1024xf32>
    %7 = arith.addf %4, %6 : vector<16x1024xf32>
    %c0_5 = arith.constant 0 : index
    %c0_6 = arith.constant 0 : index
    %8 = vector.load %arg2[%c0_5, %c0_6] : memref<16x1024xbf16, #tpu.memory_space<vmem>>, vector<16x1024xbf16>
    %9 = arith.extf %8 : vector<16x1024xbf16> to vector<16x1024xf32>
    %c0_7 = arith.constant 0 : index
    %c0_8 = arith.constant 0 : index
    %10 = vector.load %arg5[%c0_7, %c0_8] : memref<16x1xf32, #tpu.memory_space<vmem>>, vector<16x1xf32>
    %11 = vector.broadcast %10 : vector<16x1xf32> to vector<16x1024xf32>
    %12 = arith.mulf %9, %11 : vector<16x1024xf32>
    %c0_9 = arith.constant 0 : index
    %c0_10 = arith.constant 0 : index
    %13 = vector.load %arg6[%c0_9, %c0_10] : memref<16x1xf32, #tpu.memory_space<vmem>>, vector<16x1xf32>
    %14 = vector.broadcast %13 : vector<16x1xf32> to vector<16x1024xf32>
    %15 = arith.addf %12, %14 : vector<16x1024xf32>
    %16 = arith.addf %7, %15 : vector<16x1024xf32>
    %cst = arith.constant 0.000000e+00 : f32
    %17 = vector.broadcast %cst : f32 to vector<16x1024xf32>
    %18 = arith.maximumf %16, %17 : vector<16x1024xf32>
    %19 = arith.truncf %18 : vector<16x1024xf32> to vector<16x1024xbf16>
    %c0_11 = arith.constant 0 : index
    %c0_12 = arith.constant 0 : index
    %20 = vector.load %arg7[%c0_11, %c0_12] : memref<16x1024xbf16, #tpu.memory_space<vmem>>, vector<16x1024xbf16>
    tpu.vector_store %arg7[%c0_11, %c0_12], %19 {strides = array<i32>} : memref<16x1024xbf16, #tpu.memory_space<vmem>>, vector<16x1024xbf16>,
    return
  }
  func.func @transform_0(%arg0: i32) -> (i32, i32) {
    %c0_i32 = arith.constant 0 : i32
    %c0_i32_0 = arith.constant 0 : i32
    return %c0_i32, %arg0 : i32, i32
  }
  func.func @transform_1(%arg0: i32) -> (i32, i32) {
    %c1_i32 = arith.constant 1 : i32
    %c0_i32 = arith.constant 0 : i32
    return %c1_i32, %arg0 : i32, i32
  }
  func.func @transform_2(%arg0: i32) -> (i32, i32) {
    %c0_i32 = arith.constant 0 : i32
    %c0_i32_0 = arith.constant 0 : i32
    %c0_i32_1 = arith.constant 0 : i32
    return %c0_i32, %c0_i32_0 : i32, i32
  }
  func.func @transform_3(%arg0: i32) -> (i32, i32) {
    %c0_i32 = arith.constant 0 : i32
    %c0_i32_0 = arith.constant 0 : i32
    %c0_i32_1 = arith.constant 0 : i32
    return %c0_i32, %c0_i32_0 : i32, i32
  }
  func.func @transform_4(%arg0: i32) -> (i32, i32) {
    %c0_i32 = arith.constant 0 : i32
    %c0_i32_0 = arith.constant 0 : i32
    %c0_i32_1 = arith.constant 0 : i32
    return %c0_i32, %c0_i32_0 : i32, i32
  }
  func.func @transform_5(%arg0: i32) -> (i32, i32) {
    %c0_i32 = arith.constant 0 : i32
    %c0_i32_0 = arith.constant 0 : i32
    %c0_i32_1 = arith.constant 0 : i32
    return %c0_i32, %c0_i32_0 : i32, i32
  }
  func.func @transform_6(%arg0: i32) -> (i32, i32) {
    %c0_i32 = arith.constant 0 : i32
    %c0_i32_0 = arith.constant 0 : i32
    return %c0_i32, %arg0 : i32, i32
  }
}

module attributes {stable_mosaic.version = 11 : i64} {
  func.func @_mm_stats_kernel(%arg0: i32, %arg1: memref<144x128xbf16, #tpu.memory_space<vmem>>, %arg2: memref<64x144xbf16, #tpu.memory_space<vmem>>, %arg3: memref<64x128xbf16, #tpu.memory_space<vmem>>, %arg4: memref<1x128x1xf32, #tpu.memory_space<vmem>>) attributes {dimension_semantics = [#tpu.dimension_semantics<parallel>], iteration_bounds = array<i64: 2>, scalar_prefetch = 0 : i64, scratch_operands = 0 : i64, tpu.core_type = #tpu.core_type<tc>, window_params = [{transform_indices = @transform_0, window_bounds = array<i64: 144, 128>}, {pipeline_mode = #tpu.pipeline_mode<synchronous>, transform_indices = @transform_1, window_bounds = array<i64: 64, 144>}, {transform_indices = @transform_2, window_bounds = array<i64: 64, 128>}, {transform_indices = @transform_3, window_bounds = array<i64: 1, 128, 1>}]} {
    %c0 = arith.constant 0 : index
    %c0_0 = arith.constant 0 : index
    %0 = vector.load %arg2[%c0, %c0_0] : memref<64x144xbf16, #tpu.memory_space<vmem>>, vector<64x144xbf16>
    %c0_1 = arith.constant 0 : index
    %c0_2 = arith.constant 0 : index
    %1 = vector.load %arg1[%c0_1, %c0_2] : memref<144x128xbf16, #tpu.memory_space<vmem>>, vector<144x128xbf16>
    %cst = arith.constant dense<0.000000e+00> : vector<64x128xf32>
    %2 = tpu.matmul %0, %1, %cst {dimension_numbers = #tpu.dot_dimension_numbers<[1], [0], [0], [1], [0, 0, 1, 1], [], []>} : vector<64x144xbf16>, vector<144x128xbf16>, vector<64x128xf32> -> vector<64x128xf32>
    %3 = arith.truncf %2 : vector<64x128xf32> to vector<64x128xbf16>
    %c0_3 = arith.constant 0 : index
    %c0_4 = arith.constant 0 : index
    %4 = vector.load %arg3[%c0_3, %c0_4] : memref<64x128xbf16, #tpu.memory_space<vmem>>, vector<64x128xbf16>
    tpu.vector_store %arg3[%c0_3, %c0_4], %3 {strides = array<i32>} : memref<64x128xbf16, #tpu.memory_space<vmem>>, vector<64x128xbf16>,
    %cst_5 = arith.constant dense<0.000000e+00> : vector<64xf32>
    %5 = vector.multi_reduction <add>, %2, %cst_5 [1] : vector<64x128xf32> to vector<64xf32>
    %6 = vector.shape_cast %5 : vector<64xf32> to vector<64x1xf32>
    %c0_6 = arith.constant 0 : index
    %c0_7 = arith.constant 0 : index
    %c0_8 = arith.constant 0 : index
    %7 = vector.load %arg4[%c0_6, %c0_7, %c0_8] : memref<1x128x1xf32, #tpu.memory_space<vmem>>, vector<1x64x1xf32>
    %8 = vector.shape_cast %7 : vector<1x64x1xf32> to vector<64x1xf32>
    %9 = vector.shape_cast %6 : vector<64x1xf32> to vector<1x64x1xf32>
    tpu.vector_store %arg4[%c0_6, %c0_7, %c0_8], %9 {strides = array<i32>} : memref<1x128x1xf32, #tpu.memory_space<vmem>>, vector<1x64x1xf32>,
    %10 = arith.mulf %2, %2 : vector<64x128xf32>
    %cst_9 = arith.constant dense<0.000000e+00> : vector<64xf32>
    %11 = vector.multi_reduction <add>, %10, %cst_9 [1] : vector<64x128xf32> to vector<64xf32>
    %12 = vector.shape_cast %11 : vector<64xf32> to vector<64x1xf32>
    %c0_10 = arith.constant 0 : index
    %c64 = arith.constant 64 : index
    %c0_11 = arith.constant 0 : index
    %13 = vector.load %arg4[%c0_10, %c64, %c0_11] : memref<1x128x1xf32, #tpu.memory_space<vmem>>, vector<1x64x1xf32>
    %14 = vector.shape_cast %13 : vector<1x64x1xf32> to vector<64x1xf32>
    %15 = vector.shape_cast %12 : vector<64x1xf32> to vector<1x64x1xf32>
    tpu.vector_store %arg4[%c0_10, %c64, %c0_11], %15 {strides = array<i32>} : memref<1x128x1xf32, #tpu.memory_space<vmem>>, vector<1x64x1xf32>,
    return
  }
  func.func @transform_0(%arg0: i32) -> (i32, i32) {
    %c0_i32 = arith.constant 0 : i32
    %c0_i32_0 = arith.constant 0 : i32
    return %c0_i32, %arg0 : i32, i32
  }
  func.func @transform_1(%arg0: i32) -> (i32, i32) {
    %c0_i32 = arith.constant 0 : i32
    %c0_i32_0 = arith.constant 0 : i32
    %c0_i32_1 = arith.constant 0 : i32
    return %c0_i32, %c0_i32_0 : i32, i32
  }
  func.func @transform_2(%arg0: i32) -> (i32, i32) {
    %c0_i32 = arith.constant 0 : i32
    %c0_i32_0 = arith.constant 0 : i32
    return %c0_i32, %arg0 : i32, i32
  }
  func.func @transform_3(%arg0: i32) -> (i32, i32, i32) {
    %c0_i32 = arith.constant 0 : i32
    %c0_i32_0 = arith.constant 0 : i32
    %c0_i32_1 = arith.constant 0 : i32
    return %arg0, %c0_i32, %c0_i32_0 : i32, i32, i32
  }
}

module attributes {stable_mosaic.version = 11 : i64} {
  func.func @_bn_act_kernel(%arg0: i32, %arg1: memref<32x256xbf16, #tpu.memory_space<vmem>>, %arg2: memref<32x1xf32, #tpu.memory_space<vmem>>, %arg3: memref<32x1xf32, #tpu.memory_space<vmem>>, %arg4: memref<32x256xbf16, #tpu.memory_space<vmem>>) attributes {dimension_semantics = [#tpu.dimension_semantics<parallel>], iteration_bounds = array<i64: 1>, scalar_prefetch = 0 : i64, scratch_operands = 0 : i64, tpu.core_type = #tpu.core_type<tc>, window_params = [{transform_indices = @transform_0, window_bounds = array<i64: 32, 256>}, {pipeline_mode = #tpu.pipeline_mode<synchronous>, transform_indices = @transform_1, window_bounds = array<i64: 32, 1>}, {pipeline_mode = #tpu.pipeline_mode<synchronous>, transform_indices = @transform_2, window_bounds = array<i64: 32, 1>}, {transform_indices = @transform_3, window_bounds = array<i64: 32, 256>}]} {
    %c0 = arith.constant 0 : index
    %c0_0 = arith.constant 0 : index
    %0 = vector.load %arg1[%c0, %c0_0] : memref<32x256xbf16, #tpu.memory_space<vmem>>, vector<32x256xbf16>
    %1 = arith.extf %0 : vector<32x256xbf16> to vector<32x256xf32>
    %c0_1 = arith.constant 0 : index
    %c0_2 = arith.constant 0 : index
    %2 = vector.load %arg2[%c0_1, %c0_2] : memref<32x1xf32, #tpu.memory_space<vmem>>, vector<32x1xf32>
    %3 = vector.broadcast %2 : vector<32x1xf32> to vector<32x256xf32>
    %4 = arith.mulf %1, %3 : vector<32x256xf32>
    %c0_3 = arith.constant 0 : index
    %c0_4 = arith.constant 0 : index
    %5 = vector.load %arg3[%c0_3, %c0_4] : memref<32x1xf32, #tpu.memory_space<vmem>>, vector<32x1xf32>
    %6 = vector.broadcast %5 : vector<32x1xf32> to vector<32x256xf32>
    %7 = arith.addf %4, %6 : vector<32x256xf32>
    %cst = arith.constant 0.000000e+00 : f32
    %8 = vector.broadcast %cst : f32 to vector<32x256xf32>
    %9 = arith.maximumf %7, %8 : vector<32x256xf32>
    %10 = arith.truncf %9 : vector<32x256xf32> to vector<32x256xbf16>
    %c0_5 = arith.constant 0 : index
    %c0_6 = arith.constant 0 : index
    %11 = vector.load %arg4[%c0_5, %c0_6] : memref<32x256xbf16, #tpu.memory_space<vmem>>, vector<32x256xbf16>
    tpu.vector_store %arg4[%c0_5, %c0_6], %10 {strides = array<i32>} : memref<32x256xbf16, #tpu.memory_space<vmem>>, vector<32x256xbf16>,
    return
  }
  func.func @transform_0(%arg0: i32) -> (i32, i32) {
    %c0_i32 = arith.constant 0 : i32
    %c0_i32_0 = arith.constant 0 : i32
    return %c0_i32, %arg0 : i32, i32
  }
  func.func @transform_1(%arg0: i32) -> (i32, i32) {
    %c0_i32 = arith.constant 0 : i32
    %c0_i32_0 = arith.constant 0 : i32
    %c0_i32_1 = arith.constant 0 : i32
    return %c0_i32, %c0_i32_0 : i32, i32
  }
  func.func @transform_2(%arg0: i32) -> (i32, i32) {
    %c0_i32 = arith.constant 0 : i32
    %c0_i32_0 = arith.constant 0 : i32
    %c0_i32_1 = arith.constant 0 : i32
    return %c0_i32, %c0_i32_0 : i32, i32
  }
  func.func @transform_3(%arg0: i32) -> (i32, i32) {
    %c0_i32 = arith.constant 0 : i32
    %c0_i32_0 = arith.constant 0 : i32
    return %c0_i32, %arg0 : i32, i32
  }
}

module attributes {stable_mosaic.version = 11 : i64} {
  func.func @_mm_stats_kernel(%arg0: i32, %arg1: memref<288x128xbf16, #tpu.memory_space<vmem>>, %arg2: memref<32x288xbf16, #tpu.memory_space<vmem>>, %arg3: memref<32x128xbf16, #tpu.memory_space<vmem>>, %arg4: memref<1x64x1xf32, #tpu.memory_space<vmem>>) attributes {dimension_semantics = [#tpu.dimension_semantics<parallel>], iteration_bounds = array<i64: 2>, scalar_prefetch = 0 : i64, scratch_operands = 0 : i64, tpu.core_type = #tpu.core_type<tc>, window_params = [{transform_indices = @transform_0, window_bounds = array<i64: 288, 128>}, {pipeline_mode = #tpu.pipeline_mode<synchronous>, transform_indices = @transform_1, window_bounds = array<i64: 32, 288>}, {transform_indices = @transform_2, window_bounds = array<i64: 32, 128>}, {transform_indices = @transform_3, window_bounds = array<i64: 1, 64, 1>}]} {
    %c0 = arith.constant 0 : index
    %c0_0 = arith.constant 0 : index
    %0 = vector.load %arg2[%c0, %c0_0] : memref<32x288xbf16, #tpu.memory_space<vmem>>, vector<32x288xbf16>
    %c0_1 = arith.constant 0 : index
    %c0_2 = arith.constant 0 : index
    %1 = vector.load %arg1[%c0_1, %c0_2] : memref<288x128xbf16, #tpu.memory_space<vmem>>, vector<288x128xbf16>
    %cst = arith.constant dense<0.000000e+00> : vector<32x128xf32>
    %2 = tpu.matmul %0, %1, %cst {dimension_numbers = #tpu.dot_dimension_numbers<[1], [0], [0], [1], [0, 0, 1, 1], [], []>} : vector<32x288xbf16>, vector<288x128xbf16>, vector<32x128xf32> -> vector<32x128xf32>
    %3 = arith.truncf %2 : vector<32x128xf32> to vector<32x128xbf16>
    %c0_3 = arith.constant 0 : index
    %c0_4 = arith.constant 0 : index
    %4 = vector.load %arg3[%c0_3, %c0_4] : memref<32x128xbf16, #tpu.memory_space<vmem>>, vector<32x128xbf16>
    tpu.vector_store %arg3[%c0_3, %c0_4], %3 {strides = array<i32>} : memref<32x128xbf16, #tpu.memory_space<vmem>>, vector<32x128xbf16>,
    %cst_5 = arith.constant dense<0.000000e+00> : vector<32xf32>
    %5 = vector.multi_reduction <add>, %2, %cst_5 [1] : vector<32x128xf32> to vector<32xf32>
    %6 = vector.shape_cast %5 : vector<32xf32> to vector<32x1xf32>
    %c0_6 = arith.constant 0 : index
    %c0_7 = arith.constant 0 : index
    %c0_8 = arith.constant 0 : index
    %7 = vector.load %arg4[%c0_6, %c0_7, %c0_8] : memref<1x64x1xf32, #tpu.memory_space<vmem>>, vector<1x32x1xf32>
    %8 = vector.shape_cast %7 : vector<1x32x1xf32> to vector<32x1xf32>
    %9 = vector.shape_cast %6 : vector<32x1xf32> to vector<1x32x1xf32>
    tpu.vector_store %arg4[%c0_6, %c0_7, %c0_8], %9 {strides = array<i32>} : memref<1x64x1xf32, #tpu.memory_space<vmem>>, vector<1x32x1xf32>,
    %10 = arith.mulf %2, %2 : vector<32x128xf32>
    %cst_9 = arith.constant dense<0.000000e+00> : vector<32xf32>
    %11 = vector.multi_reduction <add>, %10, %cst_9 [1] : vector<32x128xf32> to vector<32xf32>
    %12 = vector.shape_cast %11 : vector<32xf32> to vector<32x1xf32>
    %c0_10 = arith.constant 0 : index
    %c32 = arith.constant 32 : index
    %c0_11 = arith.constant 0 : index
    %13 = vector.load %arg4[%c0_10, %c32, %c0_11] : memref<1x64x1xf32, #tpu.memory_space<vmem>>, vector<1x32x1xf32>
    %14 = vector.shape_cast %13 : vector<1x32x1xf32> to vector<32x1xf32>
    %15 = vector.shape_cast %12 : vector<32x1xf32> to vector<1x32x1xf32>
    tpu.vector_store %arg4[%c0_10, %c32, %c0_11], %15 {strides = array<i32>} : memref<1x64x1xf32, #tpu.memory_space<vmem>>, vector<1x32x1xf32>,
    return
  }
  func.func @transform_0(%arg0: i32) -> (i32, i32) {
    %c0_i32 = arith.constant 0 : i32
    %c0_i32_0 = arith.constant 0 : i32
    return %c0_i32, %arg0 : i32, i32
  }
  func.func @transform_1(%arg0: i32) -> (i32, i32) {
    %c0_i32 = arith.constant 0 : i32
    %c0_i32_0 = arith.constant 0 : i32
    %c0_i32_1 = arith.constant 0 : i32
    return %c0_i32, %c0_i32_0 : i32, i32
  }
  func.func @transform_2(%arg0: i32) -> (i32, i32) {
    %c0_i32 = arith.constant 0 : i32
    %c0_i32_0 = arith.constant 0 : i32
    return %c0_i32, %arg0 : i32, i32
  }
  func.func @transform_3(%arg0: i32) -> (i32, i32, i32) {
    %c0_i32 = arith.constant 0 : i32
    %c0_i32_0 = arith.constant 0 : i32
    %c0_i32_1 = arith.constant 0 : i32
    return %arg0, %c0_i32, %c0_i32_0 : i32, i32, i32
  }
}

module attributes {stable_mosaic.version = 11 : i64} {
  func.func @_bn_add_act_kernel(%arg0: i32, %arg1: memref<32x256xbf16, #tpu.memory_space<vmem>>, %arg2: memref<32x256xbf16, #tpu.memory_space<vmem>>, %arg3: memref<32x1xf32, #tpu.memory_space<vmem>>, %arg4: memref<32x1xf32, #tpu.memory_space<vmem>>, %arg5: memref<32x1xf32, #tpu.memory_space<vmem>>, %arg6: memref<32x1xf32, #tpu.memory_space<vmem>>, %arg7: memref<32x256xbf16, #tpu.memory_space<vmem>>) attributes {dimension_semantics = [#tpu.dimension_semantics<parallel>], iteration_bounds = array<i64: 1>, scalar_prefetch = 0 : i64, scratch_operands = 0 : i64, tpu.core_type = #tpu.core_type<tc>, window_params = [{transform_indices = @transform_0, window_bounds = array<i64: 32, 256>}, {transform_indices = @transform_1, window_bounds = array<i64: 32, 256>}, {pipeline_mode = #tpu.pipeline_mode<synchronous>, transform_indices = @transform_2, window_bounds = array<i64: 32, 1>}, {pipeline_mode = #tpu.pipeline_mode<synchronous>, transform_indices = @transform_3, window_bounds = array<i64: 32, 1>}, {pipeline_mode = #tpu.pipeline_mode<synchronous>, transform_indices = @transform_4, window_bounds = array<i64: 32, 1>}, {pipeline_mode = #tpu.pipeline_mode<synchronous>, transform_indices = @transform_5, window_bounds = array<i64: 32, 1>}, {transform_indices = @transform_6, window_bounds = array<i64: 32, 256>}]} {
    %c0 = arith.constant 0 : index
    %c0_0 = arith.constant 0 : index
    %0 = vector.load %arg1[%c0, %c0_0] : memref<32x256xbf16, #tpu.memory_space<vmem>>, vector<32x256xbf16>
    %1 = arith.extf %0 : vector<32x256xbf16> to vector<32x256xf32>
    %c0_1 = arith.constant 0 : index
    %c0_2 = arith.constant 0 : index
    %2 = vector.load %arg3[%c0_1, %c0_2] : memref<32x1xf32, #tpu.memory_space<vmem>>, vector<32x1xf32>
    %3 = vector.broadcast %2 : vector<32x1xf32> to vector<32x256xf32>
    %4 = arith.mulf %1, %3 : vector<32x256xf32>
    %c0_3 = arith.constant 0 : index
    %c0_4 = arith.constant 0 : index
    %5 = vector.load %arg4[%c0_3, %c0_4] : memref<32x1xf32, #tpu.memory_space<vmem>>, vector<32x1xf32>
    %6 = vector.broadcast %5 : vector<32x1xf32> to vector<32x256xf32>
    %7 = arith.addf %4, %6 : vector<32x256xf32>
    %c0_5 = arith.constant 0 : index
    %c0_6 = arith.constant 0 : index
    %8 = vector.load %arg2[%c0_5, %c0_6] : memref<32x256xbf16, #tpu.memory_space<vmem>>, vector<32x256xbf16>
    %9 = arith.extf %8 : vector<32x256xbf16> to vector<32x256xf32>
    %c0_7 = arith.constant 0 : index
    %c0_8 = arith.constant 0 : index
    %10 = vector.load %arg5[%c0_7, %c0_8] : memref<32x1xf32, #tpu.memory_space<vmem>>, vector<32x1xf32>
    %11 = vector.broadcast %10 : vector<32x1xf32> to vector<32x256xf32>
    %12 = arith.mulf %9, %11 : vector<32x256xf32>
    %c0_9 = arith.constant 0 : index
    %c0_10 = arith.constant 0 : index
    %13 = vector.load %arg6[%c0_9, %c0_10] : memref<32x1xf32, #tpu.memory_space<vmem>>, vector<32x1xf32>
    %14 = vector.broadcast %13 : vector<32x1xf32> to vector<32x256xf32>
    %15 = arith.addf %12, %14 : vector<32x256xf32>
    %16 = arith.addf %7, %15 : vector<32x256xf32>
    %cst = arith.constant 0.000000e+00 : f32
    %17 = vector.broadcast %cst : f32 to vector<32x256xf32>
    %18 = arith.maximumf %16, %17 : vector<32x256xf32>
    %19 = arith.truncf %18 : vector<32x256xf32> to vector<32x256xbf16>
    %c0_11 = arith.constant 0 : index
    %c0_12 = arith.constant 0 : index
    %20 = vector.load %arg7[%c0_11, %c0_12] : memref<32x256xbf16, #tpu.memory_space<vmem>>, vector<32x256xbf16>
    tpu.vector_store %arg7[%c0_11, %c0_12], %19 {strides = array<i32>} : memref<32x256xbf16, #tpu.memory_space<vmem>>, vector<32x256xbf16>,
    return
  }
  func.func @transform_0(%arg0: i32) -> (i32, i32) {
    %c0_i32 = arith.constant 0 : i32
    %c0_i32_0 = arith.constant 0 : i32
    return %c0_i32, %arg0 : i32, i32
  }
  func.func @transform_1(%arg0: i32) -> (i32, i32) {
    %c1_i32 = arith.constant 1 : i32
    %c0_i32 = arith.constant 0 : i32
    return %c1_i32, %arg0 : i32, i32
  }
  func.func @transform_2(%arg0: i32) -> (i32, i32) {
    %c0_i32 = arith.constant 0 : i32
    %c0_i32_0 = arith.constant 0 : i32
    %c0_i32_1 = arith.constant 0 : i32
    return %c0_i32, %c0_i32_0 : i32, i32
  }
  func.func @transform_3(%arg0: i32) -> (i32, i32) {
    %c0_i32 = arith.constant 0 : i32
    %c0_i32_0 = arith.constant 0 : i32
    %c0_i32_1 = arith.constant 0 : i32
    return %c0_i32, %c0_i32_0 : i32, i32
  }
  func.func @transform_4(%arg0: i32) -> (i32, i32) {
    %c0_i32 = arith.constant 0 : i32
    %c0_i32_0 = arith.constant 0 : i32
    %c0_i32_1 = arith.constant 0 : i32
    return %c0_i32, %c0_i32_0 : i32, i32
  }
  func.func @transform_5(%arg0: i32) -> (i32, i32) {
    %c0_i32 = arith.constant 0 : i32
    %c0_i32_0 = arith.constant 0 : i32
    %c0_i32_1 = arith.constant 0 : i32
    return %c0_i32, %c0_i32_0 : i32, i32
  }
  func.func @transform_6(%arg0: i32) -> (i32, i32) {
    %c0_i32 = arith.constant 0 : i32
    %c0_i32_0 = arith.constant 0 : i32
    return %c0_i32, %arg0 : i32, i32
  }
}

module attributes {stable_mosaic.version = 11 : i64} {
  func.func @_mm_stats_kernel(%arg0: i32, %arg1: memref<288x128xbf16, #tpu.memory_space<vmem>>, %arg2: memref<128x288xbf16, #tpu.memory_space<vmem>>, %arg3: memref<128x128xbf16, #tpu.memory_space<vmem>>, %arg4: memref<1x256x1xf32, #tpu.memory_space<vmem>>) attributes {dimension_semantics = [#tpu.dimension_semantics<parallel>], iteration_bounds = array<i64: 1>, scalar_prefetch = 0 : i64, scratch_operands = 0 : i64, tpu.core_type = #tpu.core_type<tc>, window_params = [{transform_indices = @transform_0, window_bounds = array<i64: 288, 128>}, {pipeline_mode = #tpu.pipeline_mode<synchronous>, transform_indices = @transform_1, window_bounds = array<i64: 128, 288>}, {transform_indices = @transform_2, window_bounds = array<i64: 128, 128>}, {transform_indices = @transform_3, window_bounds = array<i64: 1, 256, 1>}]} {
    %c0 = arith.constant 0 : index
    %c0_0 = arith.constant 0 : index
    %0 = vector.load %arg2[%c0, %c0_0] : memref<128x288xbf16, #tpu.memory_space<vmem>>, vector<128x288xbf16>
    %c0_1 = arith.constant 0 : index
    %c0_2 = arith.constant 0 : index
    %1 = vector.load %arg1[%c0_1, %c0_2] : memref<288x128xbf16, #tpu.memory_space<vmem>>, vector<288x128xbf16>
    %cst = arith.constant dense<0.000000e+00> : vector<128x128xf32>
    %2 = tpu.matmul %0, %1, %cst {dimension_numbers = #tpu.dot_dimension_numbers<[1], [0], [0], [1], [0, 0, 1, 1], [], []>} : vector<128x288xbf16>, vector<288x128xbf16>, vector<128x128xf32> -> vector<128x128xf32>
    %3 = arith.truncf %2 : vector<128x128xf32> to vector<128x128xbf16>
    %c0_3 = arith.constant 0 : index
    %c0_4 = arith.constant 0 : index
    %4 = vector.load %arg3[%c0_3, %c0_4] : memref<128x128xbf16, #tpu.memory_space<vmem>>, vector<128x128xbf16>
    tpu.vector_store %arg3[%c0_3, %c0_4], %3 {strides = array<i32>} : memref<128x128xbf16, #tpu.memory_space<vmem>>, vector<128x128xbf16>,
    %cst_5 = arith.constant dense<0.000000e+00> : vector<128xf32>
    %5 = vector.multi_reduction <add>, %2, %cst_5 [1] : vector<128x128xf32> to vector<128xf32>
    %6 = vector.shape_cast %5 : vector<128xf32> to vector<128x1xf32>
    %c0_6 = arith.constant 0 : index
    %c0_7 = arith.constant 0 : index
    %c0_8 = arith.constant 0 : index
    %7 = vector.load %arg4[%c0_6, %c0_7, %c0_8] : memref<1x256x1xf32, #tpu.memory_space<vmem>>, vector<1x128x1xf32>
    %8 = vector.shape_cast %7 : vector<1x128x1xf32> to vector<128x1xf32>
    %9 = vector.shape_cast %6 : vector<128x1xf32> to vector<1x128x1xf32>
    tpu.vector_store %arg4[%c0_6, %c0_7, %c0_8], %9 {strides = array<i32>} : memref<1x256x1xf32, #tpu.memory_space<vmem>>, vector<1x128x1xf32>,
    %10 = arith.mulf %2, %2 : vector<128x128xf32>
    %cst_9 = arith.constant dense<0.000000e+00> : vector<128xf32>
    %11 = vector.multi_reduction <add>, %10, %cst_9 [1] : vector<128x128xf32> to vector<128xf32>
    %12 = vector.shape_cast %11 : vector<128xf32> to vector<128x1xf32>
    %c0_10 = arith.constant 0 : index
    %c128 = arith.constant 128 : index
    %c0_11 = arith.constant 0 : index
    %13 = vector.load %arg4[%c0_10, %c128, %c0_11] : memref<1x256x1xf32, #tpu.memory_space<vmem>>, vector<1x128x1xf32>
    %14 = vector.shape_cast %13 : vector<1x128x1xf32> to vector<128x1xf32>
    %15 = vector.shape_cast %12 : vector<128x1xf32> to vector<1x128x1xf32>
    tpu.vector_store %arg4[%c0_10, %c128, %c0_11], %15 {strides = array<i32>} : memref<1x256x1xf32, #tpu.memory_space<vmem>>, vector<1x128x1xf32>,
    return
  }
  func.func @transform_0(%arg0: i32) -> (i32, i32) {
    %c0_i32 = arith.constant 0 : i32
    %c0_i32_0 = arith.constant 0 : i32
    return %c0_i32, %arg0 : i32, i32
  }
  func.func @transform_1(%arg0: i32) -> (i32, i32) {
    %c0_i32 = arith.constant 0 : i32
    %c0_i32_0 = arith.constant 0 : i32
    %c0_i32_1 = arith.constant 0 : i32
    return %c0_i32, %c0_i32_0 : i32, i32
  }
  func.func @transform_2(%arg0: i32) -> (i32, i32) {
    %c0_i32 = arith.constant 0 : i32
    %c0_i32_0 = arith.constant 0 : i32
    return %c0_i32, %arg0 : i32, i32
  }
  func.func @transform_3(%arg0: i32) -> (i32, i32, i32) {
    %c0_i32 = arith.constant 0 : i32
    %c0_i32_0 = arith.constant 0 : i32
    %c0_i32_1 = arith.constant 0 : i32
    return %arg0, %c0_i32, %c0_i32_0 : i32, i32, i32
  }
}

module attributes {stable_mosaic.version = 11 : i64} {
  func.func @_bn_act_kernel(%arg0: i32, %arg1: memref<64x128xbf16, #tpu.memory_space<vmem>>, %arg2: memref<64x1xf32, #tpu.memory_space<vmem>>, %arg3: memref<64x1xf32, #tpu.memory_space<vmem>>, %arg4: memref<64x128xbf16, #tpu.memory_space<vmem>>) attributes {dimension_semantics = [#tpu.dimension_semantics<parallel>], iteration_bounds = array<i64: 1>, scalar_prefetch = 0 : i64, scratch_operands = 0 : i64, tpu.core_type = #tpu.core_type<tc>, window_params = [{transform_indices = @transform_0, window_bounds = array<i64: 64, 128>}, {pipeline_mode = #tpu.pipeline_mode<synchronous>, transform_indices = @transform_1, window_bounds = array<i64: 64, 1>}, {pipeline_mode = #tpu.pipeline_mode<synchronous>, transform_indices = @transform_2, window_bounds = array<i64: 64, 1>}, {transform_indices = @transform_3, window_bounds = array<i64: 64, 128>}]} {
    %c0 = arith.constant 0 : index
    %c0_0 = arith.constant 0 : index
    %0 = vector.load %arg1[%c0, %c0_0] : memref<64x128xbf16, #tpu.memory_space<vmem>>, vector<64x128xbf16>
    %1 = arith.extf %0 : vector<64x128xbf16> to vector<64x128xf32>
    %c0_1 = arith.constant 0 : index
    %c0_2 = arith.constant 0 : index
    %2 = vector.load %arg2[%c0_1, %c0_2] : memref<64x1xf32, #tpu.memory_space<vmem>>, vector<64x1xf32>
    %3 = vector.broadcast %2 : vector<64x1xf32> to vector<64x128xf32>
    %4 = arith.mulf %1, %3 : vector<64x128xf32>
    %c0_3 = arith.constant 0 : index
    %c0_4 = arith.constant 0 : index
    %5 = vector.load %arg3[%c0_3, %c0_4] : memref<64x1xf32, #tpu.memory_space<vmem>>, vector<64x1xf32>
    %6 = vector.broadcast %5 : vector<64x1xf32> to vector<64x128xf32>
    %7 = arith.addf %4, %6 : vector<64x128xf32>
    %cst = arith.constant 0.000000e+00 : f32
    %8 = vector.broadcast %cst : f32 to vector<64x128xf32>
    %9 = arith.maximumf %7, %8 : vector<64x128xf32>
    %10 = arith.truncf %9 : vector<64x128xf32> to vector<64x128xbf16>
    %c0_5 = arith.constant 0 : index
    %c0_6 = arith.constant 0 : index
    %11 = vector.load %arg4[%c0_5, %c0_6] : memref<64x128xbf16, #tpu.memory_space<vmem>>, vector<64x128xbf16>
    tpu.vector_store %arg4[%c0_5, %c0_6], %10 {strides = array<i32>} : memref<64x128xbf16, #tpu.memory_space<vmem>>, vector<64x128xbf16>,
    return
  }
  func.func @transform_0(%arg0: i32) -> (i32, i32) {
    %c0_i32 = arith.constant 0 : i32
    %c0_i32_0 = arith.constant 0 : i32
    return %c0_i32, %arg0 : i32, i32
  }
  func.func @transform_1(%arg0: i32) -> (i32, i32) {
    %c0_i32 = arith.constant 0 : i32
    %c0_i32_0 = arith.constant 0 : i32
    %c0_i32_1 = arith.constant 0 : i32
    return %c0_i32, %c0_i32_0 : i32, i32
  }
  func.func @transform_2(%arg0: i32) -> (i32, i32) {
    %c0_i32 = arith.constant 0 : i32
    %c0_i32_0 = arith.constant 0 : i32
    %c0_i32_1 = arith.constant 0 : i32
    return %c0_i32, %c0_i32_0 : i32, i32
  }
  func.func @transform_3(%arg0: i32) -> (i32, i32) {
    %c0_i32 = arith.constant 0 : i32
    %c0_i32_0 = arith.constant 0 : i32
    return %c0_i32, %arg0 : i32, i32
  }
}

module attributes {stable_mosaic.version = 11 : i64} {
  func.func @_mm_stats_kernel(%arg0: i32, %arg1: memref<576x128xbf16, #tpu.memory_space<vmem>>, %arg2: memref<64x576xbf16, #tpu.memory_space<vmem>>, %arg3: memref<64x128xbf16, #tpu.memory_space<vmem>>, %arg4: memref<1x128x1xf32, #tpu.memory_space<vmem>>) attributes {dimension_semantics = [#tpu.dimension_semantics<parallel>], iteration_bounds = array<i64: 1>, scalar_prefetch = 0 : i64, scratch_operands = 0 : i64, tpu.core_type = #tpu.core_type<tc>, window_params = [{transform_indices = @transform_0, window_bounds = array<i64: 576, 128>}, {pipeline_mode = #tpu.pipeline_mode<synchronous>, transform_indices = @transform_1, window_bounds = array<i64: 64, 576>}, {transform_indices = @transform_2, window_bounds = array<i64: 64, 128>}, {transform_indices = @transform_3, window_bounds = array<i64: 1, 128, 1>}]} {
    %c0 = arith.constant 0 : index
    %c0_0 = arith.constant 0 : index
    %0 = vector.load %arg2[%c0, %c0_0] : memref<64x576xbf16, #tpu.memory_space<vmem>>, vector<64x576xbf16>
    %c0_1 = arith.constant 0 : index
    %c0_2 = arith.constant 0 : index
    %1 = vector.load %arg1[%c0_1, %c0_2] : memref<576x128xbf16, #tpu.memory_space<vmem>>, vector<576x128xbf16>
    %cst = arith.constant dense<0.000000e+00> : vector<64x128xf32>
    %2 = tpu.matmul %0, %1, %cst {dimension_numbers = #tpu.dot_dimension_numbers<[1], [0], [0], [1], [0, 0, 1, 1], [], []>} : vector<64x576xbf16>, vector<576x128xbf16>, vector<64x128xf32> -> vector<64x128xf32>
    %3 = arith.truncf %2 : vector<64x128xf32> to vector<64x128xbf16>
    %c0_3 = arith.constant 0 : index
    %c0_4 = arith.constant 0 : index
    %4 = vector.load %arg3[%c0_3, %c0_4] : memref<64x128xbf16, #tpu.memory_space<vmem>>, vector<64x128xbf16>
    tpu.vector_store %arg3[%c0_3, %c0_4], %3 {strides = array<i32>} : memref<64x128xbf16, #tpu.memory_space<vmem>>, vector<64x128xbf16>,
    %cst_5 = arith.constant dense<0.000000e+00> : vector<64xf32>
    %5 = vector.multi_reduction <add>, %2, %cst_5 [1] : vector<64x128xf32> to vector<64xf32>
    %6 = vector.shape_cast %5 : vector<64xf32> to vector<64x1xf32>
    %c0_6 = arith.constant 0 : index
    %c0_7 = arith.constant 0 : index
    %c0_8 = arith.constant 0 : index
    %7 = vector.load %arg4[%c0_6, %c0_7, %c0_8] : memref<1x128x1xf32, #tpu.memory_space<vmem>>, vector<1x64x1xf32>
    %8 = vector.shape_cast %7 : vector<1x64x1xf32> to vector<64x1xf32>
    %9 = vector.shape_cast %6 : vector<64x1xf32> to vector<1x64x1xf32>
    tpu.vector_store %arg4[%c0_6, %c0_7, %c0_8], %9 {strides = array<i32>} : memref<1x128x1xf32, #tpu.memory_space<vmem>>, vector<1x64x1xf32>,
    %10 = arith.mulf %2, %2 : vector<64x128xf32>
    %cst_9 = arith.constant dense<0.000000e+00> : vector<64xf32>
    %11 = vector.multi_reduction <add>, %10, %cst_9 [1] : vector<64x128xf32> to vector<64xf32>
    %12 = vector.shape_cast %11 : vector<64xf32> to vector<64x1xf32>
    %c0_10 = arith.constant 0 : index
    %c64 = arith.constant 64 : index
    %c0_11 = arith.constant 0 : index
    %13 = vector.load %arg4[%c0_10, %c64, %c0_11] : memref<1x128x1xf32, #tpu.memory_space<vmem>>, vector<1x64x1xf32>
    %14 = vector.shape_cast %13 : vector<1x64x1xf32> to vector<64x1xf32>
    %15 = vector.shape_cast %12 : vector<64x1xf32> to vector<1x64x1xf32>
    tpu.vector_store %arg4[%c0_10, %c64, %c0_11], %15 {strides = array<i32>} : memref<1x128x1xf32, #tpu.memory_space<vmem>>, vector<1x64x1xf32>,
    return
  }
  func.func @transform_0(%arg0: i32) -> (i32, i32) {
    %c0_i32 = arith.constant 0 : i32
    %c0_i32_0 = arith.constant 0 : i32
    return %c0_i32, %arg0 : i32, i32
  }
  func.func @transform_1(%arg0: i32) -> (i32, i32) {
    %c0_i32 = arith.constant 0 : i32
    %c0_i32_0 = arith.constant 0 : i32
    %c0_i32_1 = arith.constant 0 : i32
    return %c0_i32, %c0_i32_0 : i32, i32
  }
  func.func @transform_2(%arg0: i32) -> (i32, i32) {
    %c0_i32 = arith.constant 0 : i32
    %c0_i32_0 = arith.constant 0 : i32
    return %c0_i32, %arg0 : i32, i32
  }
  func.func @transform_3(%arg0: i32) -> (i32, i32, i32) {
    %c0_i32 = arith.constant 0 : i32
    %c0_i32_0 = arith.constant 0 : i32
    %c0_i32_1 = arith.constant 0 : i32
    return %arg0, %c0_i32, %c0_i32_0 : i32, i32, i32
  }
}

module attributes {stable_mosaic.version = 11 : i64} {
  func.func @_bn_add_act_kernel(%arg0: i32, %arg1: memref<64x128xbf16, #tpu.memory_space<vmem>>, %arg2: memref<64x128xbf16, #tpu.memory_space<vmem>>, %arg3: memref<64x1xf32, #tpu.memory_space<vmem>>, %arg4: memref<64x1xf32, #tpu.memory_space<vmem>>, %arg5: memref<64x1xf32, #tpu.memory_space<vmem>>, %arg6: memref<64x1xf32, #tpu.memory_space<vmem>>, %arg7: memref<64x128xbf16, #tpu.memory_space<vmem>>) attributes {dimension_semantics = [#tpu.dimension_semantics<parallel>], iteration_bounds = array<i64: 1>, scalar_prefetch = 0 : i64, scratch_operands = 0 : i64, tpu.core_type = #tpu.core_type<tc>, window_params = [{transform_indices = @transform_0, window_bounds = array<i64: 64, 128>}, {transform_indices = @transform_1, window_bounds = array<i64: 64, 128>}, {pipeline_mode = #tpu.pipeline_mode<synchronous>, transform_indices = @transform_2, window_bounds = array<i64: 64, 1>}, {pipeline_mode = #tpu.pipeline_mode<synchronous>, transform_indices = @transform_3, window_bounds = array<i64: 64, 1>}, {pipeline_mode = #tpu.pipeline_mode<synchronous>, transform_indices = @transform_4, window_bounds = array<i64: 64, 1>}, {pipeline_mode = #tpu.pipeline_mode<synchronous>, transform_indices = @transform_5, window_bounds = array<i64: 64, 1>}, {transform_indices = @transform_6, window_bounds = array<i64: 64, 128>}]} {
    %c0 = arith.constant 0 : index
    %c0_0 = arith.constant 0 : index
    %0 = vector.load %arg1[%c0, %c0_0] : memref<64x128xbf16, #tpu.memory_space<vmem>>, vector<64x128xbf16>
    %1 = arith.extf %0 : vector<64x128xbf16> to vector<64x128xf32>
    %c0_1 = arith.constant 0 : index
    %c0_2 = arith.constant 0 : index
    %2 = vector.load %arg3[%c0_1, %c0_2] : memref<64x1xf32, #tpu.memory_space<vmem>>, vector<64x1xf32>
    %3 = vector.broadcast %2 : vector<64x1xf32> to vector<64x128xf32>
    %4 = arith.mulf %1, %3 : vector<64x128xf32>
    %c0_3 = arith.constant 0 : index
    %c0_4 = arith.constant 0 : index
    %5 = vector.load %arg4[%c0_3, %c0_4] : memref<64x1xf32, #tpu.memory_space<vmem>>, vector<64x1xf32>
    %6 = vector.broadcast %5 : vector<64x1xf32> to vector<64x128xf32>
    %7 = arith.addf %4, %6 : vector<64x128xf32>
    %c0_5 = arith.constant 0 : index
    %c0_6 = arith.constant 0 : index
    %8 = vector.load %arg2[%c0_5, %c0_6] : memref<64x128xbf16, #tpu.memory_space<vmem>>, vector<64x128xbf16>
    %9 = arith.extf %8 : vector<64x128xbf16> to vector<64x128xf32>
    %c0_7 = arith.constant 0 : index
    %c0_8 = arith.constant 0 : index
    %10 = vector.load %arg5[%c0_7, %c0_8] : memref<64x1xf32, #tpu.memory_space<vmem>>, vector<64x1xf32>
    %11 = vector.broadcast %10 : vector<64x1xf32> to vector<64x128xf32>
    %12 = arith.mulf %9, %11 : vector<64x128xf32>
    %c0_9 = arith.constant 0 : index
    %c0_10 = arith.constant 0 : index
    %13 = vector.load %arg6[%c0_9, %c0_10] : memref<64x1xf32, #tpu.memory_space<vmem>>, vector<64x1xf32>
    %14 = vector.broadcast %13 : vector<64x1xf32> to vector<64x128xf32>
    %15 = arith.addf %12, %14 : vector<64x128xf32>
    %16 = arith.addf %7, %15 : vector<64x128xf32>
    %cst = arith.constant 0.000000e+00 : f32
    %17 = vector.broadcast %cst : f32 to vector<64x128xf32>
    %18 = arith.maximumf %16, %17 : vector<64x128xf32>
    %19 = arith.truncf %18 : vector<64x128xf32> to vector<64x128xbf16>
    %c0_11 = arith.constant 0 : index
    %c0_12 = arith.constant 0 : index
    %20 = vector.load %arg7[%c0_11, %c0_12] : memref<64x128xbf16, #tpu.memory_space<vmem>>, vector<64x128xbf16>
    tpu.vector_store %arg7[%c0_11, %c0_12], %19 {strides = array<i32>} : memref<64x128xbf16, #tpu.memory_space<vmem>>, vector<64x128xbf16>,
    return
  }
  func.func @transform_0(%arg0: i32) -> (i32, i32) {
    %c0_i32 = arith.constant 0 : i32
    %c0_i32_0 = arith.constant 0 : i32
    return %c0_i32, %arg0 : i32, i32
  }
  func.func @transform_1(%arg0: i32) -> (i32, i32) {
    %c1_i32 = arith.constant 1 : i32
    %c0_i32 = arith.constant 0 : i32
    return %c1_i32, %arg0 : i32, i32
  }
  func.func @transform_2(%arg0: i32) -> (i32, i32) {
    %c0_i32 = arith.constant 0 : i32
    %c0_i32_0 = arith.constant 0 : i32
    %c0_i32_1 = arith.constant 0 : i32
    return %c0_i32, %c0_i32_0 : i32, i32
  }
  func.func @transform_3(%arg0: i32) -> (i32, i32) {
    %c0_i32 = arith.constant 0 : i32
    %c0_i32_0 = arith.constant 0 : i32
    %c0_i32_1 = arith.constant 0 : i32
    return %c0_i32, %c0_i32_0 : i32, i32
  }
  func.func @transform_4(%arg0: i32) -> (i32, i32) {
    %c0_i32 = arith.constant 0 : i32
    %c0_i32_0 = arith.constant 0 : i32
    %c0_i32_1 = arith.constant 0 : i32
    return %c0_i32, %c0_i32_0 : i32, i32
  }
  func.func @transform_5(%arg0: i32) -> (i32, i32) {
    %c0_i32 = arith.constant 0 : i32
    %c0_i32_0 = arith.constant 0 : i32
    %c0_i32_1 = arith.constant 0 : i32
    return %c0_i32, %c0_i32_0 : i32, i32
  }
  func.func @transform_6(%arg0: i32) -> (i32, i32) {
    %c0_i32 = arith.constant 0 : i32
    %c0_i32_0 = arith.constant 0 : i32
    return %c0_i32, %arg0 : i32, i32
  }
}

</mosaic_0001>

<bundles_post_ra>
// kernel: resnet_forward.18
= control target key start
LH: loop header
LB: loop body
LE: loop exit
PB: predicated region body
PF: predicated region fallthrough
CT: control target
= control target key end

     0   :  { %s1137_s12 = smov 0   ;;  %s1139_s13 = smov 0   ;;  %s1394_s0 = inlined_call_operand.vmem [shape: bf16[27,4096], index: 0, kind: input, shape index: {}]   ;;  %s1395_s1 = inlined_call_operand.vmem [shape: bf16[8,27], index: 1, kind: input, shape index: {}]   ;;  %s1396_s2 = inlined_call_operand.vmem [shape: bf16[8,4096], index: 2, kind: output, shape index: {0}]   ;;  %s1397_s3 = inlined_call_operand.vmem [shape: f32[2,16,1], index: 3, kind: output, shape index: {1}]  }
   0x1   :  { %s1141_s14 = smov 0  }
   0x2 LB: > { %s1153_s15 = sadd.s32 4294967295, %s1114_s14   ;;  %s1156_s16 = sadd.s32 1, %s1114_s14   ;;  %s1114_s14 = sphi %s1141_s14, %s1400_s14   ;;  %s1110_s13 = sphi %s1139_s13, %s1399_s13   ;;  %s1106_s12 = sphi %s1137_s12, %s1398_s12  }
   0x3   : > { %s18_s17 = ssub.s32 %s1114_s14, %s1156_s16  ;;  %s21_s18 = sadd.s32 1, %s1110_s13 }
   0x4   : > { %p19_p0 = scmp.eq.s32.totalorder %s18_s17, 0  ;;  %p28_p1 = scmp.ne.s32.totalorder %s1110_s13, %s1106_s12 }
   0x5   : > { %p29_p2 = scmp.eq.s32.totalorder %s1114_s14, 0  ;;  %p877_p4 = scmp.ge.s32.totalorder %s1114_s14, 2 }
   0x6   : > { %s1165_s19 = scalar_select %p19_p0, %s1110_s13, %s21_s18  }
   0x7   : > { %p30_p3 = por %p29_p2, %p28_p1  ;;  %130 = sbr.rel (%p877_p4) target bundleno = 48 (0x30), region = 20 }
   0xc   : > { %133 = sbr.rel (!%p30_p3) target bundleno = 48 (0x30), region = 24  ;;  %s135_s20 = sand.u32 (%p30_p3), 1, %s1110_s13  }
   0xd   : > { %s1033_s21 = sshll.u32 (%p30_p3), %s1114_s14, 6  ;;  %s878_s22 = sshll.u32 (%p30_p3), %s135_s20, 8 }
   0xe   : > { %s1173_s25 = scalar_lea.vmem (%p30_p3), %s1394_s0, %s1033_s21  ;;  %s1178_s26 = scalar_lea.vmem (%p30_p3), [#allocation2], %s878_s22 }
   0xf   : > { %v153_v0 = vld [vmem:[%s1173_s25] sm:$0xff] (%p30_p3)  ;;  %v155_v1 = vld [vmem:[%s1173_s25 + $0x8] sm:$0xff] (%p30_p3)  ;;  %v157_v2 = vld [vmem:[%s1173_s25 + $0x10] sm:$0xff] (%p30_p3) }
  0x10   : > { %154 = vst [vmem:[%s1178_s26] sm:$0xff] (%p30_p3), %v153_v0  ;;  %v159_v3 = vld [vmem:[%s1173_s25 + $0x18] sm:$0xff] (%p30_p3)  ;;  %v161_v4 = vld [vmem:[%s1173_s25 + $0x20] sm:$0xff] (%p30_p3)  ;;  %v163_v5 = vld [vmem:[%s1173_s25 + $0x28] sm:$0xff] (%p30_p3) }
  0x11   : > { %156 = vst [vmem:[%s1178_s26 + $0x8] sm:$0xff] %v155_v1  ;;  %v165_v6 = vld [vmem:[%s1173_s25 + $0x30] sm:$0xff]  ;;  %v167_v7 = vld [vmem:[%s1173_s25 + $0x38] sm:$0xff]  ;;  %v169_v8 = vld [vmem:[%s1173_s25 + $0x80] sm:$0xff] }
  0x12   : > { %158 = vst [vmem:[%s1178_s26 + $0x10] sm:$0xff] %v157_v2  ;;  %v171_v9 = vld [vmem:[%s1173_s25 + $0x88] sm:$0xff]  ;;  %v173_v10 = vld [vmem:[%s1173_s25 + $0x90] sm:$0xff]  ;;  %v175_v11 = vld [vmem:[%s1173_s25 + $0x98] sm:$0xff] }
  0x13   : > { %160 = vst [vmem:[%s1178_s26 + $0x18] sm:$0xff] %v159_v3  ;;  %v177_v12 = vld [vmem:[%s1173_s25 + $0xa0] sm:$0xff]  ;;  %v179_v13 = vld [vmem:[%s1173_s25 + $0xa8] sm:$0xff]  ;;  %v181_v14 = vld [vmem:[%s1173_s25 + $0xb0] sm:$0xff] }
  0x14   : > { %162 = vst [vmem:[%s1178_s26 + $0x20] sm:$0xff] %v161_v4  ;;  %v183_v15 = vld [vmem:[%s1173_s25 + $0xb8] sm:$0xff]  ;;  %v185_v16 = vld [vmem:[%s1173_s25 + $0x100] sm:$0xff]  ;;  %v187_v17 = vld [vmem:[%s1173_s25 + $0x108] sm:$0xff] }
  0x15   : > { %164 = vst [vmem:[%s1178_s26 + $0x28] sm:$0xff] %v163_v5  ;;  %v189_v18 = vld [vmem:[%s1173_s25 + $0x110] sm:$0xff]  ;;  %v191_v19 = vld [vmem:[%s1173_s25 + $0x118] sm:$0xff]  ;;  %v193_v20 = vld [vmem:[%s1173_s25 + $0x120] sm:$0xff] }
  0x16   : > { %166 = vst [vmem:[%s1178_s26 + $0x30] sm:$0xff] %v165_v6  ;;  %v195_v21 = vld [vmem:[%s1173_s25 + $0x128] sm:$0xff]  ;;  %v197_v22 = vld [vmem:[%s1173_s25 + $0x130] sm:$0xff]  ;;  %v199_v23 = vld [vmem:[%s1173_s25 + $0x138] sm:$0xff] }
  0x17   : > { %168 = vst [vmem:[%s1178_s26 + $0x38] sm:$0xff] %v167_v7  ;;  %v201_v24 = vld [vmem:[%s1173_s25 + $0x180] sm:$0xff]  ;;  %v203_v25 = vld [vmem:[%s1173_s25 + $0x188] sm:$0xff]  ;;  %v205_v26 = vld [vmem:[%s1173_s25 + $0x190] sm:$0xff] }
  0x18   : > { %170 = vst [vmem:[%s1178_s26 + $0x40] sm:$0xff] %v169_v8  ;;  %v207_v27 = vld [vmem:[%s1173_s25 + $0x198] sm:$0xff]  ;;  %v209_v28 = vld [vmem:[%s1173_s25 + $0x1a0] sm:$0xff]  ;;  %v211_v29 = vld [vmem:[%s1173_s25 + $0x1a8] sm:$0xff] }
  0x19   : > { %172 = vst [vmem:[%s1178_s26 + $0x48] sm:$0xff] %v171_v9  ;;  %v213_v30 = vld [vmem:[%s1173_s25 + $0x1b0] sm:$0xff]  ;;  %v215_v31 = vld [vmem:[%s1173_s25 + $0x1b8] sm:$0xff] }
  0x1a   : > { %174 = vst [vmem:[%s1178_s26 + $0x50] sm:$0xff] %v173_v10 }
  0x1b   : > { %176 = vst [vmem:[%s1178_s26 + $0x58] sm:$0xff] %v175_v11 }
  0x1c   : > { %178 = vst [vmem:[%s1178_s26 + $0x60] sm:$0xff] %v177_v12 }
  0x1d   : > { %180 = vst [vmem:[%s1178_s26 + $0x68] sm:$0xff] %v179_v13 }
  0x1e   : > { %182 = vst [vmem:[%s1178_s26 + $0x70] sm:$0xff] %v181_v14 }
  0x1f   : > { %184 = vst [vmem:[%s1178_s26 + $0x78] sm:$0xff] %v183_v15 }
  0x20   : > { %186 = vst [vmem:[%s1178_s26 + $0x80] sm:$0xff] %v185_v16 }
  0x21   : > { %188 = vst [vmem:[%s1178_s26 + $0x88] sm:$0xff] %v187_v17 }
  0x22   : > { %190 = vst [vmem:[%s1178_s26 + $0x90] sm:$0xff] %v189_v18 }
  0x23   : > { %192 = vst [vmem:[%s1178_s26 + $0x98] sm:$0xff] %v191_v19 }
  0x24   : > { %194 = vst [vmem:[%s1178_s26 + $0xa0] sm:$0xff] %v193_v20 }
  0x25   : > { %196 = vst [vmem:[%s1178_s26 + $0xa8] sm:$0xff] %v195_v21 }
  0x26   : > { %198 = vst [vmem:[%s1178_s26 + $0xb0] sm:$0xff] %v197_v22 }
  0x27   : > { %200 = vst [vmem:[%s1178_s26 + $0xb8] sm:$0xff] %v199_v23 }
  0x28   : > { %202 = vst [vmem:[%s1178_s26 + $0xc0] sm:$0xff] %v201_v24 }
  0x29   : > { %204 = vst [vmem:[%s1178_s26 + $0xc8] sm:$0xff] %v203_v25 }
  0x2a   : > { %206 = vst [vmem:[%s1178_s26 + $0xd0] sm:$0xff] %v205_v26 }
  0x2b   : > { %208 = vst [vmem:[%s1178_s26 + $0xd8] sm:$0xff] %v207_v27 }
  0x2c   : > { %210 = vst [vmem:[%s1178_s26 + $0xe0] sm:$0xff] %v209_v28 }
  0x2d   : > { %212 = vst [vmem:[%s1178_s26 + $0xe8] sm:$0xff] %v211_v29 }
  0x2e   : > { %214 = vst [vmem:[%s1178_s26 + $0xf0] sm:$0xff] %v213_v30 }
  0x2f   : > { %216 = vst [vmem:[%s1178_s26 + $0xf8] sm:$0xff] %v215_v31 }
  0x30 PF: > { %p881_p5 = scmp.ge.s32.totalorder %s1114_s14, 1  ;;  %p221_p6 = scmp.lt.s32.totalorder %s1114_s14, 3 }
  0x32   : > { %p222_p7 = pnand %p881_p5, %p221_p6 }
  0x33   : > { %s228_s27 = sand.u32 (!%p222_p7), 1, %s1106_s12   ;;  %s883_s5 = sshll.u32 (!%p222_p7), %s1153_s15, 4 }
  0x34   : > { %225 = sbr.rel (%p222_p7) target bundleno = 381 (0x17d), region = 47  ;;  %s882_s28 = sshll.u32 (!%p222_p7), %s228_s27, 8 }
  0x35   : > { %s1246_s29 = scalar_lea.vmem (!%p222_p7), [#allocation2], %s882_s28  ;;  %p258_p8 = scmp.lt.s32.totalorder (!%p222_p7), %s883_s5, 31 }
  0x36   : > { %p263_p9 = scmp.lt.s32.totalorder (!%p222_p7), %s1153_s15, 1 }
  0x39   : > { %vm450_vm0 = vcmask 1044480   ;;  %vm451_vm1 = vcmask 1045504   ;;  %v1116_v32 = vmov 65535   ;;  %v953_v35 = vld [vmem:[%s1246_s29 + $0x80] sm:$0xf]  ;;  %vm446_vm2 = vcmask 220160  }
  0x3a   : > { %v452_v33 = vsel %vm450_vm0, 4294967295, %v1116_v32  ;;  %v1059_v36 = vld [vmem:[%s1246_s29 + $0xbc] sm:$0x30]  ;;  %v1051_v37 = vld [vmem:[%s1246_s29 + $0x84] sm:$0xf]  ;;  %s1402_s5 = smov (!%p258_p8, %s883_s5), 31 }
  0x3b   : > { %v1244_v34 = vsel %vm451_vm1, %v452_v33, 0  ;;  %v954_v38 = vor.u32 %v1059_v36, %v953_v35  ;;  %v955_v39 = vld [vmem:[%s1246_s29 + $0xc0] sm:$0x30]  ;;  %v961_v40 = vld [vmem:[%s1246_s29 + $0x88] sm:$0xf]  ;;  %s884_s6 = sshll.u32 %s1402_s5, 2 }
  0x3c   : > { %v1060_v41 = vld [vmem:[%s1246_s29 + $0xc4] sm:$0x30]  ;;  %v958_v42 = vor.u32 %v1051_v37, %v955_v39  ;;  %v1052_v44 = vld [vmem:[%s1246_s29 + $0x8c] sm:$0xf]  ;;  %v889_v46 = vld [vmem:[%s1246_s29] sm:$0xf]  ;;  %s1369_s9 = scalar_lea.vmem %s1396_s2, %s884_s6 }
  0x3d   : > { %v962_v43 = vor.u32 %v1060_v41, %v961_v40  ;;  %v963_v45 = vld [vmem:[%s1246_s29 + $0xc8] sm:$0x30]  ;;  %v455_v47 = vand.u32 %v954_v38, %v1244_v34  ;;  %v1043_v49 = vld [vmem:[%s1246_s29 + $0x3c] sm:$0xf0]  ;;  %v1035_v50 = vld [vmem:[%s1246_s29 + $0x4] sm:$0xf] }
  0x3e   : > { %v966_v48 = vor.u32 %v1052_v44, %v963_v45  ;;  %v891_v51 = vld [vmem:[%s1246_s29 + $0x40] sm:$0xf0]  ;;  %v458_v52 = vand.u32 %v958_v42, %v1244_v34  ;;  %v897_v54 = vld [vmem:[%s1246_s29 + $0x8] sm:$0xf]  ;;  %v1036_v56 = vld [vmem:[%s1246_s29 + $0xc] sm:$0xf]  ;;  %v890_v58 = vor.u32 %v1043_v49, %v889_v46 }
  0x3f   : > { %v461_v53 = vand.u32 %v962_v43, %v1244_v34  ;;  %v1044_v55 = vld [vmem:[%s1246_s29 + $0x44] sm:$0xf0]  ;;  %508 = vmatpush.bf16.msra.mxu0 %v455_v47  ;;  %v899_v59 = vld [vmem:[%s1246_s29 + $0x48] sm:$0xf0]  ;;  %v977_v60 = vld [vmem:[%s1246_s29 + $0x98] sm:$0xf]  ;;  %v894_v62 = vor.u32 %v1035_v50, %v891_v51 }
  0x40   : > { %v464_v57 = vand.u32 %v966_v48, %v1244_v34  ;;  %v1062_v61 = vld [vmem:[%s1246_s29 + $0xd4] sm:$0x30]  ;;  %521 = vmatpush.bf16.msra.mxu1 %v458_v52  ;;  %v898_v63 = vor.u32 %v1044_v55, %v897_v54  ;;  %v969_v1 = vld [vmem:[%s1246_s29 + $0x90] sm:$0xf]  ;;  %v1054_v3 = vld [vmem:[%s1246_s29 + $0x9c] sm:$0xf]  ;;  %v902_v4 = vor.u32 %v1036_v56, %v899_v59 }
  0x41   : > { %534 = vmatpush.bf16.msra.mxu2 %v461_v53  ;;  %v978_v0 = vor.u32 %v1062_v61, %v977_v60  ;;  %v1061_v2 = vld [vmem:[%s1246_s29 + $0xcc] sm:$0x30]  ;;  %v1276_v5 = vld [vmem:[%s1395_s1] sm:$0xf]  ;;  %v979_v7 = vld [vmem:[%s1246_s29 + $0xd8] sm:$0x30] }
  0x42   : > { %547 = vmatpush.bf16.msra.mxu3 %v464_v57  ;;  %v970_v6 = vor.u32 %v1061_v2, %v969_v1  ;;  %v1053_v8 = vld [vmem:[%s1246_s29 + $0x94] sm:$0xf]  ;;  %v982_v11 = vor.u32 %v1054_v3, %v979_v7  ;;  %v913_v13 = vld [vmem:[%s1246_s29 + $0x18] sm:$0xf]  ;;  %v905_v15 = vld [vmem:[%s1246_s29 + $0x10] sm:$0xf] }
  0x43   : > { %v971_v9 = vld [vmem:[%s1246_s29 + $0xd0] sm:$0x30]  ;;  %v473_v10 = vand.u32 %v978_v0, %v1244_v34  ;;  %v1046_v14 = vld [vmem:[%s1246_s29 + $0x54] sm:$0xf0]  ;;  %509 = vmatpush.bf16.msra.mxu0 %v890_v58  ;;  %v1045_v16 = vld [vmem:[%s1246_s29 + $0x4c] sm:$0xf0] }
  0x44   : > { %v974_v12 = vor.u32 %v1053_v8, %v971_v9  ;;  %v1038_v17 = vld [vmem:[%s1246_s29 + $0x1c] sm:$0xf]  ;;  %522 = vmatpush.bf16.msra.mxu1 %v894_v62  ;;  %v467_v19 = vand.u32 %v970_v6, %v1244_v34  ;;  %v476_v20 = vand.u32 %v982_v11, %v1244_v34  ;;  %v1037_v21 = vld [vmem:[%s1246_s29 + $0x14] sm:$0xf]  ;;  %v993_v23 = vld [vmem:[%s1246_s29 + $0xa8] sm:$0xf]  ;;  %v914_v25 = vor.u32 %v1046_v14, %v913_v13 }
  0x45   : > { %v915_v18 = vld [vmem:[%s1246_s29 + $0x58] sm:$0xf0]  ;;  %535 = vmatpush.bf16.msra.mxu2 %v898_v63  ;;  %v907_v22 = vld [vmem:[%s1246_s29 + $0x50] sm:$0xf0]  ;;  %v1064_v26 = vld [vmem:[%s1246_s29 + $0xe4] sm:$0x30]  ;;  %v906_v40 = vor.u32 %v1045_v16, %v905_v15 }
  0x46   : > { %548 = vmatpush.bf16.msra.mxu3 %v902_v4  ;;  %v470_v24 = vand.u32 %v974_v12, %v1244_v34  ;;  %v985_v27 = vld [vmem:[%s1246_s29 + $0xa0] sm:$0xf]  ;;  %1015 = vmatmul.msk.bf16.vlgmr.msra.gmra.mxu0 %vm446_vm2, %v1276_v5  ;;  %v918_v29 = vor.u32 %v1038_v17, %v915_v18  ;;  %v994_v30 = vor.u32 %v1064_v26, %v993_v23  ;;  %v1056_v32 = vld [vmem:[%s1246_s29 + $0xac] sm:$0xf]  ;;  %v1055_v35 = vld [vmem:[%s1246_s29 + $0xa4] sm:$0xf] }
  0x47   : > { %v1063_v28 = vld [vmem:[%s1246_s29 + $0xdc] sm:$0x30]  ;;  %v995_v33 = vld [vmem:[%s1246_s29 + $0xe8] sm:$0x30]  ;;  %1016 = vmatmul.msk.bf16.vlgmr.msra.gmra.mxu1 %vm446_vm2, %v1276_v5  ;;  %v987_v37 = vld [vmem:[%s1246_s29 + $0xe0] sm:$0x30]  ;;  %560 = vmatpush.bf16.msrb.mxu0 %v467_v19  ;;  %v910_v44 = vor.u32 %v1037_v21, %v907_v22 }
  0x48   : > { %v986_v31 = vor.u32 %v1063_v28, %v985_v27  ;;  %1017 = vmatmul.msk.bf16.vlgmr.msra.gmra.mxu2 %vm446_vm2, %v1276_v5  ;;  %v998_v36 = vor.u32 %v1056_v32, %v995_v33  ;;  %v929_v38 = vld [vmem:[%s1246_s29 + $0x28] sm:$0xf]  ;;  %v485_v41 = vand.u32 %v994_v30, %v1244_v34  ;;  %v990_v42 = vor.u32 %v1055_v35, %v987_v37  ;;  %v1040_v43 = vld [vmem:[%s1246_s29 + $0x2c] sm:$0xf]  ;;  %v921_v50 = vld [vmem:[%s1246_s29 + $0x20] sm:$0xf] }
  0x49   : > { %586 = vmatpush.bf16.msrb.mxu2 %v473_v10  ;;  %v1048_v39 = vld [vmem:[%s1246_s29 + $0x64] sm:$0xf0]  ;;  %1018 = vmatmul.msk.bf16.vlgmr.msra.gmra.mxu3 %vm446_vm2, %v1276_v5  ;;  %v931_v47 = vld [vmem:[%s1246_s29 + $0x68] sm:$0xf0]  ;;  %v1047_v51 = vld [vmem:[%s1246_s29 + $0x5c] sm:$0xf0] }
  0x4a   : > { %599 = vmatpush.bf16.msrb.mxu3 %v476_v20  ;;  %573 = vmatpush.bf16.msrb.mxu1 %v470_v24  ;;  %v479_v45 = vand.u32 %v986_v31, %v1244_v34  ;;  %v488_v46 = vand.u32 %v998_v36, %v1244_v34  ;;  %v482_v48 = vand.u32 %v990_v42, %v1244_v34  ;;  %v1039_v53 = vld [vmem:[%s1246_s29 + $0x24] sm:$0xf]  ;;  %v1009_v56 = vld [vmem:[%s1246_s29 + $0xb8] sm:$0xf]  ;;  %v1001_v58 = vld [vmem:[%s1246_s29 + $0xb0] sm:$0xf] }
  0x4b   : > { %v930_v49 = vor.u32 %v1048_v39, %v929_v38  ;;  %v934_v52 = vor.u32 %v1040_v43, %v931_v47  ;;  %v923_v54 = vld [vmem:[%s1246_s29 + $0x60] sm:$0xf0]  ;;  %561 = vmatpush.bf16.msrb.mxu0 %v906_v40  ;;  %v922_v55 = vor.u32 %v1047_v51, %v921_v50  ;;  %v1066_v57 = vld [vmem:[%s1246_s29 + $0xf4] sm:$0x30]  ;;  %v1065_v60 = vld [vmem:[%s1246_s29 + $0xec] sm:$0x30] }
  0x4c   : > { %v926_v59 = vor.u32 %v1039_v53, %v923_v54  ;;  %v1058_v61 = vld [vmem:[%s1246_s29 + $0xbc] sm:$0xf]  ;;  %v1057_v63 = vld [vmem:[%s1246_s29 + $0xb4] sm:$0xf]  ;;  %v1010_v1 = vor.u32 %v1066_v57, %v1009_v56  ;;  %v1002_v2 = vor.u32 %v1065_v60, %v1001_v58  ;;  %v945_v9 = vld [vmem:[%s1246_s29 + $0x38] sm:$0xf] }
  0x4d   : > { %587 = vmatpush.bf16.msrb.mxu2 %v914_v25  ;;  %v1011_v62 = vld [vmem:[%s1246_s29 + $0xf8] sm:$0x30]  ;;  %v1003_v0 = vld [vmem:[%s1246_s29 + $0xf0] sm:$0x30]  ;;  %v1050_v10 = vld [vmem:[%s1246_s29 + $0x74] sm:$0xf0] }
  0x4e   : > { %600 = vmatpush.bf16.msrb.mxu3 %v918_v29  ;;  %574 = vmatpush.bf16.msrb.mxu1 %v910_v44  ;;  %v1014_v3 = vor.u32 %v1058_v61, %v1011_v62  ;;  %v1006_v4 = vor.u32 %v1057_v63, %v1003_v0  ;;  %v497_v6 = vand.u32 %v1010_v1, %v1244_v34  ;;  %v937_v11 = vld [vmem:[%s1246_s29 + $0x30] sm:$0xf]  ;;  %v1042_v14 = vld [vmem:[%s1246_s29 + $0x3c] sm:$0xf]  ;;  %v1041_v16 = vld [vmem:[%s1246_s29 + $0x34] sm:$0xf] }
  0x4f   : > { %612 = vmatpush.bf16.msra.mxu0 %v479_v45  ;;  %v491_v7 = vand.u32 %v1002_v2, %v1244_v34  ;;  %v1049_v13 = vld [vmem:[%s1246_s29 + $0x6c] sm:$0xf0]  ;;  %v947_v15 = vld [vmem:[%s1246_s29 + $0x78] sm:$0xf0]  ;;  %v939_v17 = vld [vmem:[%s1246_s29 + $0x70] sm:$0xf0]  ;;  %v946_v18 = vor.u32 %v1050_v10, %v945_v9 }
  0x50   : > { %v500_v8 = vand.u32 %v1014_v3, %v1244_v34  ;;  %v494_v12 = vand.u32 %v1006_v4, %v1244_v34  ;;  %v938_v19 = vor.u32 %v1049_v13, %v937_v11  ;;  %v950_v34 = vor.u32 %v1042_v14, %v947_v15  ;;  %s1404_s15 = smov (!%p263_p9, %s1153_s15), 1 }
  0x51   : > { %638 = vmatpush.bf16.msra.mxu2 %v485_v41  ;;  %v942_v20 = vor.u32 %v1041_v16, %v939_v17  ;;  %s1034_s10 = sshll.u32 %s1404_s15, 4  ;;  %vm743_vm3 = vcmask 7168  }
  0x52   : > { %651 = vmatpush.bf16.msra.mxu3 %v488_v46  ;;  %625 = vmatpush.bf16.msra.mxu1 %v482_v48  ;;  %s267_s14 = scalar_lea.vmem %s1397_s3, %s1034_s10 }
  0x53   : > { %613 = vmatpush.bf16.msra.mxu0 %v922_v55 }
  0x55   : > { %639 = vmatpush.bf16.msra.mxu2 %v930_v49 }
  0x56   : > { %652 = vmatpush.bf16.msra.mxu3 %v934_v52  ;;  %626 = vmatpush.bf16.msra.mxu1 %v926_v59 }
  0x57   : > { %1019 = vmatmul.msk.bf16.vlgmr.msrb.gmra.mxu0 %vm446_vm2, %v1276_v5  ;;  %1020 = vmatmul.msk.bf16.vlgmr.msrb.gmra.mxu1 %vm446_vm2, %v1276_v5 }
  0x58   : > { %1021 = vmatmul.msk.bf16.vlgmr.msrb.gmra.mxu2 %vm446_vm2, %v1276_v5  ;;  %664 = vmatpush.bf16.msrb.mxu0 %v491_v7 }
  0x59   : > { %1022 = vmatmul.msk.bf16.vlgmr.msrb.gmra.mxu3 %vm446_vm2, %v1276_v5  ;;  %690 = vmatpush.bf16.msrb.mxu2 %v497_v6 }
  0x5a   : > { %703 = vmatpush.bf16.msrb.mxu3 %v500_v8  ;;  %677 = vmatpush.bf16.msrb.mxu1 %v494_v12 }
  0x5c   : > { %665 = vmatpush.bf16.msrb.mxu0 %v938_v19 }
  0x5d   : > { %691 = vmatpush.bf16.msrb.mxu2 %v946_v18 }
  0x5e   : > { %704 = vmatpush.bf16.msrb.mxu3 %v950_v34  ;;  %678 = vmatpush.bf16.msrb.mxu1 %v942_v20 }
  0x67   : > { %1023 = vmatmul.msk.bf16.vlgmr.msra.gmra.mxu0 %vm446_vm2, %v1276_v5  ;;  %1024 = vmatmul.msk.bf16.vlgmr.msra.gmra.mxu1 %vm446_vm2, %v1276_v5 }
  0x68   : > { %1025 = vmatmul.msk.bf16.vlgmr.msra.gmra.mxu2 %vm446_vm2, %v1276_v5 }
  0x69   : > { %1026 = vmatmul.msk.bf16.vlgmr.msra.gmra.mxu3 %vm446_vm2, %v1276_v5 }
  0x77   : > { %1027 = vmatmul.msk.bf16.vlgmr.msrb.gmra.mxu0 %vm446_vm2, %v1276_v5  ;;  %1028 = vmatmul.msk.bf16.vlgmr.msrb.gmra.mxu1 %vm446_vm2, %v1276_v5 }
  0x78   : > { %1029 = vmatmul.msk.bf16.vlgmr.msrb.gmra.mxu2 %vm446_vm2, %v1276_v5 }
  0x79   : > { %1030 = vmatmul.msk.bf16.vlgmr.msrb.gmra.mxu3 %vm446_vm2, %v1276_v5 }
  0xc3   : > { %v511_v21 = vpop.f32.mrf.mxu0 }
  0xc4   : > { %v524_v22 = vpop.f32.mrf.mxu1  ;;  %v745_v35 = vmul.f32 %v511_v21, %v511_v21 }
  0xc5   : > { %v710_v23 = vpack.c.bf16 %v524_v22, %v511_v21  ;;  %v726_v32 = vadd.f32 %v524_v22, %v511_v21  ;;  %v746_v36 = vmul.f32 %v524_v22, %v524_v22 }
  0xc7   : > { %718 = vst [vmem:[%s1369_s9] sm:$0xff] %v710_v23  ;;  %v761_v40 = vadd.f32 %v746_v36, %v745_v35 }
  0xcb   : > { %v537_v24 = vpop.f32.mrf.mxu2  ;;  %v513_v26 = vpop.f32.mrf.mxu0 }
  0xcc   : > { %v550_v25 = vpop.f32.mrf.mxu3  ;;  %v526_v27 = vpop.f32.mrf.mxu1  ;;  %v727_v37 = vadd.f32 %v726_v32, %v537_v24  ;;  %v747_v38 = vmul.f32 %v537_v24, %v537_v24 }
  0xcd   : > { %v711_v5 = vpack.c.bf16 %v550_v25, %v537_v24  ;;  %v748_v47 = vmul.f32 %v550_v25, %v550_v25 }
  0xce   : > { %v728_v41 = vadd.f32 %v727_v37, %v550_v25  ;;  %v762_v46 = vadd.f32 %v761_v40, %v747_v38 }
  0xcf   : > { %719 = vst [vmem:[%s1369_s9 + $0x8] sm:$0xff] %v711_v5 }
  0xd0   : > { %v763_v50 = vadd.f32 %v762_v46, %v748_v47 }
  0xd3   : > { %v539_v28 = vpop.f32.mrf.mxu2 }
  0xd4   : > { %v552_v29 = vpop.f32.mrf.mxu3  ;;  %v563_v30 = vpop.f32.mrf.mxu0 }
  0xd5   : > { %v576_v31 = vpop.f32.mrf.mxu1  ;;  %v729_v48 = vadd.f32 %v728_v41, %v563_v30  ;;  %v749_v49 = vmul.f32 %v563_v30, %v563_v30 }
  0xd6   : > { %v712_v33 = vpack.c.bf16 %v576_v31, %v563_v30  ;;  %v750_v54 = vmul.f32 %v576_v31, %v576_v31 }
  0xd7   : > { %v730_v51 = vadd.f32 %v729_v48, %v576_v31  ;;  %v764_v53 = vadd.f32 %v763_v50, %v749_v49 }
  0xd8   : > { %720 = vst [vmem:[%s1369_s9 + $0x10] sm:$0xff] %v712_v33 }
  0xd9   : > { %v765_v61 = vadd.f32 %v764_v53, %v750_v54 }
  0xdb   : > { %v589_v39 = vpop.f32.mrf.mxu2 }
  0xdc   : > { %v602_v42 = vpop.f32.mrf.mxu3  ;;  %v565_v43 = vpop.f32.mrf.mxu0  ;;  %v731_v55 = vadd.f32 %v730_v51, %v589_v39  ;;  %v751_v59 = vmul.f32 %v589_v39, %v589_v39 }
  0xdd   : > { %v713_v44 = vpack.c.bf16 %v602_v42, %v589_v39  ;;  %v578_v45 = vpop.f32.mrf.mxu1  ;;  %v752_v0 = vmul.f32 %v602_v42, %v602_v42 }
  0xde   : > { %v732_v62 = vadd.f32 %v731_v55, %v602_v42  ;;  %v766_v63 = vadd.f32 %v765_v61, %v751_v59 }
  0xdf   : > { %721 = vst [vmem:[%s1369_s9 + $0x18] sm:$0xff] %v713_v44 }
  0xe0   : > { %v767_v9 = vadd.f32 %v766_v63, %v752_v0 }
  0xe3   : > { %v591_v52 = vpop.f32.mrf.mxu2 }
  0xe4   : > { %v604_v56 = vpop.f32.mrf.mxu3  ;;  %v615_v57 = vpop.f32.mrf.mxu0 }
  0xe5   : > { %v628_v58 = vpop.f32.mrf.mxu1  ;;  %v733_v1 = vadd.f32 %v732_v62, %v615_v57  ;;  %v753_v3 = vmul.f32 %v615_v57, %v615_v57 }
  0xe6   : > { %v714_v60 = vpack.c.bf16 %v628_v58, %v615_v57  ;;  %v754_v12 = vmul.f32 %v628_v58, %v628_v58 }
  0xe7   : > { %v734_v10 = vadd.f32 %v733_v1, %v628_v58  ;;  %v768_v11 = vadd.f32 %v767_v9, %v753_v3 }
  0xe8   : > { %722 = vst [vmem:[%s1369_s9 + $0x20] sm:$0xff] %v714_v60 }
  0xe9   : > { %v769_v16 = vadd.f32 %v768_v11, %v754_v12 }
  0xeb   : > { %v641_v2 = vpop.f32.mrf.mxu2 }
  0xec   : > { %v654_v4 = vpop.f32.mrf.mxu3  ;;  %v617_v6 = vpop.f32.mrf.mxu0  ;;  %v735_v13 = vadd.f32 %v734_v10, %v641_v2  ;;  %v755_v14 = vmul.f32 %v641_v2, %v641_v2 }
  0xed   : > { %v715_v7 = vpack.c.bf16 %v654_v4, %v641_v2  ;;  %v630_v8 = vpop.f32.mrf.mxu1  ;;  %v756_v21 = vmul.f32 %v654_v4, %v654_v4 }
  0xee   : > { %v736_v17 = vadd.f32 %v735_v13, %v654_v4  ;;  %v770_v20 = vadd.f32 %v769_v16, %v755_v14 }
  0xef   : > { %723 = vst [vmem:[%s1369_s9 + $0x28] sm:$0xff] %v715_v7 }
  0xf0   : > { %v771_v25 = vadd.f32 %v770_v20, %v756_v21 }
  0xf3   : > { %v643_v15 = vpop.f32.mrf.mxu2 }
  0xf4   : > { %v656_v18 = vpop.f32.mrf.mxu3  ;;  %v667_v19 = vpop.f32.mrf.mxu0 }
  0xf5   : > { %v680_v34 = vpop.f32.mrf.mxu1  ;;  %v737_v22 = vadd.f32 %v736_v17, %v667_v19  ;;  %v757_v24 = vmul.f32 %v667_v19, %v667_v19 }
  0xf6   : > { %v716_v23 = vpack.c.bf16 %v680_v34, %v667_v19  ;;  %v758_v28 = vmul.f32 %v680_v34, %v680_v34 }
  0xf7   : > { %v738_v26 = vadd.f32 %v737_v22, %v680_v34  ;;  %v772_v27 = vadd.f32 %v771_v25, %v757_v24 }
  0xf8   : > { %724 = vst [vmem:[%s1369_s9 + $0x30] sm:$0xff] %v716_v23 }
  0xf9   : > { %v773_v37 = vadd.f32 %v772_v27, %v758_v28 }
  0xfb   : > { %v693_v5 = vpop.f32.mrf.mxu2 }
  0xfc   : > { %v706_v29 = vpop.f32.mrf.mxu3  ;;  %v669_v30 = vpop.f32.mrf.mxu0  ;;  %v739_v31 = vadd.f32 %v738_v26, %v693_v5  ;;  %v759_v35 = vmul.f32 %v693_v5, %v693_v5 }
  0xfd   : > { %v717_v32 = vpack.c.bf16 %v706_v29, %v693_v5  ;;  %v682_v33 = vpop.f32.mrf.mxu1  ;;  %v760_v38 = vmul.f32 %v706_v29, %v706_v29 }
  0xfe   : > { %v740_v36 = vadd.f32 %v739_v31, %v706_v29  ;;  %v774_v39 = vadd.f32 %v773_v37, %v759_v35 }
  0xff   : > { %725 = vst [vmem:[%s1369_s9 + $0x38] sm:$0xff] %v717_v32 }
 0x100   : > { %741 = vadd.xlane.f32.xlu0 %v740_v36  ;;  %v775_v42 = vadd.f32 %v774_v39, %v760_v38 }
 0x103   : > { %v695_v40 = vpop.f32.mrf.mxu2 }
 0x104   : > { %v708_v41 = vpop.f32.mrf.mxu3 }
 0x108   : > { %776 = vadd.xlane.f32.xlu0 %v775_v42 }
 0x173   : > { %v742_v43 = vpop.xlane.xlu0 %741 }
 0x174   : > { %744 = vst.msk [vmem:[%s267_s14] sm:$0xff] %vm743_vm3, %v742_v43 }
 0x17b   : > { %v777_v44 = vpop.xlane.xlu0 %776 }
 0x17c   : > { %778 = vst.msk [vmem:[%s267_s14 + $0x8] sm:$0xff] %vm743_vm3, %v777_v44 }
 0x17d PF: > { %p11_p10 = scmp.ge.s32.totalorder %s1156_s16, 4   ;;  %s1398_s12 = smov %s1110_s13 }
 0x17e   : > { %s1399_s13 = smov %s1165_s19  ;;  %s1400_s14 = smov %s1156_s16 }
 0x17f   :  { %13 = sbr.rel (!%p11_p10) target bundleno = 2 (0x2), region = 98 }

// kernel: resnet_forward.19
= control target key start
LH: loop header
LB: loop body
LE: loop exit
PB: predicated region body
PF: predicated region fallthrough
CT: control target
= control target key end

     0   :  { %v208_v0 = vmov 0   ;;  %s368_s1 = inlined_call_operand.vmem [shape: f32[8,1], index: 1, kind: input, shape index: {}]   ;;  %s369_s2 = inlined_call_operand.vmem [shape: f32[8,1], index: 2, kind: input, shape index: {}]   ;;  %s370_s0 = inlined_call_operand.vmem [shape: bf16[8,4096], index: 0, kind: input, shape index: {}]   ;;  %s371_s3 = inlined_call_operand.vmem [shape: bf16[8,4096], index: 3, kind: output, shape index: {}]  }
   0x1   :  { %207 = vset.pattern.permute.xlu0 %v208_v0  ;;  %v62_v1 = vld [vmem:[%s368_s1] sm:$0xff]  ;;  %v15_v4 = vld [vmem:[%s370_s0 + $0x8] sm:$0xff]  ;;  %v16_v5 = vld [vmem:[%s370_s0 + $0x10] sm:$0xff] }
   0x2   :  { %65 = vperm.xlu0 %207, %v62_v1   ;;  %v100_v2 = vld [vmem:[%s369_s2] sm:$0xff]  ;;  %v17_v6 = vld [vmem:[%s370_s0 + $0x18] sm:$0xff]  ;;  %v19_v8 = vld [vmem:[%s370_s0 + $0x28] sm:$0xff]  ;;  %v32_v13 = vunpack.c.l.bf16 %v15_v4  ;;  %v33_v14 = vunpack.c.h.bf16 %v15_v4  ;;  %v34_v17 = vunpack.c.l.bf16 %v16_v5  ;;  %v35_v18 = vunpack.c.h.bf16 %v16_v5 }
   0x3   :  { %v14_v3 = vld [vmem:[%s370_s0] sm:$0xff]  ;;  %v20_v9 = vld [vmem:[%s370_s0 + $0x30] sm:$0xff]  ;;  %v21_v10 = vld [vmem:[%s370_s0 + $0x38] sm:$0xff]  ;;  %v36_v19 = vunpack.c.l.bf16 %v17_v6  ;;  %v37_v20 = vunpack.c.h.bf16 %v17_v6  ;;  %v40_v25 = vunpack.c.l.bf16 %v19_v8  ;;  %v41_v26 = vunpack.c.h.bf16 %v19_v8 }
   0x4   :  { %v18_v7 = vld [vmem:[%s370_s0 + $0x20] sm:$0xff]  ;;  %v30_v11 = vunpack.c.l.bf16 %v14_v3  ;;  %v31_v12 = vunpack.c.h.bf16 %v14_v3  ;;  %v23_v16 = vld [vmem:[%s370_s0 + $0x48] sm:$0xff]  ;;  %v24_v21 = vld [vmem:[%s370_s0 + $0x50] sm:$0xff]  ;;  %v42_v30 = vunpack.c.l.bf16 %v20_v9  ;;  %v43_v31 = vunpack.c.h.bf16 %v20_v9 }
   0x5   :  { %v22_v15 = vld [vmem:[%s370_s0 + $0x40] sm:$0xff]  ;;  %v25_v22 = vld [vmem:[%s370_s0 + $0x58] sm:$0xff]  ;;  %v38_v23 = vunpack.c.l.bf16 %v18_v7  ;;  %v39_v24 = vunpack.c.h.bf16 %v18_v7  ;;  %v27_v29 = vld [vmem:[%s370_s0 + $0x68] sm:$0xff]  ;;  %v44_v32 = vunpack.c.l.bf16 %v21_v10  ;;  %v45_v33 = vunpack.c.h.bf16 %v21_v10 }
   0x6   :  { %v26_v28 = vld [vmem:[%s370_s0 + $0x60] sm:$0xff]  ;;  %v28_v34 = vld [vmem:[%s370_s0 + $0x70] sm:$0xff]  ;;  %v29_v35 = vld [vmem:[%s370_s0 + $0x78] sm:$0xff]  ;;  %v46_v36 = vunpack.c.l.bf16 %v22_v15  ;;  %v47_v37 = vunpack.c.h.bf16 %v22_v15  ;;  %v48_v38 = vunpack.c.l.bf16 %v23_v16  ;;  %v49_v39 = vunpack.c.h.bf16 %v23_v16 }
   0x7   :  { %v50_v40 = vunpack.c.l.bf16 %v24_v21  ;;  %v51_v41 = vunpack.c.h.bf16 %v24_v21  ;;  %v52_v42 = vunpack.c.l.bf16 %v25_v22  ;;  %v53_v43 = vunpack.c.h.bf16 %v25_v22 }
   0x8   :  { %v54_v44 = vunpack.c.l.bf16 %v26_v28  ;;  %v55_v45 = vunpack.c.h.bf16 %v26_v28  ;;  %v56_v46 = vunpack.c.l.bf16 %v27_v29  ;;  %v57_v47 = vunpack.c.h.bf16 %v27_v29 }
   0x9   :  { %v58_v48 = vunpack.c.l.bf16 %v28_v34  ;;  %v59_v49 = vunpack.c.h.bf16 %v28_v34  ;;  %v60_v50 = vunpack.c.l.bf16 %v29_v35  ;;  %v61_v51 = vunpack.c.h.bf16 %v29_v35 }
   0xa   :  { %103 = vperm.xlu0 %207, %v100_v2  }
  0x74   :  { %v66_v27 = vpop.permute.xlu0 %65 }
  0x75   :  { %v68_v52 = vmul.f32 %v66_v27, %v30_v11  ;;  %v69_v53 = vmul.f32 %v66_v27, %v31_v12  ;;  %v70_v54 = vmul.f32 %v66_v27, %v32_v13  ;;  %v71_v55 = vmul.f32 %v66_v27, %v33_v14 }
  0x76   :  { %v72_v56 = vmul.f32 %v66_v27, %v34_v17  ;;  %v73_v57 = vmul.f32 %v66_v27, %v35_v18  ;;  %v74_v58 = vmul.f32 %v66_v27, %v36_v19  ;;  %v75_v59 = vmul.f32 %v66_v27, %v37_v20 }
  0x77   :  { %v76_v60 = vmul.f32 %v66_v27, %v38_v23  ;;  %v77_v61 = vmul.f32 %v66_v27, %v39_v24  ;;  %v78_v62 = vmul.f32 %v66_v27, %v40_v25  ;;  %v79_v63 = vmul.f32 %v66_v27, %v41_v26 }
  0x78   :  { %v80_v0 = vmul.f32 %v66_v27, %v42_v30  ;;  %v81_v1 = vmul.f32 %v66_v27, %v43_v31  ;;  %v82_v2 = vmul.f32 %v66_v27, %v44_v32  ;;  %v83_v3 = vmul.f32 %v66_v27, %v45_v33 }
  0x79   :  { %v84_v4 = vmul.f32 %v66_v27, %v46_v36  ;;  %v85_v5 = vmul.f32 %v66_v27, %v47_v37  ;;  %v86_v6 = vmul.f32 %v66_v27, %v48_v38  ;;  %v87_v7 = vmul.f32 %v66_v27, %v49_v39 }
  0x7a   :  { %v88_v9 = vmul.f32 %v66_v27, %v50_v40  ;;  %v89_v10 = vmul.f32 %v66_v27, %v51_v41  ;;  %v90_v11 = vmul.f32 %v66_v27, %v52_v42  ;;  %v91_v12 = vmul.f32 %v66_v27, %v53_v43 }
  0x7b   :  { %v92_v13 = vmul.f32 %v66_v27, %v54_v44  ;;  %v93_v14 = vmul.f32 %v66_v27, %v55_v45  ;;  %v94_v15 = vmul.f32 %v66_v27, %v56_v46  ;;  %v95_v16 = vmul.f32 %v66_v27, %v57_v47 }
  0x7c   :  { %v283_v8 = vpop.permute.xlu0 %103  ;;  %v96_v17 = vmul.f32 %v66_v27, %v58_v48  ;;  %v97_v18 = vmul.f32 %v66_v27, %v59_v49  ;;  %v98_v19 = vmul.f32 %v66_v27, %v60_v50  ;;  %v285_v20 = vmul.f32 %v66_v27, %v61_v51 }
  0x7d   :  { %v106_v21 = vadd.f32 %v283_v8, %v68_v52  ;;  %v107_v22 = vadd.f32 %v283_v8, %v69_v53  ;;  %v108_v23 = vadd.f32 %v283_v8, %v70_v54  ;;  %v109_v24 = vadd.f32 %v283_v8, %v71_v55 }
  0x7e   :  { %v110_v25 = vadd.f32 %v283_v8, %v72_v56  ;;  %v111_v26 = vadd.f32 %v283_v8, %v73_v57  ;;  %v112_v28 = vadd.f32 %v283_v8, %v74_v58  ;;  %v113_v29 = vadd.f32 %v283_v8, %v75_v59 }
  0x7f   :  { %v114_v30 = vadd.f32 %v283_v8, %v76_v60  ;;  %v115_v27 = vadd.f32 %v283_v8, %v77_v61  ;;  %v116_v31 = vadd.f32 %v283_v8, %v78_v62  ;;  %v117_v32 = vadd.f32 %v283_v8, %v79_v63 }
  0x80   :  { %v118_v33 = vadd.f32 %v283_v8, %v80_v0  ;;  %v119_v34 = vadd.f32 %v283_v8, %v81_v1  ;;  %v120_v35 = vadd.f32 %v283_v8, %v82_v2  ;;  %v121_v36 = vadd.f32 %v283_v8, %v83_v3 }
  0x81   :  { %v122_v37 = vadd.f32 %v283_v8, %v84_v4  ;;  %v123_v38 = vadd.f32 %v283_v8, %v85_v5  ;;  %v124_v39 = vadd.f32 %v283_v8, %v86_v6  ;;  %v125_v40 = vadd.f32 %v283_v8, %v87_v7 }
  0x82   :  { %v126_v41 = vadd.f32 %v283_v8, %v88_v9  ;;  %v127_v42 = vadd.f32 %v283_v8, %v89_v10  ;;  %v138_v43 = vmax.f32 %v106_v21, 0.0  ;;  %v139_v44 = vmax.f32 %v107_v22, 0.0 }
  0x83   :  { %v140_v45 = vmax.f32 %v108_v23, 0.0  ;;  %v141_v46 = vmax.f32 %v109_v24, 0.0  ;;  %v142_v47 = vmax.f32 %v110_v25, 0.0  ;;  %v143_v48 = vmax.f32 %v111_v26, 0.0 }
  0x84   :  { %v128_v49 = vadd.f32 %v283_v8, %v90_v11  ;;  %v129_v50 = vadd.f32 %v283_v8, %v91_v12  ;;  %v144_v51 = vmax.f32 %v112_v28, 0.0  ;;  %v145_v52 = vmax.f32 %v113_v29, 0.0 }
  0x85   :  { %v130_v53 = vadd.f32 %v283_v8, %v92_v13  ;;  %v131_v54 = vadd.f32 %v283_v8, %v93_v14  ;;  %v146_v55 = vmax.f32 %v114_v30, 0.0  ;;  %v147_v56 = vmax.f32 %v115_v27, 0.0 }
  0x86   :  { %v132_v57 = vadd.f32 %v283_v8, %v94_v15  ;;  %v148_v58 = vmax.f32 %v116_v31, 0.0  ;;  %v149_v59 = vmax.f32 %v117_v32, 0.0  ;;  %v150_v60 = vmax.f32 %v118_v33, 0.0 }
  0x87   :  { %v151_v61 = vmax.f32 %v119_v34, 0.0  ;;  %v170_v62 = vpack.c.bf16 %v139_v44, %v138_v43  ;;  %v171_v63 = vpack.c.bf16 %v141_v46, %v140_v45  ;;  %v172_v0 = vpack.c.bf16 %v143_v48, %v142_v47 }
  0x88   :  { %v133_v1 = vadd.f32 %v283_v8, %v95_v16  ;;  %v152_v2 = vmax.f32 %v120_v35, 0.0  ;;  %v153_v3 = vmax.f32 %v121_v36, 0.0  ;;  %v173_v4 = vpack.c.bf16 %v145_v52, %v144_v51 }
  0x89   :  { %v134_v5 = vadd.f32 %v283_v8, %v96_v17  ;;  %v154_v6 = vmax.f32 %v122_v37, 0.0  ;;  %v155_v7 = vmax.f32 %v123_v38, 0.0  ;;  %v174_v9 = vpack.c.bf16 %v147_v56, %v146_v55  ;;  %186 = vst [vmem:[%s371_s3] sm:$0xff] %v170_v62 }
  0x8a   :  { %v135_v10 = vadd.f32 %v283_v8, %v97_v18  ;;  %v156_v11 = vmax.f32 %v124_v39, 0.0  ;;  %v157_v12 = vmax.f32 %v125_v40, 0.0  ;;  %v175_v13 = vpack.c.bf16 %v149_v59, %v148_v58  ;;  %187 = vst [vmem:[%s371_s3 + $0x8] sm:$0xff] %v171_v63 }
  0x8b   :  { %v136_v14 = vadd.f32 %v283_v8, %v98_v19  ;;  %v158_v15 = vmax.f32 %v126_v41, 0.0  ;;  %v159_v16 = vmax.f32 %v127_v42, 0.0  ;;  %v176_v17 = vpack.c.bf16 %v151_v61, %v150_v60  ;;  %188 = vst [vmem:[%s371_s3 + $0x10] sm:$0xff] %v172_v0 }
  0x8c   :  { %v137_v21 = vadd.f32 %v283_v8, %v285_v20  ;;  %v160_v18 = vmax.f32 %v128_v49, 0.0  ;;  %v161_v22 = vmax.f32 %v129_v50, 0.0  ;;  %v177_v23 = vpack.c.bf16 %v153_v3, %v152_v2  ;;  %189 = vst [vmem:[%s371_s3 + $0x18] sm:$0xff] %v173_v4 }
  0x8d   :  { %v162_v24 = vmax.f32 %v130_v53, 0.0  ;;  %v163_v25 = vmax.f32 %v131_v54, 0.0  ;;  %v178_v19 = vpack.c.bf16 %v155_v7, %v154_v6  ;;  %190 = vst [vmem:[%s371_s3 + $0x20] sm:$0xff] %v174_v9  ;;  %v164_v26 = vmax.f32 %v132_v57, 0.0 }
  0x8e   :  { %v165_v28 = vmax.f32 %v133_v1, 0.0  ;;  %v179_v29 = vpack.c.bf16 %v157_v12, %v156_v11  ;;  %191 = vst [vmem:[%s371_s3 + $0x28] sm:$0xff] %v175_v13  ;;  %v166_v8 = vmax.f32 %v134_v5, 0.0  ;;  %v167_v20 = vmax.f32 %v135_v10, 0.0 }
  0x8f   :  { %v180_v30 = vpack.c.bf16 %v159_v16, %v158_v15  ;;  %192 = vst [vmem:[%s371_s3 + $0x30] sm:$0xff] %v176_v17  ;;  %v168_v27 = vmax.f32 %v136_v14, 0.0  ;;  %v169_v31 = vmax.f32 %v137_v21, 0.0  ;;  %v181_v32 = vpack.c.bf16 %v161_v22, %v160_v18 }
  0x90   :  { %193 = vst [vmem:[%s371_s3 + $0x38] sm:$0xff] %v177_v23  ;;  %v182_v33 = vpack.c.bf16 %v163_v25, %v162_v24  ;;  %v183_v34 = vpack.c.bf16 %v165_v28, %v164_v26  ;;  %v184_v35 = vpack.c.bf16 %v167_v20, %v166_v8 }
  0x91   :  { %194 = vst [vmem:[%s371_s3 + $0x40] sm:$0xff] %v178_v19  ;;  %v185_v36 = vpack.c.bf16 %v169_v31, %v168_v27 }
  0x92   :  { %195 = vst [vmem:[%s371_s3 + $0x48] sm:$0xff] %v179_v29 }
  0x93   :  { %196 = vst [vmem:[%s371_s3 + $0x50] sm:$0xff] %v180_v30 }
  0x94   :  { %197 = vst [vmem:[%s371_s3 + $0x58] sm:$0xff] %v181_v32 }
  0x95   :  { %198 = vst [vmem:[%s371_s3 + $0x60] sm:$0xff] %v182_v33 }
  0x96   :  { %199 = vst [vmem:[%s371_s3 + $0x68] sm:$0xff] %v183_v34 }
  0x97   :  { %200 = vst [vmem:[%s371_s3 + $0x70] sm:$0xff] %v184_v35 }
  0x98   :  { %201 = vst [vmem:[%s371_s3 + $0x78] sm:$0xff] %v185_v36 }

// kernel: resnet_forward.23
= control target key start
LH: loop header
LB: loop body
LE: loop exit
PB: predicated region body
PF: predicated region fallthrough
CT: control target
= control target key end

     0   :  { %v374_v0 = vmov 0   ;;  %s921_s3 = inlined_call_operand.vmem [shape: f32[8,1], index: 3, kind: input, shape index: {}]   ;;  %s922_s2 = inlined_call_operand.vmem [shape: f32[8,1], index: 2, kind: input, shape index: {}]   ;;  %s923_s5 = inlined_call_operand.vmem [shape: f32[8,1], index: 5, kind: input, shape index: {}]   ;;  %s924_s4 = inlined_call_operand.vmem [shape: f32[8,1], index: 4, kind: input, shape index: {}]   ;;  %s925_s0 = inlined_call_operand.vmem [shape: bf16[8,4096], index: 0, kind: input, shape index: {}]   ;;  %s926_s1 = inlined_call_operand.vmem [shape: bf16[8,4096], index: 1, kind: input, shape index: {}]   ;;  %s927_s6 = inlined_call_operand.vmem [shape: bf16[8,4096], index: 6, kind: output, shape index: {}]  }
   0x1   :  { %373 = vset.pattern.permute.xlu1 %v374_v0  ;;  %372 = vset.pattern.permute.xlu0 %v374_v0  ;;  %v109_v1 = vld [vmem:[%s921_s3] sm:$0xff]  ;;  %v430_v6 = vld [vmem:[%s925_s0 + $0x8] sm:$0xff]  ;;  %v435_v7 = vld [vmem:[%s925_s0 + $0x10] sm:$0xff] }
   0x2   :  { %v71_v2 = vld [vmem:[%s922_s2] sm:$0xff]  ;;  %112 = vperm.xlu1 %373, %v109_v1   ;;  %v440_v8 = vld [vmem:[%s925_s0 + $0x18] sm:$0xff]  ;;  %v450_v10 = vld [vmem:[%s925_s0 + $0x28] sm:$0xff]  ;;  %v41_v15 = vunpack.c.l.bf16 %v430_v6  ;;  %v42_v16 = vunpack.c.h.bf16 %v430_v6  ;;  %v43_v19 = vunpack.c.l.bf16 %v435_v7  ;;  %v44_v20 = vunpack.c.h.bf16 %v435_v7 }
   0x3   :  { %74 = vperm.xlu0 %372, %v71_v2   ;;  %v233_v3 = vld [vmem:[%s923_s5] sm:$0xff]  ;;  %v455_v11 = vld [vmem:[%s925_s0 + $0x30] sm:$0xff]  ;;  %v460_v12 = vld [vmem:[%s925_s0 + $0x38] sm:$0xff]  ;;  %v45_v21 = vunpack.c.l.bf16 %v440_v8  ;;  %v46_v22 = vunpack.c.h.bf16 %v440_v8  ;;  %v49_v27 = vunpack.c.l.bf16 %v450_v10  ;;  %v50_v28 = vunpack.c.h.bf16 %v450_v10 }
   0x4   :  { %v195_v4 = vld [vmem:[%s924_s4] sm:$0xff]  ;;  %v474_v18 = vld [vmem:[%s925_s0 + $0x48] sm:$0xff]  ;;  %v483_v23 = vld [vmem:[%s925_s0 + $0x50] sm:$0xff]  ;;  %v51_v31 = vunpack.c.l.bf16 %v455_v11  ;;  %v52_v32 = vunpack.c.h.bf16 %v455_v11  ;;  %v53_v33 = vunpack.c.l.bf16 %v460_v12  ;;  %v54_v34 = vunpack.c.h.bf16 %v460_v12 }
   0x5   :  { %v425_v5 = vld [vmem:[%s925_s0] sm:$0xff]  ;;  %v488_v24 = vld [vmem:[%s925_s0 + $0x58] sm:$0xff]  ;;  %v502_v30 = vld [vmem:[%s925_s0 + $0x68] sm:$0xff]  ;;  %v57_v39 = vunpack.c.l.bf16 %v474_v18  ;;  %v58_v40 = vunpack.c.h.bf16 %v474_v18  ;;  %v59_v41 = vunpack.c.l.bf16 %v483_v23 }
   0x6   :  { %v445_v9 = vld [vmem:[%s925_s0 + $0x20] sm:$0xff]  ;;  %v39_v13 = vunpack.c.l.bf16 %v425_v5  ;;  %v40_v14 = vunpack.c.h.bf16 %v425_v5  ;;  %v511_v35 = vld [vmem:[%s925_s0 + $0x70] sm:$0xff]  ;;  %v516_v36 = vld [vmem:[%s925_s0 + $0x78] sm:$0xff]  ;;  %v929_v12 = vunpack.c.l.bf16 %v488_v24  ;;  %v933_v18 = vunpack.c.l.bf16 %v502_v30 }
   0x7   :  { %v469_v17 = vld [vmem:[%s925_s0 + $0x40] sm:$0xff]  ;;  %v47_v25 = vunpack.c.l.bf16 %v445_v9  ;;  %v48_v26 = vunpack.c.h.bf16 %v445_v9  ;;  %v534_v46 = vld [vmem:[%s926_s1 + $0x8] sm:$0xff]  ;;  %v543_v51 = vld [vmem:[%s926_s1 + $0x10] sm:$0xff] }
   0x8   :  { %v497_v29 = vld [vmem:[%s925_s0 + $0x60] sm:$0xff]  ;;  %v55_v37 = vunpack.c.l.bf16 %v469_v17  ;;  %v56_v38 = vunpack.c.h.bf16 %v469_v17  ;;  %v548_v52 = vld [vmem:[%s926_s1 + $0x18] sm:$0xff]  ;;  %v562_v58 = vld [vmem:[%s926_s1 + $0x28] sm:$0xff] }
   0x9   :  { %v529_v45 = vld [vmem:[%s926_s1] sm:$0xff]  ;;  %v567_v59 = vld [vmem:[%s926_s1 + $0x30] sm:$0xff]  ;;  %v572_v60 = vld [vmem:[%s926_s1 + $0x38] sm:$0xff]  ;;  %v931_v17 = vunpack.c.l.bf16 %v497_v29 }
   0xa   :  { %236 = vperm.xlu1 %373, %v233_v3   ;;  %v557_v57 = vld [vmem:[%s926_s1 + $0x20] sm:$0xff]  ;;  %v586_v2 = vld [vmem:[%s926_s1 + $0x48] sm:$0xff]  ;;  %v595_v0 = vld [vmem:[%s926_s1 + $0x50] sm:$0xff] }
   0xb   :  { %198 = vperm.xlu0 %372, %v195_v4   ;;  %v581_v1 = vld [vmem:[%s926_s1 + $0x40] sm:$0xff]  ;;  %v600_v61 = vld [vmem:[%s926_s1 + $0x58] sm:$0xff]  ;;  %v614_v55 = vld [vmem:[%s926_s1 + $0x68] sm:$0xff] }
   0xc   :  { %v609_v63 = vld [vmem:[%s926_s1 + $0x60] sm:$0xff]  ;;  %v623_v62 = vld [vmem:[%s926_s1 + $0x70] sm:$0xff]  ;;  %v628_v53 = vld [vmem:[%s926_s1 + $0x78] sm:$0xff] }
  0x75   :  { %v75_v49 = vpop.permute.xlu0 %74 }
  0x76   :  { %v77_v47 = vmul.f32 %v75_v49, %v39_v13  ;;  %v78_v43 = vmul.f32 %v75_v49, %v40_v14  ;;  %v79_v42 = vmul.f32 %v75_v49, %v41_v15  ;;  %v80_v54 = vmul.f32 %v75_v49, %v42_v16 }
  0x77   :  { %v81_v56 = vmul.f32 %v75_v49, %v43_v19  ;;  %v82_v4 = vmul.f32 %v75_v49, %v44_v20  ;;  %v83_v48 = vmul.f32 %v75_v49, %v45_v21  ;;  %v84_v13 = vmul.f32 %v75_v49, %v46_v22 }
  0x78   :  { %v85_v5 = vmul.f32 %v75_v49, %v47_v25  ;;  %v86_v14 = vmul.f32 %v75_v49, %v48_v26  ;;  %v87_v6 = vmul.f32 %v75_v49, %v49_v27  ;;  %v88_v15 = vmul.f32 %v75_v49, %v50_v28 }
  0x79   :  { %v89_v7 = vmul.f32 %v75_v49, %v51_v31  ;;  %v90_v16 = vmul.f32 %v75_v49, %v52_v32  ;;  %v91_v8 = vmul.f32 %v75_v49, %v53_v33  ;;  %v92_v19 = vmul.f32 %v75_v49, %v54_v34 }
  0x7a   :  { %v93_v9 = vmul.f32 %v75_v49, %v55_v37  ;;  %v94_v20 = vmul.f32 %v75_v49, %v56_v38  ;;  %v95_v10 = vmul.f32 %v75_v49, %v57_v39  ;;  %v96_v21 = vmul.f32 %v75_v49, %v58_v40 }
  0x7b   :  { %v97_v11 = vmul.f32 %v75_v49, %v59_v41  ;;  %v928_v22 = vunpack.c.h.bf16 %v483_v23  ;;  %v99_v26 = vmul.f32 %v75_v49, %v929_v12  ;;  %v930_v27 = vunpack.c.h.bf16 %v488_v24  ;;  %v113_v23 = vpop.permute.xlu1 %112 }
  0x7c   :  { %v101_v31 = vmul.f32 %v75_v49, %v931_v17  ;;  %v932_v32 = vunpack.c.h.bf16 %v497_v29  ;;  %v103_v34 = vmul.f32 %v75_v49, %v933_v18  ;;  %v934_v37 = vunpack.c.h.bf16 %v502_v30 }
  0x7d   :  { %v98_v25 = vmul.f32 %v75_v49, %v928_v22  ;;  %v100_v28 = vmul.f32 %v75_v49, %v930_v27  ;;  %v935_v39 = vunpack.c.l.bf16 %v511_v35  ;;  %v936_v41 = vunpack.c.h.bf16 %v511_v35 }
  0x7e   :  { %v102_v33 = vmul.f32 %v75_v49, %v932_v32  ;;  %v104_v38 = vmul.f32 %v75_v49, %v934_v37  ;;  %v937_v22 = vunpack.c.l.bf16 %v516_v36  ;;  %v938_v27 = vunpack.c.h.bf16 %v516_v36 }
  0x7f   :  { %v105_v40 = vmul.f32 %v75_v49, %v935_v39  ;;  %v106_v24 = vmul.f32 %v75_v49, %v936_v41  ;;  %v710_v17 = vadd.f32 %v113_v23, %v77_v47  ;;  %v712_v32 = vadd.f32 %v113_v23, %v78_v43 }
  0x80   :  { %v107_v12 = vmul.f32 %v75_v49, %v937_v22  ;;  %v108_v29 = vmul.f32 %v75_v49, %v938_v27  ;;  %v714_v18 = vadd.f32 %v113_v23, %v79_v42  ;;  %v716_v30 = vadd.f32 %v113_v23, %v80_v54 }
  0x81   :  { %v718_v37 = vadd.f32 %v113_v23, %v81_v56  ;;  %v720_v39 = vadd.f32 %v113_v23, %v82_v4  ;;  %v722_v35 = vadd.f32 %v113_v23, %v83_v48  ;;  %v724_v41 = vadd.f32 %v113_v23, %v84_v13 }
  0x82   :  { %v726_v22 = vadd.f32 %v113_v23, %v85_v5  ;;  %v728_v36 = vadd.f32 %v113_v23, %v86_v14  ;;  %v730_v47 = vadd.f32 %v113_v23, %v87_v6  ;;  %v732_v43 = vadd.f32 %v113_v23, %v88_v15  ;;  %v199_v14 = vpop.permute.xlu0 %198 }
  0x83   :  { %v734_v42 = vadd.f32 %v113_v23, %v89_v7  ;;  %v736_v49 = vadd.f32 %v113_v23, %v90_v16  ;;  %v738_v54 = vadd.f32 %v113_v23, %v91_v8  ;;  %v740_v56 = vadd.f32 %v113_v23, %v92_v19 }
  0x84   :  { %939 = vst [vmem:[#allocation2_spill] sm:$0xff] %v730_v47  ;;  %v742_v48 = vadd.f32 %v113_v23, %v93_v9  ;;  %v744_v4 = vadd.f32 %v113_v23, %v94_v20  ;;  %v746_v13 = vadd.f32 %v113_v23, %v95_v10  ;;  %v748_v5 = vadd.f32 %v113_v23, %v96_v21 }
  0x85   :  { %940 = vst [vmem:[#allocation3_spill] sm:$0xff] %v732_v43  ;;  %v750_v6 = vadd.f32 %v113_v23, %v97_v11  ;;  %v752_v15 = vadd.f32 %v113_v23, %v98_v25  ;;  %v754_v7 = vadd.f32 %v113_v23, %v99_v26  ;;  %v756_v16 = vadd.f32 %v113_v23, %v100_v28 }
  0x86   :  { %941 = vst [vmem:[#allocation4_spill] sm:$0xff] %v734_v42  ;;  %v758_v8 = vadd.f32 %v113_v23, %v101_v31  ;;  %v760_v19 = vadd.f32 %v113_v23, %v102_v33  ;;  %v762_v9 = vadd.f32 %v113_v23, %v103_v34  ;;  %v764_v20 = vadd.f32 %v113_v23, %v104_v38 }
  0x87   :  { %942 = vst [vmem:[#allocation5_spill] sm:$0xff] %v736_v49  ;;  %v766_v10 = vadd.f32 %v113_v23, %v105_v40  ;;  %v768_v21 = vadd.f32 %v113_v23, %v106_v24  ;;  %v770_v11 = vadd.f32 %v113_v23, %v107_v12  ;;  %v772_v25 = vadd.f32 %v113_v23, %v108_v29 }
  0x88   :  { %943 = vst [vmem:[#allocation6_spill] sm:$0xff] %v738_v54  ;;  %v961_v26 = vunpack.c.l.bf16 %v529_v45  ;;  %v962_v31 = vunpack.c.h.bf16 %v529_v45  ;;  %v963_v33 = vunpack.c.l.bf16 %v534_v46  ;;  %v964_v38 = vunpack.c.h.bf16 %v534_v46 }
  0x89   :  { %944 = vst [vmem:[#allocation7_spill] sm:$0xff] %v740_v56  ;;  %v965_v40 = vunpack.c.l.bf16 %v543_v51  ;;  %v966_v12 = vunpack.c.h.bf16 %v543_v51  ;;  %v967_v23 = vunpack.c.l.bf16 %v548_v52  ;;  %v969_v45 = vunpack.c.l.bf16 %v557_v57 }
  0x8a   :  { %945 = vst [vmem:[#allocation8_spill] sm:$0xff] %v742_v48  ;;  %v201_v28 = vmul.f32 %v199_v14, %v961_v26  ;;  %v202_v27 = vmul.f32 %v199_v14, %v962_v31  ;;  %v203_v34 = vmul.f32 %v199_v14, %v963_v33  ;;  %v204_v3 = vmul.f32 %v199_v14, %v964_v38 }
  0x8b   :  { %946 = vst [vmem:[#allocation9_spill] sm:$0xff] %v744_v4  ;;  %v205_v24 = vmul.f32 %v199_v14, %v965_v40  ;;  %v206_v50 = vmul.f32 %v199_v14, %v966_v12  ;;  %v207_v29 = vmul.f32 %v199_v14, %v967_v23  ;;  %v968_v26 = vunpack.c.h.bf16 %v548_v52 }
  0x8c   :  { %947 = vst [vmem:[#allocation10_spill] sm:$0xff] %v746_v13  ;;  %v209_v31 = vmul.f32 %v199_v14, %v969_v45  ;;  %v970_v33 = vunpack.c.h.bf16 %v557_v57  ;;  %v971_v46 = vunpack.c.l.bf16 %v562_v58  ;;  %v972_v40 = vunpack.c.h.bf16 %v562_v58 }
  0x8d   :  { %948 = vst [vmem:[#allocation11_spill] sm:$0xff] %v748_v5  ;;  %v208_v44 = vmul.f32 %v199_v14, %v968_v26  ;;  %v973_v51 = vunpack.c.l.bf16 %v567_v59  ;;  %v974_v23 = vunpack.c.h.bf16 %v567_v59  ;;  %v975_v52 = vunpack.c.l.bf16 %v572_v60 }
  0x8e   :  { %949 = vst [vmem:[#allocation12_spill] sm:$0xff] %v750_v6  ;;  %v211_v38 = vmul.f32 %v199_v14, %v971_v46  ;;  %v976_v45 = vunpack.c.h.bf16 %v572_v60  ;;  %v977_v57 = vunpack.c.l.bf16 %v581_v1  ;;  %v978_v46 = vunpack.c.h.bf16 %v581_v1 }
  0x8f   :  { %950 = vst [vmem:[#allocation13_spill] sm:$0xff] %v752_v15  ;;  %v213_v12 = vmul.f32 %v199_v14, %v973_v51  ;;  %v215_v26 = vmul.f32 %v199_v14, %v975_v52  ;;  %v979_v58 = vunpack.c.l.bf16 %v586_v2  ;;  %v980_v51 = vunpack.c.h.bf16 %v586_v2 }
  0x90   :  { %951 = vst [vmem:[#allocation14_spill] sm:$0xff] %v754_v7  ;;  %v981_v59 = vunpack.c.l.bf16 %v595_v0  ;;  %v982_v52 = vunpack.c.h.bf16 %v595_v0  ;;  %v983_v60 = vunpack.c.l.bf16 %v600_v61  ;;  %v985_v1 = vunpack.c.l.bf16 %v609_v63  ;;  %v237_v0 = vpop.permute.xlu1 %236 }
  0x91   :  { %952 = vst [vmem:[#allocation15_spill] sm:$0xff] %v756_v16  ;;  %v987_v2 = vunpack.c.l.bf16 %v614_v55  ;;  %v240_v5 = vadd.f32 %v237_v0, %v202_v27  ;;  %v241_v13 = vadd.f32 %v237_v0, %v203_v34  ;;  %v243_v4 = vadd.f32 %v237_v0, %v205_v24 }
  0x92   :  { %953 = vst [vmem:[#allocation16_spill] sm:$0xff] %v758_v8  ;;  %v246_v48 = vadd.f32 %v237_v0, %v208_v44  ;;  %v247_v56 = vadd.f32 %v237_v0, %v209_v31  ;;  %v253_v42 = vadd.f32 %v237_v0, %v215_v26  ;;  %v994_v26 = vld [vmem:[#allocation3_spill] sm:$0xff] }
  0x93   :  { %954 = vst [vmem:[#allocation17_spill] sm:$0xff] %v760_v19  ;;  %v222_v19 = vmul.f32 %v199_v14, %v982_v52  ;;  %v989_v52 = vunpack.c.l.bf16 %v623_v62 }
  0x94   :  { %955 = vst [vmem:[#allocation18_spill] sm:$0xff] %v762_v9  ;;  %v220_v9 = vmul.f32 %v199_v14, %v980_v51  ;;  %v227_v51 = vmul.f32 %v199_v14, %v987_v2  ;;  %v242_v2 = vadd.f32 %v237_v0, %v204_v3 }
  0x95   :  { %956 = vst [vmem:[#allocation19_spill] sm:$0xff] %v764_v20  ;;  %v218_v20 = vmul.f32 %v199_v14, %v978_v46  ;;  %v225_v46 = vmul.f32 %v199_v14, %v985_v1  ;;  %v229_v15 = vmul.f32 %v199_v14, %v989_v52  ;;  %v992_v1 = vunpack.c.h.bf16 %v628_v53 }
  0x96   :  { %957 = vst [vmem:[#allocation20_spill] sm:$0xff] %v766_v10  ;;  %v216_v10 = vmul.f32 %v199_v14, %v976_v45  ;;  %v223_v45 = vmul.f32 %v199_v14, %v983_v60  ;;  %v990_v60 = vunpack.c.h.bf16 %v623_v62  ;;  %v249_v52 = vadd.f32 %v237_v0, %v211_v38 }
  0x97   :  { %958 = vst [vmem:[#allocation21_spill] sm:$0xff] %v768_v21  ;;  %v214_v21 = vmul.f32 %v199_v14, %v974_v23  ;;  %v221_v23 = vmul.f32 %v199_v14, %v981_v59  ;;  %v988_v59 = vunpack.c.h.bf16 %v614_v55  ;;  %v244_v55 = vadd.f32 %v237_v0, %v206_v50 }
  0x98   :  { %959 = vst [vmem:[#allocation22_spill] sm:$0xff] %v770_v11  ;;  %v212_v11 = vmul.f32 %v199_v14, %v972_v40  ;;  %v219_v40 = vmul.f32 %v199_v14, %v979_v58  ;;  %v986_v58 = vunpack.c.h.bf16 %v609_v63  ;;  %v232_v63 = vmul.f32 %v199_v14, %v992_v1 }
  0x99   :  { %960 = vst [vmem:[#allocation23_spill] sm:$0xff] %v772_v25  ;;  %v210_v25 = vmul.f32 %v199_v14, %v970_v33  ;;  %v217_v33 = vmul.f32 %v199_v14, %v977_v57  ;;  %v984_v57 = vunpack.c.h.bf16 %v600_v61  ;;  %v228_v7 = vmul.f32 %v199_v14, %v988_v59 }
  0x9a   :  { %v226_v16 = vmul.f32 %v199_v14, %v986_v58  ;;  %v230_v61 = vmul.f32 %v199_v14, %v990_v60  ;;  %v239_v58 = vadd.f32 %v237_v0, %v201_v28  ;;  %v245_v59 = vadd.f32 %v237_v0, %v207_v29 }
  0x9b   :  { %v224_v8 = vmul.f32 %v199_v14, %v984_v57  ;;  %v991_v57 = vunpack.c.l.bf16 %v628_v53  ;;  %v248_v54 = vadd.f32 %v237_v0, %v210_v25  ;;  %v250_v49 = vadd.f32 %v237_v0, %v212_v11 }
  0x9c   :  { %v251_v62 = vadd.f32 %v237_v0, %v213_v12  ;;  %v252_v60 = vadd.f32 %v237_v0, %v214_v21  ;;  %v254_v43 = vadd.f32 %v237_v0, %v216_v10  ;;  %v256_v47 = vadd.f32 %v237_v0, %v218_v20  ;;  %v993_v12 = vld [vmem:[#allocation2_spill] sm:$0xff] }
  0x9d   :  { %v231_v6 = vmul.f32 %v199_v14, %v991_v57  ;;  %v255_v57 = vadd.f32 %v237_v0, %v217_v33  ;;  %v257_v53 = vadd.f32 %v237_v0, %v219_v40  ;;  %v258_v14 = vadd.f32 %v237_v0, %v220_v9  ;;  %v997_v33 = vld [vmem:[#allocation6_spill] sm:$0xff]  ;;  %v999_v40 = vld [vmem:[#allocation8_spill] sm:$0xff] }
  0x9e   :  { %v259_v28 = vadd.f32 %v237_v0, %v221_v23  ;;  %v260_v27 = vadd.f32 %v237_v0, %v222_v19  ;;  %v261_v34 = vadd.f32 %v237_v0, %v223_v45  ;;  %v262_v3 = vadd.f32 %v237_v0, %v224_v8  ;;  %v1000_v23 = vld [vmem:[#allocation9_spill] sm:$0xff] }
  0x9f   :  { %v263_v24 = vadd.f32 %v237_v0, %v225_v46  ;;  %v264_v50 = vadd.f32 %v237_v0, %v226_v16  ;;  %v265_v29 = vadd.f32 %v237_v0, %v227_v51  ;;  %v266_v44 = vadd.f32 %v237_v0, %v228_v7  ;;  %v1004_v46 = vld [vmem:[#allocation13_spill] sm:$0xff] }
  0xa0   :  { %v267_v31 = vadd.f32 %v237_v0, %v229_v15  ;;  %v268_v25 = vadd.f32 %v237_v0, %v230_v61  ;;  %v269_v38 = vadd.f32 %v237_v0, %v231_v6  ;;  %v838_v11 = vadd.f32 %v237_v0, %v232_v63 }
  0xa1   :  { %v271_v21 = vadd.f32 %v239_v58, %v710_v17  ;;  %v272_v10 = vadd.f32 %v240_v5, %v712_v32  ;;  %v273_v20 = vadd.f32 %v241_v13, %v714_v18  ;;  %v274_v9 = vadd.f32 %v242_v2, %v716_v30  ;;  %v995_v5 = vld [vmem:[#allocation4_spill] sm:$0xff]  ;;  %v996_v13 = vld [vmem:[#allocation5_spill] sm:$0xff]  ;;  %v1005_v58 = vld [vmem:[#allocation14_spill] sm:$0xff] }
  0xa2   :  { %v275_v19 = vadd.f32 %v243_v4, %v718_v37  ;;  %v276_v8 = vadd.f32 %v244_v55, %v720_v39  ;;  %v277_v16 = vadd.f32 %v245_v59, %v722_v35  ;;  %v278_v15 = vadd.f32 %v246_v48, %v724_v41  ;;  %v998_v4 = vld [vmem:[#allocation7_spill] sm:$0xff]  ;;  %v1001_v48 = vld [vmem:[#allocation10_spill] sm:$0xff] }
  0xa3   :  { %v279_v6 = vadd.f32 %v247_v56, %v726_v22  ;;  %v280_v7 = vadd.f32 %v248_v54, %v728_v36  ;;  %v281_v17 = vadd.f32 %v249_v52, %v993_v12  ;;  %v282_v32 = vadd.f32 %v250_v49, %v994_v26  ;;  %v1002_v56 = vld [vmem:[#allocation11_spill] sm:$0xff]  ;;  %v1003_v54 = vld [vmem:[#allocation12_spill] sm:$0xff] }
  0xa4   :  { %v283_v18 = vadd.f32 %v251_v62, %v995_v5  ;;  %v284_v30 = vadd.f32 %v252_v60, %v996_v13  ;;  %v285_v37 = vadd.f32 %v253_v42, %v997_v33  ;;  %v286_v39 = vadd.f32 %v254_v43, %v998_v4  ;;  %v1006_v2 = vld [vmem:[#allocation15_spill] sm:$0xff]  ;;  %v1007_v52 = vld [vmem:[#allocation16_spill] sm:$0xff]  ;;  %v1008_v60 = vld [vmem:[#allocation17_spill] sm:$0xff] }
  0xa5   :  { %v287_v35 = vadd.f32 %v255_v57, %v999_v40  ;;  %v288_v41 = vadd.f32 %v256_v47, %v1000_v23  ;;  %v289_v22 = vadd.f32 %v257_v53, %v1001_v48  ;;  %v290_v36 = vadd.f32 %v258_v14, %v1002_v56  ;;  %v1011_v5 = vld [vmem:[#allocation20_spill] sm:$0xff]  ;;  %v1014_v4 = vld [vmem:[#allocation23_spill] sm:$0xff] }
  0xa6   :  { %v291_v45 = vadd.f32 %v259_v28, %v1003_v54  ;;  %v292_v49 = vadd.f32 %v260_v27, %v1004_v46  ;;  %v303_v51 = vmax.f32 %v271_v21, 0.0  ;;  %v304_v0 = vmax.f32 %v272_v10, 0.0  ;;  %v1009_v28 = vld [vmem:[#allocation18_spill] sm:$0xff] }
  0xa7   :  { %v305_v61 = vmax.f32 %v273_v20, 0.0  ;;  %v306_v1 = vmax.f32 %v274_v9, 0.0  ;;  %v307_v63 = vmax.f32 %v275_v19, 0.0  ;;  %v308_v42 = vmax.f32 %v276_v8, 0.0 }
  0xa8   :  { %v293_v43 = vadd.f32 %v261_v34, %v1005_v58  ;;  %v294_v55 = vadd.f32 %v262_v3, %v1006_v2  ;;  %v309_v59 = vmax.f32 %v277_v16, 0.0  ;;  %v310_v47 = vmax.f32 %v278_v15, 0.0  ;;  %v1010_v34 = vld [vmem:[#allocation19_spill] sm:$0xff] }
  0xa9   :  { %v295_v62 = vadd.f32 %v263_v24, %v1007_v52  ;;  %v296_v57 = vadd.f32 %v264_v50, %v1008_v60  ;;  %v311_v53 = vmax.f32 %v279_v6, 0.0  ;;  %v312_v14 = vmax.f32 %v280_v7, 0.0 }
  0xaa   :  { %v297_v27 = vadd.f32 %v265_v29, %v1009_v28  ;;  %v313_v21 = vmax.f32 %v281_v17, 0.0  ;;  %v314_v10 = vmax.f32 %v282_v32, 0.0  ;;  %v315_v20 = vmax.f32 %v283_v18, 0.0  ;;  %v1012_v29 = vld [vmem:[#allocation21_spill] sm:$0xff] }
  0xab   :  { %v316_v9 = vmax.f32 %v284_v30, 0.0  ;;  %v335_v19 = vpack.c.bf16 %v304_v0, %v303_v51  ;;  %v336_v8 = vpack.c.bf16 %v306_v1, %v305_v61  ;;  %v337_v12 = vpack.c.bf16 %v308_v42, %v307_v63 }
  0xac   :  { %v298_v26 = vadd.f32 %v266_v44, %v1010_v34  ;;  %v317_v3 = vmax.f32 %v285_v37, 0.0  ;;  %v318_v16 = vmax.f32 %v286_v39, 0.0  ;;  %v338_v15 = vpack.c.bf16 %v310_v47, %v309_v59  ;;  %v1013_v44 = vld [vmem:[#allocation22_spill] sm:$0xff] }
  0xad   :  { %v299_v24 = vadd.f32 %v267_v31, %v1011_v5  ;;  %v319_v13 = vmax.f32 %v287_v35, 0.0  ;;  %v320_v50 = vmax.f32 %v288_v41, 0.0  ;;  %v339_v6 = vpack.c.bf16 %v312_v14, %v311_v53  ;;  %351 = vst [vmem:[%s927_s6] sm:$0xff] %v335_v19 }
  0xae   :  { %v300_v7 = vadd.f32 %v268_v25, %v1012_v29  ;;  %v321_v17 = vmax.f32 %v289_v22, 0.0  ;;  %v322_v32 = vmax.f32 %v290_v36, 0.0  ;;  %v340_v18 = vpack.c.bf16 %v314_v10, %v313_v21  ;;  %352 = vst [vmem:[%s927_s6 + $0x8] sm:$0xff] %v336_v8 }
  0xaf   :  { %v301_v30 = vadd.f32 %v269_v38, %v1013_v44  ;;  %v323_v33 = vmax.f32 %v291_v45, 0.0  ;;  %v324_v31 = vmax.f32 %v292_v49, 0.0  ;;  %v341_v37 = vpack.c.bf16 %v316_v9, %v315_v20  ;;  %353 = vst [vmem:[%s927_s6 + $0x10] sm:$0xff] %v337_v12 }
  0xb0   :  { %v302_v39 = vadd.f32 %v838_v11, %v1014_v4  ;;  %v325_v25 = vmax.f32 %v293_v43, 0.0  ;;  %v326_v40 = vmax.f32 %v294_v55, 0.0  ;;  %v342_v35 = vpack.c.bf16 %v318_v16, %v317_v3  ;;  %354 = vst [vmem:[%s927_s6 + $0x18] sm:$0xff] %v338_v15 }
  0xb1   :  { %v327_v23 = vmax.f32 %v295_v62, 0.0  ;;  %v328_v41 = vmax.f32 %v296_v57, 0.0  ;;  %v343_v38 = vpack.c.bf16 %v320_v50, %v319_v13  ;;  %355 = vst [vmem:[%s927_s6 + $0x20] sm:$0xff] %v339_v6  ;;  %v329_v48 = vmax.f32 %v297_v27, 0.0 }
  0xb2   :  { %v330_v22 = vmax.f32 %v298_v26, 0.0  ;;  %v344_v56 = vpack.c.bf16 %v322_v32, %v321_v17  ;;  %356 = vst [vmem:[%s927_s6 + $0x28] sm:$0xff] %v340_v18  ;;  %v331_v11 = vmax.f32 %v299_v24, 0.0  ;;  %v332_v36 = vmax.f32 %v300_v7, 0.0 }
  0xb3   :  { %v345_v54 = vpack.c.bf16 %v324_v31, %v323_v33  ;;  %357 = vst [vmem:[%s927_s6 + $0x30] sm:$0xff] %v341_v37  ;;  %v333_v45 = vmax.f32 %v301_v30, 0.0  ;;  %v334_v46 = vmax.f32 %v302_v39, 0.0  ;;  %v346_v49 = vpack.c.bf16 %v326_v40, %v325_v25 }
  0xb4   :  { %358 = vst [vmem:[%s927_s6 + $0x38] sm:$0xff] %v342_v35  ;;  %v347_v51 = vpack.c.bf16 %v328_v41, %v327_v23  ;;  %v348_v0 = vpack.c.bf16 %v330_v22, %v329_v48  ;;  %v349_v61 = vpack.c.bf16 %v332_v36, %v331_v11 }
  0xb5   :  { %359 = vst [vmem:[%s927_s6 + $0x40] sm:$0xff] %v343_v38  ;;  %v350_v1 = vpack.c.bf16 %v334_v46, %v333_v45 }
  0xb6   :  { %360 = vst [vmem:[%s927_s6 + $0x48] sm:$0xff] %v344_v56 }
  0xb7   :  { %361 = vst [vmem:[%s927_s6 + $0x50] sm:$0xff] %v345_v54 }
  0xb8   :  { %362 = vst [vmem:[%s927_s6 + $0x58] sm:$0xff] %v346_v49 }
  0xb9   :  { %363 = vst [vmem:[%s927_s6 + $0x60] sm:$0xff] %v347_v51 }
  0xba   :  { %364 = vst [vmem:[%s927_s6 + $0x68] sm:$0xff] %v348_v0 }
  0xbb   :  { %365 = vst [vmem:[%s927_s6 + $0x70] sm:$0xff] %v349_v61 }
  0xbc   :  { %366 = vst [vmem:[%s927_s6 + $0x78] sm:$0xff] %v350_v1 }

// kernel: resnet_forward.20
= control target key start
LH: loop header
LB: loop body
LE: loop exit
PB: predicated region body
PF: predicated region fallthrough
CT: control target
= control target key end

     0   :  { %s1628_s12 = smov 0   ;;  %s1630_s13 = smov 0   ;;  %s2035_s0 = inlined_call_operand.vmem [shape: bf16[72,4096], index: 0, kind: input, shape index: {}]   ;;  %s2036_s1 = inlined_call_operand.vmem [shape: bf16[8,72], index: 1, kind: input, shape index: {}]   ;;  %s2037_s2 = inlined_call_operand.vmem [shape: bf16[8,4096], index: 2, kind: output, shape index: {0}]   ;;  %s2038_s3 = inlined_call_operand.vmem [shape: f32[2,16,1], index: 3, kind: output, shape index: {1}]  }
   0x1   :  { %s1632_s14 = smov 0  }
   0x2 LB: > { %s1644_s15 = sadd.s32 4294967295, %s1606_s14   ;;  %s1647_s16 = sadd.s32 1, %s1606_s14   ;;  %s1606_s14 = sphi %s1632_s14, %s2041_s14   ;;  %s1602_s13 = sphi %s1630_s13, %s2040_s13   ;;  %s1598_s12 = sphi %s1628_s12, %s2039_s12  }
   0x3   : > { %s18_s17 = ssub.s32 %s1606_s14, %s1647_s16  ;;  %s21_s18 = sadd.s32 1, %s1602_s13 }
   0x4   : > { %p19_p0 = scmp.eq.s32.totalorder %s18_s17, 0  ;;  %p28_p1 = scmp.ne.s32.totalorder %s1602_s13, %s1598_s12 }
   0x5   : > { %p29_p2 = scmp.eq.s32.totalorder %s1606_s14, 0  ;;  %p1210_p4 = scmp.ge.s32.totalorder %s1606_s14, 2 }
   0x6   : > { %s1656_s19 = scalar_select %p19_p0, %s1602_s13, %s21_s18  }
   0x7   : > { %p30_p3 = por %p29_p2, %p28_p1  ;;  %130 = sbr.rel (%p1210_p4) target bundleno = 88 (0x58), region = 20 }
   0xc   : > { %133 = sbr.rel (!%p30_p3) target bundleno = 88 (0x58), region = 24  ;;  %s135_s20 = sand.u32 (%p30_p3), 1, %s1602_s13  }
   0xd   : > { %s1492_s21 = sshll.u32 (%p30_p3), %s1606_s14, 6  ;;  %s1558_s22 = smul.u32 (%p30_p3), 576, %s135_s20 }
   0xe   : > { %s1664_s25 = scalar_lea.vmem (%p30_p3), %s2035_s0, %s1492_s21 }
   0xf   : > { %v153_v0 = vld [vmem:[%s1664_s25] sm:$0xff] (%p30_p3)  ;;  %v155_v1 = vld [vmem:[%s1664_s25 + $0x8] sm:$0xff] (%p30_p3)  ;;  %v157_v2 = vld [vmem:[%s1664_s25 + $0x10] sm:$0xff] (%p30_p3)  ;;  %s1669_s26 = scalar_lea.vmem (%p30_p3), [#allocation2], %s1558_s22 }
  0x10   : > { %154 = vst [vmem:[%s1669_s26] sm:$0xff] (%p30_p3), %v153_v0  ;;  %v159_v3 = vld [vmem:[%s1664_s25 + $0x18] sm:$0xff] (%p30_p3)  ;;  %v161_v4 = vld [vmem:[%s1664_s25 + $0x20] sm:$0xff] (%p30_p3)  ;;  %v163_v5 = vld [vmem:[%s1664_s25 + $0x28] sm:$0xff] (%p30_p3) }
  0x11   : > { %156 = vst [vmem:[%s1669_s26 + $0x8] sm:$0xff] %v155_v1  ;;  %v165_v6 = vld [vmem:[%s1664_s25 + $0x30] sm:$0xff]  ;;  %v167_v7 = vld [vmem:[%s1664_s25 + $0x38] sm:$0xff]  ;;  %v169_v8 = vld [vmem:[%s1664_s25 + $0x80] sm:$0xff] }
  0x12   : > { %158 = vst [vmem:[%s1669_s26 + $0x10] sm:$0xff] %v157_v2  ;;  %v171_v9 = vld [vmem:[%s1664_s25 + $0x88] sm:$0xff]  ;;  %v173_v10 = vld [vmem:[%s1664_s25 + $0x90] sm:$0xff]  ;;  %v175_v11 = vld [vmem:[%s1664_s25 + $0x98] sm:$0xff] }
  0x13   : > { %160 = vst [vmem:[%s1669_s26 + $0x18] sm:$0xff] %v159_v3  ;;  %v177_v12 = vld [vmem:[%s1664_s25 + $0xa0] sm:$0xff]  ;;  %v179_v13 = vld [vmem:[%s1664_s25 + $0xa8] sm:$0xff]  ;;  %v181_v14 = vld [vmem:[%s1664_s25 + $0xb0] sm:$0xff] }
  0x14   : > { %162 = vst [vmem:[%s1669_s26 + $0x20] sm:$0xff] %v161_v4  ;;  %v183_v15 = vld [vmem:[%s1664_s25 + $0xb8] sm:$0xff]  ;;  %v185_v16 = vld [vmem:[%s1664_s25 + $0x100] sm:$0xff]  ;;  %v187_v17 = vld [vmem:[%s1664_s25 + $0x108] sm:$0xff] }
  0x15   : > { %164 = vst [vmem:[%s1669_s26 + $0x28] sm:$0xff] %v163_v5  ;;  %v189_v18 = vld [vmem:[%s1664_s25 + $0x110] sm:$0xff]  ;;  %v191_v19 = vld [vmem:[%s1664_s25 + $0x118] sm:$0xff]  ;;  %v193_v20 = vld [vmem:[%s1664_s25 + $0x120] sm:$0xff] }
  0x16   : > { %166 = vst [vmem:[%s1669_s26 + $0x30] sm:$0xff] %v165_v6  ;;  %v195_v21 = vld [vmem:[%s1664_s25 + $0x128] sm:$0xff]  ;;  %v197_v22 = vld [vmem:[%s1664_s25 + $0x130] sm:$0xff]  ;;  %v199_v23 = vld [vmem:[%s1664_s25 + $0x138] sm:$0xff] }
  0x17   : > { %168 = vst [vmem:[%s1669_s26 + $0x38] sm:$0xff] %v167_v7  ;;  %v201_v24 = vld [vmem:[%s1664_s25 + $0x180] sm:$0xff]  ;;  %v203_v25 = vld [vmem:[%s1664_s25 + $0x188] sm:$0xff]  ;;  %v205_v26 = vld [vmem:[%s1664_s25 + $0x190] sm:$0xff] }
  0x18   : > { %170 = vst [vmem:[%s1669_s26 + $0x40] sm:$0xff] %v169_v8  ;;  %v207_v27 = vld [vmem:[%s1664_s25 + $0x198] sm:$0xff]  ;;  %v209_v28 = vld [vmem:[%s1664_s25 + $0x1a0] sm:$0xff]  ;;  %v211_v29 = vld [vmem:[%s1664_s25 + $0x1a8] sm:$0xff] }
  0x19   : > { %172 = vst [vmem:[%s1669_s26 + $0x48] sm:$0xff] %v171_v9  ;;  %v213_v30 = vld [vmem:[%s1664_s25 + $0x1b0] sm:$0xff]  ;;  %v215_v31 = vld [vmem:[%s1664_s25 + $0x1b8] sm:$0xff]  ;;  %v217_v32 = vld [vmem:[%s1664_s25 + $0x200] sm:$0xff] }
  0x1a   : > { %174 = vst [vmem:[%s1669_s26 + $0x50] sm:$0xff] %v173_v10  ;;  %v219_v33 = vld [vmem:[%s1664_s25 + $0x208] sm:$0xff]  ;;  %v221_v34 = vld [vmem:[%s1664_s25 + $0x210] sm:$0xff]  ;;  %v223_v35 = vld [vmem:[%s1664_s25 + $0x218] sm:$0xff] }
  0x1b   : > { %176 = vst [vmem:[%s1669_s26 + $0x58] sm:$0xff] %v175_v11  ;;  %v225_v36 = vld [vmem:[%s1664_s25 + $0x220] sm:$0xff]  ;;  %v227_v37 = vld [vmem:[%s1664_s25 + $0x228] sm:$0xff]  ;;  %v229_v38 = vld [vmem:[%s1664_s25 + $0x230] sm:$0xff] }
  0x1c   : > { %178 = vst [vmem:[%s1669_s26 + $0x60] sm:$0xff] %v177_v12  ;;  %v231_v39 = vld [vmem:[%s1664_s25 + $0x238] sm:$0xff]  ;;  %v233_v40 = vld [vmem:[%s1664_s25 + $0x280] sm:$0xff]  ;;  %v235_v41 = vld [vmem:[%s1664_s25 + $0x288] sm:$0xff] }
  0x1d   : > { %180 = vst [vmem:[%s1669_s26 + $0x68] sm:$0xff] %v179_v13  ;;  %v237_v42 = vld [vmem:[%s1664_s25 + $0x290] sm:$0xff]  ;;  %v239_v43 = vld [vmem:[%s1664_s25 + $0x298] sm:$0xff]  ;;  %v241_v44 = vld [vmem:[%s1664_s25 + $0x2a0] sm:$0xff] }
  0x1e   : > { %182 = vst [vmem:[%s1669_s26 + $0x70] sm:$0xff] %v181_v14  ;;  %v243_v45 = vld [vmem:[%s1664_s25 + $0x2a8] sm:$0xff]  ;;  %v245_v46 = vld [vmem:[%s1664_s25 + $0x2b0] sm:$0xff]  ;;  %v247_v47 = vld [vmem:[%s1664_s25 + $0x2b8] sm:$0xff] }
  0x1f   : > { %184 = vst [vmem:[%s1669_s26 + $0x78] sm:$0xff] %v183_v15  ;;  %v249_v48 = vld [vmem:[%s1664_s25 + $0x300] sm:$0xff]  ;;  %v251_v49 = vld [vmem:[%s1664_s25 + $0x308] sm:$0xff]  ;;  %v253_v50 = vld [vmem:[%s1664_s25 + $0x310] sm:$0xff] }
  0x20   : > { %186 = vst [vmem:[%s1669_s26 + $0x80] sm:$0xff] %v185_v16  ;;  %v255_v51 = vld [vmem:[%s1664_s25 + $0x318] sm:$0xff]  ;;  %v257_v52 = vld [vmem:[%s1664_s25 + $0x320] sm:$0xff]  ;;  %v259_v53 = vld [vmem:[%s1664_s25 + $0x328] sm:$0xff] }
  0x21   : > { %188 = vst [vmem:[%s1669_s26 + $0x88] sm:$0xff] %v187_v17  ;;  %v261_v54 = vld [vmem:[%s1664_s25 + $0x330] sm:$0xff]  ;;  %v263_v55 = vld [vmem:[%s1664_s25 + $0x338] sm:$0xff]  ;;  %v265_v56 = vld [vmem:[%s1664_s25 + $0x380] sm:$0xff] }
  0x22   : > { %190 = vst [vmem:[%s1669_s26 + $0x90] sm:$0xff] %v189_v18  ;;  %v267_v57 = vld [vmem:[%s1664_s25 + $0x388] sm:$0xff]  ;;  %v269_v58 = vld [vmem:[%s1664_s25 + $0x390] sm:$0xff]  ;;  %v271_v59 = vld [vmem:[%s1664_s25 + $0x398] sm:$0xff] }
  0x23   : > { %192 = vst [vmem:[%s1669_s26 + $0x98] sm:$0xff] %v191_v19  ;;  %v273_v60 = vld [vmem:[%s1664_s25 + $0x3a0] sm:$0xff]  ;;  %v275_v61 = vld [vmem:[%s1664_s25 + $0x3a8] sm:$0xff]  ;;  %v277_v62 = vld [vmem:[%s1664_s25 + $0x3b0] sm:$0xff] }
  0x24   : > { %194 = vst [vmem:[%s1669_s26 + $0xa0] sm:$0xff] %v193_v20  ;;  %v279_v63 = vld [vmem:[%s1664_s25 + $0x3b8] sm:$0xff]  ;;  %v281_v0 = vld [vmem:[%s1664_s25 + $0x400] sm:$0xff]  ;;  %v283_v1 = vld [vmem:[%s1664_s25 + $0x408] sm:$0xff] }
  0x25   : > { %196 = vst [vmem:[%s1669_s26 + $0xa8] sm:$0xff] %v195_v21  ;;  %v285_v2 = vld [vmem:[%s1664_s25 + $0x410] sm:$0xff]  ;;  %v287_v3 = vld [vmem:[%s1664_s25 + $0x418] sm:$0xff]  ;;  %v289_v4 = vld [vmem:[%s1664_s25 + $0x420] sm:$0xff] }
  0x26   : > { %198 = vst [vmem:[%s1669_s26 + $0xb0] sm:$0xff] %v197_v22  ;;  %v291_v5 = vld [vmem:[%s1664_s25 + $0x428] sm:$0xff]  ;;  %v293_v6 = vld [vmem:[%s1664_s25 + $0x430] sm:$0xff]  ;;  %v295_v7 = vld [vmem:[%s1664_s25 + $0x438] sm:$0xff] }
  0x27   : > { %200 = vst [vmem:[%s1669_s26 + $0xb8] sm:$0xff] %v199_v23 }
  0x28   : > { %202 = vst [vmem:[%s1669_s26 + $0xc0] sm:$0xff] %v201_v24 }
  0x29   : > { %204 = vst [vmem:[%s1669_s26 + $0xc8] sm:$0xff] %v203_v25 }
  0x2a   : > { %206 = vst [vmem:[%s1669_s26 + $0xd0] sm:$0xff] %v205_v26 }
  0x2b   : > { %208 = vst [vmem:[%s1669_s26 + $0xd8] sm:$0xff] %v207_v27 }
  0x2c   : > { %210 = vst [vmem:[%s1669_s26 + $0xe0] sm:$0xff] %v209_v28 }
  0x2d   : > { %212 = vst [vmem:[%s1669_s26 + $0xe8] sm:$0xff] %v211_v29 }
  0x2e   : > { %214 = vst [vmem:[%s1669_s26 + $0xf0] sm:$0xff] %v213_v30 }
  0x2f   : > { %216 = vst [vmem:[%s1669_s26 + $0xf8] sm:$0xff] %v215_v31 }
  0x30   : > { %218 = vst [vmem:[%s1669_s26 + $0x100] sm:$0xff] %v217_v32 }
  0x31   : > { %220 = vst [vmem:[%s1669_s26 + $0x108] sm:$0xff] %v219_v33 }
  0x32   : > { %222 = vst [vmem:[%s1669_s26 + $0x110] sm:$0xff] %v221_v34 }
  0x33   : > { %224 = vst [vmem:[%s1669_s26 + $0x118] sm:$0xff] %v223_v35 }
  0x34   : > { %226 = vst [vmem:[%s1669_s26 + $0x120] sm:$0xff] %v225_v36 }
  0x35   : > { %228 = vst [vmem:[%s1669_s26 + $0x128] sm:$0xff] %v227_v37 }
  0x36   : > { %230 = vst [vmem:[%s1669_s26 + $0x130] sm:$0xff] %v229_v38 }
  0x37   : > { %232 = vst [vmem:[%s1669_s26 + $0x138] sm:$0xff] %v231_v39 }
  0x38   : > { %234 = vst [vmem:[%s1669_s26 + $0x140] sm:$0xff] %v233_v40 }
  0x39   : > { %236 = vst [vmem:[%s1669_s26 + $0x148] sm:$0xff] %v235_v41 }
  0x3a   : > { %238 = vst [vmem:[%s1669_s26 + $0x150] sm:$0xff] %v237_v42 }
  0x3b   : > { %240 = vst [vmem:[%s1669_s26 + $0x158] sm:$0xff] %v239_v43 }
  0x3c   : > { %242 = vst [vmem:[%s1669_s26 + $0x160] sm:$0xff] %v241_v44 }
  0x3d   : > { %244 = vst [vmem:[%s1669_s26 + $0x168] sm:$0xff] %v243_v45 }
  0x3e   : > { %246 = vst [vmem:[%s1669_s26 + $0x170] sm:$0xff] %v245_v46 }
  0x3f   : > { %248 = vst [vmem:[%s1669_s26 + $0x178] sm:$0xff] %v247_v47 }
  0x40   : > { %250 = vst [vmem:[%s1669_s26 + $0x180] sm:$0xff] %v249_v48 }
  0x41   : > { %252 = vst [vmem:[%s1669_s26 + $0x188] sm:$0xff] %v251_v49 }
  0x42   : > { %254 = vst [vmem:[%s1669_s26 + $0x190] sm:$0xff] %v253_v50 }
  0x43   : > { %256 = vst [vmem:[%s1669_s26 + $0x198] sm:$0xff] %v255_v51 }
  0x44   : > { %258 = vst [vmem:[%s1669_s26 + $0x1a0] sm:$0xff] %v257_v52 }
  0x45   : > { %260 = vst [vmem:[%s1669_s26 + $0x1a8] sm:$0xff] %v259_v53 }
  0x46   : > { %262 = vst [vmem:[%s1669_s26 + $0x1b0] sm:$0xff] %v261_v54 }
  0x47   : > { %264 = vst [vmem:[%s1669_s26 + $0x1b8] sm:$0xff] %v263_v55 }
  0x48   : > { %266 = vst [vmem:[%s1669_s26 + $0x1c0] sm:$0xff] %v265_v56 }
  0x49   : > { %268 = vst [vmem:[%s1669_s26 + $0x1c8] sm:$0xff] %v267_v57 }
  0x4a   : > { %270 = vst [vmem:[%s1669_s26 + $0x1d0] sm:$0xff] %v269_v58 }
  0x4b   : > { %272 = vst [vmem:[%s1669_s26 + $0x1d8] sm:$0xff] %v271_v59 }
  0x4c   : > { %274 = vst [vmem:[%s1669_s26 + $0x1e0] sm:$0xff] %v273_v60 }
  0x4d   : > { %276 = vst [vmem:[%s1669_s26 + $0x1e8] sm:$0xff] %v275_v61 }
  0x4e   : > { %278 = vst [vmem:[%s1669_s26 + $0x1f0] sm:$0xff] %v277_v62 }
  0x4f   : > { %280 = vst [vmem:[%s1669_s26 + $0x1f8] sm:$0xff] %v279_v63 }
  0x50   : > { %282 = vst [vmem:[%s1669_s26 + $0x200] sm:$0xff] %v281_v0 }
  0x51   : > { %284 = vst [vmem:[%s1669_s26 + $0x208] sm:$0xff] %v283_v1 }
  0x52   : > { %286 = vst [vmem:[%s1669_s26 + $0x210] sm:$0xff] %v285_v2 }
  0x53   : > { %288 = vst [vmem:[%s1669_s26 + $0x218] sm:$0xff] %v287_v3 }
  0x54   : > { %290 = vst [vmem:[%s1669_s26 + $0x220] sm:$0xff] %v289_v4 }
  0x55   : > { %292 = vst [vmem:[%s1669_s26 + $0x228] sm:$0xff] %v291_v5 }
  0x56   : > { %294 = vst [vmem:[%s1669_s26 + $0x230] sm:$0xff] %v293_v6 }
  0x57   : > { %296 = vst [vmem:[%s1669_s26 + $0x238] sm:$0xff] %v295_v7 }
  0x58 PF: > { %p1213_p5 = scmp.ge.s32.totalorder %s1606_s14, 1  ;;  %p301_p6 = scmp.lt.s32.totalorder %s1606_s14, 3 }
  0x5a   : > { %p302_p7 = pnand %p1213_p5, %p301_p6 }
  0x5b   : > { %s308_s27 = sand.u32 (!%p302_p7), 1, %s1598_s12   ;;  %s1214_s5 = sshll.u32 (!%p302_p7), %s1644_s15, 4 }
  0x5c   : > { %305 = sbr.rel (%p302_p7) target bundleno = 444 (0x1bc), region = 47  ;;  %p338_p8 = scmp.lt.s32.totalorder (!%p302_p7), %s1214_s5, 31 }
  0x5d   : > { %s1559_s28 = smul.u32 (!%p302_p7), 576, %s308_s27  ;;  %p343_p9 = scmp.lt.s32.totalorder (!%p302_p7), %s1644_s15, 1 }
  0x5f   : > { %s1815_s29 = scalar_lea.vmem (!%p302_p7), [#allocation2], %s1559_s28 }
  0x61   : > { %v414_v8 = vld [vmem:[%s1815_s29 + $0x200] sm:$0xff]  ;;  %v415_v9 = vld [vmem:[%s1815_s29 + $0x208] sm:$0xff]  ;;  %vm786_vm0 = vcmask 1043456   ;;  %v416_v54 = vld [vmem:[%s1815_s29 + $0x210] sm:$0xff]  ;;  %vm782_vm1 = vcmask 588800   ;;  %s2043_s5 = smov (!%p338_p8, %s1214_s5), 31 }
  0x62   : > { %v622_v10 = vunpack.c.l.b16 %v414_v8  ;;  %v623_v11 = vunpack.c.h.b16 %v414_v8  ;;  %v624_v12 = vunpack.c.l.b16 %v415_v9  ;;  %v625_v13 = vunpack.c.h.b16 %v415_v9  ;;  %v1412_v14 = vld [vmem:[%s1815_s29 + $0x180] sm:$0xf]  ;;  %v1542_v20 = vld [vmem:[%s1815_s29 + $0x184] sm:$0xf]  ;;  %v1420_v22 = vld [vmem:[%s1815_s29 + $0x188] sm:$0xf] }
  0x63   : > { %v1550_v15 = vld [vmem:[%s1815_s29 + $0x1bc] sm:$0xf0]  ;;  %v1414_v21 = vld [vmem:[%s1815_s29 + $0x1c0] sm:$0xf0]  ;;  %v1551_v23 = vld [vmem:[%s1815_s29 + $0x1c4] sm:$0xf0]  ;;  %v626_v56 = vunpack.c.l.b16 %v416_v54  ;;  %v627_v57 = vunpack.c.h.b16 %v416_v54 }
  0x64   : > { %v702_v16 = vpack.c.b16 %v622_v10, %v622_v10  ;;  %v703_v17 = vpack.c.b16 %v623_v11, %v623_v11  ;;  %v704_v18 = vpack.c.b16 %v624_v12, %v624_v12  ;;  %v705_v19 = vpack.c.b16 %v625_v13, %v625_v13  ;;  %v1543_v24 = vld [vmem:[%s1815_s29 + $0x18c] sm:$0xf]  ;;  %v1348_v32 = vld [vmem:[%s1815_s29 + $0x100] sm:$0xf]  ;;  %v1526_v36 = vld [vmem:[%s1815_s29 + $0x104] sm:$0xf] }
  0x65   : > { %v1422_v25 = vld [vmem:[%s1815_s29 + $0x1c8] sm:$0xf0]  ;;  %v1413_v30 = vor.u32 %v1550_v15, %v1412_v14  ;;  %v1417_v31 = vor.u32 %v1542_v20, %v1414_v21  ;;  %v1534_v33 = vld [vmem:[%s1815_s29 + $0x13c] sm:$0xf0]  ;;  %v1421_v34 = vor.u32 %v1551_v23, %v1420_v22  ;;  %v1350_v37 = vld [vmem:[%s1815_s29 + $0x140] sm:$0xf0]  ;;  %v706_v9 = vpack.c.b16 %v626_v56, %v626_v56 }
  0x66   : > { %v788_v26 = vsel %vm786_vm0, %v702_v16, 0  ;;  %v791_v27 = vsel %vm786_vm0, %v703_v17, 0  ;;  %v794_v28 = vsel %vm786_vm0, %v704_v18, 0  ;;  %v797_v29 = vsel %vm786_vm0, %v705_v19, 0  ;;  %v1356_v38 = vld [vmem:[%s1815_s29 + $0x108] sm:$0xf] }
  0x67   : > { %838 = vmatpush.bf16.msra.mxu0 %v788_v26  ;;  %851 = vmatpush.bf16.msra.mxu1 %v791_v27  ;;  %v1425_v35 = vor.u32 %v1543_v24, %v1422_v25  ;;  %v1535_v39 = vld [vmem:[%s1815_s29 + $0x144] sm:$0xf0]  ;;  %v1527_v40 = vld [vmem:[%s1815_s29 + $0x10c] sm:$0xf]  ;;  %v1284_v42 = vld [vmem:[%s1815_s29 + $0x80] sm:$0xf]  ;;  %v1349_v43 = vor.u32 %v1534_v33, %v1348_v32  ;;  %v1353_v44 = vor.u32 %v1526_v36, %v1350_v37 }
  0x68   : > { %864 = vmatpush.bf16.msra.mxu2 %v794_v28  ;;  %877 = vmatpush.bf16.msra.mxu3 %v797_v29  ;;  %v1358_v41 = vld [vmem:[%s1815_s29 + $0x148] sm:$0xf0]  ;;  %v1518_v45 = vld [vmem:[%s1815_s29 + $0xbc] sm:$0xf0]  ;;  %v1510_v46 = vld [vmem:[%s1815_s29 + $0x84] sm:$0xf]  ;;  %v1357_v48 = vor.u32 %v1535_v39, %v1356_v38  ;;  %v707_v10 = vpack.c.b16 %v627_v57, %v627_v57 }
  0x69   : > { %v1286_v47 = vld [vmem:[%s1815_s29 + $0xc0] sm:$0xf0]  ;;  %v1361_v49 = vor.u32 %v1527_v40, %v1358_v41  ;;  %v1292_v50 = vld [vmem:[%s1815_s29 + $0x88] sm:$0xf]  ;;  %v1511_v52 = vld [vmem:[%s1815_s29 + $0x8c] sm:$0xf]  ;;  %v1285_v58 = vor.u32 %v1518_v45, %v1284_v42 }
  0x6a   : > { %v1519_v51 = vld [vmem:[%s1815_s29 + $0xc4] sm:$0xf0]  ;;  %v1294_v53 = vld [vmem:[%s1815_s29 + $0xc8] sm:$0xf0]  ;;  %v417_v55 = vld [vmem:[%s1815_s29 + $0x218] sm:$0xff]  ;;  %v1289_v59 = vor.u32 %v1510_v46, %v1286_v47  ;;  %v800_v20 = vsel %vm786_vm0, %v706_v9, 0 }
  0x6b   : > { %839 = vmatpush.bf16.msra.mxu0 %v1413_v30  ;;  %852 = vmatpush.bf16.msra.mxu1 %v1417_v31  ;;  %v1220_v60 = vld [vmem:[%s1815_s29] sm:$0xf]  ;;  %v628_v62 = vunpack.c.l.b16 %v417_v55  ;;  %v629_v63 = vunpack.c.h.b16 %v417_v55  ;;  %v1293_v0 = vor.u32 %v1519_v51, %v1292_v50  ;;  %v1297_v1 = vor.u32 %v1511_v52, %v1294_v53  ;;  %v1494_v2 = vld [vmem:[%s1815_s29 + $0x4] sm:$0xf]  ;;  %v1228_v4 = vld [vmem:[%s1815_s29 + $0x8] sm:$0xf] }
  0x6c   : > { %865 = vmatpush.bf16.msra.mxu2 %v1421_v34  ;;  %878 = vmatpush.bf16.msra.mxu3 %v1425_v35  ;;  %v1502_v61 = vld [vmem:[%s1815_s29 + $0x3c] sm:$0xf0]  ;;  %v1222_v3 = vld [vmem:[%s1815_s29 + $0x40] sm:$0xf0]  ;;  %v1503_v5 = vld [vmem:[%s1815_s29 + $0x44] sm:$0xf0] }
  0x6d   : > { %v1495_v6 = vld [vmem:[%s1815_s29 + $0xc] sm:$0xf]  ;;  %v1221_v8 = vor.u32 %v1502_v61, %v1220_v60  ;;  %v1225_v11 = vor.u32 %v1494_v2, %v1222_v3  ;;  %v708_v12 = vpack.c.b16 %v628_v62, %v628_v62  ;;  %v709_v13 = vpack.c.b16 %v629_v63, %v629_v63  ;;  %v1428_v16 = vld [vmem:[%s1815_s29 + $0x190] sm:$0xf]  ;;  %v1544_v18 = vld [vmem:[%s1815_s29 + $0x194] sm:$0xf] }
  0x6e   : > { %v1230_v7 = vld [vmem:[%s1815_s29 + $0x48] sm:$0xf0]  ;;  %v1229_v14 = vor.u32 %v1503_v5, %v1228_v4  ;;  %v1552_v17 = vld [vmem:[%s1815_s29 + $0x1cc] sm:$0xf0]  ;;  %v1430_v19 = vld [vmem:[%s1815_s29 + $0x1d0] sm:$0xf0] }
  0x6f   : > { %840 = vmatpush.bf16.msra.mxu0 %v1349_v43  ;;  %853 = vmatpush.bf16.msra.mxu1 %v1353_v44  ;;  %v1233_v15 = vor.u32 %v1495_v6, %v1230_v7  ;;  %v803_v21 = vsel %vm786_vm0, %v707_v10, 0  ;;  %v1436_v22 = vld [vmem:[%s1815_s29 + $0x198] sm:$0xf]  ;;  %v806_v24 = vsel %vm786_vm0, %v708_v12, 0  ;;  %v809_v25 = vsel %vm786_vm0, %v709_v13, 0  ;;  %v418_v38 = vld [vmem:[%s1815_s29 + $0x220] sm:$0xff] }
  0x70   : > { %866 = vmatpush.bf16.msra.mxu2 %v1357_v48  ;;  %879 = vmatpush.bf16.msra.mxu3 %v1361_v49  ;;  %v1553_v23 = vld [vmem:[%s1815_s29 + $0x1d4] sm:$0xf0]  ;;  %v1545_v26 = vld [vmem:[%s1815_s29 + $0x19c] sm:$0xf]  ;;  %v1872_v28 = vld [vmem:[%s2036_s1] sm:$0xf]  ;;  %v1429_v29 = vor.u32 %v1552_v17, %v1428_v16  ;;  %v1433_v30 = vor.u32 %v1544_v18, %v1430_v19  ;;  %v630_v47 = vunpack.c.l.b16 %v418_v38  ;;  %v631_v53 = vunpack.c.h.b16 %v418_v38 }
  0x71   : > { %v1438_v27 = vld [vmem:[%s1815_s29 + $0x1d8] sm:$0xf0]  ;;  %v1364_v31 = vld [vmem:[%s1815_s29 + $0x110] sm:$0xf]  ;;  %v1528_v33 = vld [vmem:[%s1815_s29 + $0x114] sm:$0xf]  ;;  %v1437_v34 = vor.u32 %v1553_v23, %v1436_v22 }
  0x72   : > { %v1536_v32 = vld [vmem:[%s1815_s29 + $0x14c] sm:$0xf0]  ;;  %v1441_v35 = vor.u32 %v1545_v26, %v1438_v27  ;;  %v1366_v36 = vld [vmem:[%s1815_s29 + $0x150] sm:$0xf0]  ;;  %v1372_v37 = vld [vmem:[%s1815_s29 + $0x118] sm:$0xf]  ;;  %v710_v63 = vpack.c.b16 %v630_v47, %v630_v47  ;;  %v711_v5 = vpack.c.b16 %v631_v53, %v631_v53 }
  0x73   : > { %841 = vmatpush.bf16.msra.mxu0 %v1285_v58  ;;  %854 = vmatpush.bf16.msra.mxu1 %v1289_v59  ;;  %v1537_v39 = vld [vmem:[%s1815_s29 + $0x154] sm:$0xf0]  ;;  %v1529_v40 = vld [vmem:[%s1815_s29 + $0x11c] sm:$0xf]  ;;  %v419_v42 = vld [vmem:[%s1815_s29 + $0x228] sm:$0xff]  ;;  %v1365_v43 = vor.u32 %v1536_v32, %v1364_v31  ;;  %v1369_v44 = vor.u32 %v1528_v33, %v1366_v36  ;;  %s1215_s6 = sshll.u32 %s2043_s5, 2 }
  0x74   : > { %867 = vmatpush.bf16.msra.mxu2 %v1293_v0  ;;  %880 = vmatpush.bf16.msra.mxu3 %v1297_v1  ;;  %v1374_v41 = vld [vmem:[%s1815_s29 + $0x158] sm:$0xf0]  ;;  %v1300_v45 = vld [vmem:[%s1815_s29 + $0x90] sm:$0xf]  ;;  %v1373_v48 = vor.u32 %v1537_v39, %v1372_v37  ;;  %v1512_v50 = vld [vmem:[%s1815_s29 + $0x94] sm:$0xf]  ;;  %v632_v57 = vunpack.c.l.b16 %v419_v42  ;;  %v633_v58 = vunpack.c.h.b16 %v419_v42  ;;  %s2010_s9 = scalar_lea.vmem %s2037_s2, %s1215_s6 }
  0x75   : > { %v1520_v46 = vld [vmem:[%s1815_s29 + $0xcc] sm:$0xf0]  ;;  %v1377_v49 = vor.u32 %v1529_v40, %v1374_v41  ;;  %v1302_v51 = vld [vmem:[%s1815_s29 + $0xd0] sm:$0xf0]  ;;  %v1308_v52 = vld [vmem:[%s1815_s29 + $0x98] sm:$0xf] }
  0x76   : > { %v1521_v54 = vld [vmem:[%s1815_s29 + $0xd4] sm:$0xf0]  ;;  %v1513_v55 = vld [vmem:[%s1815_s29 + $0x9c] sm:$0xf]  ;;  %v1301_v59 = vor.u32 %v1520_v46, %v1300_v45  ;;  %v1305_v60 = vor.u32 %v1512_v50, %v1302_v51  ;;  %v1236_v61 = vld [vmem:[%s1815_s29 + $0x10] sm:$0xf]  ;;  %v712_v9 = vpack.c.b16 %v632_v57, %v632_v57  ;;  %v713_v10 = vpack.c.b16 %v633_v58, %v633_v58 }
  0x77   : > { %842 = vmatpush.bf16.msra.mxu0 %v1221_v8  ;;  %855 = vmatpush.bf16.msra.mxu1 %v1225_v11  ;;  %v1310_v56 = vld [vmem:[%s1815_s29 + $0xd8] sm:$0xf0]  ;;  %v1504_v62 = vld [vmem:[%s1815_s29 + $0x4c] sm:$0xf0]  ;;  %v1309_v0 = vor.u32 %v1521_v54, %v1308_v52  ;;  %v1496_v2 = vld [vmem:[%s1815_s29 + $0x14] sm:$0xf] }
  0x78   : > { %868 = vmatpush.bf16.msra.mxu2 %v1229_v14  ;;  %881 = vmatpush.bf16.msra.mxu3 %v1233_v15  ;;  %v1313_v1 = vor.u32 %v1513_v55, %v1310_v56  ;;  %v1238_v3 = vld [vmem:[%s1815_s29 + $0x50] sm:$0xf0]  ;;  %v1244_v4 = vld [vmem:[%s1815_s29 + $0x18] sm:$0xf]  ;;  %v1497_v7 = vld [vmem:[%s1815_s29 + $0x1c] sm:$0xf]  ;;  %v1237_v11 = vor.u32 %v1504_v62, %v1236_v61 }
  0x79   : > { %v1505_v6 = vld [vmem:[%s1815_s29 + $0x54] sm:$0xf0]  ;;  %v1246_v8 = vld [vmem:[%s1815_s29 + $0x58] sm:$0xf0]  ;;  %v1241_v12 = vor.u32 %v1496_v2, %v1238_v3  ;;  %v812_v15 = vsel %vm786_vm0, %v710_v63, 0  ;;  %v815_v16 = vsel %vm786_vm0, %v711_v5, 0 }
  0x7a   : > { %1474 = vmatmul.msk.bf16.vlgmr.msra.gmra.mxu0 %vm782_vm1, %v1872_v28  ;;  %1475 = vmatmul.msk.bf16.vlgmr.msra.gmra.mxu1 %vm782_vm1, %v1872_v28  ;;  %v1245_v13 = vor.u32 %v1505_v6, %v1244_v4  ;;  %v1249_v14 = vor.u32 %v1497_v7, %v1246_v8  ;;  %v818_v17 = vsel %vm786_vm0, %v712_v9, 0  ;;  %v821_v18 = vsel %vm786_vm0, %v713_v10, 0  ;;  %v1444_v19 = vld [vmem:[%s1815_s29 + $0x1a0] sm:$0xf]  ;;  %v1446_v22 = vld [vmem:[%s1815_s29 + $0x1e0] sm:$0xf0] }
  0x7b   : > { %890 = vmatpush.bf16.msrb.mxu0 %v800_v20  ;;  %903 = vmatpush.bf16.msrb.mxu1 %v803_v21  ;;  %v1554_v20 = vld [vmem:[%s1815_s29 + $0x1dc] sm:$0xf0]  ;;  %v1546_v21 = vld [vmem:[%s1815_s29 + $0x1a4] sm:$0xf]  ;;  %v1452_v23 = vld [vmem:[%s1815_s29 + $0x1a8] sm:$0xf] }
  0x7c   : > { %916 = vmatpush.bf16.msrb.mxu2 %v806_v24  ;;  %929 = vmatpush.bf16.msrb.mxu3 %v809_v25  ;;  %v1555_v24 = vld [vmem:[%s1815_s29 + $0x1e4] sm:$0xf0]  ;;  %v1547_v25 = vld [vmem:[%s1815_s29 + $0x1ac] sm:$0xf]  ;;  %v1445_v27 = vor.u32 %v1554_v20, %v1444_v19  ;;  %v1538_v31 = vld [vmem:[%s1815_s29 + $0x15c] sm:$0xf0] }
  0x7d   : > { %1476 = vmatmul.msk.bf16.vlgmr.msra.gmra.mxu2 %vm782_vm1, %v1872_v28  ;;  %1477 = vmatmul.msk.bf16.vlgmr.msra.gmra.mxu3 %vm782_vm1, %v1872_v28  ;;  %v1454_v26 = vld [vmem:[%s1815_s29 + $0x1e8] sm:$0xf0]  ;;  %v420_v32 = vld [vmem:[%s1815_s29 + $0x230] sm:$0xff]  ;;  %v1453_v33 = vor.u32 %v1555_v24, %v1452_v23  ;;  %v1382_v36 = vld [vmem:[%s1815_s29 + $0x160] sm:$0xf0]  ;;  %s2045_s15 = smov (!%p343_p9, %s1644_s15), 1 }
  0x7e   : > { %v1388_v37 = vld [vmem:[%s1815_s29 + $0x128] sm:$0xf]  ;;  %v1531_v39 = vld [vmem:[%s1815_s29 + $0x12c] sm:$0xf]  ;;  %v421_v41 = vld [vmem:[%s1815_s29 + $0x238] sm:$0xff]  ;;  %v634_v46 = vunpack.c.l.b16 %v420_v32  ;;  %v635_v52 = vunpack.c.h.b16 %v420_v32  ;;  %s1493_s10 = sshll.u32 %s2045_s15, 4 }
  0x7f   : > { %891 = vmatpush.bf16.msrb.mxu0 %v1429_v29  ;;  %904 = vmatpush.bf16.msrb.mxu1 %v1433_v30  ;;  %v1449_v29 = vor.u32 %v1546_v21, %v1446_v22  ;;  %v1380_v30 = vld [vmem:[%s1815_s29 + $0x120] sm:$0xf]  ;;  %v1539_v38 = vld [vmem:[%s1815_s29 + $0x164] sm:$0xf0]  ;;  %v1390_v40 = vld [vmem:[%s1815_s29 + $0x168] sm:$0xf0]  ;;  %v636_v56 = vunpack.c.l.b16 %v421_v41  ;;  %v637_v57 = vunpack.c.h.b16 %v421_v41  ;;  %s347_s14 = scalar_lea.vmem %s2038_s3, %s1493_s10 }
  0x80   : > { %917 = vmatpush.bf16.msrb.mxu2 %v1437_v34  ;;  %930 = vmatpush.bf16.msrb.mxu3 %v1441_v35  ;;  %v1457_v34 = vor.u32 %v1547_v25, %v1454_v26  ;;  %v1530_v35 = vld [vmem:[%s1815_s29 + $0x124] sm:$0xf]  ;;  %v1381_v42 = vor.u32 %v1538_v31, %v1380_v30  ;;  %v1522_v45 = vld [vmem:[%s1815_s29 + $0xdc] sm:$0xf0]  ;;  %v1389_v47 = vor.u32 %v1539_v38, %v1388_v37  ;;  %v1324_v51 = vld [vmem:[%s1815_s29 + $0xa8] sm:$0xf] }
  0x81   : > { %v1318_v50 = vld [vmem:[%s1815_s29 + $0xe0] sm:$0xf0]  ;;  %v1523_v53 = vld [vmem:[%s1815_s29 + $0xe4] sm:$0xf0]  ;;  %v1515_v54 = vld [vmem:[%s1815_s29 + $0xac] sm:$0xf]  ;;  %v714_v62 = vpack.c.b16 %v634_v46, %v634_v46  ;;  %v715_v4 = vpack.c.b16 %v635_v52, %v635_v52  ;;  %v716_v8 = vpack.c.b16 %v636_v56, %v636_v56  ;;  %v717_v9 = vpack.c.b16 %v637_v57, %v637_v57 }
  0x82   : > { %v1326_v55 = vld [vmem:[%s1815_s29 + $0xe8] sm:$0xf0]  ;;  %v1506_v61 = vld [vmem:[%s1815_s29 + $0x5c] sm:$0xf0]  ;;  %v1325_v63 = vor.u32 %v1523_v53, %v1324_v51  ;;  %v1254_v2 = vld [vmem:[%s1815_s29 + $0x60] sm:$0xf0] }
  0x83   : > { %892 = vmatpush.bf16.msrb.mxu0 %v1365_v43  ;;  %905 = vmatpush.bf16.msrb.mxu1 %v1369_v44  ;;  %v1385_v43 = vor.u32 %v1530_v35, %v1382_v36  ;;  %v1316_v44 = vld [vmem:[%s1815_s29 + $0xa0] sm:$0xf]  ;;  %v1260_v3 = vld [vmem:[%s1815_s29 + $0x28] sm:$0xf]  ;;  %v1499_v6 = vld [vmem:[%s1815_s29 + $0x2c] sm:$0xf] }
  0x84   : > { %918 = vmatpush.bf16.msrb.mxu2 %v1373_v48  ;;  %931 = vmatpush.bf16.msrb.mxu3 %v1377_v49  ;;  %v1393_v48 = vor.u32 %v1531_v39, %v1390_v40  ;;  %v1514_v49 = vld [vmem:[%s1815_s29 + $0xa4] sm:$0xf]  ;;  %v1317_v58 = vor.u32 %v1522_v45, %v1316_v44  ;;  %v1507_v5 = vld [vmem:[%s1815_s29 + $0x64] sm:$0xf0]  ;;  %v1262_v7 = vld [vmem:[%s1815_s29 + $0x68] sm:$0xf0] }
  0x85   : > { %v1556_v19 = vld [vmem:[%s1815_s29 + $0x1ec] sm:$0xf0]  ;;  %v1548_v20 = vld [vmem:[%s1815_s29 + $0x1b4] sm:$0xf]  ;;  %v1468_v22 = vld [vmem:[%s1815_s29 + $0x1b8] sm:$0xf] }
  0x86   : > { %v1462_v21 = vld [vmem:[%s1815_s29 + $0x1f0] sm:$0xf0]  ;;  %v1557_v23 = vld [vmem:[%s1815_s29 + $0x1f4] sm:$0xf0]  ;;  %v1549_v24 = vld [vmem:[%s1815_s29 + $0x1bc] sm:$0xf] }
  0x87   : > { %893 = vmatpush.bf16.msrb.mxu0 %v1301_v59  ;;  %906 = vmatpush.bf16.msrb.mxu1 %v1305_v60  ;;  %v1321_v59 = vor.u32 %v1514_v49, %v1318_v50  ;;  %v1252_v60 = vld [vmem:[%s1815_s29 + $0x20] sm:$0xf]  ;;  %v1470_v25 = vld [vmem:[%s1815_s29 + $0x1f8] sm:$0xf0]  ;;  %v1540_v30 = vld [vmem:[%s1815_s29 + $0x16c] sm:$0xf0]  ;;  %v1469_v31 = vor.u32 %v1557_v23, %v1468_v22 }
  0x88   : > { %919 = vmatpush.bf16.msrb.mxu2 %v1309_v0  ;;  %932 = vmatpush.bf16.msrb.mxu3 %v1313_v1  ;;  %v1329_v0 = vor.u32 %v1515_v54, %v1326_v55  ;;  %v1498_v1 = vld [vmem:[%s1815_s29 + $0x24] sm:$0xf]  ;;  %v1253_v10 = vor.u32 %v1506_v61, %v1252_v60  ;;  %v1473_v32 = vor.u32 %v1549_v24, %v1470_v25  ;;  %v1404_v35 = vld [vmem:[%s1815_s29 + $0x138] sm:$0xf]  ;;  %v1533_v37 = vld [vmem:[%s1815_s29 + $0x13c] sm:$0xf] }
  0x89   : > { %v1541_v36 = vld [vmem:[%s1815_s29 + $0x174] sm:$0xf0]  ;;  %v1406_v38 = vld [vmem:[%s1815_s29 + $0x178] sm:$0xf0]  ;;  %v1332_v41 = vld [vmem:[%s1815_s29 + $0xb0] sm:$0xf] }
  0x8a   : > { %v1409_v44 = vor.u32 %v1533_v37, %v1406_v38  ;;  %v1516_v45 = vld [vmem:[%s1815_s29 + $0xb4] sm:$0xf]  ;;  %v1517_v49 = vld [vmem:[%s1815_s29 + $0xbc] sm:$0xf]  ;;  %v1268_v53 = vld [vmem:[%s1815_s29 + $0x30] sm:$0xf] }
  0x8b   : > { %894 = vmatpush.bf16.msrb.mxu0 %v1237_v11  ;;  %907 = vmatpush.bf16.msrb.mxu1 %v1241_v12  ;;  %v1257_v11 = vor.u32 %v1498_v1, %v1254_v2  ;;  %v1261_v12 = vor.u32 %v1507_v5, %v1260_v3  ;;  %v1334_v46 = vld [vmem:[%s1815_s29 + $0xf0] sm:$0xf0]  ;;  %v1342_v50 = vld [vmem:[%s1815_s29 + $0xf8] sm:$0xf0]  ;;  %v1508_v54 = vld [vmem:[%s1815_s29 + $0x6c] sm:$0xf0] }
  0x8c   : > { %920 = vmatpush.bf16.msrb.mxu2 %v1245_v13  ;;  %933 = vmatpush.bf16.msrb.mxu3 %v1249_v14  ;;  %v1265_v13 = vor.u32 %v1499_v6, %v1262_v7  ;;  %v824_v14 = vsel %vm786_vm0, %v714_v62, 0  ;;  %v1337_v52 = vor.u32 %v1516_v45, %v1334_v46  ;;  %v1345_v56 = vor.u32 %v1517_v49, %v1342_v50  ;;  %v1500_v57 = vld [vmem:[%s1815_s29 + $0x34] sm:$0xf]  ;;  %v1509_v60 = vld [vmem:[%s1815_s29 + $0x74] sm:$0xf0] }
  0x8d   : > { %v1501_v61 = vld [vmem:[%s1815_s29 + $0x3c] sm:$0xf]  ;;  %vm1076_vm2 = vcmask 7168  }
  0x8e   : > { %1478 = vmatmul.msk.bf16.vlgmr.msrb.gmra.mxu0 %vm782_vm1, %v1872_v28  ;;  %1479 = vmatmul.msk.bf16.vlgmr.msrb.gmra.mxu1 %vm782_vm1, %v1872_v28  ;;  %v1278_v62 = vld [vmem:[%s1815_s29 + $0x78] sm:$0xf0] }
  0x8f   : > { %942 = vmatpush.bf16.msra.mxu0 %v812_v15  ;;  %955 = vmatpush.bf16.msra.mxu1 %v815_v16  ;;  %v827_v15 = vsel %vm786_vm0, %v715_v4, 0  ;;  %v830_v16 = vsel %vm786_vm0, %v716_v8, 0  ;;  %v1281_v2 = vor.u32 %v1501_v61, %v1278_v62 }
  0x90   : > { %968 = vmatpush.bf16.msra.mxu2 %v818_v17  ;;  %981 = vmatpush.bf16.msra.mxu3 %v821_v18  ;;  %v833_v17 = vsel %vm786_vm0, %v717_v9, 0  ;;  %v1460_v18 = vld [vmem:[%s1815_s29 + $0x1b0] sm:$0xf] }
  0x91   : > { %1480 = vmatmul.msk.bf16.vlgmr.msrb.gmra.mxu2 %vm782_vm1, %v1872_v28  ;;  %1481 = vmatmul.msk.bf16.vlgmr.msrb.gmra.mxu3 %vm782_vm1, %v1872_v28  ;;  %v1461_v26 = vor.u32 %v1556_v19, %v1460_v18 }
  0x93   : > { %943 = vmatpush.bf16.msra.mxu0 %v1445_v27  ;;  %956 = vmatpush.bf16.msra.mxu1 %v1449_v29  ;;  %v1465_v27 = vor.u32 %v1548_v20, %v1462_v21  ;;  %v1396_v29 = vld [vmem:[%s1815_s29 + $0x130] sm:$0xf] }
  0x94   : > { %969 = vmatpush.bf16.msra.mxu2 %v1453_v33  ;;  %982 = vmatpush.bf16.msra.mxu3 %v1457_v34  ;;  %v1532_v33 = vld [vmem:[%s1815_s29 + $0x134] sm:$0xf]  ;;  %v1397_v39 = vor.u32 %v1540_v30, %v1396_v29 }
  0x95   : > { %v1398_v34 = vld [vmem:[%s1815_s29 + $0x170] sm:$0xf0] }
  0x96   : > { %v1401_v40 = vor.u32 %v1532_v33, %v1398_v34 }
  0x97   : > { %944 = vmatpush.bf16.msra.mxu0 %v1381_v42  ;;  %957 = vmatpush.bf16.msra.mxu1 %v1385_v43  ;;  %v1524_v42 = vld [vmem:[%s1815_s29 + $0xec] sm:$0xf0]  ;;  %v1405_v43 = vor.u32 %v1541_v36, %v1404_v35 }
  0x98   : > { %970 = vmatpush.bf16.msra.mxu2 %v1389_v47  ;;  %983 = vmatpush.bf16.msra.mxu3 %v1393_v48  ;;  %v1340_v47 = vld [vmem:[%s1815_s29 + $0xb8] sm:$0xf]  ;;  %v1333_v51 = vor.u32 %v1524_v42, %v1332_v41 }
  0x99   : > { %v1525_v48 = vld [vmem:[%s1815_s29 + $0xf4] sm:$0xf0] }
  0x9a   : > { %v1341_v55 = vor.u32 %v1525_v48, %v1340_v47 }
  0x9b   : > { %945 = vmatpush.bf16.msra.mxu0 %v1317_v58  ;;  %958 = vmatpush.bf16.msra.mxu1 %v1321_v59  ;;  %v1270_v58 = vld [vmem:[%s1815_s29 + $0x70] sm:$0xf0]  ;;  %v1276_v59 = vld [vmem:[%s1815_s29 + $0x38] sm:$0xf] }
  0x9c   : > { %971 = vmatpush.bf16.msra.mxu2 %v1325_v63  ;;  %984 = vmatpush.bf16.msra.mxu3 %v1329_v0  ;;  %v1269_v63 = vor.u32 %v1508_v54, %v1268_v53  ;;  %v1273_v0 = vor.u32 %v1500_v57, %v1270_v58  ;;  %v1277_v1 = vor.u32 %v1509_v60, %v1276_v59 }
  0x9f   : > { %946 = vmatpush.bf16.msra.mxu0 %v1253_v10  ;;  %959 = vmatpush.bf16.msra.mxu1 %v1257_v11 }
  0xa0   : > { %972 = vmatpush.bf16.msra.mxu2 %v1261_v12  ;;  %985 = vmatpush.bf16.msra.mxu3 %v1265_v13 }
  0xa2   : > { %1482 = vmatmul.msk.bf16.vlgmr.msra.gmra.mxu0 %vm782_vm1, %v1872_v28  ;;  %1483 = vmatmul.msk.bf16.vlgmr.msra.gmra.mxu1 %vm782_vm1, %v1872_v28 }
  0xa3   : > { %994 = vmatpush.bf16.msrb.mxu0 %v824_v14  ;;  %1007 = vmatpush.bf16.msrb.mxu1 %v827_v15 }
  0xa4   : > { %1020 = vmatpush.bf16.msrb.mxu2 %v830_v16  ;;  %1033 = vmatpush.bf16.msrb.mxu3 %v833_v17 }
  0xa5   : > { %1484 = vmatmul.msk.bf16.vlgmr.msra.gmra.mxu2 %vm782_vm1, %v1872_v28  ;;  %1485 = vmatmul.msk.bf16.vlgmr.msra.gmra.mxu3 %vm782_vm1, %v1872_v28 }
  0xa7   : > { %995 = vmatpush.bf16.msrb.mxu0 %v1461_v26  ;;  %1008 = vmatpush.bf16.msrb.mxu1 %v1465_v27 }
  0xa8   : > { %1021 = vmatpush.bf16.msrb.mxu2 %v1469_v31  ;;  %1034 = vmatpush.bf16.msrb.mxu3 %v1473_v32 }
  0xab   : > { %996 = vmatpush.bf16.msrb.mxu0 %v1397_v39  ;;  %1009 = vmatpush.bf16.msrb.mxu1 %v1401_v40 }
  0xac   : > { %1022 = vmatpush.bf16.msrb.mxu2 %v1405_v43  ;;  %1035 = vmatpush.bf16.msrb.mxu3 %v1409_v44 }
  0xaf   : > { %997 = vmatpush.bf16.msrb.mxu0 %v1333_v51  ;;  %1010 = vmatpush.bf16.msrb.mxu1 %v1337_v52 }
  0xb0   : > { %1023 = vmatpush.bf16.msrb.mxu2 %v1341_v55  ;;  %1036 = vmatpush.bf16.msrb.mxu3 %v1345_v56 }
  0xb3   : > { %998 = vmatpush.bf16.msrb.mxu0 %v1269_v63  ;;  %1011 = vmatpush.bf16.msrb.mxu1 %v1273_v0 }
  0xb4   : > { %1024 = vmatpush.bf16.msrb.mxu2 %v1277_v1  ;;  %1037 = vmatpush.bf16.msrb.mxu3 %v1281_v2 }
  0xb6   : > { %1486 = vmatmul.msk.bf16.vlgmr.msrb.gmra.mxu0 %vm782_vm1, %v1872_v28  ;;  %1487 = vmatmul.msk.bf16.vlgmr.msrb.gmra.mxu1 %vm782_vm1, %v1872_v28 }
  0xb7   : > { %1488 = vmatmul.msk.bf16.vlgmr.msrb.gmra.mxu2 %vm782_vm1, %v1872_v28  ;;  %1489 = vmatmul.msk.bf16.vlgmr.msrb.gmra.mxu3 %vm782_vm1, %v1872_v28 }
  0xf7   : > { %v844_v3 = vpop.f32.mrf.mxu0  ;;  %v857_v4 = vpop.f32.mrf.mxu1 }
  0xf8   : > { %v1043_v5 = vpack.c.bf16 %v857_v4, %v844_v3  ;;  %v1059_v15 = vadd.f32 %v857_v4, %v844_v3  ;;  %v1078_v16 = vmul.f32 %v844_v3, %v844_v3  ;;  %v1079_v17 = vmul.f32 %v857_v4, %v857_v4 }
  0xfa   : > { %1051 = vst [vmem:[%s2010_s9] sm:$0xff] %v1043_v5  ;;  %v1094_v24 = vadd.f32 %v1079_v17, %v1078_v16 }
  0xff   : > { %v846_v28 = vpop.f32.mrf.mxu0  ;;  %v859_v9 = vpop.f32.mrf.mxu1 }
 0x100   : > { %v870_v6 = vpop.f32.mrf.mxu2  ;;  %v883_v7 = vpop.f32.mrf.mxu3 }
 0x101   : > { %v1044_v8 = vpack.c.bf16 %v883_v7, %v870_v6  ;;  %v1060_v18 = vadd.f32 %v1059_v15, %v870_v6  ;;  %v1080_v25 = vmul.f32 %v870_v6, %v870_v6  ;;  %v1081_v29 = vmul.f32 %v883_v7, %v883_v7 }
 0x103   : > { %1052 = vst [vmem:[%s2010_s9 + $0x8] sm:$0xff] %v1044_v8  ;;  %v1061_v26 = vadd.f32 %v1060_v18, %v883_v7  ;;  %v1095_v27 = vadd.f32 %v1094_v24, %v1080_v25 }
 0x105   : > { %v1096_v34 = vadd.f32 %v1095_v27, %v1081_v29 }
 0x108   : > { %v872_v10 = vpop.f32.mrf.mxu2  ;;  %v885_v11 = vpop.f32.mrf.mxu3 }
 0x10b   : > { %v896_v12 = vpop.f32.mrf.mxu0  ;;  %v909_v13 = vpop.f32.mrf.mxu1 }
 0x10c   : > { %v1045_v14 = vpack.c.bf16 %v909_v13, %v896_v12  ;;  %v1062_v30 = vadd.f32 %v1061_v26, %v896_v12  ;;  %v1082_v31 = vmul.f32 %v896_v12, %v896_v12  ;;  %v1083_v39 = vmul.f32 %v909_v13, %v909_v13 }
 0x10e   : > { %1053 = vst [vmem:[%s2010_s9 + $0x10] sm:$0xff] %v1045_v14  ;;  %v1063_v35 = vadd.f32 %v1062_v30, %v909_v13  ;;  %v1097_v38 = vadd.f32 %v1096_v34, %v1082_v31 }
 0x110   : > { %v1098_v43 = vadd.f32 %v1097_v38, %v1083_v39 }
 0x113   : > { %v898_v22 = vpop.f32.mrf.mxu0  ;;  %v911_v23 = vpop.f32.mrf.mxu1 }
 0x114   : > { %v922_v19 = vpop.f32.mrf.mxu2  ;;  %v935_v20 = vpop.f32.mrf.mxu3 }
 0x115   : > { %v1046_v21 = vpack.c.bf16 %v935_v20, %v922_v19  ;;  %v1064_v40 = vadd.f32 %v1063_v35, %v922_v19  ;;  %v1084_v42 = vmul.f32 %v922_v19, %v922_v19  ;;  %v1085_v46 = vmul.f32 %v935_v20, %v935_v20 }
 0x117   : > { %1054 = vst [vmem:[%s2010_s9 + $0x18] sm:$0xff] %v1046_v21  ;;  %v1065_v44 = vadd.f32 %v1064_v40, %v935_v20  ;;  %v1099_v45 = vadd.f32 %v1098_v43, %v1084_v42 }
 0x119   : > { %v1100_v54 = vadd.f32 %v1099_v45, %v1085_v46 }
 0x11c   : > { %v924_v32 = vpop.f32.mrf.mxu2  ;;  %v937_v33 = vpop.f32.mrf.mxu3 }
 0x11f   : > { %v948_v36 = vpop.f32.mrf.mxu0  ;;  %v961_v37 = vpop.f32.mrf.mxu1 }
 0x120   : > { %v1047_v41 = vpack.c.bf16 %v961_v37, %v948_v36  ;;  %v1066_v47 = vadd.f32 %v1065_v44, %v948_v36  ;;  %v1086_v53 = vmul.f32 %v948_v36, %v948_v36  ;;  %v1087_v57 = vmul.f32 %v961_v37, %v961_v37 }
 0x122   : > { %1055 = vst [vmem:[%s2010_s9 + $0x20] sm:$0xff] %v1047_v41  ;;  %v1067_v55 = vadd.f32 %v1066_v47, %v961_v37  ;;  %v1101_v56 = vadd.f32 %v1100_v54, %v1086_v53 }
 0x124   : > { %v1102_v62 = vadd.f32 %v1101_v56, %v1087_v57 }
 0x127   : > { %v950_v51 = vpop.f32.mrf.mxu0  ;;  %v963_v52 = vpop.f32.mrf.mxu1 }
 0x128   : > { %v974_v48 = vpop.f32.mrf.mxu2  ;;  %v987_v49 = vpop.f32.mrf.mxu3 }
 0x129   : > { %v1048_v50 = vpack.c.bf16 %v987_v49, %v974_v48  ;;  %v1068_v58 = vadd.f32 %v1067_v55, %v974_v48  ;;  %v1088_v59 = vmul.f32 %v974_v48, %v974_v48  ;;  %v1089_v4 = vmul.f32 %v987_v49, %v987_v49 }
 0x12b   : > { %1056 = vst [vmem:[%s2010_s9 + $0x28] sm:$0xff] %v1048_v50  ;;  %v1069_v63 = vadd.f32 %v1068_v58, %v987_v49  ;;  %v1103_v3 = vadd.f32 %v1102_v62, %v1088_v59 }
 0x12d   : > { %v1104_v7 = vadd.f32 %v1103_v3, %v1089_v4 }
 0x130   : > { %v976_v60 = vpop.f32.mrf.mxu2  ;;  %v989_v61 = vpop.f32.mrf.mxu3 }
 0x133   : > { %v1000_v0 = vpop.f32.mrf.mxu0  ;;  %v1013_v1 = vpop.f32.mrf.mxu1 }
 0x134   : > { %v1049_v2 = vpack.c.bf16 %v1013_v1, %v1000_v0  ;;  %v1070_v5 = vadd.f32 %v1069_v63, %v1000_v0  ;;  %v1090_v6 = vmul.f32 %v1000_v0, %v1000_v0  ;;  %v1091_v11 = vmul.f32 %v1013_v1, %v1013_v1 }
 0x136   : > { %1057 = vst [vmem:[%s2010_s9 + $0x30] sm:$0xff] %v1049_v2  ;;  %v1071_v8 = vadd.f32 %v1070_v5, %v1013_v1  ;;  %v1105_v10 = vadd.f32 %v1104_v7, %v1090_v6 }
 0x138   : > { %v1106_v18 = vadd.f32 %v1105_v10, %v1091_v11 }
 0x13a   : > { %v1026_v28 = vpop.f32.mrf.mxu2  ;;  %v1039_v9 = vpop.f32.mrf.mxu3 }
 0x13b   : > { %v1050_v12 = vpack.c.bf16 %v1039_v9, %v1026_v28  ;;  %v1002_v13 = vpop.f32.mrf.mxu0  ;;  %v1015_v14 = vpop.f32.mrf.mxu1  ;;  %v1072_v15 = vadd.f32 %v1071_v8, %v1026_v28  ;;  %v1092_v16 = vmul.f32 %v1026_v28, %v1026_v28  ;;  %v1093_v19 = vmul.f32 %v1039_v9, %v1039_v9 }
 0x13d   : > { %1058 = vst [vmem:[%s2010_s9 + $0x38] sm:$0xff] %v1050_v12  ;;  %v1073_v17 = vadd.f32 %v1072_v15, %v1039_v9  ;;  %v1107_v20 = vadd.f32 %v1106_v18, %v1092_v16 }
 0x13f   : > { %1074 = vadd.xlane.f32.xlu0 %v1073_v17  ;;  %v1108_v23 = vadd.f32 %v1107_v20, %v1093_v19 }
 0x142   : > { %v1028_v21 = vpop.f32.mrf.mxu2  ;;  %v1041_v22 = vpop.f32.mrf.mxu3 }
 0x147   : > { %1109 = vadd.xlane.f32.xlu0 %v1108_v23 }
 0x1b2   : > { %v1075_v24 = vpop.xlane.xlu0 %1074 }
 0x1b3   : > { %1077 = vst.msk [vmem:[%s347_s14] sm:$0xff] %vm1076_vm2, %v1075_v24 }
 0x1ba   : > { %v1110_v25 = vpop.xlane.xlu0 %1109 }
 0x1bb   : > { %1111 = vst.msk [vmem:[%s347_s14 + $0x8] sm:$0xff] %vm1076_vm2, %v1110_v25 }
 0x1bc PF: > { %p11_p10 = scmp.ge.s32.totalorder %s1647_s16, 4   ;;  %s2039_s12 = smov %s1602_s13 }
 0x1bd   : > { %s2040_s13 = smov %s1656_s19  ;;  %s2041_s14 = smov %s1647_s16 }
 0x1be   :  { %13 = sbr.rel (!%p11_p10) target bundleno = 2 (0x2), region = 98 }

// kernel: resnet_forward.24
= control target key start
LH: loop header
LB: loop body
LE: loop exit
PB: predicated region body
PF: predicated region fallthrough
CT: control target
= control target key end

     0   :  { %s850_s12 = smov 0   ;;  %s852_s13 = smov 0   ;;  %s1031_s0 = inlined_call_operand.vmem [shape: bf16[72,1024], index: 0, kind: input, shape index: {}]   ;;  %s1032_s1 = inlined_call_operand.vmem [shape: bf16[32,72], index: 1, kind: input, shape index: {}]   ;;  %s1033_s2 = inlined_call_operand.vmem [shape: bf16[32,1024], index: 2, kind: output, shape index: {0}]   ;;  %s1034_s3 = inlined_call_operand.vmem [shape: f32[2,64,1], index: 3, kind: output, shape index: {1}]  }
   0x1   :  { %s854_s14 = smov 0  }
   0x2 LB: > { %s866_s15 = sadd.s32 4294967295, %s828_s14   ;;  %s869_s16 = sadd.s32 1, %s828_s14   ;;  %s828_s14 = sphi %s854_s14, %s1038_s14   ;;  %s824_s13 = sphi %s852_s13, %s1037_s13   ;;  %s820_s12 = sphi %s850_s12, %s1036_s12  }
   0x3   : > { %s18_s17 = ssub.s32 %s828_s14, %s869_s16  ;;  %s21_s18 = sadd.s32 1, %s824_s13 }
   0x4   : > { %p19_p0 = scmp.eq.s32.totalorder %s18_s17, 0  ;;  %p28_p1 = scmp.ne.s32.totalorder %s824_s13, %s820_s12 }
   0x5   : > { %p29_p2 = scmp.eq.s32.totalorder %s828_s14, 0  ;;  %p79_p3 = scmp.eq.s32.totalorder %s866_s15, 1 }
   0x6   : > { %s879_s19 = scalar_select %p19_p0, %s824_s13, %s21_s18  }
   0x7   : > { %p30_p4 = por %p29_p2, %p28_p1  ;;  %p881_p5 = por %p79_p3, %p28_p1 }
   0x8   : > { %p667_p6 = scmp.ge.s32.totalorder %s828_s14, 2 }
   0xa   : > { %130 = sbr.rel (%p667_p6) target bundleno = 37 (0x25), region = 20 }
   0xf   : > { %133 = sbr.rel (!%p30_p4) target bundleno = 37 (0x25), region = 24  ;;  %s135_s21 = sand.u32 (%p30_p4), 1, %s824_s13  }
  0x10   : > { %s759_s22 = sshll.u32 (%p30_p4), %s828_s14, 4  ;;  %s780_s23 = smul.u32 (%p30_p4), 144, %s135_s21 }
  0x11   : > { %s891_s26 = scalar_lea.vmem (%p30_p4), %s1031_s0, %s759_s22 }
  0x12   : > { %v153_v0 = vld [vmem:[%s891_s26] sm:$0xff] (%p30_p4)  ;;  %v155_v1 = vld [vmem:[%s891_s26 + $0x8] sm:$0xff] (%p30_p4)  ;;  %s896_s27 = scalar_lea.vmem (%p30_p4), [#allocation2], %s780_s23 }
  0x13   : > { %v157_v2 = vld [vmem:[%s891_s26 + $0x20] sm:$0xff] (%p30_p4)  ;;  %154 = vst [vmem:[%s896_s27] sm:$0xff] (%p30_p4), %v153_v0  ;;  %v159_v3 = vld [vmem:[%s891_s26 + $0x28] sm:$0xff] (%p30_p4) }
  0x14   : > { %156 = vst [vmem:[%s896_s27 + $0x8] sm:$0xff] %v155_v1  ;;  %v161_v4 = vld [vmem:[%s891_s26 + $0x40] sm:$0xff]  ;;  %v163_v5 = vld [vmem:[%s891_s26 + $0x48] sm:$0xff] }
  0x15   : > { %158 = vst [vmem:[%s896_s27 + $0x10] sm:$0xff] %v157_v2  ;;  %v165_v6 = vld [vmem:[%s891_s26 + $0x60] sm:$0xff]  ;;  %v167_v7 = vld [vmem:[%s891_s26 + $0x68] sm:$0xff] }
  0x16   : > { %160 = vst [vmem:[%s896_s27 + $0x18] sm:$0xff] %v159_v3  ;;  %v169_v8 = vld [vmem:[%s891_s26 + $0x80] sm:$0xff]  ;;  %v171_v9 = vld [vmem:[%s891_s26 + $0x88] sm:$0xff] }
  0x17   : > { %162 = vst [vmem:[%s896_s27 + $0x20] sm:$0xff] %v161_v4  ;;  %v173_v10 = vld [vmem:[%s891_s26 + $0xa0] sm:$0xff]  ;;  %v175_v11 = vld [vmem:[%s891_s26 + $0xa8] sm:$0xff] }
  0x18   : > { %164 = vst [vmem:[%s896_s27 + $0x28] sm:$0xff] %v163_v5  ;;  %v177_v12 = vld [vmem:[%s891_s26 + $0xc0] sm:$0xff]  ;;  %v179_v13 = vld [vmem:[%s891_s26 + $0xc8] sm:$0xff] }
  0x19   : > { %166 = vst [vmem:[%s896_s27 + $0x30] sm:$0xff] %v165_v6  ;;  %v181_v14 = vld [vmem:[%s891_s26 + $0xe0] sm:$0xff]  ;;  %v183_v15 = vld [vmem:[%s891_s26 + $0xe8] sm:$0xff] }
  0x1a   : > { %168 = vst [vmem:[%s896_s27 + $0x38] sm:$0xff] %v167_v7  ;;  %v185_v16 = vld [vmem:[%s891_s26 + $0x100] sm:$0xff]  ;;  %v187_v17 = vld [vmem:[%s891_s26 + $0x108] sm:$0xff] }
  0x1b   : > { %170 = vst [vmem:[%s896_s27 + $0x40] sm:$0xff] %v169_v8 }
  0x1c   : > { %172 = vst [vmem:[%s896_s27 + $0x48] sm:$0xff] %v171_v9 }
  0x1d   : > { %174 = vst [vmem:[%s896_s27 + $0x50] sm:$0xff] %v173_v10 }
  0x1e   : > { %176 = vst [vmem:[%s896_s27 + $0x58] sm:$0xff] %v175_v11 }
  0x1f   : > { %178 = vst [vmem:[%s896_s27 + $0x60] sm:$0xff] %v177_v12 }
  0x20   : > { %180 = vst [vmem:[%s896_s27 + $0x68] sm:$0xff] %v179_v13 }
  0x21   : > { %182 = vst [vmem:[%s896_s27 + $0x70] sm:$0xff] %v181_v14 }
  0x22   : > { %184 = vst [vmem:[%s896_s27 + $0x78] sm:$0xff] %v183_v15 }
  0x23   : > { %186 = vst [vmem:[%s896_s27 + $0x80] sm:$0xff] %v185_v16 }
  0x24   : > { %188 = vst [vmem:[%s896_s27 + $0x88] sm:$0xff] %v187_v17 }
  0x25 PF: > { %p670_p7 = scmp.ge.s32.totalorder %s828_s14, 1  ;;  %p193_p8 = scmp.lt.s32.totalorder %s828_s14, 3 }
  0x27   : > { %p194_p9 = pnand %p670_p7, %p193_p8 }
  0x28   : > { %s200_s28 = sand.u32 (!%p194_p9), 1, %s820_s12   ;;  %p229_p10 = scmp.lt.s32.totalorder (!%p194_p9), %s866_s15, 1 }
  0x29   : > { %197 = sbr.rel (%p194_p9) target bundleno = 357 (0x165), region = 47  ;;  %s671_s8 = sshll.u32 (!%p194_p9), %s200_s28, 6 }
  0x2a   : > { %s781_s29 = smul.u32 (!%p194_p9), 144, %s200_s28  ;;  %s984_s9 = scalar_lea.vmem (!%p194_p9), [#allocation3], %s671_s8 }
  0x2c   : > { %s936_s30 = scalar_lea.vmem (!%p194_p9), [#allocation2], %s781_s29 }
  0x2e   : > { %v255_v18 = vld [vmem:[%s936_s30 + $0x80] sm:$0xff]  ;;  %v256_v19 = vld [vmem:[%s936_s30 + $0x88] sm:$0xff]  ;;  %vm364_vm0 = vcmask 1043456   ;;  %v777_v25 = vld [vmem:[%s936_s30 + $0x6c] sm:$0xf0]  ;;  %vm357_vm1 = vcmask 588800  }
  0x2f   : > { %v317_v20 = vunpack.c.l.b16 %v255_v18  ;;  %v318_v21 = vunpack.c.h.b16 %v255_v18  ;;  %v319_v22 = vunpack.c.l.b16 %v256_v19  ;;  %v320_v23 = vunpack.c.h.b16 %v256_v19  ;;  %v732_v24 = vld [vmem:[%s936_s30 + $0x60] sm:$0xf]  ;;  %v775_v30 = vld [vmem:[%s936_s30 + $0x64] sm:$0xf]  ;;  %v734_v31 = vld [vmem:[%s936_s30 + $0x70] sm:$0xf0] }
  0x30   : > { %v740_v32 = vld [vmem:[%s936_s30 + $0x68] sm:$0xf]  ;;  %v778_v33 = vld [vmem:[%s936_s30 + $0x74] sm:$0xf0]  ;;  %v776_v34 = vld [vmem:[%s936_s30 + $0x6c] sm:$0xf]  ;;  %v733_v40 = vor.u32 %v777_v25, %v732_v24  ;;  %v737_v41 = vor.u32 %v775_v30, %v734_v31 }
  0x31   : > { %v337_v26 = vpack.c.b16 %v317_v20, %v317_v20  ;;  %v338_v27 = vpack.c.b16 %v318_v21, %v318_v21  ;;  %v339_v28 = vpack.c.b16 %v319_v22, %v319_v22  ;;  %v340_v29 = vpack.c.b16 %v320_v23, %v320_v23  ;;  %v742_v35 = vld [vmem:[%s936_s30 + $0x78] sm:$0xf0]  ;;  %v716_v42 = vld [vmem:[%s936_s30 + $0x40] sm:$0xf]  ;;  %v773_v43 = vld [vmem:[%s936_s30 + $0x4c] sm:$0xf0] }
  0x32   : > { %v741_v44 = vor.u32 %v778_v33, %v740_v32  ;;  %v745_v45 = vor.u32 %v776_v34, %v742_v35  ;;  %v771_v46 = vld [vmem:[%s936_s30 + $0x44] sm:$0xf]  ;;  %v718_v47 = vld [vmem:[%s936_s30 + $0x50] sm:$0xf0]  ;;  %v724_v48 = vld [vmem:[%s936_s30 + $0x48] sm:$0xf]  ;;  %v717_v52 = vor.u32 %v773_v43, %v716_v42 }
  0x33   : > { %v366_v36 = vsel %vm364_vm0, %v337_v26, 0  ;;  %v369_v37 = vsel %vm364_vm0, %v338_v27, 0  ;;  %v372_v38 = vsel %vm364_vm0, %v339_v28, 0  ;;  %v375_v39 = vsel %vm364_vm0, %v340_v29, 0  ;;  %v774_v49 = vld [vmem:[%s936_s30 + $0x54] sm:$0xf0] }
  0x34   : > { %380 = vmatpush.bf16.msra.mxu0 %v366_v36  ;;  %399 = vmatpush.bf16.msra.mxu1 %v369_v37  ;;  %v772_v50 = vld [vmem:[%s936_s30 + $0x4c] sm:$0xf]  ;;  %v726_v51 = vld [vmem:[%s936_s30 + $0x58] sm:$0xf0]  ;;  %v721_v53 = vor.u32 %v771_v46, %v718_v47  ;;  %v700_v54 = vld [vmem:[%s936_s30 + $0x20] sm:$0xf]  ;;  %v725_v56 = vor.u32 %v774_v49, %v724_v48 }
  0x35   : > { %418 = vmatpush.bf16.msra.mxu2 %v372_v38  ;;  %437 = vmatpush.bf16.msra.mxu3 %v375_v39  ;;  %v769_v55 = vld [vmem:[%s936_s30 + $0x2c] sm:$0xf0]  ;;  %v729_v57 = vor.u32 %v772_v50, %v726_v51  ;;  %v767_v58 = vld [vmem:[%s936_s30 + $0x24] sm:$0xf]  ;;  %v702_v59 = vld [vmem:[%s936_s30 + $0x30] sm:$0xf0] }
  0x36   : > { %v708_v60 = vld [vmem:[%s936_s30 + $0x28] sm:$0xf]  ;;  %v770_v61 = vld [vmem:[%s936_s30 + $0x34] sm:$0xf0]  ;;  %v768_v62 = vld [vmem:[%s936_s30 + $0x2c] sm:$0xf]  ;;  %v701_v0 = vor.u32 %v769_v55, %v700_v54  ;;  %v705_v1 = vor.u32 %v767_v58, %v702_v59 }
  0x37   : > { %v710_v63 = vld [vmem:[%s936_s30 + $0x38] sm:$0xf0]  ;;  %v684_v2 = vld [vmem:[%s936_s30] sm:$0xf]  ;;  %v765_v3 = vld [vmem:[%s936_s30 + $0xc] sm:$0xf0]  ;;  %v709_v4 = vor.u32 %v770_v61, %v708_v60 }
  0x38   : > { %381 = vmatpush.bf16.msra.mxu0 %v733_v40  ;;  %400 = vmatpush.bf16.msra.mxu1 %v737_v41  ;;  %v713_v5 = vor.u32 %v768_v62, %v710_v63  ;;  %v763_v6 = vld [vmem:[%s936_s30 + $0x4] sm:$0xf]  ;;  %v686_v7 = vld [vmem:[%s936_s30 + $0x10] sm:$0xf0]  ;;  %v692_v8 = vld [vmem:[%s936_s30 + $0x8] sm:$0xf]  ;;  %v685_v12 = vor.u32 %v765_v3, %v684_v2 }
  0x39   : > { %419 = vmatpush.bf16.msra.mxu2 %v741_v44  ;;  %438 = vmatpush.bf16.msra.mxu3 %v745_v45  ;;  %v766_v9 = vld [vmem:[%s936_s30 + $0x14] sm:$0xf0]  ;;  %v764_v10 = vld [vmem:[%s936_s30 + $0xc] sm:$0xf]  ;;  %v694_v11 = vld [vmem:[%s936_s30 + $0x18] sm:$0xf0]  ;;  %v689_v13 = vor.u32 %v763_v6, %v686_v7 }
  0x3a   : > { %v693_v14 = vor.u32 %v766_v9, %v692_v8  ;;  %v697_v15 = vor.u32 %v764_v10, %v694_v11  ;;  %v761_v16 = vld [vmem:[%s1032_s1] sm:$0xff]  ;;  %v762_v17 = vld [vmem:[%s1032_s1 + $0x8] sm:$0xff]  ;;  %s230_s10 = scalar_select %p229_p10, %s866_s15, 1  ;;  %vm489_vm2 = vcmask 7168  }
  0x3b   : > { %s779_s18 = sshll.u32 (%p881_p5), %s866_s15, 4 }
  0x3c   : > { %382 = vmatpush.bf16.msra.mxu0 %v717_v52  ;;  %401 = vmatpush.bf16.msra.mxu1 %v721_v53  ;;  %s760_s11 = sshll.u32 %s230_s10, 6  ;;  %s548_s23 = scalar_lea.vmem (%p881_p5), %s1033_s2, %s779_s18 }
  0x3d   : > { %420 = vmatpush.bf16.msra.mxu2 %v725_v56  ;;  %439 = vmatpush.bf16.msra.mxu3 %v729_v57  ;;  %s233_s17 = scalar_lea.vmem %s1034_s3, %s760_s11 }
  0x40   : > { %383 = vmatpush.bf16.msra.mxu0 %v701_v0  ;;  %402 = vmatpush.bf16.msra.mxu1 %v705_v1 }
  0x41   : > { %421 = vmatpush.bf16.msra.mxu2 %v709_v4  ;;  %440 = vmatpush.bf16.msra.mxu3 %v713_v5 }
  0x44   : > { %384 = vmatpush.bf16.msra.mxu0 %v685_v12  ;;  %403 = vmatpush.bf16.msra.mxu1 %v689_v13 }
  0x45   : > { %422 = vmatpush.bf16.msra.mxu2 %v693_v14  ;;  %441 = vmatpush.bf16.msra.mxu3 %v697_v15 }
  0x47   : > { %746 = vmatmul.msk.bf16.vlgmr.msra.gmra.mxu0 %vm357_vm1, %v761_v16  ;;  %748 = vmatmul.msk.bf16.vlgmr.msra.gmra.mxu1 %vm357_vm1, %v761_v16 }
  0x48   : > { %750 = vmatmul.msk.bf16.vlgmr.msra.gmra.mxu2 %vm357_vm1, %v761_v16  ;;  %752 = vmatmul.msk.bf16.vlgmr.msra.gmra.mxu3 %vm357_vm1, %v761_v16 }
  0x57   : > { %747 = vmatmul.msk.bf16.gmra.mxu0 %vm357_vm1, %v762_v17  ;;  %749 = vmatmul.msk.bf16.gmra.mxu1 %vm357_vm1, %v762_v17 }
  0x58   : > { %751 = vmatmul.msk.bf16.gmra.mxu2 %vm357_vm1, %v762_v17  ;;  %753 = vmatmul.msk.bf16.gmra.mxu3 %vm357_vm1, %v762_v17 }
  0xc4   : > { %v386_v18 = vpop.f32.mrf.mxu0  ;;  %v405_v19 = vpop.f32.mrf.mxu1 }
  0xc5   : > { %v453_v20 = vpack.c.bf16 %v405_v19, %v386_v18  ;;  %v494_v21 = vmul.f32 %v386_v18, %v386_v18  ;;  %v495_v22 = vmul.f32 %v405_v19, %v405_v19  ;;  %v469_v23 = vadd.f32 %v405_v19, %v386_v18 }
  0xc7   : > { %461 = vst [vmem:[%s984_s9] sm:$0xff] %v453_v20  ;;  %v510_v24 = vadd.f32 %v495_v22, %v494_v21 }
  0xcb   : > { %v424_v25 = vpop.f32.mrf.mxu2  ;;  %v443_v26 = vpop.f32.mrf.mxu3 }
  0xcc   : > { %v496_v27 = vmul.f32 %v424_v25, %v424_v25  ;;  %v454_v28 = vpack.c.bf16 %v443_v26, %v424_v25  ;;  %v388_v29 = vpop.f32.mrf.mxu0  ;;  %v407_v30 = vpop.f32.mrf.mxu1  ;;  %v470_v31 = vadd.f32 %v469_v23, %v424_v25  ;;  %v497_v32 = vmul.f32 %v443_v26, %v443_v26 }
  0xcd   : > { %v455_v33 = vpack.c.bf16 %v407_v30, %v388_v29  ;;  %v498_v36 = vmul.f32 %v388_v29, %v388_v29  ;;  %v499_v37 = vmul.f32 %v407_v30, %v407_v30  ;;  %v474_v39 = vadd.f32 %v407_v30, %v388_v29 }
  0xce   : > { %462 = vst [vmem:[%s984_s9 + $0x8] sm:$0xff] %v454_v28  ;;  %v471_v34 = vadd.f32 %v470_v31, %v443_v26  ;;  %v511_v35 = vadd.f32 %v510_v24, %v496_v27  ;;  %v561_v26 = vld [vmem:[%s984_s9] sm:$0xff] (%p881_p5) }
  0xcf   : > { %463 = vst [vmem:[%s984_s9 + $0x10] sm:$0xff] %v455_v33  ;;  %v515_v47 = vadd.f32 %v499_v37, %v498_v36 }
  0xd0   : > { %472 = vadd.xlane.f32.xlu0 %v471_v34  ;;  %v512_v38 = vadd.f32 %v511_v35, %v497_v32  ;;  %562 = vst [vmem:[%s548_s23] sm:$0xff] (%p881_p5), %v561_v26 }
  0xd2   : > { %513 = vadd.xlane.f32.xlu2 %v512_v38 }
  0xd3   : > { %v426_v40 = vpop.f32.mrf.mxu2  ;;  %v445_v41 = vpop.f32.mrf.mxu3 }
  0xd4   : > { %v500_v42 = vmul.f32 %v426_v40, %v426_v40  ;;  %v456_v43 = vpack.c.bf16 %v445_v41, %v426_v40  ;;  %v391_v44 = vpop.f32.mrf.mxu0  ;;  %v410_v45 = vpop.f32.mrf.mxu1  ;;  %v475_v46 = vadd.f32 %v474_v39, %v426_v40  ;;  %v501_v49 = vmul.f32 %v445_v41, %v445_v41 }
  0xd5   : > { %v457_v48 = vpack.c.bf16 %v410_v45, %v391_v44  ;;  %v502_v50 = vmul.f32 %v391_v44, %v391_v44  ;;  %v503_v51 = vmul.f32 %v410_v45, %v410_v45  ;;  %v479_v54 = vadd.f32 %v410_v45, %v391_v44  ;;  %v563_v27 = vld [vmem:[%s984_s9 + $0x8] sm:$0xff] (%p881_p5) }
  0xd6   : > { %464 = vst [vmem:[%s984_s9 + $0x18] sm:$0xff] %v456_v43  ;;  %v476_v52 = vadd.f32 %v475_v46, %v445_v41  ;;  %v516_v53 = vadd.f32 %v515_v47, %v500_v42  ;;  %v565_v28 = vld [vmem:[%s984_s9 + $0x10] sm:$0xff] (%p881_p5) }
  0xd7   : > { %465 = vst [vmem:[%s984_s9 + $0x20] sm:$0xff] %v457_v48  ;;  %v520_v56 = vadd.f32 %v503_v51, %v502_v50 }
  0xd8   : > { %477 = vadd.xlane.f32.xlu0 %v476_v52  ;;  %v517_v55 = vadd.f32 %v516_v53, %v501_v49  ;;  %564 = vst [vmem:[%s548_s23 + $0x8] sm:$0xff] (%p881_p5), %v563_v27 }
  0xd9   : > { %566 = vst [vmem:[%s548_s23 + $0x20] sm:$0xff] (%p881_p5), %v565_v28 }
  0xda   : > { %518 = vadd.xlane.f32.xlu2 %v517_v55 }
  0xdb   : > { %v429_v57 = vpop.f32.mrf.mxu2  ;;  %v448_v58 = vpop.f32.mrf.mxu3 }
  0xdc   : > { %v504_v59 = vmul.f32 %v429_v57, %v429_v57  ;;  %v458_v60 = vpack.c.bf16 %v448_v58, %v429_v57  ;;  %v393_v61 = vpop.f32.mrf.mxu0  ;;  %v412_v62 = vpop.f32.mrf.mxu1  ;;  %v480_v63 = vadd.f32 %v479_v54, %v429_v57  ;;  %v505_v0 = vmul.f32 %v448_v58, %v448_v58 }
  0xdd   : > { %v459_v1 = vpack.c.bf16 %v412_v62, %v393_v61  ;;  %v484_v5 = vadd.f32 %v412_v62, %v393_v61  ;;  %v506_v8 = vmul.f32 %v393_v61, %v393_v61  ;;  %v507_v9 = vmul.f32 %v412_v62, %v412_v62  ;;  %v567_v29 = vld [vmem:[%s984_s9 + $0x18] sm:$0xff] (%p881_p5) }
  0xde   : > { %466 = vst [vmem:[%s984_s9 + $0x28] sm:$0xff] %v458_v60  ;;  %v481_v2 = vadd.f32 %v480_v63, %v448_v58  ;;  %v521_v3 = vadd.f32 %v520_v56, %v504_v59  ;;  %v569_v30 = vld [vmem:[%s984_s9 + $0x20] sm:$0xff] (%p881_p5) }
  0xdf   : > { %467 = vst [vmem:[%s984_s9 + $0x30] sm:$0xff] %v459_v1  ;;  %v525_v14 = vadd.f32 %v507_v9, %v506_v8 }
  0xe0   : > { %482 = vadd.xlane.f32.xlu1 %v481_v2  ;;  %v522_v4 = vadd.f32 %v521_v3, %v505_v0  ;;  %568 = vst [vmem:[%s548_s23 + $0x28] sm:$0xff] (%p881_p5), %v567_v29 }
  0xe1   : > { %570 = vst [vmem:[%s548_s23 + $0x40] sm:$0xff] (%p881_p5), %v569_v30 }
  0xe2   : > { %523 = vadd.xlane.f32.xlu0 %v522_v4 }
  0xe3   : > { %v431_v6 = vpop.f32.mrf.mxu2  ;;  %v450_v7 = vpop.f32.mrf.mxu3 }
  0xe4   : > { %v485_v10 = vadd.f32 %v484_v5, %v431_v6  ;;  %v460_v11 = vpack.c.bf16 %v450_v7, %v431_v6  ;;  %v508_v12 = vmul.f32 %v431_v6, %v431_v6  ;;  %v509_v16 = vmul.f32 %v450_v7, %v450_v7 }
  0xe5   : > { %v571_v31 = vld [vmem:[%s984_s9 + $0x28] sm:$0xff] (%p881_p5) }
  0xe6   : > { %468 = vst [vmem:[%s984_s9 + $0x38] sm:$0xff] %v460_v11  ;;  %v486_v13 = vadd.f32 %v485_v10, %v450_v7  ;;  %v526_v15 = vadd.f32 %v525_v14, %v508_v12  ;;  %v573_v32 = vld [vmem:[%s984_s9 + $0x30] sm:$0xff] (%p881_p5) }
  0xe7   : > { %572 = vst [vmem:[%s548_s23 + $0x48] sm:$0xff] (%p881_p5), %v571_v31 }
  0xe8   : > { %487 = vadd.xlane.f32.xlu1 %v486_v13  ;;  %v527_v17 = vadd.f32 %v526_v15, %v509_v16  ;;  %574 = vst [vmem:[%s548_s23 + $0x60] sm:$0xff] (%p881_p5), %v573_v32 }
  0xed   : > { %v575_v33 = vld [vmem:[%s984_s9 + $0x38] sm:$0xff] (%p881_p5) }
  0xee   : > { %576 = vst [vmem:[%s548_s23 + $0x68] sm:$0xff] (%p881_p5), %v575_v33 }
  0xf0   : > { %528 = vadd.xlane.f32.xlu1 %v527_v17 }
 0x143   : > { %v473_v18 = vpop.xlane.xlu0 %472 }
 0x144   : > { %490 = vst.msk [vmem:[%s233_s17] sm:$0xff] %vm489_vm2, %v473_v18 }
 0x145   : > { %v514_v19 = vpop.xlane.xlu2 %513 }
 0x146   : > { %530 = vst.msk [vmem:[%s233_s17 + $0x20] sm:$0xff] %vm489_vm2, %v514_v19 }
 0x14b   : > { %v478_v20 = vpop.xlane.xlu0 %477 }
 0x14c   : > { %491 = vst.msk [vmem:[%s233_s17 + $0x8] sm:$0xff] %vm489_vm2, %v478_v20 }
 0x14d   : > { %v519_v21 = vpop.xlane.xlu2 %518 }
 0x14e   : > { %531 = vst.msk [vmem:[%s233_s17 + $0x28] sm:$0xff] %vm489_vm2, %v519_v21 }
 0x153   : > { %v483_v22 = vpop.xlane.xlu1 %482 }
 0x154   : > { %492 = vst.msk [vmem:[%s233_s17 + $0x10] sm:$0xff] %vm489_vm2, %v483_v22 }
 0x155   : > { %v524_v23 = vpop.xlane.xlu0 %523 }
 0x156   : > { %532 = vst.msk [vmem:[%s233_s17 + $0x30] sm:$0xff] %vm489_vm2, %v524_v23 }
 0x15b   : > { %v488_v24 = vpop.xlane.xlu1 %487 }
 0x15c   : > { %493 = vst.msk [vmem:[%s233_s17 + $0x18] sm:$0xff] %vm489_vm2, %v488_v24 }
 0x160   : > { %545 = sbr.rel (!%p881_p5) target bundleno = 357 (0x165), region = 55 }
 0x163   : > { %v529_v25 = vpop.xlane.xlu1 %528 }
 0x164   : > { %533 = vst.msk [vmem:[%s233_s17 + $0x38] sm:$0xff] %vm489_vm2, %v529_v25 }
 0x165 PF: > { %p11_p11 = scmp.ge.s32.totalorder %s869_s16, 4   ;;  %s1036_s12 = smov %s824_s13 }
 0x166   : > { %s1037_s13 = smov %s879_s19  ;;  %s1038_s14 = smov %s869_s16 }
 0x167   :  { %13 = sbr.rel (!%p11_p11) target bundleno = 2 (0x2), region = 121 }

// kernel: resnet_forward.25
= control target key start
LH: loop header
LB: loop body
LE: loop exit
PB: predicated region body
PF: predicated region fallthrough
CT: control target
= control target key end

     0   :  { %v133_v0 = vmov 0   ;;  %s214_s2 = inlined_call_operand.vmem [shape: f32[16,1], index: 2, kind: input, shape index: {}]   ;;  %s215_s1 = inlined_call_operand.vmem [shape: f32[16,1], index: 1, kind: input, shape index: {}]   ;;  %s216_s0 = inlined_call_operand.vmem [shape: bf16[32,1024], index: 0, kind: input, shape index: {}]   ;;  %s217_s3 = inlined_call_operand.vmem [shape: bf16[16,1024], index: 3, kind: output, shape index: {}]  }
   0x1   :  { %132 = vset.pattern.permute.xlu1 %v133_v0  ;;  %131 = vset.pattern.permute.xlu0 %v133_v0  ;;  %v66_v1 = vld [vmem:[%s214_s2] sm:$0xff]  ;;  %v67_v3 = vld [vmem:[%s214_s2 + $0x8] sm:$0xff]  ;;  %v16_v7 = vld [vmem:[%s216_s0 + $0x10] sm:$0xff] }
   0x2   :  { %v38_v2 = vld [vmem:[%s215_s1] sm:$0xff]  ;;  %70 = vperm.xlu1 %132, %v66_v1   ;;  %v39_v4 = vld [vmem:[%s215_s1 + $0x8] sm:$0xff]  ;;  %v17_v8 = vld [vmem:[%s216_s0 + $0x18] sm:$0xff]  ;;  %v26_v17 = vunpack.c.l.bf16 %v16_v7  ;;  %v27_v18 = vunpack.c.h.bf16 %v16_v7 }
   0x3   :  { %42 = vperm.xlu0 %131, %v38_v2   ;;  %v14_v5 = vld [vmem:[%s216_s0] sm:$0xff]  ;;  %v15_v6 = vld [vmem:[%s216_s0 + $0x8] sm:$0xff]  ;;  %v20_v15 = vld [vmem:[%s216_s0 + $0x30] sm:$0xff]  ;;  %v28_v19 = vunpack.c.l.bf16 %v17_v8  ;;  %v29_v20 = vunpack.c.h.bf16 %v17_v8 }
   0x4   :  { %v18_v9 = vld [vmem:[%s216_s0 + $0x20] sm:$0xff]  ;;  %v19_v10 = vld [vmem:[%s216_s0 + $0x28] sm:$0xff]  ;;  %v22_v11 = vunpack.c.l.bf16 %v14_v5  ;;  %v23_v12 = vunpack.c.h.bf16 %v14_v5  ;;  %v24_v13 = vunpack.c.l.bf16 %v15_v6  ;;  %v25_v14 = vunpack.c.h.bf16 %v15_v6  ;;  %v21_v16 = vld [vmem:[%s216_s0 + $0x38] sm:$0xff] }
   0x5   :  { %v30_v21 = vunpack.c.l.bf16 %v18_v9  ;;  %v31_v22 = vunpack.c.h.bf16 %v18_v9  ;;  %v32_v23 = vunpack.c.l.bf16 %v19_v10  ;;  %v33_v24 = vunpack.c.h.bf16 %v19_v10 }
   0x6   :  { %v34_v27 = vunpack.c.l.bf16 %v20_v15  ;;  %v35_v28 = vunpack.c.h.bf16 %v20_v15  ;;  %v36_v29 = vunpack.c.l.bf16 %v21_v16  ;;  %v37_v30 = vunpack.c.h.bf16 %v21_v16 }
   0xa   :  { %75 = vperm.xlu1 %132, %v67_v3  }
   0xb   :  { %47 = vperm.xlu0 %131, %v39_v4  }
  0x74   :  { %v71_v25 = vpop.permute.xlu1 %70 }
  0x75   :  { %v43_v26 = vpop.permute.xlu0 %42 }
  0x76   :  { %v50_v31 = vmul.f32 %v43_v26, %v22_v11  ;;  %v51_v32 = vmul.f32 %v43_v26, %v23_v12  ;;  %v52_v33 = vmul.f32 %v43_v26, %v24_v13  ;;  %v53_v34 = vmul.f32 %v43_v26, %v25_v14 }
  0x77   :  { %v54_v35 = vmul.f32 %v43_v26, %v26_v17  ;;  %v55_v36 = vmul.f32 %v43_v26, %v27_v18  ;;  %v56_v37 = vmul.f32 %v43_v26, %v28_v19  ;;  %v57_v38 = vmul.f32 %v43_v26, %v29_v20 }
  0x78   :  { %v78_v39 = vadd.f32 %v71_v25, %v50_v31  ;;  %v79_v40 = vadd.f32 %v71_v25, %v51_v32  ;;  %v80_v41 = vadd.f32 %v71_v25, %v52_v33  ;;  %v81_v42 = vadd.f32 %v71_v25, %v53_v34 }
  0x79   :  { %v82_v43 = vadd.f32 %v71_v25, %v54_v35  ;;  %v83_v44 = vadd.f32 %v71_v25, %v55_v36  ;;  %v84_v45 = vadd.f32 %v71_v25, %v56_v37  ;;  %v85_v46 = vadd.f32 %v71_v25, %v57_v38 }
  0x7a   :  { %v94_v47 = vmax.f32 %v78_v39, 0.0  ;;  %v95_v48 = vmax.f32 %v79_v40, 0.0  ;;  %v96_v49 = vmax.f32 %v80_v41, 0.0  ;;  %v97_v50 = vmax.f32 %v81_v42, 0.0 }
  0x7b   :  { %v98_v51 = vmax.f32 %v82_v43, 0.0  ;;  %v99_v52 = vmax.f32 %v83_v44, 0.0  ;;  %v100_v53 = vmax.f32 %v84_v45, 0.0  ;;  %v101_v54 = vmax.f32 %v85_v46, 0.0 }
  0x7c   :  { %v110_v55 = vpack.c.bf16 %v95_v48, %v94_v47  ;;  %v111_v56 = vpack.c.bf16 %v97_v50, %v96_v49  ;;  %v76_v0 = vpop.permute.xlu1 %75 }
  0x7d   :  { %v112_v57 = vpack.c.bf16 %v99_v52, %v98_v51  ;;  %v113_v58 = vpack.c.bf16 %v101_v54, %v100_v53  ;;  %v48_v59 = vpop.permute.xlu0 %47 }
  0x7e   :  { %118 = vst [vmem:[%s217_s3] sm:$0xff] %v110_v55  ;;  %v58_v60 = vmul.f32 %v48_v59, %v30_v21  ;;  %v59_v61 = vmul.f32 %v48_v59, %v31_v22  ;;  %v60_v62 = vmul.f32 %v48_v59, %v32_v23  ;;  %v61_v63 = vmul.f32 %v48_v59, %v33_v24 }
  0x7f   :  { %119 = vst [vmem:[%s217_s3 + $0x8] sm:$0xff] %v111_v56  ;;  %v62_v1 = vmul.f32 %v48_v59, %v34_v27  ;;  %v63_v2 = vmul.f32 %v48_v59, %v35_v28  ;;  %v64_v3 = vmul.f32 %v48_v59, %v36_v29  ;;  %v65_v4 = vmul.f32 %v48_v59, %v37_v30 }
  0x80   :  { %120 = vst [vmem:[%s217_s3 + $0x10] sm:$0xff] %v112_v57  ;;  %v86_v5 = vadd.f32 %v76_v0, %v58_v60  ;;  %v87_v6 = vadd.f32 %v76_v0, %v59_v61  ;;  %v88_v7 = vadd.f32 %v76_v0, %v60_v62  ;;  %v89_v8 = vadd.f32 %v76_v0, %v61_v63 }
  0x81   :  { %121 = vst [vmem:[%s217_s3 + $0x18] sm:$0xff] %v113_v58  ;;  %v90_v9 = vadd.f32 %v76_v0, %v62_v1  ;;  %v91_v10 = vadd.f32 %v76_v0, %v63_v2  ;;  %v92_v11 = vadd.f32 %v76_v0, %v64_v3  ;;  %v93_v12 = vadd.f32 %v76_v0, %v65_v4 }
  0x82   :  { %v102_v13 = vmax.f32 %v86_v5, 0.0  ;;  %v103_v14 = vmax.f32 %v87_v6, 0.0  ;;  %v104_v15 = vmax.f32 %v88_v7, 0.0  ;;  %v105_v16 = vmax.f32 %v89_v8, 0.0 }
  0x83   :  { %v106_v17 = vmax.f32 %v90_v9, 0.0  ;;  %v107_v18 = vmax.f32 %v91_v10, 0.0  ;;  %v108_v19 = vmax.f32 %v92_v11, 0.0  ;;  %v109_v20 = vmax.f32 %v93_v12, 0.0 }
  0x84   :  { %v114_v21 = vpack.c.bf16 %v103_v14, %v102_v13  ;;  %v115_v22 = vpack.c.bf16 %v105_v16, %v104_v15 }
  0x85   :  { %v116_v23 = vpack.c.bf16 %v107_v18, %v106_v17  ;;  %v117_v24 = vpack.c.bf16 %v109_v20, %v108_v19 }
  0x86   :  { %122 = vst [vmem:[%s217_s3 + $0x20] sm:$0xff] %v114_v21 }
  0x87   :  { %123 = vst [vmem:[%s217_s3 + $0x28] sm:$0xff] %v115_v22 }
  0x88   :  { %124 = vst [vmem:[%s217_s3 + $0x30] sm:$0xff] %v116_v23 }
  0x89   :  { %125 = vst [vmem:[%s217_s3 + $0x38] sm:$0xff] %v117_v24 }

// kernel: resnet_forward.26
= control target key start
LH: loop header
LB: loop body
LE: loop exit
PB: predicated region body
PF: predicated region fallthrough
CT: control target
= control target key end

     0   :  { %s1059_s12 = smov 0   ;;  %s1061_s13 = smov 0   ;;  %s1310_s0 = inlined_call_operand.vmem [shape: bf16[144,1024], index: 0, kind: input, shape index: {}]   ;;  %s1311_s1 = inlined_call_operand.vmem [shape: bf16[16,144], index: 1, kind: input, shape index: {}]   ;;  %s1312_s2 = inlined_call_operand.vmem [shape: bf16[16,1024], index: 2, kind: output, shape index: {0}]   ;;  %s1313_s3 = inlined_call_operand.vmem [shape: f32[2,32,1], index: 3, kind: output, shape index: {1}]  }
   0x1   :  { %s1063_s14 = smov 0  }
   0x2 LB: > { %s1075_s15 = sadd.s32 4294967295, %s1037_s14   ;;  %s1078_s16 = sadd.s32 1, %s1037_s14   ;;  %s1037_s14 = sphi %s1063_s14, %s1317_s14   ;;  %s1033_s13 = sphi %s1061_s13, %s1316_s13   ;;  %s1029_s12 = sphi %s1059_s12, %s1315_s12  }
   0x3   : > { %s18_s17 = ssub.s32 %s1037_s14, %s1078_s16  ;;  %s21_s18 = sadd.s32 1, %s1033_s13 }
   0x4   : > { %p19_p0 = scmp.eq.s32.totalorder %s18_s17, 0  ;;  %p28_p1 = scmp.ne.s32.totalorder %s1033_s13, %s1029_s12 }
   0x5   : > { %p29_p2 = scmp.eq.s32.totalorder %s1037_s14, 0  ;;  %p79_p3 = scmp.eq.s32.totalorder %s1075_s15, 1 }
   0x6   : > { %s1088_s19 = scalar_select %p19_p0, %s1033_s13, %s21_s18  }
   0x7   : > { %p30_p4 = por %p29_p2, %p28_p1  ;;  %p1090_p5 = por %p79_p3, %p28_p1 }
   0x8   : > { %p780_p6 = scmp.ge.s32.totalorder %s1037_s14, 2 }
   0xa   : > { %130 = sbr.rel (%p780_p6) target bundleno = 55 (0x37), region = 20 }
   0xf   : > { %133 = sbr.rel (!%p30_p4) target bundleno = 55 (0x37), region = 24  ;;  %s135_s21 = sand.u32 (%p30_p4), 1, %s1033_s13  }
  0x10   : > { %s948_s22 = sshll.u32 (%p30_p4), %s1037_s14, 4  ;;  %s989_s23 = smul.u32 (%p30_p4), 288, %s135_s21 }
  0x11   : > { %s1100_s26 = scalar_lea.vmem (%p30_p4), %s1310_s0, %s948_s22 }
  0x12   : > { %v153_v0 = vld [vmem:[%s1100_s26] sm:$0xff] (%p30_p4)  ;;  %v155_v1 = vld [vmem:[%s1100_s26 + $0x8] sm:$0xff] (%p30_p4)  ;;  %s1105_s27 = scalar_lea.vmem (%p30_p4), [#allocation2], %s989_s23 }
  0x13   : > { %v157_v2 = vld [vmem:[%s1100_s26 + $0x20] sm:$0xff] (%p30_p4)  ;;  %154 = vst [vmem:[%s1105_s27] sm:$0xff] (%p30_p4), %v153_v0  ;;  %v159_v3 = vld [vmem:[%s1100_s26 + $0x28] sm:$0xff] (%p30_p4) }
  0x14   : > { %156 = vst [vmem:[%s1105_s27 + $0x8] sm:$0xff] %v155_v1  ;;  %v161_v4 = vld [vmem:[%s1100_s26 + $0x40] sm:$0xff]  ;;  %v163_v5 = vld [vmem:[%s1100_s26 + $0x48] sm:$0xff] }
  0x15   : > { %158 = vst [vmem:[%s1105_s27 + $0x10] sm:$0xff] %v157_v2  ;;  %v165_v6 = vld [vmem:[%s1100_s26 + $0x60] sm:$0xff]  ;;  %v167_v7 = vld [vmem:[%s1100_s26 + $0x68] sm:$0xff] }
  0x16   : > { %160 = vst [vmem:[%s1105_s27 + $0x18] sm:$0xff] %v159_v3  ;;  %v169_v8 = vld [vmem:[%s1100_s26 + $0x80] sm:$0xff]  ;;  %v171_v9 = vld [vmem:[%s1100_s26 + $0x88] sm:$0xff] }
  0x17   : > { %162 = vst [vmem:[%s1105_s27 + $0x20] sm:$0xff] %v161_v4  ;;  %v173_v10 = vld [vmem:[%s1100_s26 + $0xa0] sm:$0xff]  ;;  %v175_v11 = vld [vmem:[%s1100_s26 + $0xa8] sm:$0xff] }
  0x18   : > { %164 = vst [vmem:[%s1105_s27 + $0x28] sm:$0xff] %v163_v5  ;;  %v177_v12 = vld [vmem:[%s1100_s26 + $0xc0] sm:$0xff]  ;;  %v179_v13 = vld [vmem:[%s1100_s26 + $0xc8] sm:$0xff] }
  0x19   : > { %166 = vst [vmem:[%s1105_s27 + $0x30] sm:$0xff] %v165_v6  ;;  %v181_v14 = vld [vmem:[%s1100_s26 + $0xe0] sm:$0xff]  ;;  %v183_v15 = vld [vmem:[%s1100_s26 + $0xe8] sm:$0xff] }
  0x1a   : > { %168 = vst [vmem:[%s1105_s27 + $0x38] sm:$0xff] %v167_v7  ;;  %v185_v16 = vld [vmem:[%s1100_s26 + $0x100] sm:$0xff]  ;;  %v187_v17 = vld [vmem:[%s1100_s26 + $0x108] sm:$0xff] }
  0x1b   : > { %170 = vst [vmem:[%s1105_s27 + $0x40] sm:$0xff] %v169_v8  ;;  %v189_v18 = vld [vmem:[%s1100_s26 + $0x120] sm:$0xff]  ;;  %v191_v19 = vld [vmem:[%s1100_s26 + $0x128] sm:$0xff] }
  0x1c   : > { %172 = vst [vmem:[%s1105_s27 + $0x48] sm:$0xff] %v171_v9  ;;  %v193_v20 = vld [vmem:[%s1100_s26 + $0x140] sm:$0xff]  ;;  %v195_v21 = vld [vmem:[%s1100_s26 + $0x148] sm:$0xff] }
  0x1d   : > { %174 = vst [vmem:[%s1105_s27 + $0x50] sm:$0xff] %v173_v10  ;;  %v197_v22 = vld [vmem:[%s1100_s26 + $0x160] sm:$0xff]  ;;  %v199_v23 = vld [vmem:[%s1100_s26 + $0x168] sm:$0xff] }
  0x1e   : > { %176 = vst [vmem:[%s1105_s27 + $0x58] sm:$0xff] %v175_v11  ;;  %v201_v24 = vld [vmem:[%s1100_s26 + $0x180] sm:$0xff]  ;;  %v203_v25 = vld [vmem:[%s1100_s26 + $0x188] sm:$0xff] }
  0x1f   : > { %178 = vst [vmem:[%s1105_s27 + $0x60] sm:$0xff] %v177_v12  ;;  %v205_v26 = vld [vmem:[%s1100_s26 + $0x1a0] sm:$0xff]  ;;  %v207_v27 = vld [vmem:[%s1100_s26 + $0x1a8] sm:$0xff] }
  0x20   : > { %180 = vst [vmem:[%s1105_s27 + $0x68] sm:$0xff] %v179_v13  ;;  %v209_v28 = vld [vmem:[%s1100_s26 + $0x1c0] sm:$0xff]  ;;  %v211_v29 = vld [vmem:[%s1100_s26 + $0x1c8] sm:$0xff] }
  0x21   : > { %182 = vst [vmem:[%s1105_s27 + $0x70] sm:$0xff] %v181_v14  ;;  %v213_v30 = vld [vmem:[%s1100_s26 + $0x1e0] sm:$0xff]  ;;  %v215_v31 = vld [vmem:[%s1100_s26 + $0x1e8] sm:$0xff] }
  0x22   : > { %184 = vst [vmem:[%s1105_s27 + $0x78] sm:$0xff] %v183_v15  ;;  %v217_v32 = vld [vmem:[%s1100_s26 + $0x200] sm:$0xff]  ;;  %v219_v33 = vld [vmem:[%s1100_s26 + $0x208] sm:$0xff] }
  0x23   : > { %186 = vst [vmem:[%s1105_s27 + $0x80] sm:$0xff] %v185_v16  ;;  %v221_v34 = vld [vmem:[%s1100_s26 + $0x220] sm:$0xff]  ;;  %v223_v35 = vld [vmem:[%s1100_s26 + $0x228] sm:$0xff] }
  0x24   : > { %188 = vst [vmem:[%s1105_s27 + $0x88] sm:$0xff] %v187_v17 }
  0x25   : > { %190 = vst [vmem:[%s1105_s27 + $0x90] sm:$0xff] %v189_v18 }
  0x26   : > { %192 = vst [vmem:[%s1105_s27 + $0x98] sm:$0xff] %v191_v19 }
  0x27   : > { %194 = vst [vmem:[%s1105_s27 + $0xa0] sm:$0xff] %v193_v20 }
  0x28   : > { %196 = vst [vmem:[%s1105_s27 + $0xa8] sm:$0xff] %v195_v21 }
  0x29   : > { %198 = vst [vmem:[%s1105_s27 + $0xb0] sm:$0xff] %v197_v22 }
  0x2a   : > { %200 = vst [vmem:[%s1105_s27 + $0xb8] sm:$0xff] %v199_v23 }
  0x2b   : > { %202 = vst [vmem:[%s1105_s27 + $0xc0] sm:$0xff] %v201_v24 }
  0x2c   : > { %204 = vst [vmem:[%s1105_s27 + $0xc8] sm:$0xff] %v203_v25 }
  0x2d   : > { %206 = vst [vmem:[%s1105_s27 + $0xd0] sm:$0xff] %v205_v26 }
  0x2e   : > { %208 = vst [vmem:[%s1105_s27 + $0xd8] sm:$0xff] %v207_v27 }
  0x2f   : > { %210 = vst [vmem:[%s1105_s27 + $0xe0] sm:$0xff] %v209_v28 }
  0x30   : > { %212 = vst [vmem:[%s1105_s27 + $0xe8] sm:$0xff] %v211_v29 }
  0x31   : > { %214 = vst [vmem:[%s1105_s27 + $0xf0] sm:$0xff] %v213_v30 }
  0x32   : > { %216 = vst [vmem:[%s1105_s27 + $0xf8] sm:$0xff] %v215_v31 }
  0x33   : > { %218 = vst [vmem:[%s1105_s27 + $0x100] sm:$0xff] %v217_v32 }
  0x34   : > { %220 = vst [vmem:[%s1105_s27 + $0x108] sm:$0xff] %v219_v33 }
  0x35   : > { %222 = vst [vmem:[%s1105_s27 + $0x110] sm:$0xff] %v221_v34 }
  0x36   : > { %224 = vst [vmem:[%s1105_s27 + $0x118] sm:$0xff] %v223_v35 }
  0x37 PF: > { %p783_p7 = scmp.ge.s32.totalorder %s1037_s14, 1  ;;  %p229_p8 = scmp.lt.s32.totalorder %s1037_s14, 3 }
  0x39   : > { %p230_p9 = pnand %p783_p7, %p229_p8 }
  0x3a   : > { %s236_s28 = sand.u32 (!%p230_p9), 1, %s1029_s12   ;;  %p265_p10 = scmp.lt.s32.totalorder (!%p230_p9), %s1075_s15, 1 }
  0x3b   : > { %233 = sbr.rel (%p230_p9) target bundleno = 383 (0x17f), region = 47  ;;  %s784_s14 = sshll.u32 (!%p230_p9), %s236_s28, 5 }
  0x3c   : > { %s990_s29 = smul.u32 (!%p230_p9), 288, %s236_s28  ;;  %s1279_s17 = scalar_lea.vmem (!%p230_p9), [#allocation3], %s784_s14 }
  0x3e   : > { %s1187_s7 = scalar_lea.vmem (!%p230_p9), [#allocation2], %s990_s29 }
  0x40   : > { %v950_v36 = vld [vmem:[%s1311_s1 + $0x4] sm:$0xf]  ;;  %v791_v37 = vld [vmem:[%s1311_s1 + $0x8] sm:$0xf0]  ;;  %vm498_vm0 = vcmask 130048   ;;  %s266_s12 = scalar_select %p265_p10, %s1075_s15, 1 }
  0x41   : > { %v909_v38 = vld [vmem:[%s1187_s7 + $0xe0] sm:$0xf]  ;;  %v982_v39 = vld [vmem:[%s1187_s7 + $0xec] sm:$0xf0]  ;;  %v980_v40 = vld [vmem:[%s1187_s7 + $0xe4] sm:$0xf]  ;;  %v1201_v54 = vor.u32 %v950_v36, %v791_v37 }
  0x42   : > { %v910_v41 = vor.u32 %v982_v39, %v909_v38  ;;  %v911_v42 = vld [vmem:[%s1187_s7 + $0xf0] sm:$0xf0]  ;;  %v925_v43 = vld [vmem:[%s1187_s7 + $0x100] sm:$0xf]  ;;  %v986_v44 = vld [vmem:[%s1187_s7 + $0x10c] sm:$0xf0] }
  0x43   : > { %v914_v45 = vor.u32 %v980_v40, %v911_v42  ;;  %v926_v46 = vor.u32 %v986_v44, %v925_v43  ;;  %v917_v47 = vld [vmem:[%s1187_s7 + $0xe8] sm:$0xf]  ;;  %v983_v48 = vld [vmem:[%s1187_s7 + $0xf4] sm:$0xf0]  ;;  %v893_v49 = vld [vmem:[%s1187_s7 + $0xc0] sm:$0xf] }
  0x44   : > { %502 = vmatpush.bf16.msra.mxu0 %v910_v41  ;;  %v918_v50 = vor.u32 %v983_v48, %v917_v47  ;;  %v978_v51 = vld [vmem:[%s1187_s7 + $0xcc] sm:$0xf0]  ;;  %v976_v52 = vld [vmem:[%s1187_s7 + $0xc4] sm:$0xf]  ;;  %v895_v53 = vld [vmem:[%s1187_s7 + $0xd0] sm:$0xf0] }
  0x45   : > { %530 = vmatpush.bf16.msra.mxu2 %v914_v45  ;;  %523 = vmatpush.bf16.msra.mxu1 %v926_v46  ;;  %v894_v55 = vor.u32 %v978_v51, %v893_v49  ;;  %v898_v56 = vor.u32 %v976_v52, %v895_v53  ;;  %v901_v57 = vld [vmem:[%s1187_s7 + $0xc8] sm:$0xf]  ;;  %v979_v58 = vld [vmem:[%s1187_s7 + $0xd4] sm:$0xf0]  ;;  %v877_v59 = vld [vmem:[%s1187_s7 + $0xa0] sm:$0xf] }
  0x46   : > { %v902_v60 = vor.u32 %v979_v58, %v901_v57  ;;  %v974_v61 = vld [vmem:[%s1187_s7 + $0xac] sm:$0xf0]  ;;  %v972_v62 = vld [vmem:[%s1187_s7 + $0xa4] sm:$0xf]  ;;  %v879_v63 = vld [vmem:[%s1187_s7 + $0xb0] sm:$0xf0] }
  0x47   : > { %v933_v0 = vld [vmem:[%s1187_s7 + $0x108] sm:$0xf]  ;;  %v987_v1 = vld [vmem:[%s1187_s7 + $0x114] sm:$0xf0]  ;;  %v878_v3 = vor.u32 %v974_v61, %v877_v59  ;;  %v981_v6 = vld [vmem:[%s1187_s7 + $0xec] sm:$0xf]  ;;  %v882_v8 = vor.u32 %v972_v62, %v879_v63 }
  0x48   : > { %v885_v2 = vld [vmem:[%s1187_s7 + $0xa8] sm:$0xf]  ;;  %503 = vmatpush.bf16.msra.mxu0 %v894_v55  ;;  %v934_v4 = vor.u32 %v987_v1, %v933_v0  ;;  %v975_v5 = vld [vmem:[%s1187_s7 + $0xb4] sm:$0xf0]  ;;  %v919_v7 = vld [vmem:[%s1187_s7 + $0xf8] sm:$0xf0]  ;;  %939 = vmatmul.msk.bf16.vlgmr.msra.gmra.mxu1 %vm498_vm0, %v1201_v54 }
  0x49   : > { %558 = vmatpush.bf16.msrb.mxu1 %v918_v50  ;;  %531 = vmatpush.bf16.msra.mxu2 %v898_v56  ;;  %v922_v9 = vor.u32 %v981_v6, %v919_v7  ;;  %v861_v10 = vld [vmem:[%s1187_s7 + $0x80] sm:$0xf]  ;;  %v970_v11 = vld [vmem:[%s1187_s7 + $0x8c] sm:$0xf0]  ;;  %v886_v12 = vor.u32 %v975_v5, %v885_v2  ;;  %v968_v13 = vld [vmem:[%s1187_s7 + $0x84] sm:$0xf] }
  0x4a   : > { %579 = vmatpush.bf16.msra.mxu3 %v934_v4  ;;  %v863_v14 = vld [vmem:[%s1187_s7 + $0x90] sm:$0xf0]  ;;  %v869_v15 = vld [vmem:[%s1187_s7 + $0x88] sm:$0xf]  ;;  %v971_v16 = vld [vmem:[%s1187_s7 + $0x94] sm:$0xf0]  ;;  %v862_v19 = vor.u32 %v970_v11, %v861_v10 }
  0x4b   : > { %v977_v17 = vld [vmem:[%s1187_s7 + $0xcc] sm:$0xf]  ;;  %v903_v18 = vld [vmem:[%s1187_s7 + $0xd8] sm:$0xf0]  ;;  %v866_v21 = vor.u32 %v968_v13, %v863_v14  ;;  %v845_v22 = vld [vmem:[%s1187_s7 + $0x60] sm:$0xf]  ;;  %v870_v25 = vor.u32 %v971_v16, %v869_v15 }
  0x4c   : > { %504 = vmatpush.bf16.msra.mxu0 %v878_v3  ;;  %v906_v20 = vor.u32 %v977_v17, %v903_v18  ;;  %v966_v23 = vld [vmem:[%s1187_s7 + $0x6c] sm:$0xf0]  ;;  %v973_v24 = vld [vmem:[%s1187_s7 + $0xac] sm:$0xf]  ;;  %v964_v26 = vld [vmem:[%s1187_s7 + $0x64] sm:$0xf] }
  0x4d   : > { %559 = vmatpush.bf16.msrb.mxu1 %v902_v60  ;;  %532 = vmatpush.bf16.msra.mxu2 %v882_v8  ;;  %v847_v27 = vld [vmem:[%s1187_s7 + $0x70] sm:$0xf0]  ;;  %v887_v28 = vld [vmem:[%s1187_s7 + $0xb8] sm:$0xf0]  ;;  %v853_v29 = vld [vmem:[%s1187_s7 + $0x68] sm:$0xf]  ;;  %v846_v32 = vor.u32 %v966_v23, %v845_v22 }
  0x4e   : > { %586 = vmatpush.bf16.msrb.mxu3 %v922_v9  ;;  %v967_v30 = vld [vmem:[%s1187_s7 + $0x74] sm:$0xf0]  ;;  %v890_v31 = vor.u32 %v973_v24, %v887_v28  ;;  %v969_v33 = vld [vmem:[%s1187_s7 + $0x8c] sm:$0xf]  ;;  %v871_v34 = vld [vmem:[%s1187_s7 + $0x98] sm:$0xf0]  ;;  %v850_v35 = vor.u32 %v964_v26, %v847_v27 }
  0x4f   : > { %941 = vmatmul.msk.bf16.vlgmr.msra.gmra.mxu3 %vm498_vm0, %v1201_v54  ;;  %v829_v36 = vld [vmem:[%s1187_s7 + $0x40] sm:$0xf]  ;;  %v962_v37 = vld [vmem:[%s1187_s7 + $0x4c] sm:$0xf0]  ;;  %v854_v38 = vor.u32 %v967_v30, %v853_v29  ;;  %v960_v39 = vld [vmem:[%s1187_s7 + $0x44] sm:$0xf]  ;;  %v874_v43 = vor.u32 %v969_v33, %v871_v34 }
  0x50   : > { %505 = vmatpush.bf16.msra.mxu0 %v862_v19  ;;  %v831_v40 = vld [vmem:[%s1187_s7 + $0x50] sm:$0xf0]  ;;  %v837_v41 = vld [vmem:[%s1187_s7 + $0x48] sm:$0xf]  ;;  %v963_v42 = vld [vmem:[%s1187_s7 + $0x54] sm:$0xf0]  ;;  %v830_v44 = vor.u32 %v962_v37, %v829_v36 }
  0x51   : > { %560 = vmatpush.bf16.msrb.mxu1 %v886_v12  ;;  %533 = vmatpush.bf16.msra.mxu2 %v866_v21  ;;  %v965_v45 = vld [vmem:[%s1187_s7 + $0x6c] sm:$0xf]  ;;  %v855_v46 = vld [vmem:[%s1187_s7 + $0x78] sm:$0xf0]  ;;  %v834_v47 = vor.u32 %v960_v39, %v831_v40  ;;  %v813_v48 = vld [vmem:[%s1187_s7 + $0x20] sm:$0xf]  ;;  %v838_v50 = vor.u32 %v963_v42, %v837_v41 }
  0x52   : > { %587 = vmatpush.bf16.msrb.mxu3 %v906_v20  ;;  %v958_v49 = vld [vmem:[%s1187_s7 + $0x2c] sm:$0xf0]  ;;  %v956_v51 = vld [vmem:[%s1187_s7 + $0x24] sm:$0xf]  ;;  %v815_v52 = vld [vmem:[%s1187_s7 + $0x30] sm:$0xf0]  ;;  %v858_v56 = vor.u32 %v965_v45, %v855_v46 }
  0x53   : > { %v821_v53 = vld [vmem:[%s1187_s7 + $0x28] sm:$0xf]  ;;  %v959_v55 = vld [vmem:[%s1187_s7 + $0x34] sm:$0xf0]  ;;  %v797_v57 = vld [vmem:[%s1187_s7] sm:$0xf]  ;;  %v814_v58 = vor.u32 %v958_v49, %v813_v48  ;;  %v818_v62 = vor.u32 %v956_v51, %v815_v52 }
  0x54   : > { %506 = vmatpush.bf16.msra.mxu0 %v846_v32  ;;  %v954_v59 = vld [vmem:[%s1187_s7 + $0xc] sm:$0xf0]  ;;  %v961_v60 = vld [vmem:[%s1187_s7 + $0x4c] sm:$0xf]  ;;  %v839_v61 = vld [vmem:[%s1187_s7 + $0x58] sm:$0xf0]  ;;  %v822_v2 = vor.u32 %v959_v55, %v821_v53 }
  0x55   : > { %561 = vmatpush.bf16.msrb.mxu1 %v870_v25  ;;  %534 = vmatpush.bf16.msra.mxu2 %v850_v35  ;;  %v952_v63 = vld [vmem:[%s1187_s7 + $0x4] sm:$0xf]  ;;  %v799_v0 = vld [vmem:[%s1187_s7 + $0x10] sm:$0xf0]  ;;  %v805_v1 = vld [vmem:[%s1187_s7 + $0x8] sm:$0xf]  ;;  %v842_v6 = vor.u32 %v961_v60, %v839_v61  ;;  %v798_v10 = vor.u32 %v954_v59, %v797_v57 }
  0x56   : > { %588 = vmatpush.bf16.msrb.mxu3 %v890_v31  ;;  %v955_v3 = vld [vmem:[%s1187_s7 + $0x14] sm:$0xf0]  ;;  %v985_v4 = vld [vmem:[%s1187_s7 + $0x10c] sm:$0xf]  ;;  %v935_v5 = vld [vmem:[%s1187_s7 + $0x118] sm:$0xf0]  ;;  %v802_v14 = vor.u32 %v952_v63, %v799_v0 }
  0x57   : > { %v789_v7 = vld [vmem:[%s1311_s1] sm:$0xf]  ;;  %v984_v8 = vld [vmem:[%s1187_s7 + $0x104] sm:$0xf]  ;;  %v927_v9 = vld [vmem:[%s1187_s7 + $0x110] sm:$0xf0]  ;;  %v938_v15 = vor.u32 %v985_v4, %v935_v5  ;;  %v806_v16 = vor.u32 %v955_v3, %v805_v1 }
  0x58   : > { %507 = vmatpush.bf16.msra.mxu0 %v830_v44  ;;  %v951_v11 = vld [vmem:[%s1311_s1 + $0x4] sm:$0xf0]  ;;  %v957_v12 = vld [vmem:[%s1187_s7 + $0x2c] sm:$0xf]  ;;  %v823_v13 = vld [vmem:[%s1187_s7 + $0x38] sm:$0xf0]  ;;  %v930_v17 = vor.u32 %v984_v8, %v927_v9 }
  0x59   : > { %562 = vmatpush.bf16.msrb.mxu1 %v854_v38  ;;  %535 = vmatpush.bf16.msra.mxu2 %v834_v47  ;;  %v790_v18 = vor.u32 %v951_v11, %v789_v7  ;;  %v826_v19 = vor.u32 %v957_v12, %v823_v13  ;;  %v953_v20 = vld [vmem:[%s1187_s7 + $0xc] sm:$0xf]  ;;  %v807_v21 = vld [vmem:[%s1187_s7 + $0x18] sm:$0xf0]  ;;  %s949_s18 = sshll.u32 %s266_s12, 5  ;;  %vm632_vm1 = vcmask 7168  }
  0x5a   : > { %589 = vmatpush.bf16.msrb.mxu3 %v874_v43  ;;  %v810_v22 = vor.u32 %v953_v20, %v807_v21  ;;  %s269_s23 = scalar_lea.vmem %s1313_s3, %s949_s18  ;;  %s988_s24 = sshll.u32 (%p1090_p5), %s1075_s15, 4 }
  0x5b   : > { %s669_s27 = scalar_lea.vmem (%p1090_p5), %s1312_s2, %s988_s24 }
  0x5c   : > { %508 = vmatpush.bf16.msra.mxu0 %v814_v58 }
  0x5d   : > { %563 = vmatpush.bf16.msrb.mxu1 %v838_v50  ;;  %536 = vmatpush.bf16.msra.mxu2 %v818_v62 }
  0x5e   : > { %590 = vmatpush.bf16.msrb.mxu3 %v858_v56 }
  0x60   : > { %509 = vmatpush.bf16.msra.mxu0 %v798_v10 }
  0x61   : > { %564 = vmatpush.bf16.msrb.mxu1 %v822_v2  ;;  %537 = vmatpush.bf16.msra.mxu2 %v802_v14 }
  0x62   : > { %591 = vmatpush.bf16.msrb.mxu3 %v842_v6 }
  0x63   : > { %510 = vmatmul.bf16.vlgmr.msra.gmra.mxu0 %v790_v18 }
  0x64   : > { %607 = vmatpush.bf16.msrb.mxu0 %v938_v15  ;;  %538 = vmatmul.bf16.vlgmr.msra.gmra.mxu2 %v790_v18 }
  0x65   : > { %565 = vmatpush.bf16.msrb.mxu1 %v806_v16  ;;  %551 = vmatpush.bf16.msrb.mxu2 %v930_v17 }
  0x66   : > { %592 = vmatpush.bf16.msrb.mxu3 %v826_v19 }
  0x68   : > { %566 = vmatmul.bf16.vlgmr.msrb.gmra.mxu1 %v790_v18 }
  0x6a   : > { %593 = vmatpush.bf16.msrb.mxu3 %v810_v22 }
  0x6d   : > { %594 = vmatmul.bf16.vlgmr.msrb.gmra.mxu3 %v790_v18 }
  0x73   : > { %942 = vmatmul.msk.bf16.vlgmr.msrb.gmra.mxu0 %vm498_vm0, %v1201_v54 }
  0x74   : > { %940 = vmatmul.msk.bf16.vlgmr.msrb.gmra.mxu2 %vm498_vm0, %v1201_v54 }
  0xc5   : > { %v525_v23 = vpop.f32.mrf.mxu1 }
  0xcd   : > { %v527_v26 = vpop.f32.mrf.mxu1 }
  0xd2   : > { %v581_v24 = vpop.f32.mrf.mxu3 }
  0xda   : > { %v583_v27 = vpop.f32.mrf.mxu3 }
  0xe0   : > { %v511_v25 = vpop.f32.mrf.mxu0 }
  0xe1   : > { %v526_v54 = vadd.f32 %v525_v23, %v511_v25 }
  0xe3   : > { %v635_v44 = vmul.f32 %v526_v54, %v526_v54 }
  0xe5   : > { %v567_v30 = vpop.f32.mrf.mxu1 }
  0xe6   : > { %v582_v34 = vadd.f32 %v581_v24, %v567_v30 }
  0xe7   : > { %v539_v28 = vpop.f32.mrf.mxu2 }
  0xe8   : > { %v513_v29 = vpop.f32.mrf.mxu0  ;;  %v637_v50 = vmul.f32 %v582_v34, %v582_v34 }
  0xe9   : > { %v528_v53 = vadd.f32 %v527_v26, %v513_v29 }
  0xeb   : > { %v639_v60 = vmul.f32 %v528_v53, %v528_v53 }
  0xed   : > { %v569_v37 = vpop.f32.mrf.mxu1 }
  0xee   : > { %v584_v42 = vadd.f32 %v583_v27, %v569_v37 }
  0xef   : > { %v541_v32 = vpop.f32.mrf.mxu2 }
  0xf0   : > { %v595_v31 = vpop.f32.mrf.mxu3  ;;  %v609_v33 = vpop.f32.mrf.mxu0  ;;  %v641_v0 = vmul.f32 %v584_v42, %v584_v42 }
  0xf1   : > { %v610_v35 = vadd.f32 %v609_v33, %v595_v31 }
  0xf3   : > { %v615_v36 = vpack.c.bf16 %v610_v35, %v582_v34  ;;  %v638_v51 = vmul.f32 %v610_v35, %v610_v35 }
  0xf5   : > { %619 = vst [vmem:[%s1279_s17 + $0x8] sm:$0xff] %v615_v36 }
  0xf7   : > { %v553_v39 = vpop.f32.mrf.mxu2 }
  0xf8   : > { %v597_v38 = vpop.f32.mrf.mxu3  ;;  %v554_v40 = vadd.f32 %v553_v39, %v539_v28  ;;  %v611_v41 = vpop.f32.mrf.mxu0 }
  0xf9   : > { %v612_v43 = vadd.f32 %v611_v41, %v597_v38 }
  0xfa   : > { %v614_v45 = vpack.c.bf16 %v554_v40, %v526_v54  ;;  %v636_v46 = vmul.f32 %v554_v40, %v554_v40  ;;  %v622_v47 = vadd.f32 %v554_v40, %v526_v54 }
  0xfb   : > { %v617_v48 = vpack.c.bf16 %v612_v43, %v584_v42  ;;  %v642_v4 = vmul.f32 %v612_v43, %v612_v43 }
  0xfc   : > { %618 = vst [vmem:[%s1279_s17] sm:$0xff] %v614_v45  ;;  %v623_v49 = vadd.f32 %v622_v47, %v582_v34  ;;  %v643_v52 = vadd.f32 %v636_v46, %v635_v44  ;;  %v684_v12 = vld [vmem:[%s1279_s17 + $0x8] sm:$0xff] (%p1090_p5) }
  0xfd   : > { %621 = vst [vmem:[%s1279_s17 + $0x18] sm:$0xff] %v617_v48 }
  0xfe   : > { %v624_v55 = vadd.f32 %v623_v49, %v610_v35  ;;  %v644_v56 = vadd.f32 %v643_v52, %v637_v50  ;;  %685 = vst [vmem:[%s669_s27 + $0x8] sm:$0xff] (%p1090_p5), %v684_v12 }
  0xff   : > { %v555_v57 = vpop.f32.mrf.mxu2 }
 0x100   : > { %v556_v58 = vadd.f32 %v555_v57, %v541_v32  ;;  %625 = vadd.xlane.f32.xlu0 %v624_v55  ;;  %v645_v59 = vadd.f32 %v644_v56, %v638_v51 }
 0x102   : > { %v616_v61 = vpack.c.bf16 %v556_v58, %v528_v53  ;;  %v627_v62 = vadd.f32 %v556_v58, %v528_v53  ;;  %v640_v63 = vmul.f32 %v556_v58, %v556_v58  ;;  %646 = vadd.xlane.f32.xlu1 %v645_v59 }
 0x103   : > { %v682_v11 = vld [vmem:[%s1279_s17] sm:$0xff] (%p1090_p5) }
 0x104   : > { %620 = vst [vmem:[%s1279_s17 + $0x10] sm:$0xff] %v616_v61  ;;  %v628_v1 = vadd.f32 %v627_v62, %v584_v42  ;;  %v648_v2 = vadd.f32 %v640_v63, %v639_v60  ;;  %v688_v14 = vld [vmem:[%s1279_s17 + $0x18] sm:$0xff] (%p1090_p5) }
 0x105   : > { %683 = vst [vmem:[%s669_s27] sm:$0xff] (%p1090_p5), %v682_v11 }
 0x106   : > { %v629_v3 = vadd.f32 %v628_v1, %v612_v43  ;;  %v649_v5 = vadd.f32 %v648_v2, %v641_v0  ;;  %689 = vst [vmem:[%s669_s27 + $0x28] sm:$0xff] (%p1090_p5), %v688_v14 }
 0x108   : > { %630 = vadd.xlane.f32.xlu0 %v629_v3  ;;  %v650_v6 = vadd.f32 %v649_v5, %v642_v4 }
 0x10a   : > { %651 = vadd.xlane.f32.xlu1 %v650_v6 }
 0x10b   : > { %v686_v13 = vld [vmem:[%s1279_s17 + $0x10] sm:$0xff] (%p1090_p5) }
 0x10c   : > { %687 = vst [vmem:[%s669_s27 + $0x20] sm:$0xff] (%p1090_p5), %v686_v13 }
 0x173   : > { %v626_v7 = vpop.xlane.xlu0 %625 }
 0x174   : > { %633 = vst.msk [vmem:[%s269_s23] sm:$0xff] %vm632_vm1, %v626_v7 }
 0x175   : > { %v647_v8 = vpop.xlane.xlu1 %646 }
 0x176   : > { %653 = vst.msk [vmem:[%s269_s23 + $0x10] sm:$0xff] %vm632_vm1, %v647_v8 }
 0x17a   : > { %666 = sbr.rel (!%p1090_p5) target bundleno = 383 (0x17f), region = 55 }
 0x17b   : > { %v631_v9 = vpop.xlane.xlu0 %630 }
 0x17c   : > { %634 = vst.msk [vmem:[%s269_s23 + $0x8] sm:$0xff] %vm632_vm1, %v631_v9 }
 0x17d   : > { %v652_v10 = vpop.xlane.xlu1 %651 }
 0x17e   : > { %654 = vst.msk [vmem:[%s269_s23 + $0x18] sm:$0xff] %vm632_vm1, %v652_v10 }
 0x17f PF: > { %p11_p11 = scmp.ge.s32.totalorder %s1078_s16, 4   ;;  %s1315_s12 = smov %s1033_s13 }
 0x180   : > { %s1316_s13 = smov %s1088_s19  ;;  %s1317_s14 = smov %s1078_s16 }
 0x181   :  { %13 = sbr.rel (!%p11_p11) target bundleno = 2 (0x2), region = 121 }

// kernel: resnet_forward.27
= control target key start
LH: loop header
LB: loop body
LE: loop exit
PB: predicated region body
PF: predicated region fallthrough
CT: control target
= control target key end

     0   :  { %v250_v0 = vmov 0   ;;  %s422_s4 = inlined_call_operand.vmem [shape: f32[16,1], index: 4, kind: input, shape index: {}]   ;;  %s423_s2 = inlined_call_operand.vmem [shape: f32[16,1], index: 2, kind: input, shape index: {}]   ;;  %s424_s3 = inlined_call_operand.vmem [shape: f32[16,1], index: 3, kind: input, shape index: {}]   ;;  %s425_s5 = inlined_call_operand.vmem [shape: f32[16,1], index: 5, kind: input, shape index: {}]   ;;  %s426_s0 = inlined_call_operand.vmem [shape: bf16[16,1024], index: 0, kind: input, shape index: {}]   ;;  %s427_s1 = inlined_call_operand.vmem [shape: bf16[32,1024], index: 1, kind: input, shape index: {}]   ;;  %s428_s6 = inlined_call_operand.vmem [shape: bf16[16,1024], index: 6, kind: output, shape index: {}]  }
   0x1   :  { %248 = vset.pattern.permute.xlu1 %v250_v0  ;;  %247 = vset.pattern.permute.xlu0 %v250_v0  ;;  %v130_v1 = vld [vmem:[%s422_s4] sm:$0xff]  ;;  %v131_v4 = vld [vmem:[%s422_s4 + $0x8] sm:$0xff]  ;;  %v28_v11 = vld [vmem:[%s426_s0 + $0x10] sm:$0xff] }
   0x2   :  { %v50_v2 = vld [vmem:[%s423_s2] sm:$0xff]  ;;  %134 = vperm.xlu1 %248, %v130_v1   ;;  %249 = vset.pattern.permute.xlu2 %v250_v0  ;;  %v51_v5 = vld [vmem:[%s423_s2 + $0x8] sm:$0xff]  ;;  %v29_v12 = vld [vmem:[%s426_s0 + $0x18] sm:$0xff]  ;;  %v38_v21 = vunpack.c.l.bf16 %v28_v11  ;;  %v39_v22 = vunpack.c.h.bf16 %v28_v11 }
   0x3   :  { %54 = vperm.xlu0 %247, %v50_v2   ;;  %v78_v3 = vld [vmem:[%s424_s3] sm:$0xff]  ;;  %v79_v6 = vld [vmem:[%s424_s3 + $0x8] sm:$0xff]  ;;  %v335_v19 = vld [vmem:[%s427_s1 + $0x50] sm:$0xff]  ;;  %v40_v23 = vunpack.c.l.bf16 %v29_v12  ;;  %v41_v24 = vunpack.c.h.bf16 %v29_v12 }
   0x4   :  { %82 = vperm.xlu2 %249, %v78_v3   ;;  %v159_v7 = vld [vmem:[%s425_s5 + $0x8] sm:$0xff]  ;;  %v158_v8 = vld [vmem:[%s425_s5] sm:$0xff]  ;;  %v340_v20 = vld [vmem:[%s427_s1 + $0x58] sm:$0xff]  ;;  %v118_v35 = vunpack.c.l.bf16 %v335_v19  ;;  %v119_v36 = vunpack.c.h.bf16 %v335_v19 }
   0x5   :  { %v26_v9 = vld [vmem:[%s426_s0] sm:$0xff]  ;;  %v27_v10 = vld [vmem:[%s426_s0 + $0x8] sm:$0xff]  ;;  %v32_v27 = vld [vmem:[%s426_s0 + $0x30] sm:$0xff]  ;;  %v120_v37 = vunpack.c.l.bf16 %v340_v20  ;;  %v121_v38 = vunpack.c.h.bf16 %v340_v20 }
   0x6   :  { %v325_v13 = vld [vmem:[%s427_s1 + $0x40] sm:$0xff]  ;;  %v330_v14 = vld [vmem:[%s427_s1 + $0x48] sm:$0xff]  ;;  %v34_v15 = vunpack.c.l.bf16 %v26_v9  ;;  %v35_v16 = vunpack.c.h.bf16 %v26_v9  ;;  %v36_v17 = vunpack.c.l.bf16 %v27_v10  ;;  %v37_v18 = vunpack.c.h.bf16 %v27_v10  ;;  %v33_v28 = vld [vmem:[%s426_s0 + $0x38] sm:$0xff] }
   0x7   :  { %v30_v25 = vld [vmem:[%s426_s0 + $0x20] sm:$0xff]  ;;  %v31_v26 = vld [vmem:[%s426_s0 + $0x28] sm:$0xff]  ;;  %v114_v29 = vunpack.c.l.bf16 %v325_v13  ;;  %v115_v30 = vunpack.c.h.bf16 %v325_v13  ;;  %v116_v31 = vunpack.c.l.bf16 %v330_v14  ;;  %v117_v32 = vunpack.c.h.bf16 %v330_v14  ;;  %v244_v54 = vld [vmem:[%s427_s1 + $0x70] sm:$0xff] }
   0x8   :  { %v42_v39 = vunpack.c.l.bf16 %v30_v25  ;;  %v43_v40 = vunpack.c.h.bf16 %v30_v25  ;;  %v44_v41 = vunpack.c.l.bf16 %v31_v26  ;;  %v45_v42 = vunpack.c.h.bf16 %v31_v26  ;;  %v242_v48 = vld [vmem:[%s427_s1 + $0x60] sm:$0xff]  ;;  %v243_v49 = vld [vmem:[%s427_s1 + $0x68] sm:$0xff]  ;;  %v245_v55 = vld [vmem:[%s427_s1 + $0x78] sm:$0xff] }
   0x9   :  { %v46_v44 = vunpack.c.l.bf16 %v32_v27  ;;  %v47_v45 = vunpack.c.h.bf16 %v32_v27  ;;  %v48_v46 = vunpack.c.l.bf16 %v33_v28  ;;  %v49_v47 = vunpack.c.h.bf16 %v33_v28 }
   0xa   :  { %139 = vperm.xlu1 %248, %v131_v4   ;;  %v122_v60 = vunpack.c.l.bf16 %v242_v48  ;;  %v123_v61 = vunpack.c.h.bf16 %v242_v48  ;;  %v124_v62 = vunpack.c.l.bf16 %v243_v49  ;;  %v125_v63 = vunpack.c.h.bf16 %v243_v49 }
   0xb   :  { %59 = vperm.xlu0 %247, %v51_v5   ;;  %v126_v0 = vunpack.c.l.bf16 %v244_v54  ;;  %v127_v1 = vunpack.c.h.bf16 %v244_v54  ;;  %v128_v2 = vunpack.c.l.bf16 %v245_v55  ;;  %v129_v3 = vunpack.c.h.bf16 %v245_v55 }
   0xc   :  { %87 = vperm.xlu2 %249, %v79_v6  }
  0x12   :  { %167 = vperm.xlu1 %248, %v159_v7  }
  0x13   :  { %162 = vperm.xlu0 %247, %v158_v8  }
  0x5e   :  { %v83_v43 = vpop.permute.xlu2 %82 }
  0x66   :  { %v88_v26 = vpop.permute.xlu2 %87 }
  0x74   :  { %v135_v33 = vpop.permute.xlu1 %134 }
  0x75   :  { %v55_v34 = vpop.permute.xlu0 %54  ;;  %v145_v25 = vmul.f32 %v135_v33, %v117_v32  ;;  %v146_v27 = vmul.f32 %v135_v33, %v118_v35  ;;  %v147_v28 = vmul.f32 %v135_v33, %v119_v36  ;;  %v149_v48 = vmul.f32 %v135_v33, %v121_v38 }
  0x76   :  { %v62_v50 = vmul.f32 %v55_v34, %v34_v15  ;;  %v63_v51 = vmul.f32 %v55_v34, %v35_v16  ;;  %v64_v52 = vmul.f32 %v55_v34, %v36_v17  ;;  %v65_v53 = vmul.f32 %v55_v34, %v37_v18 }
  0x77   :  { %v66_v56 = vmul.f32 %v55_v34, %v38_v21  ;;  %v67_v57 = vmul.f32 %v55_v34, %v39_v22  ;;  %v68_v58 = vmul.f32 %v55_v34, %v40_v23  ;;  %v69_v59 = vmul.f32 %v55_v34, %v41_v24 }
  0x78   :  { %v374_v4 = vadd.f32 %v83_v43, %v62_v50  ;;  %v376_v5 = vadd.f32 %v83_v43, %v63_v51  ;;  %v378_v6 = vadd.f32 %v83_v43, %v64_v52  ;;  %v380_v7 = vadd.f32 %v83_v43, %v65_v53 }
  0x79   :  { %v382_v10 = vadd.f32 %v83_v43, %v66_v56  ;;  %v384_v11 = vadd.f32 %v83_v43, %v67_v57  ;;  %v386_v12 = vadd.f32 %v83_v43, %v68_v58  ;;  %v388_v13 = vadd.f32 %v83_v43, %v69_v59 }
  0x7a   :  { %v142_v22 = vmul.f32 %v135_v33, %v114_v29  ;;  %v143_v23 = vmul.f32 %v135_v33, %v115_v30  ;;  %v144_v24 = vmul.f32 %v135_v33, %v116_v31  ;;  %v148_v34 = vmul.f32 %v135_v33, %v120_v37 }
  0x7c   :  { %v140_v8 = vpop.permute.xlu1 %139 }
  0x7d   :  { %v60_v9 = vpop.permute.xlu0 %59  ;;  %v153_v29 = vmul.f32 %v140_v8, %v125_v63  ;;  %v154_v31 = vmul.f32 %v140_v8, %v126_v0  ;;  %v155_v32 = vmul.f32 %v140_v8, %v127_v1  ;;  %v156_v51 = vmul.f32 %v140_v8, %v128_v2 }
  0x7e   :  { %v70_v14 = vmul.f32 %v60_v9, %v42_v39  ;;  %v71_v15 = vmul.f32 %v60_v9, %v43_v40  ;;  %v72_v16 = vmul.f32 %v60_v9, %v44_v41  ;;  %v73_v17 = vmul.f32 %v60_v9, %v45_v42 }
  0x7f   :  { %v74_v18 = vmul.f32 %v60_v9, %v46_v44  ;;  %v75_v19 = vmul.f32 %v60_v9, %v47_v45  ;;  %v76_v20 = vmul.f32 %v60_v9, %v48_v46  ;;  %v77_v21 = vmul.f32 %v60_v9, %v49_v47 }
  0x80   :  { %v98_v49 = vadd.f32 %v88_v26, %v70_v14  ;;  %v99_v43 = vadd.f32 %v88_v26, %v71_v15  ;;  %v100_v50 = vadd.f32 %v88_v26, %v72_v16  ;;  %v101_v39 = vadd.f32 %v88_v26, %v73_v17 }
  0x81   :  { %v102_v40 = vadd.f32 %v88_v26, %v74_v18  ;;  %v103_v41 = vadd.f32 %v88_v26, %v75_v19  ;;  %v104_v42 = vadd.f32 %v88_v26, %v76_v20  ;;  %v105_v44 = vadd.f32 %v88_v26, %v77_v21 }
  0x82   :  { %v150_v45 = vmul.f32 %v140_v8, %v122_v60  ;;  %v151_v46 = vmul.f32 %v140_v8, %v123_v61  ;;  %v152_v47 = vmul.f32 %v140_v8, %v124_v62  ;;  %v157_v35 = vmul.f32 %v140_v8, %v129_v3 }
  0x84   :  { %v168_v30 = vpop.permute.xlu1 %167 }
  0x85   :  { %v178_v36 = vadd.f32 %v168_v30, %v150_v45  ;;  %v179_v37 = vadd.f32 %v168_v30, %v151_v46  ;;  %v180_v33 = vadd.f32 %v168_v30, %v152_v47  ;;  %v181_v38 = vadd.f32 %v168_v30, %v153_v29  ;;  %v163_v0 = vpop.permute.xlu0 %162 }
  0x86   :  { %v182_v52 = vadd.f32 %v168_v30, %v154_v31  ;;  %v183_v53 = vadd.f32 %v168_v30, %v155_v32  ;;  %v184_v54 = vadd.f32 %v168_v30, %v156_v51  ;;  %v185_v55 = vadd.f32 %v168_v30, %v157_v35 }
  0x87   :  { %v194_v56 = vadd.f32 %v178_v36, %v98_v49  ;;  %v195_v57 = vadd.f32 %v179_v37, %v99_v43  ;;  %v196_v58 = vadd.f32 %v180_v33, %v100_v50  ;;  %v197_v59 = vadd.f32 %v181_v38, %v101_v39 }
  0x88   :  { %v198_v60 = vadd.f32 %v182_v52, %v102_v40  ;;  %v199_v61 = vadd.f32 %v183_v53, %v103_v41  ;;  %v200_v62 = vadd.f32 %v184_v54, %v104_v42  ;;  %v201_v63 = vadd.f32 %v185_v55, %v105_v44 }
  0x89   :  { %v210_v1 = vmax.f32 %v194_v56, 0.0  ;;  %v211_v2 = vmax.f32 %v195_v57, 0.0  ;;  %v212_v3 = vmax.f32 %v196_v58, 0.0  ;;  %v213_v8 = vmax.f32 %v197_v59, 0.0 }
  0x8a   :  { %v214_v9 = vmax.f32 %v198_v60, 0.0  ;;  %v215_v14 = vmax.f32 %v199_v61, 0.0  ;;  %v216_v15 = vmax.f32 %v200_v62, 0.0  ;;  %v217_v16 = vmax.f32 %v201_v63, 0.0 }
  0x8b   :  { %v222_v17 = vpack.c.bf16 %v211_v2, %v210_v1  ;;  %v223_v18 = vpack.c.bf16 %v213_v8, %v212_v3  ;;  %v170_v19 = vadd.f32 %v163_v0, %v142_v22  ;;  %v171_v20 = vadd.f32 %v163_v0, %v143_v23 }
  0x8c   :  { %v224_v21 = vpack.c.bf16 %v215_v14, %v214_v9  ;;  %v225_v26 = vpack.c.bf16 %v217_v16, %v216_v15  ;;  %v172_v49 = vadd.f32 %v163_v0, %v144_v24  ;;  %v173_v43 = vadd.f32 %v163_v0, %v145_v25 }
  0x8d   :  { %230 = vst [vmem:[%s428_s6 + $0x20] sm:$0xff] %v222_v17  ;;  %v174_v50 = vadd.f32 %v163_v0, %v146_v27  ;;  %v175_v39 = vadd.f32 %v163_v0, %v147_v28  ;;  %v176_v40 = vadd.f32 %v163_v0, %v148_v34  ;;  %v177_v41 = vadd.f32 %v163_v0, %v149_v48 }
  0x8e   :  { %231 = vst [vmem:[%s428_s6 + $0x28] sm:$0xff] %v223_v18  ;;  %v186_v42 = vadd.f32 %v170_v19, %v374_v4  ;;  %v187_v22 = vadd.f32 %v171_v20, %v376_v5  ;;  %v188_v23 = vadd.f32 %v172_v49, %v378_v6  ;;  %v189_v24 = vadd.f32 %v173_v43, %v380_v7 }
  0x8f   :  { %232 = vst [vmem:[%s428_s6 + $0x30] sm:$0xff] %v224_v21  ;;  %v190_v25 = vadd.f32 %v174_v50, %v382_v10  ;;  %v191_v27 = vadd.f32 %v175_v39, %v384_v11  ;;  %v192_v28 = vadd.f32 %v176_v40, %v386_v12  ;;  %v193_v34 = vadd.f32 %v177_v41, %v388_v13 }
  0x90   :  { %233 = vst [vmem:[%s428_s6 + $0x38] sm:$0xff] %v225_v26  ;;  %v202_v4 = vmax.f32 %v186_v42, 0.0  ;;  %v203_v5 = vmax.f32 %v187_v22, 0.0  ;;  %v204_v6 = vmax.f32 %v188_v23, 0.0  ;;  %v205_v7 = vmax.f32 %v189_v24, 0.0 }
  0x91   :  { %v206_v48 = vmax.f32 %v190_v25, 0.0  ;;  %v207_v44 = vmax.f32 %v191_v27, 0.0  ;;  %v208_v45 = vmax.f32 %v192_v28, 0.0  ;;  %v209_v46 = vmax.f32 %v193_v34, 0.0 }
  0x92   :  { %v218_v47 = vpack.c.bf16 %v203_v5, %v202_v4  ;;  %v219_v10 = vpack.c.bf16 %v205_v7, %v204_v6 }
  0x93   :  { %v220_v29 = vpack.c.bf16 %v207_v44, %v206_v48  ;;  %v221_v11 = vpack.c.bf16 %v209_v46, %v208_v45 }
  0x94   :  { %226 = vst [vmem:[%s428_s6] sm:$0xff] %v218_v47 }
  0x95   :  { %227 = vst [vmem:[%s428_s6 + $0x8] sm:$0xff] %v219_v10 }
  0x96   :  { %228 = vst [vmem:[%s428_s6 + $0x10] sm:$0xff] %v220_v29 }
  0x97   :  { %229 = vst [vmem:[%s428_s6 + $0x18] sm:$0xff] %v221_v11 }

// kernel: resnet_forward.28
= control target key start
LH: loop header
LB: loop body
LE: loop exit
PB: predicated region body
PF: predicated region fallthrough
CT: control target
= control target key end

     0   :  { %s922_s12 = smov 0   ;;  %s924_s13 = smov 0   ;;  %s1142_s0 = inlined_call_operand.vmem [shape: bf16[144,256], index: 0, kind: input, shape index: {}]   ;;  %s1143_s1 = inlined_call_operand.vmem [shape: bf16[64,144], index: 1, kind: input, shape index: {}]   ;;  %s1144_s2 = inlined_call_operand.vmem [shape: bf16[64,256], index: 2, kind: output, shape index: {0}]   ;;  %s1145_s3 = inlined_call_operand.vmem [shape: f32[2,128,1], index: 3, kind: output, shape index: {1}]  }
   0x1   :  { %s926_s14 = smov 0  }
   0x2 LB: > { %s938_s15 = sadd.s32 4294967295, %s900_s14   ;;  %s941_s16 = sadd.s32 1, %s900_s14   ;;  %s900_s14 = sphi %s926_s14, %s1149_s14   ;;  %s896_s13 = sphi %s924_s13, %s1148_s13   ;;  %s892_s12 = sphi %s922_s12, %s1147_s12  }
   0x3   : > { %s18_s17 = ssub.s32 %s900_s14, %s941_s16  ;;  %s21_s18 = sadd.s32 1, %s896_s13 }
   0x4   : > { %p19_p0 = scmp.eq.s32.totalorder %s18_s17, 0  ;;  %p28_p1 = scmp.ne.s32.totalorder %s896_s13, %s892_s12 }
   0x5   : > { %p29_p2 = scmp.eq.s32.totalorder %s900_s14, 0  ;;  %p79_p3 = scmp.eq.s32.totalorder %s938_s15, 1 }
   0x6   : > { %s951_s19 = scalar_select %p19_p0, %s896_s13, %s21_s18  }
   0x7   : > { %p30_p4 = por %p29_p2, %p28_p1  ;;  %p953_p5 = por %p79_p3, %p28_p1 }
   0x8   : > { %p720_p6 = scmp.ge.s32.totalorder %s900_s14, 2 }
   0xa   : > { %130 = sbr.rel (%p720_p6) target bundleno = 38 (0x26), region = 20 }
   0xf   : > { %133 = sbr.rel (!%p30_p4) target bundleno = 38 (0x26), region = 24  ;;  %s135_s21 = sand.u32 (%p30_p4), 1, %s896_s13  }
  0x10   : > { %s721_s22 = sshll.u32 (%p30_p4), %s900_s14, 2  ;;  %s852_s23 = smul.u32 (%p30_p4), 72, %s135_s21 }
  0x11   : > { %s963_s26 = scalar_lea.vmem (%p30_p4), %s1142_s0, %s721_s22 }
  0x12   : > { %v156_v0 = vld [vmem:[%s963_s26] sm:$0xf] (%p30_p4)  ;;  %v158_v1 = vld [vmem:[%s963_s26 + $0x8] sm:$0xf] (%p30_p4)  ;;  %v160_v2 = vld [vmem:[%s963_s26 + $0x10] sm:$0xf] (%p30_p4) }
  0x13   : > { %s968_s27 = scalar_lea.vmem (%p30_p4), [#allocation2], %s852_s23  ;;  %v162_v3 = vld [vmem:[%s963_s26 + $0x18] sm:$0xf] (%p30_p4)  ;;  %v164_v4 = vld [vmem:[%s963_s26 + $0x20] sm:$0xf] (%p30_p4) }
  0x14   : > { %157 = vst [vmem:[%s968_s27] sm:$0xf] %v156_v0  ;;  %v166_v5 = vld [vmem:[%s963_s26 + $0x28] sm:$0xf]  ;;  %v168_v6 = vld [vmem:[%s963_s26 + $0x30] sm:$0xf] }
  0x15   : > { %159 = vst [vmem:[%s968_s27 + $0x4] sm:$0xf] %v158_v1  ;;  %v170_v7 = vld [vmem:[%s963_s26 + $0x38] sm:$0xf]  ;;  %v172_v8 = vld [vmem:[%s963_s26 + $0x40] sm:$0xf] }
  0x16   : > { %161 = vst [vmem:[%s968_s27 + $0x8] sm:$0xf] %v160_v2  ;;  %v174_v9 = vld [vmem:[%s963_s26 + $0x48] sm:$0xf]  ;;  %v176_v10 = vld [vmem:[%s963_s26 + $0x50] sm:$0xf] }
  0x17   : > { %163 = vst [vmem:[%s968_s27 + $0xc] sm:$0xf] %v162_v3  ;;  %v178_v11 = vld [vmem:[%s963_s26 + $0x58] sm:$0xf]  ;;  %v180_v12 = vld [vmem:[%s963_s26 + $0x60] sm:$0xf] }
  0x18   : > { %165 = vst [vmem:[%s968_s27 + $0x10] sm:$0xf] %v164_v4  ;;  %v182_v13 = vld [vmem:[%s963_s26 + $0x68] sm:$0xf]  ;;  %v184_v14 = vld [vmem:[%s963_s26 + $0x70] sm:$0xf] }
  0x19   : > { %167 = vst [vmem:[%s968_s27 + $0x14] sm:$0xf] %v166_v5  ;;  %v186_v15 = vld [vmem:[%s963_s26 + $0x78] sm:$0xf]  ;;  %v188_v16 = vld [vmem:[%s963_s26 + $0x80] sm:$0xf] }
  0x1a   : > { %169 = vst [vmem:[%s968_s27 + $0x18] sm:$0xf] %v168_v6  ;;  %v190_v17 = vld [vmem:[%s963_s26 + $0x88] sm:$0xf] }
  0x1b   : > { %171 = vst [vmem:[%s968_s27 + $0x1c] sm:$0xf] %v170_v7 }
  0x1c   : > { %173 = vst [vmem:[%s968_s27 + $0x20] sm:$0xf] %v172_v8 }
  0x1d   : > { %175 = vst [vmem:[%s968_s27 + $0x24] sm:$0xf] %v174_v9 }
  0x1e   : > { %177 = vst [vmem:[%s968_s27 + $0x28] sm:$0xf] %v176_v10 }
  0x1f   : > { %179 = vst [vmem:[%s968_s27 + $0x2c] sm:$0xf] %v178_v11 }
  0x20   : > { %181 = vst [vmem:[%s968_s27 + $0x30] sm:$0xf] %v180_v12 }
  0x21   : > { %183 = vst [vmem:[%s968_s27 + $0x34] sm:$0xf] %v182_v13 }
  0x22   : > { %185 = vst [vmem:[%s968_s27 + $0x38] sm:$0xf] %v184_v14 }
  0x23   : > { %187 = vst [vmem:[%s968_s27 + $0x3c] sm:$0xf] %v186_v15 }
  0x24   : > { %189 = vst [vmem:[%s968_s27 + $0x40] sm:$0xf] %v188_v16 }
  0x25   : > { %191 = vst [vmem:[%s968_s27 + $0x44] sm:$0xf] %v190_v17 }
  0x26 PF: > { %p722_p7 = scmp.ge.s32.totalorder %s900_s14, 1  ;;  %p250_p8 = scmp.lt.s32.totalorder %s900_s14, 3 }
  0x28   : > { %p251_p9 = pnand %p722_p7, %p250_p8 }
  0x29   : > { %s257_s28 = sand.u32 (!%p251_p9), 1, %s892_s12   ;;  %p284_p10 = scmp.lt.s32.totalorder (!%p251_p9), %s938_s15, 1 }
  0x2a   : > { %254 = sbr.rel (%p251_p9) target bundleno = 373 (0x175), region = 65  ;;  %s723_s22 = sshll.u32 (!%p251_p9), %s257_s28, 5 }
  0x2b   : > { %s853_s29 = smul.u32 (!%p251_p9), 72, %s257_s28  ;;  %s1073_s23 = scalar_lea.vmem (!%p251_p9), [#allocation3], %s723_s22 }
  0x2d   : > { %s1014_s7 = scalar_lea.vmem (!%p251_p9), [#allocation2], %s853_s29 }
  0x2f   : > { %v805_v18 = vld [vmem:[%s1143_s1 + $0x14] sm:$0xf]  ;;  %v738_v19 = vld [vmem:[%s1143_s1 + $0x18] sm:$0xf0]  ;;  %v803_v21 = vld [vmem:[%s1143_s1 + $0x4] sm:$0xf] }
  0x30   : > { %v818_v20 = vld [vmem:[%s1014_s7 + $0x38] sm:$0xff]  ;;  %v730_v22 = vld [vmem:[%s1143_s1 + $0x8] sm:$0xf0]  ;;  %v817_v24 = vld [vmem:[%s1014_s7 + $0x30] sm:$0xff]  ;;  %v741_v25 = vor.u32 %v805_v18, %v738_v19  ;;  %vm406_vm0 = vcmask 130048   ;;  %s285_s12 = scalar_select %p284_p10, %s938_s15, 1 }
  0x31   : > { %v819_v23 = vld [vmem:[%s1014_s7 + $0x40] sm:$0xff]  ;;  %419 = vmatpush.bf16.msra.mxu0 %v818_v20  ;;  %843 = vmatpush.bf16.msra.mxu2 %v818_v20  ;;  %v733_v26 = vor.u32 %v803_v21, %v730_v22  ;;  %v816_v27 = vld [vmem:[%s1014_s7 + $0x28] sm:$0xff]  ;;  %v814_v29 = vld [vmem:[%s1014_s7 + $0x18] sm:$0xff]  ;;  %vm509_vm1 = vcmask 7168   ;;  %s799_s27 = sshll.u32 (%p953_p5), %s938_s15, 2 }
  0x32   : > { %851 = vmatpush.bf16.msra.mxu3 %v819_v23  ;;  %455 = vmatpush.bf16.msra.mxu1 %v819_v23  ;;  %v815_v28 = vld [vmem:[%s1014_s7 + $0x20] sm:$0xff]  ;;  %v813_v32 = vld [vmem:[%s1014_s7 + $0x10] sm:$0xff]  ;;  %v812_v34 = vld [vmem:[%s1014_s7 + $0x8] sm:$0xff]  ;;  %s802_s28 = sshll.u32 %s285_s12, 7  ;;  %s563_s4 = scalar_lea.vmem (%p953_p5), %s1144_s2, %s799_s27 }
  0x33   : > { %v807_v30 = vld [vmem:[%s1143_s1 + $0x24] sm:$0xf]  ;;  %v746_v31 = vld [vmem:[%s1143_s1 + $0x28] sm:$0xf0]  ;;  %v728_v35 = vld [vmem:[%s1143_s1] sm:$0xf]  ;;  %s1084_s26 = scalar_lea.vmem %s1145_s3, %s802_s28 }
  0x34   : > { %v749_v33 = vor.u32 %v807_v30, %v746_v31  ;;  %v804_v36 = vld [vmem:[%s1143_s1 + $0x4] sm:$0xf0]  ;;  %v744_v38 = vld [vmem:[%s1143_s1 + $0x20] sm:$0xf]  ;;  %v809_v42 = vld [vmem:[%s1143_s1 + $0x34] sm:$0xf] }
  0x35   : > { %420 = vmatpush.bf16.msra.mxu0 %v817_v24  ;;  %844 = vmatpush.bf16.msra.mxu2 %v817_v24  ;;  %v811_v37 = vld [vmem:[%s1014_s7] sm:$0xff]  ;;  %v729_v40 = vor.u32 %v804_v36, %v728_v35  ;;  %v754_v43 = vld [vmem:[%s1143_s1 + $0x38] sm:$0xf0]  ;;  %v736_v45 = vld [vmem:[%s1143_s1 + $0x10] sm:$0xf] }
  0x36   : > { %795 = vmatmul.msk.bf16.vlgmr.msra.gmra.mxu3 %vm406_vm0, %v741_v25  ;;  %794 = vmatmul.msk.bf16.vlgmr.msra.gmra.mxu1 %vm406_vm0, %v733_v26  ;;  %v808_v39 = vld [vmem:[%s1143_s1 + $0x24] sm:$0xf0]  ;;  %v757_v44 = vor.u32 %v809_v42, %v754_v43  ;;  %v806_v46 = vld [vmem:[%s1143_s1 + $0x14] sm:$0xf0]  ;;  %v752_v47 = vld [vmem:[%s1143_s1 + $0x30] sm:$0xf] }
  0x37   : > { %v745_v41 = vor.u32 %v808_v39, %v744_v38  ;;  %v810_v48 = vld [vmem:[%s1143_s1 + $0x34] sm:$0xf0]  ;;  %v737_v49 = vor.u32 %v806_v46, %v736_v45 }
  0x38   : > { %v753_v50 = vor.u32 %v810_v48, %v752_v47 }
  0x39   : > { %421 = vmatpush.bf16.msra.mxu0 %v816_v27  ;;  %845 = vmatpush.bf16.msra.mxu2 %v816_v27 }
  0x3d   : > { %422 = vmatpush.bf16.msra.mxu0 %v815_v28  ;;  %846 = vmatpush.bf16.msra.mxu2 %v815_v28 }
  0x41   : > { %423 = vmatpush.bf16.msra.mxu0 %v814_v29  ;;  %847 = vmatpush.bf16.msra.mxu2 %v814_v29 }
  0x45   : > { %424 = vmatpush.bf16.msra.mxu0 %v813_v32  ;;  %848 = vmatpush.bf16.msra.mxu2 %v813_v32 }
  0x46   : > { %796 = vmatmul.msk.bf16.gmra.mxu3 %vm406_vm0, %v749_v33 }
  0x49   : > { %425 = vmatpush.bf16.msra.mxu0 %v812_v34  ;;  %849 = vmatpush.bf16.msra.mxu2 %v812_v34 }
  0x4d   : > { %426 = vmatpush.bf16.msra.mxu0 %v811_v37  ;;  %850 = vmatpush.bf16.msra.mxu2 %v811_v37 }
  0x50   : > { %427 = vmatmul.bf16.vlgmr.msra.gmra.mxu0 %v729_v40  ;;  %437 = vmatmul.bf16.vlgmr.msra.gmra.mxu2 %v745_v41 }
  0x56   : > { %797 = vmatmul.msk.bf16.gmra.mxu3 %vm406_vm0, %v757_v44 }
  0x60   : > { %432 = vmatmul.bf16.gmra.mxu0 %v737_v49  ;;  %442 = vmatmul.bf16.gmra.mxu2 %v753_v50 }
  0xb3   : > { %v457_v53 = vpop.f32.mrf.mxu1 }
  0xb9   : > { %v462_v51 = vpop.f32.mrf.mxu3 }
  0xbb   : > { %v459_v59 = vpop.f32.mrf.mxu1 }
  0xc1   : > { %v464_v52 = vpop.f32.mrf.mxu3 }
  0xc9   : > { %v467_v54 = vpop.f32.mrf.mxu3 }
  0xcd   : > { %v428_v55 = vpop.f32.mrf.mxu0 }
  0xce   : > { %v458_v56 = vadd.f32 %v457_v53, %v428_v55 }
  0xd0   : > { %493 = vadd.xlane.f32.xlu0 %v458_v56  ;;  %v518_v57 = vmul.f32 %v458_v56, %v458_v56 }
  0xd1   : > { %v469_v61 = vpop.f32.mrf.mxu3 }
  0xd2   : > { %526 = vadd.xlane.f32.xlu2 %v518_v57 }
  0xd3   : > { %v438_v58 = vpop.f32.mrf.mxu2 }
  0xd4   : > { %v468_v63 = vadd.f32 %v467_v54, %v438_v58 }
  0xd5   : > { %v430_v60 = vpop.f32.mrf.mxu0 }
  0xd6   : > { %v460_v62 = vadd.f32 %v459_v59, %v430_v60  ;;  %v522_v3 = vmul.f32 %v468_v63, %v468_v63 }
  0xd8   : > { %v823_v0 = vpack.c.bf16 %v460_v62, %v458_v56  ;;  %495 = vadd.xlane.f32.xlu0 %v460_v62  ;;  %v519_v11 = vmul.f32 %v460_v62, %v460_v62 }
  0xd9   : > { %v472_v7 = vpop.f32.mrf.mxu3 }
  0xda   : > { %824 = vst [vmem:[%s1073_s23] sm:$0xff] %v823_v0   ;;  %501 = vadd.xlane.f32.xlu2 %v468_v63 }
  0xdb   : > { %v440_v1 = vpop.f32.mrf.mxu2 }
  0xdc   : > { %v470_v2 = vadd.f32 %v469_v61, %v440_v1 }
  0xdd   : > { %v433_v4 = vpop.f32.mrf.mxu0 }
  0xde   : > { %v463_v5 = vadd.f32 %v462_v51, %v433_v4  ;;  %v833_v6 = vpack.c.bf16 %v470_v2, %v468_v63  ;;  %v523_v22 = vmul.f32 %v470_v2, %v470_v2 }
  0xe0   : > { %841 = vst [vmem:[%s1073_s23 + $0x10] sm:$0xff] %v833_v6   ;;  %534 = vadd.xlane.f32.xlu0 %v522_v3  ;;  %497 = vadd.xlane.f32.xlu1 %v463_v5  ;;  %v520_v12 = vmul.f32 %v463_v5, %v463_v5 }
  0xe1   : > { %v474_v15 = vpop.f32.mrf.mxu3  ;;  %v580_v39 = vld [vmem:[%s1073_s23] sm:$0xf] (%p953_p5)  ;;  %v582_v40 = vld [vmem:[%s1073_s23 + $0x4] sm:$0xf] (%p953_p5) }
  0xe2   : > { %503 = vadd.xlane.f32.xlu2 %v470_v2  ;;  %581 = vst [vmem:[%s563_s4] sm:$0xf] (%p953_p5), %v580_v39 }
  0xe3   : > { %v443_v8 = vpop.f32.mrf.mxu2  ;;  %583 = vst [vmem:[%s563_s4 + $0x8] sm:$0xf] (%p953_p5), %v582_v40 }
  0xe4   : > { %v473_v16 = vadd.f32 %v472_v7, %v443_v8 }
  0xe5   : > { %v435_v9 = vpop.f32.mrf.mxu0 }
  0xe6   : > { %v465_v10 = vadd.f32 %v464_v52, %v435_v9  ;;  %v524_v20 = vmul.f32 %v473_v16, %v473_v16 }
  0xe7   : > { %v588_v43 = vld [vmem:[%s1073_s23 + $0x10] sm:$0xf] (%p953_p5)  ;;  %v590_v44 = vld [vmem:[%s1073_s23 + $0x14] sm:$0xf] (%p953_p5) }
  0xe8   : > { %v828_v13 = vpack.c.bf16 %v465_v10, %v463_v5  ;;  %528 = vadd.xlane.f32.xlu0 %v519_v11  ;;  %530 = vadd.xlane.f32.xlu1 %v520_v12  ;;  %v521_v14 = vmul.f32 %v465_v10, %v465_v10  ;;  %589 = vst [vmem:[%s563_s4 + $0x20] sm:$0xf] (%p953_p5), %v588_v43 }
  0xe9   : > { %591 = vst [vmem:[%s563_s4 + $0x28] sm:$0xf] (%p953_p5), %v590_v44 }
  0xea   : > { %840 = vst [vmem:[%s1073_s23 + $0x8] sm:$0xff] %v828_v13   ;;  %532 = vadd.xlane.f32.xlu2 %v521_v14 }
  0xeb   : > { %v445_v17 = vpop.f32.mrf.mxu2 }
  0xec   : > { %v475_v18 = vadd.f32 %v474_v15, %v445_v17 }
  0xee   : > { %v838_v19 = vpack.c.bf16 %v475_v18, %v473_v16  ;;  %v525_v21 = vmul.f32 %v475_v18, %v475_v18 }
  0xf0   : > { %842 = vst [vmem:[%s1073_s23 + $0x18] sm:$0xff] %v838_v19   ;;  %505 = vadd.xlane.f32.xlu0 %v473_v16  ;;  %499 = vadd.xlane.f32.xlu1 %v465_v10 }
  0xf1   : > { %v584_v41 = vld [vmem:[%s1073_s23 + $0x8] sm:$0xf] (%p953_p5)  ;;  %v586_v42 = vld [vmem:[%s1073_s23 + $0xc] sm:$0xf] (%p953_p5) }
  0xf2   : > { %538 = vadd.xlane.f32.xlu2 %v524_v20  ;;  %585 = vst [vmem:[%s563_s4 + $0x10] sm:$0xf] (%p953_p5), %v584_v41 }
  0xf3   : > { %587 = vst [vmem:[%s563_s4 + $0x18] sm:$0xf] (%p953_p5), %v586_v42 }
  0xf7   : > { %v592_v45 = vld [vmem:[%s1073_s23 + $0x18] sm:$0xf] (%p953_p5)  ;;  %v594_v46 = vld [vmem:[%s1073_s23 + $0x1c] sm:$0xf] (%p953_p5) }
  0xf8   : > { %540 = vadd.xlane.f32.xlu0 %v525_v21  ;;  %507 = vadd.xlane.f32.xlu1 %v475_v18  ;;  %593 = vst [vmem:[%s563_s4 + $0x30] sm:$0xf] (%p953_p5), %v592_v45 }
  0xf9   : > { %595 = vst [vmem:[%s563_s4 + $0x38] sm:$0xf] (%p953_p5), %v594_v46 }
 0x100   : > { %536 = vadd.xlane.f32.xlu1 %v523_v22 }
 0x143   : > { %v494_v23 = vpop.xlane.xlu0 %493 }
 0x144   : > { %510 = vst.msk [vmem:[%s1084_s26] sm:$0xff] %vm509_vm1, %v494_v23 }
 0x145   : > { %v527_v24 = vpop.xlane.xlu2 %526 }
 0x146   : > { %542 = vst.msk [vmem:[%s1084_s26 + $0x40] sm:$0xff] %vm509_vm1, %v527_v24 }
 0x14b   : > { %v496_v25 = vpop.xlane.xlu0 %495 }
 0x14c   : > { %511 = vst.msk [vmem:[%s1084_s26 + $0x8] sm:$0xff] %vm509_vm1, %v496_v25 }
 0x14d   : > { %v502_v26 = vpop.xlane.xlu2 %501 }
 0x14e   : > { %514 = vst.msk [vmem:[%s1084_s26 + $0x20] sm:$0xff] %vm509_vm1, %v502_v26 }
 0x153   : > { %v535_v27 = vpop.xlane.xlu0 %534  ;;  %v498_v28 = vpop.xlane.xlu1 %497 }
 0x154   : > { %546 = vst.msk [vmem:[%s1084_s26 + $0x60] sm:$0xff] %vm509_vm1, %v535_v27 }
 0x155   : > { %512 = vst.msk [vmem:[%s1084_s26 + $0x10] sm:$0xff] %vm509_vm1, %v498_v28  ;;  %v504_v29 = vpop.xlane.xlu2 %503 }
 0x156   : > { %515 = vst.msk [vmem:[%s1084_s26 + $0x28] sm:$0xff] %vm509_vm1, %v504_v29 }
 0x15b   : > { %v529_v30 = vpop.xlane.xlu0 %528  ;;  %v531_v31 = vpop.xlane.xlu1 %530 }
 0x15c   : > { %543 = vst.msk [vmem:[%s1084_s26 + $0x48] sm:$0xff] %vm509_vm1, %v529_v30 }
 0x15d   : > { %544 = vst.msk [vmem:[%s1084_s26 + $0x50] sm:$0xff] %vm509_vm1, %v531_v31  ;;  %v533_v32 = vpop.xlane.xlu2 %532 }
 0x15e   : > { %545 = vst.msk [vmem:[%s1084_s26 + $0x58] sm:$0xff] %vm509_vm1, %v533_v32 }
 0x163   : > { %v506_v33 = vpop.xlane.xlu0 %505  ;;  %v500_v34 = vpop.xlane.xlu1 %499 }
 0x164   : > { %516 = vst.msk [vmem:[%s1084_s26 + $0x30] sm:$0xff] %vm509_vm1, %v506_v33 }
 0x165   : > { %513 = vst.msk [vmem:[%s1084_s26 + $0x18] sm:$0xff] %vm509_vm1, %v500_v34  ;;  %v539_v35 = vpop.xlane.xlu2 %538 }
 0x166   : > { %548 = vst.msk [vmem:[%s1084_s26 + $0x70] sm:$0xff] %vm509_vm1, %v539_v35 }
 0x16b   : > { %v541_v36 = vpop.xlane.xlu0 %540  ;;  %v508_v37 = vpop.xlane.xlu1 %507 }
 0x16c   : > { %549 = vst.msk [vmem:[%s1084_s26 + $0x78] sm:$0xff] %vm509_vm1, %v541_v36 }
 0x16d   : > { %517 = vst.msk [vmem:[%s1084_s26 + $0x38] sm:$0xff] %vm509_vm1, %v508_v37 }
 0x170   : > { %561 = sbr.rel (!%p953_p5) target bundleno = 373 (0x175), region = 73 }
 0x173   : > { %v537_v38 = vpop.xlane.xlu1 %536 }
 0x174   : > { %547 = vst.msk [vmem:[%s1084_s26 + $0x68] sm:$0xff] %vm509_vm1, %v537_v38 }
 0x175 PF: > { %p11_p11 = scmp.ge.s32.totalorder %s941_s16, 4   ;;  %s1147_s12 = smov %s896_s13 }
 0x176   : > { %s1148_s13 = smov %s951_s19  ;;  %s1149_s14 = smov %s941_s16 }
 0x177   :  { %13 = sbr.rel (!%p11_p11) target bundleno = 2 (0x2), region = 157 }

// kernel: resnet_forward.29
= control target key start
LH: loop header
LB: loop body
LE: loop exit
PB: predicated region body
PF: predicated region fallthrough
CT: control target
= control target key end

     0   :  { %v114_v0 = vmov 0   ;;  %s183_s1 = inlined_call_operand.vmem [shape: f32[32,1], index: 1, kind: input, shape index: {}]   ;;  %s184_s2 = inlined_call_operand.vmem [shape: f32[32,1], index: 2, kind: input, shape index: {}]   ;;  %s185_s0 = inlined_call_operand.vmem [shape: bf16[64,256], index: 0, kind: input, shape index: {}]   ;;  %s186_s3 = inlined_call_operand.vmem [shape: bf16[32,256], index: 3, kind: output, shape index: {}]  }
   0x1   :  { %112 = vset.pattern.permute.xlu1 %v114_v0  ;;  %111 = vset.pattern.permute.xlu0 %v114_v0  ;;  %v28_v1 = vld [vmem:[%s183_s1 + $0x10] sm:$0xff]  ;;  %v26_v2 = vld [vmem:[%s183_s1] sm:$0xff]  ;;  %v29_v4 = vld [vmem:[%s183_s1 + $0x18] sm:$0xff] }
   0x2   :  { %42 = vperm.xlu1 %112, %v28_v1   ;;  %32 = vperm.xlu0 %111, %v26_v2   ;;  %v58_v3 = vld [vmem:[%s184_s2] sm:$0xff]  ;;  %v27_v5 = vld [vmem:[%s183_s1 + $0x8] sm:$0xff]  ;;  %v61_v7 = vld [vmem:[%s184_s2 + $0x18] sm:$0xff] }
   0x3   :  { %113 = vset.pattern.permute.xlu2 %v114_v0  ;;  %v59_v6 = vld [vmem:[%s184_s2 + $0x8] sm:$0xff]  ;;  %v60_v8 = vld [vmem:[%s184_s2 + $0x10] sm:$0xff]  ;;  %v14_v9 = vld [vmem:[%s185_s0] sm:$0xff] }
   0x4   :  { %64 = vperm.xlu2 %113, %v58_v3   ;;  %v18_v10 = vunpack.c.l.bf16 %v14_v9  ;;  %v19_v11 = vunpack.c.h.bf16 %v14_v9  ;;  %v15_v17 = vld [vmem:[%s185_s0 + $0x8] sm:$0xff]  ;;  %v16_v24 = vld [vmem:[%s185_s0 + $0x10] sm:$0xff]  ;;  %v17_v27 = vld [vmem:[%s185_s0 + $0x18] sm:$0xff] }
   0x5   :  { %v20_v22 = vunpack.c.l.bf16 %v15_v17  ;;  %v21_v23 = vunpack.c.h.bf16 %v15_v17  ;;  %v22_v31 = vunpack.c.l.bf16 %v16_v24  ;;  %v23_v32 = vunpack.c.h.bf16 %v16_v24 }
   0x6   :  { %v24_v34 = vunpack.c.l.bf16 %v17_v27  ;;  %v25_v35 = vunpack.c.h.bf16 %v17_v27 }
   0xa   :  { %47 = vperm.xlu1 %112, %v29_v4   ;;  %37 = vperm.xlu0 %111, %v27_v5  }
   0xc   :  { %69 = vperm.xlu2 %113, %v59_v6  }
  0x12   :  { %79 = vperm.xlu1 %112, %v61_v7   ;;  %74 = vperm.xlu0 %111, %v60_v8  }
  0x5e   :  { %v65_v12 = vpop.permute.xlu2 %64 }
  0x66   :  { %v70_v33 = vpop.permute.xlu2 %69 }
  0x74   :  { %v43_v13 = vpop.permute.xlu1 %42  ;;  %v33_v14 = vpop.permute.xlu0 %32 }
  0x75   :  { %v50_v15 = vmul.f32 %v33_v14, %v18_v10  ;;  %v51_v16 = vmul.f32 %v33_v14, %v19_v11  ;;  %v54_v40 = vmul.f32 %v43_v13, %v22_v31  ;;  %v55_v41 = vmul.f32 %v43_v13, %v23_v32 }
  0x77   :  { %v82_v18 = vadd.f32 %v65_v12, %v50_v15  ;;  %v83_v19 = vadd.f32 %v65_v12, %v51_v16 }
  0x79   :  { %v90_v20 = vmax.f32 %v82_v18, 0.0  ;;  %v91_v21 = vmax.f32 %v83_v19, 0.0 }
  0x7b   :  { %v98_v25 = vpack.c.bf16 %v91_v21, %v90_v20 }
  0x7c   :  { %v48_v26 = vpop.permute.xlu1 %47  ;;  %v38_v28 = vpop.permute.xlu0 %37 }
  0x7d   :  { %102 = vst [vmem:[%s186_s3] sm:$0xff] %v98_v25  ;;  %v52_v29 = vmul.f32 %v38_v28, %v20_v22  ;;  %v53_v30 = vmul.f32 %v38_v28, %v21_v23  ;;  %v56_v42 = vmul.f32 %v48_v26, %v24_v34  ;;  %v57_v43 = vmul.f32 %v48_v26, %v25_v35 }
  0x7f   :  { %v84_v36 = vadd.f32 %v70_v33, %v52_v29  ;;  %v85_v37 = vadd.f32 %v70_v33, %v53_v30 }
  0x81   :  { %v92_v38 = vmax.f32 %v84_v36, 0.0  ;;  %v93_v39 = vmax.f32 %v85_v37, 0.0 }
  0x83   :  { %v99_v44 = vpack.c.bf16 %v93_v39, %v92_v38 }
  0x84   :  { %v80_v45 = vpop.permute.xlu1 %79  ;;  %v75_v46 = vpop.permute.xlu0 %74 }
  0x85   :  { %103 = vst [vmem:[%s186_s3 + $0x8] sm:$0xff] %v99_v44  ;;  %v88_v47 = vadd.f32 %v80_v45, %v56_v42  ;;  %v89_v48 = vadd.f32 %v80_v45, %v57_v43  ;;  %v86_v49 = vadd.f32 %v75_v46, %v54_v40  ;;  %v87_v50 = vadd.f32 %v75_v46, %v55_v41 }
  0x87   :  { %v96_v51 = vmax.f32 %v88_v47, 0.0  ;;  %v97_v52 = vmax.f32 %v89_v48, 0.0  ;;  %v94_v53 = vmax.f32 %v86_v49, 0.0  ;;  %v95_v54 = vmax.f32 %v87_v50, 0.0 }
  0x89   :  { %v101_v55 = vpack.c.bf16 %v97_v52, %v96_v51  ;;  %v100_v56 = vpack.c.bf16 %v95_v54, %v94_v53 }
  0x8b   :  { %105 = vst [vmem:[%s186_s3 + $0x18] sm:$0xff] %v101_v55 }
  0x8c   :  { %104 = vst [vmem:[%s186_s3 + $0x10] sm:$0xff] %v100_v56 }

// kernel: resnet_forward.30
= control target key start
LH: loop header
LB: loop body
LE: loop exit
PB: predicated region body
PF: predicated region fallthrough
CT: control target
= control target key end

     0   :  { %s1021_s12 = smov 0   ;;  %s1023_s13 = smov 0   ;;  %s1240_s0 = inlined_call_operand.vmem [shape: bf16[288,256], index: 0, kind: input, shape index: {}]   ;;  %s1241_s1 = inlined_call_operand.vmem [shape: bf16[32,288], index: 1, kind: input, shape index: {}]   ;;  %s1242_s2 = inlined_call_operand.vmem [shape: bf16[32,256], index: 2, kind: output, shape index: {0}]   ;;  %s1243_s3 = inlined_call_operand.vmem [shape: f32[2,64,1], index: 3, kind: output, shape index: {1}]  }
   0x1   :  { %s1025_s14 = smov 0  }
   0x2 LB: > { %s1037_s15 = sadd.s32 4294967295, %s999_s14   ;;  %s1040_s16 = sadd.s32 1, %s999_s14   ;;  %s999_s14 = sphi %s1025_s14, %s1247_s14   ;;  %s995_s13 = sphi %s1023_s13, %s1246_s13   ;;  %s991_s12 = sphi %s1021_s12, %s1245_s12  }
   0x3   : > { %s18_s17 = ssub.s32 %s999_s14, %s1040_s16  ;;  %s21_s18 = sadd.s32 1, %s995_s13 }
   0x4   : > { %p19_p0 = scmp.eq.s32.totalorder %s18_s17, 0  ;;  %p28_p1 = scmp.ne.s32.totalorder %s995_s13, %s991_s12 }
   0x5   : > { %p29_p2 = scmp.eq.s32.totalorder %s999_s14, 0  ;;  %p79_p3 = scmp.eq.s32.totalorder %s1037_s15, 1 }
   0x6   : > { %s1050_s19 = scalar_select %p19_p0, %s995_s13, %s21_s18  }
   0x7   : > { %p30_p4 = por %p29_p2, %p28_p1  ;;  %p1052_p5 = por %p79_p3, %p28_p1 }
   0x8   : > { %p799_p6 = scmp.ge.s32.totalorder %s999_s14, 2 }
   0xa   : > { %130 = sbr.rel (%p799_p6) target bundleno = 56 (0x38), region = 20 }
   0xf   : > { %133 = sbr.rel (!%p30_p4) target bundleno = 56 (0x38), region = 24  ;;  %s135_s21 = sand.u32 (%p30_p4), 1, %s995_s13  }
  0x10   : > { %s800_s22 = sshll.u32 (%p30_p4), %s999_s14, 2  ;;  %s951_s23 = smul.u32 (%p30_p4), 144, %s135_s21 }
  0x11   : > { %s1062_s26 = scalar_lea.vmem (%p30_p4), %s1240_s0, %s800_s22 }
  0x12   : > { %v156_v0 = vld [vmem:[%s1062_s26] sm:$0xf] (%p30_p4)  ;;  %v158_v1 = vld [vmem:[%s1062_s26 + $0x8] sm:$0xf] (%p30_p4)  ;;  %v160_v2 = vld [vmem:[%s1062_s26 + $0x10] sm:$0xf] (%p30_p4) }
  0x13   : > { %s1067_s27 = scalar_lea.vmem (%p30_p4), [#allocation2], %s951_s23  ;;  %v162_v3 = vld [vmem:[%s1062_s26 + $0x18] sm:$0xf] (%p30_p4)  ;;  %v164_v4 = vld [vmem:[%s1062_s26 + $0x20] sm:$0xf] (%p30_p4) }
  0x14   : > { %157 = vst [vmem:[%s1067_s27] sm:$0xf] %v156_v0  ;;  %v166_v5 = vld [vmem:[%s1062_s26 + $0x28] sm:$0xf]  ;;  %v168_v6 = vld [vmem:[%s1062_s26 + $0x30] sm:$0xf] }
  0x15   : > { %159 = vst [vmem:[%s1067_s27 + $0x4] sm:$0xf] %v158_v1  ;;  %v170_v7 = vld [vmem:[%s1062_s26 + $0x38] sm:$0xf]  ;;  %v172_v8 = vld [vmem:[%s1062_s26 + $0x40] sm:$0xf] }
  0x16   : > { %161 = vst [vmem:[%s1067_s27 + $0x8] sm:$0xf] %v160_v2  ;;  %v174_v9 = vld [vmem:[%s1062_s26 + $0x48] sm:$0xf]  ;;  %v176_v10 = vld [vmem:[%s1062_s26 + $0x50] sm:$0xf] }
  0x17   : > { %163 = vst [vmem:[%s1067_s27 + $0xc] sm:$0xf] %v162_v3  ;;  %v178_v11 = vld [vmem:[%s1062_s26 + $0x58] sm:$0xf]  ;;  %v180_v12 = vld [vmem:[%s1062_s26 + $0x60] sm:$0xf] }
  0x18   : > { %165 = vst [vmem:[%s1067_s27 + $0x10] sm:$0xf] %v164_v4  ;;  %v182_v13 = vld [vmem:[%s1062_s26 + $0x68] sm:$0xf]  ;;  %v184_v14 = vld [vmem:[%s1062_s26 + $0x70] sm:$0xf] }
  0x19   : > { %167 = vst [vmem:[%s1067_s27 + $0x14] sm:$0xf] %v166_v5  ;;  %v186_v15 = vld [vmem:[%s1062_s26 + $0x78] sm:$0xf]  ;;  %v188_v16 = vld [vmem:[%s1062_s26 + $0x80] sm:$0xf] }
  0x1a   : > { %169 = vst [vmem:[%s1067_s27 + $0x18] sm:$0xf] %v168_v6  ;;  %v190_v17 = vld [vmem:[%s1062_s26 + $0x88] sm:$0xf]  ;;  %v192_v18 = vld [vmem:[%s1062_s26 + $0x90] sm:$0xf] }
  0x1b   : > { %171 = vst [vmem:[%s1067_s27 + $0x1c] sm:$0xf] %v170_v7  ;;  %v194_v19 = vld [vmem:[%s1062_s26 + $0x98] sm:$0xf]  ;;  %v196_v20 = vld [vmem:[%s1062_s26 + $0xa0] sm:$0xf] }
  0x1c   : > { %173 = vst [vmem:[%s1067_s27 + $0x20] sm:$0xf] %v172_v8  ;;  %v198_v21 = vld [vmem:[%s1062_s26 + $0xa8] sm:$0xf]  ;;  %v200_v22 = vld [vmem:[%s1062_s26 + $0xb0] sm:$0xf] }
  0x1d   : > { %175 = vst [vmem:[%s1067_s27 + $0x24] sm:$0xf] %v174_v9  ;;  %v202_v23 = vld [vmem:[%s1062_s26 + $0xb8] sm:$0xf]  ;;  %v204_v24 = vld [vmem:[%s1062_s26 + $0xc0] sm:$0xf] }
  0x1e   : > { %177 = vst [vmem:[%s1067_s27 + $0x28] sm:$0xf] %v176_v10  ;;  %v206_v25 = vld [vmem:[%s1062_s26 + $0xc8] sm:$0xf]  ;;  %v208_v26 = vld [vmem:[%s1062_s26 + $0xd0] sm:$0xf] }
  0x1f   : > { %179 = vst [vmem:[%s1067_s27 + $0x2c] sm:$0xf] %v178_v11  ;;  %v210_v27 = vld [vmem:[%s1062_s26 + $0xd8] sm:$0xf]  ;;  %v212_v28 = vld [vmem:[%s1062_s26 + $0xe0] sm:$0xf] }
  0x20   : > { %181 = vst [vmem:[%s1067_s27 + $0x30] sm:$0xf] %v180_v12  ;;  %v214_v29 = vld [vmem:[%s1062_s26 + $0xe8] sm:$0xf]  ;;  %v216_v30 = vld [vmem:[%s1062_s26 + $0xf0] sm:$0xf] }
  0x21   : > { %183 = vst [vmem:[%s1067_s27 + $0x34] sm:$0xf] %v182_v13  ;;  %v218_v31 = vld [vmem:[%s1062_s26 + $0xf8] sm:$0xf]  ;;  %v220_v32 = vld [vmem:[%s1062_s26 + $0x100] sm:$0xf] }
  0x22   : > { %185 = vst [vmem:[%s1067_s27 + $0x38] sm:$0xf] %v184_v14  ;;  %v222_v33 = vld [vmem:[%s1062_s26 + $0x108] sm:$0xf]  ;;  %v224_v34 = vld [vmem:[%s1062_s26 + $0x110] sm:$0xf] }
  0x23   : > { %187 = vst [vmem:[%s1067_s27 + $0x3c] sm:$0xf] %v186_v15  ;;  %v226_v35 = vld [vmem:[%s1062_s26 + $0x118] sm:$0xf] }
  0x24   : > { %189 = vst [vmem:[%s1067_s27 + $0x40] sm:$0xf] %v188_v16 }
  0x25   : > { %191 = vst [vmem:[%s1067_s27 + $0x44] sm:$0xf] %v190_v17 }
  0x26   : > { %193 = vst [vmem:[%s1067_s27 + $0x48] sm:$0xf] %v192_v18 }
  0x27   : > { %195 = vst [vmem:[%s1067_s27 + $0x4c] sm:$0xf] %v194_v19 }
  0x28   : > { %197 = vst [vmem:[%s1067_s27 + $0x50] sm:$0xf] %v196_v20 }
  0x29   : > { %199 = vst [vmem:[%s1067_s27 + $0x54] sm:$0xf] %v198_v21 }
  0x2a   : > { %201 = vst [vmem:[%s1067_s27 + $0x58] sm:$0xf] %v200_v22 }
  0x2b   : > { %203 = vst [vmem:[%s1067_s27 + $0x5c] sm:$0xf] %v202_v23 }
  0x2c   : > { %205 = vst [vmem:[%s1067_s27 + $0x60] sm:$0xf] %v204_v24 }
  0x2d   : > { %207 = vst [vmem:[%s1067_s27 + $0x64] sm:$0xf] %v206_v25 }
  0x2e   : > { %209 = vst [vmem:[%s1067_s27 + $0x68] sm:$0xf] %v208_v26 }
  0x2f   : > { %211 = vst [vmem:[%s1067_s27 + $0x6c] sm:$0xf] %v210_v27 }
  0x30   : > { %213 = vst [vmem:[%s1067_s27 + $0x70] sm:$0xf] %v212_v28 }
  0x31   : > { %215 = vst [vmem:[%s1067_s27 + $0x74] sm:$0xf] %v214_v29 }
  0x32   : > { %217 = vst [vmem:[%s1067_s27 + $0x78] sm:$0xf] %v216_v30 }
  0x33   : > { %219 = vst [vmem:[%s1067_s27 + $0x7c] sm:$0xf] %v218_v31 }
  0x34   : > { %221 = vst [vmem:[%s1067_s27 + $0x80] sm:$0xf] %v220_v32 }
  0x35   : > { %223 = vst [vmem:[%s1067_s27 + $0x84] sm:$0xf] %v222_v33 }
  0x36   : > { %225 = vst [vmem:[%s1067_s27 + $0x88] sm:$0xf] %v224_v34 }
  0x37   : > { %227 = vst [vmem:[%s1067_s27 + $0x8c] sm:$0xf] %v226_v35 }
  0x38 PF: > { %p801_p7 = scmp.ge.s32.totalorder %s999_s14, 1  ;;  %p322_p8 = scmp.lt.s32.totalorder %s999_s14, 3 }
  0x3a   : > { %p323_p9 = pnand %p801_p7, %p322_p8 }
  0x3b   : > { %s329_s28 = sand.u32 (!%p323_p9), 1, %s991_s12   ;;  %p356_p10 = scmp.lt.s32.totalorder (!%p323_p9), %s1037_s15, 1 }
  0x3c   : > { %326 = sbr.rel (%p323_p9) target bundleno = 377 (0x179), region = 65  ;;  %s802_s8 = sshll.u32 (!%p323_p9), %s329_s28, 4 }
  0x3d   : > { %s952_s29 = smul.u32 (!%p323_p9), 144, %s329_s28  ;;  %s1203_s9 = scalar_lea.vmem (!%p323_p9), [#allocation3], %s802_s8 }
  0x3f   : > { %s1143_s30 = scalar_lea.vmem (!%p323_p9), [#allocation2], %s952_s29 }
  0x41   : > { %v921_v36 = vld [vmem:[%s1143_s30 + $0x38] sm:$0xff]  ;;  %v920_v38 = vld [vmem:[%s1143_s30 + $0x30] sm:$0xff]  ;;  %v931_v40 = vld [vmem:[%s1143_s30 + $0x88] sm:$0xff]  ;;  %vm544_vm0 = vcmask 261120   ;;  %s357_s12 = scalar_select %p356_p10, %s1037_s15, 1  ;;  %vm624_vm1 = vcmask 7168  }
  0x42   : > { %v929_v37 = vld [vmem:[%s1143_s30 + $0x78] sm:$0xff]  ;;  %551 = vmatpush.bf16.msra.mxu0 %v921_v36  ;;  %v928_v39 = vld [vmem:[%s1143_s30 + $0x70] sm:$0xff]  ;;  %943 = vmatpush.bf16.msra.mxu3 %v921_v36  ;;  %v930_v41 = vld [vmem:[%s1143_s30 + $0x80] sm:$0xff]  ;;  %s904_s17 = sshll.u32 (%p1052_p5), %s1037_s15, 2 }
  0x43   : > { %570 = vmatpush.bf16.msra.mxu1 %v929_v37  ;;  %595 = vmatpush.bf16.msra.mxu2 %v931_v40  ;;  %v815_v42 = vld [vmem:[%s1241_s1 + $0x8] sm:$0xf]  ;;  %v910_v43 = vld [vmem:[%s1241_s1 + $0x10] sm:$0xf0]  ;;  %v827_v53 = vld [vmem:[%s1241_s1 + $0x20] sm:$0xf]  ;;  %s658_s22 = scalar_lea.vmem (%p1052_p5), %s1242_s2, %s904_s17 }
  0x44   : > { %v919_v44 = vld [vmem:[%s1143_s30 + $0x28] sm:$0xff]  ;;  %v816_v46 = vor.u32 %v910_v43, %v815_v42  ;;  %v918_v47 = vld [vmem:[%s1143_s30 + $0x20] sm:$0xff]  ;;  %v917_v49 = vld [vmem:[%s1143_s30 + $0x18] sm:$0xff]  ;;  %s907_s28 = sshll.u32 %s357_s12, 6 }
  0x45   : > { %v927_v45 = vld [vmem:[%s1143_s30 + $0x68] sm:$0xff]  ;;  %v926_v48 = vld [vmem:[%s1143_s30 + $0x60] sm:$0xff]  ;;  %v925_v50 = vld [vmem:[%s1143_s30 + $0x58] sm:$0xff]  ;;  %s360_s14 = scalar_lea.vmem %s1243_s3, %s907_s28 }
  0x46   : > { %552 = vmatpush.bf16.msra.mxu0 %v920_v38  ;;  %944 = vmatpush.bf16.msra.mxu3 %v920_v38  ;;  %v916_v51 = vld [vmem:[%s1143_s30 + $0x10] sm:$0xff]  ;;  %v913_v54 = vld [vmem:[%s1241_s1 + $0x28] sm:$0xf0]  ;;  %v914_v61 = vld [vmem:[%s1143_s30] sm:$0xff] }
  0x47   : > { %571 = vmatpush.bf16.msra.mxu1 %v928_v39  ;;  %596 = vmatpush.bf16.msra.mxu2 %v930_v41  ;;  %v924_v52 = vld [vmem:[%s1143_s30 + $0x50] sm:$0xff]  ;;  %v915_v55 = vld [vmem:[%s1143_s30 + $0x8] sm:$0xff]  ;;  %v828_v57 = vor.u32 %v913_v54, %v827_v53  ;;  %v922_v62 = vld [vmem:[%s1143_s30 + $0x40] sm:$0xff] }
  0x48   : > { %v923_v56 = vld [vmem:[%s1143_s30 + $0x48] sm:$0xff]  ;;  %v807_v58 = vld [vmem:[%s1241_s1] sm:$0xf]  ;;  %v908_v60 = vld [vmem:[%s1241_s1 + $0x4] sm:$0xf] }
  0x49   : > { %v909_v59 = vld [vmem:[%s1241_s1 + $0x8] sm:$0xf0]  ;;  %v809_v63 = vld [vmem:[%s1241_s1 + $0xc] sm:$0xf0]  ;;  %v819_v0 = vld [vmem:[%s1241_s1 + $0x18] sm:$0xf] }
  0x4a   : > { %553 = vmatpush.bf16.msra.mxu0 %v919_v44  ;;  %945 = vmatpush.bf16.msra.mxu3 %v919_v44  ;;  %v912_v1 = vld [vmem:[%s1241_s1 + $0x20] sm:$0xf0]  ;;  %v808_v2 = vor.u32 %v909_v59, %v807_v58  ;;  %v812_v3 = vor.u32 %v908_v60, %v809_v63  ;;  %v911_v5 = vld [vmem:[%s1241_s1 + $0x1c] sm:$0xf]  ;;  %v821_v6 = vld [vmem:[%s1241_s1 + $0x24] sm:$0xf0] }
  0x4b   : > { %572 = vmatpush.bf16.msra.mxu1 %v927_v45  ;;  %901 = vmatmul.msk.bf16.vlgmr.msra.gmra.mxu2 %vm544_vm0, %v816_v46  ;;  %v820_v4 = vor.u32 %v912_v1, %v819_v0  ;;  %v824_v7 = vor.u32 %v911_v5, %v821_v6 }
  0x4e   : > { %554 = vmatpush.bf16.msra.mxu0 %v918_v47  ;;  %946 = vmatpush.bf16.msra.mxu3 %v918_v47 }
  0x4f   : > { %573 = vmatpush.bf16.msra.mxu1 %v926_v48 }
  0x52   : > { %555 = vmatpush.bf16.msra.mxu0 %v917_v49  ;;  %947 = vmatpush.bf16.msra.mxu3 %v917_v49 }
  0x53   : > { %574 = vmatpush.bf16.msra.mxu1 %v925_v50 }
  0x56   : > { %556 = vmatpush.bf16.msra.mxu0 %v916_v51  ;;  %948 = vmatpush.bf16.msra.mxu3 %v916_v51 }
  0x57   : > { %575 = vmatpush.bf16.msra.mxu1 %v924_v52 }
  0x5a   : > { %557 = vmatpush.bf16.msra.mxu0 %v915_v55  ;;  %949 = vmatpush.bf16.msra.mxu3 %v915_v55 }
  0x5b   : > { %576 = vmatpush.bf16.msra.mxu1 %v923_v56  ;;  %902 = vmatmul.msk.bf16.gmra.mxu2 %vm544_vm0, %v828_v57 }
  0x5e   : > { %558 = vmatpush.bf16.msra.mxu0 %v914_v61  ;;  %950 = vmatpush.bf16.msra.mxu3 %v914_v61 }
  0x5f   : > { %577 = vmatpush.bf16.msra.mxu1 %v922_v62 }
  0x61   : > { %559 = vmatmul.bf16.vlgmr.msra.gmra.mxu0 %v808_v2  ;;  %564 = vmatmul.bf16.vlgmr.msra.gmra.mxu3 %v820_v4 }
  0x62   : > { %578 = vmatmul.bf16.vlgmr.msra.gmra.mxu1 %v812_v3 }
  0x72   : > { %583 = vmatmul.bf16.gmra.mxu1 %v824_v7 }
  0xce   : > { %v598_v8 = vpop.f32.mrf.mxu2 }
  0xd6   : > { %v600_v14 = vpop.f32.mrf.mxu2 }
  0xde   : > { %v560_v9 = vpop.f32.mrf.mxu0  ;;  %v603_v22 = vpop.f32.mrf.mxu2 }
  0xdf   : > { %v579_v10 = vpop.f32.mrf.mxu1 }
  0xe0   : > { %v580_v11 = vadd.f32 %v579_v10, %v560_v9 }
  0xe2   : > { %v599_v12 = vadd.f32 %v598_v8, %v580_v11 }
  0xe4   : > { %616 = vadd.xlane.f32.xlu0 %v599_v12  ;;  %v629_v13 = vmul.f32 %v599_v12, %v599_v12  ;;  %v565_v21 = vpop.f32.mrf.mxu3 }
  0xe6   : > { %633 = vadd.xlane.f32.xlu2 %v629_v13  ;;  %v562_v15 = vpop.f32.mrf.mxu0  ;;  %v605_v30 = vpop.f32.mrf.mxu2 }
  0xe7   : > { %v581_v16 = vpop.f32.mrf.mxu1 }
  0xe8   : > { %v582_v17 = vadd.f32 %v581_v16, %v562_v15 }
  0xea   : > { %v601_v18 = vadd.f32 %v600_v14, %v582_v17 }
  0xec   : > { %v935_v19 = vpack.c.bf16 %v601_v18, %v599_v12  ;;  %618 = vadd.xlane.f32.xlu0 %v601_v18  ;;  %v630_v20 = vmul.f32 %v601_v18, %v601_v18  ;;  %v567_v27 = vpop.f32.mrf.mxu3 }
  0xee   : > { %936 = vst [vmem:[%s1203_s9] sm:$0xff] %v935_v19   ;;  %635 = vadd.xlane.f32.xlu2 %v630_v20 }
  0xef   : > { %v584_v23 = vpop.f32.mrf.mxu1 }
  0xf0   : > { %v585_v24 = vadd.f32 %v584_v23, %v565_v21 }
  0xf2   : > { %v604_v25 = vadd.f32 %v603_v22, %v585_v24 }
  0xf4   : > { %620 = vadd.xlane.f32.xlu1 %v604_v25  ;;  %v631_v26 = vmul.f32 %v604_v25, %v604_v25 }
  0xf5   : > { %v675_v42 = vld [vmem:[%s1203_s9] sm:$0xf] (%p1052_p5)  ;;  %v677_v43 = vld [vmem:[%s1203_s9 + $0x4] sm:$0xf] (%p1052_p5) }
  0xf6   : > { %637 = vadd.xlane.f32.xlu0 %v631_v26  ;;  %676 = vst [vmem:[%s658_s22] sm:$0xf] (%p1052_p5), %v675_v42 }
  0xf7   : > { %v586_v28 = vpop.f32.mrf.mxu1  ;;  %678 = vst [vmem:[%s658_s22 + $0x8] sm:$0xf] (%p1052_p5), %v677_v43 }
  0xf8   : > { %v587_v29 = vadd.f32 %v586_v28, %v567_v27 }
  0xfa   : > { %v606_v31 = vadd.f32 %v605_v30, %v587_v29 }
  0xfc   : > { %v940_v32 = vpack.c.bf16 %v606_v31, %v604_v25  ;;  %622 = vadd.xlane.f32.xlu1 %v606_v31  ;;  %v632_v33 = vmul.f32 %v606_v31, %v606_v31 }
  0xfe   : > { %942 = vst [vmem:[%s1203_s9 + $0x8] sm:$0xff] %v940_v32  }
 0x104   : > { %639 = vadd.xlane.f32.xlu1 %v632_v33 }
 0x105   : > { %v679_v44 = vld [vmem:[%s1203_s9 + $0x8] sm:$0xf] (%p1052_p5)  ;;  %v681_v45 = vld [vmem:[%s1203_s9 + $0xc] sm:$0xf] (%p1052_p5) }
 0x106   : > { %680 = vst [vmem:[%s658_s22 + $0x10] sm:$0xf] (%p1052_p5), %v679_v44 }
 0x107   : > { %682 = vst [vmem:[%s658_s22 + $0x18] sm:$0xf] (%p1052_p5), %v681_v45 }
 0x157   : > { %v617_v34 = vpop.xlane.xlu0 %616 }
 0x158   : > { %625 = vst.msk [vmem:[%s360_s14] sm:$0xff] %vm624_vm1, %v617_v34 }
 0x159   : > { %v634_v35 = vpop.xlane.xlu2 %633 }
 0x15a   : > { %641 = vst.msk [vmem:[%s360_s14 + $0x20] sm:$0xff] %vm624_vm1, %v634_v35 }
 0x15f   : > { %v619_v36 = vpop.xlane.xlu0 %618 }
 0x160   : > { %626 = vst.msk [vmem:[%s360_s14 + $0x8] sm:$0xff] %vm624_vm1, %v619_v36 }
 0x161   : > { %v636_v37 = vpop.xlane.xlu2 %635 }
 0x162   : > { %642 = vst.msk [vmem:[%s360_s14 + $0x28] sm:$0xff] %vm624_vm1, %v636_v37 }
 0x167   : > { %v621_v38 = vpop.xlane.xlu1 %620 }
 0x168   : > { %627 = vst.msk [vmem:[%s360_s14 + $0x10] sm:$0xff] %vm624_vm1, %v621_v38 }
 0x169   : > { %v638_v39 = vpop.xlane.xlu0 %637 }
 0x16a   : > { %643 = vst.msk [vmem:[%s360_s14 + $0x30] sm:$0xff] %vm624_vm1, %v638_v39 }
 0x16f   : > { %v623_v40 = vpop.xlane.xlu1 %622 }
 0x170   : > { %628 = vst.msk [vmem:[%s360_s14 + $0x18] sm:$0xff] %vm624_vm1, %v623_v40 }
 0x174   : > { %656 = sbr.rel (!%p1052_p5) target bundleno = 377 (0x179), region = 73 }
 0x177   : > { %v640_v41 = vpop.xlane.xlu1 %639 }
 0x178   : > { %644 = vst.msk [vmem:[%s360_s14 + $0x38] sm:$0xff] %vm624_vm1, %v640_v41 }
 0x179 PF: > { %p11_p11 = scmp.ge.s32.totalorder %s1040_s16, 4   ;;  %s1245_s12 = smov %s995_s13 }
 0x17a   : > { %s1246_s13 = smov %s1050_s19  ;;  %s1247_s14 = smov %s1040_s16 }
 0x17b   :  { %13 = sbr.rel (!%p11_p11) target bundleno = 2 (0x2), region = 157 }

// kernel: resnet_forward.31
= control target key start
LH: loop header
LB: loop body
LE: loop exit
PB: predicated region body
PF: predicated region fallthrough
CT: control target
= control target key end

     0   :  { %v214_v0 = vmov 0   ;;  %s350_s3 = inlined_call_operand.vmem [shape: f32[32,1], index: 3, kind: input, shape index: {}]   ;;  %s351_s2 = inlined_call_operand.vmem [shape: f32[32,1], index: 2, kind: input, shape index: {}]   ;;  %s352_s4 = inlined_call_operand.vmem [shape: f32[32,1], index: 4, kind: input, shape index: {}]   ;;  %s353_s5 = inlined_call_operand.vmem [shape: f32[32,1], index: 5, kind: input, shape index: {}]   ;;  %s354_s1 = inlined_call_operand.vmem [shape: bf16[64,256], index: 1, kind: input, shape index: {}]   ;;  %s355_s0 = inlined_call_operand.vmem [shape: bf16[32,256], index: 0, kind: input, shape index: {}]   ;;  %s356_s6 = inlined_call_operand.vmem [shape: bf16[32,256], index: 6, kind: output, shape index: {}]  }
   0x1   :  { %213 = vset.pattern.permute.xlu2 %v214_v0  ;;  %212 = vset.pattern.permute.xlu1 %v214_v0  ;;  %v70_v1 = vld [vmem:[%s350_s3] sm:$0xff]  ;;  %v40_v2 = vld [vmem:[%s351_s2 + $0x10] sm:$0xff]  ;;  %v71_v4 = vld [vmem:[%s350_s3 + $0x8] sm:$0xff] }
   0x2   :  { %v38_v3 = vld [vmem:[%s351_s2] sm:$0xff]  ;;  %211 = vset.pattern.permute.xlu0 %v214_v0  ;;  %76 = vperm.xlu2 %213, %v70_v1   ;;  %v41_v5 = vld [vmem:[%s351_s2 + $0x18] sm:$0xff]  ;;  %v39_v6 = vld [vmem:[%s351_s2 + $0x8] sm:$0xff] }
   0x3   :  { %54 = vperm.xlu1 %212, %v40_v2   ;;  %44 = vperm.xlu0 %211, %v38_v3   ;;  %v114_v7 = vld [vmem:[%s352_s4] sm:$0xff]  ;;  %v73_v8 = vld [vmem:[%s350_s3 + $0x18] sm:$0xff]  ;;  %v72_v9 = vld [vmem:[%s350_s3 + $0x10] sm:$0xff] }
   0x4   :  { %v117_v10 = vld [vmem:[%s352_s4 + $0x18] sm:$0xff]  ;;  %v116_v11 = vld [vmem:[%s352_s4 + $0x10] sm:$0xff]  ;;  %v115_v12 = vld [vmem:[%s352_s4 + $0x8] sm:$0xff] }
   0x5   :  { %v148_v13 = vld [vmem:[%s353_s5 + $0x10] sm:$0xff]  ;;  %v147_v14 = vld [vmem:[%s353_s5 + $0x8] sm:$0xff]  ;;  %v146_v15 = vld [vmem:[%s353_s5] sm:$0xff] }
   0x6   :  { %v149_v16 = vld [vmem:[%s353_s5 + $0x18] sm:$0xff]  ;;  %v28_v27 = vld [vmem:[%s355_s0 + $0x10] sm:$0xff]  ;;  %v26_v31 = vld [vmem:[%s355_s0] sm:$0xff] }
   0x7   :  { %v208_v28 = vld [vmem:[%s354_s1 + $0x30] sm:$0xff]  ;;  %v34_v29 = vunpack.c.l.bf16 %v28_v27  ;;  %v35_v30 = vunpack.c.h.bf16 %v28_v27  ;;  %v27_v32 = vld [vmem:[%s355_s0 + $0x8] sm:$0xff]  ;;  %v206_v35 = vld [vmem:[%s354_s1 + $0x20] sm:$0xff]  ;;  %v30_v37 = vunpack.c.l.bf16 %v26_v31  ;;  %v31_v47 = vunpack.c.h.bf16 %v26_v31 }
   0x8   :  { %v110_v33 = vunpack.c.l.bf16 %v208_v28  ;;  %v111_v34 = vunpack.c.h.bf16 %v208_v28  ;;  %v207_v36 = vld [vmem:[%s354_s1 + $0x28] sm:$0xff]  ;;  %v32_v38 = vunpack.c.l.bf16 %v27_v32  ;;  %v33_v39 = vunpack.c.h.bf16 %v27_v32  ;;  %v209_v51 = vld [vmem:[%s354_s1 + $0x38] sm:$0xff] }
   0x9   :  { %v106_v46 = vunpack.c.l.bf16 %v206_v35  ;;  %v108_v49 = vunpack.c.l.bf16 %v207_v36  ;;  %v109_v50 = vunpack.c.h.bf16 %v207_v36  ;;  %v107_v56 = vunpack.c.h.bf16 %v206_v35  ;;  %v29_v1 = vld [vmem:[%s355_s0 + $0x18] sm:$0xff] }
   0xa   :  { %81 = vperm.xlu2 %213, %v71_v4   ;;  %v112_v63 = vunpack.c.l.bf16 %v209_v51 }
   0xb   :  { %59 = vperm.xlu1 %212, %v41_v5   ;;  %49 = vperm.xlu0 %211, %v39_v6  }
  0x12   :  { %120 = vperm.xlu2 %213, %v114_v7  }
  0x13   :  { %91 = vperm.xlu1 %212, %v73_v8   ;;  %86 = vperm.xlu0 %211, %v72_v9  }
  0x1a   :  { %135 = vperm.xlu2 %213, %v117_v10  }
  0x1b   :  { %130 = vperm.xlu1 %212, %v116_v11   ;;  %125 = vperm.xlu0 %211, %v115_v12  }
  0x22   :  { %162 = vperm.xlu2 %213, %v148_v13  }
  0x23   :  { %157 = vperm.xlu1 %212, %v147_v14   ;;  %152 = vperm.xlu0 %211, %v146_v15  }
  0x2b   :  { %167 = vperm.xlu0 %211, %v149_v16   ;;  %v113_v16 = vunpack.c.h.bf16 %v209_v51 }
  0x5c   :  { %v298_v17 = vpop.permute.xlu2 %76 }
  0x64   :  { %v82_v18 = vpop.permute.xlu2 %81 }
  0x6c   :  { %v121_v21 = vpop.permute.xlu2 %120 }
  0x6d   :  { %v138_v62 = vmul.f32 %v121_v21, %v106_v46  ;;  %v139_v6 = vmul.f32 %v121_v21, %v107_v56 }
  0x74   :  { %v302_v24 = vpop.permute.xlu2 %135 }
  0x75   :  { %v55_v19 = vpop.permute.xlu1 %54  ;;  %v45_v20 = vpop.permute.xlu0 %44  ;;  %v144_v32 = vmul.f32 %v302_v24, %v112_v63 }
  0x76   :  { %v66_v42 = vmul.f32 %v55_v19, %v34_v29  ;;  %v67_v43 = vmul.f32 %v55_v19, %v35_v30  ;;  %v62_v57 = vmul.f32 %v45_v20, %v30_v37  ;;  %v63_v0 = vmul.f32 %v45_v20, %v31_v47 }
  0x77   :  { %v36_v20 = vunpack.c.l.bf16 %v29_v1 }
  0x78   :  { %v94_v7 = vadd.f32 %v298_v17, %v62_v57  ;;  %v95_v19 = vadd.f32 %v298_v17, %v63_v0 }
  0x7c   :  { %v163_v48 = vpop.permute.xlu2 %162 }
  0x7d   :  { %v300_v22 = vpop.permute.xlu1 %59  ;;  %v50_v23 = vpop.permute.xlu0 %49 }
  0x7e   :  { %v64_v58 = vmul.f32 %v50_v23, %v32_v38  ;;  %v65_v59 = vmul.f32 %v50_v23, %v33_v39  ;;  %v68_v17 = vmul.f32 %v300_v22, %v36_v20 }
  0x80   :  { %v96_v8 = vadd.f32 %v82_v18, %v64_v58  ;;  %v97_v9 = vadd.f32 %v82_v18, %v65_v59 }
  0x85   :  { %v304_v25 = vpop.permute.xlu1 %91  ;;  %v87_v26 = vpop.permute.xlu0 %86 }
  0x86   :  { %v98_v52 = vadd.f32 %v87_v26, %v66_v42  ;;  %v99_v53 = vadd.f32 %v87_v26, %v67_v43  ;;  %v37_v26 = vunpack.c.h.bf16 %v29_v1  ;;  %v100_v39 = vadd.f32 %v304_v25, %v68_v17 }
  0x88   :  { %v69_v35 = vmul.f32 %v300_v22, %v37_v26 }
  0x8d   :  { %v131_v40 = vpop.permute.xlu1 %130  ;;  %v126_v41 = vpop.permute.xlu0 %125 }
  0x8e   :  { %v142_v44 = vmul.f32 %v131_v40, %v110_v33  ;;  %v143_v45 = vmul.f32 %v131_v40, %v111_v34  ;;  %v140_v4 = vmul.f32 %v126_v41, %v108_v49  ;;  %v141_v5 = vmul.f32 %v126_v41, %v109_v50 }
  0x8f   :  { %v145_v34 = vmul.f32 %v302_v24, %v113_v16  ;;  %v101_v40 = vadd.f32 %v304_v25, %v69_v35 }
  0x90   :  { %v174_v54 = vadd.f32 %v163_v48, %v142_v44  ;;  %v175_v55 = vadd.f32 %v163_v48, %v143_v45 }
  0x92   :  { %v182_v60 = vadd.f32 %v174_v54, %v98_v52  ;;  %v183_v61 = vadd.f32 %v175_v55, %v99_v53 }
  0x94   :  { %v190_v2 = vmax.f32 %v182_v60, 0.0  ;;  %v191_v3 = vmax.f32 %v183_v61, 0.0 }
  0x95   :  { %v158_v10 = vpop.permute.xlu1 %157  ;;  %v153_v11 = vpop.permute.xlu0 %152 }
  0x96   :  { %v196_v12 = vpack.c.bf16 %v191_v3, %v190_v2  ;;  %v172_v13 = vadd.f32 %v158_v10, %v140_v4  ;;  %v173_v14 = vadd.f32 %v158_v10, %v141_v5  ;;  %v170_v15 = vadd.f32 %v153_v11, %v138_v62 }
  0x97   :  { %v171_v23 = vadd.f32 %v153_v11, %v139_v6 }
  0x98   :  { %200 = vst [vmem:[%s356_s6 + $0x10] sm:$0xff] %v196_v12  ;;  %v180_v21 = vadd.f32 %v172_v13, %v96_v8  ;;  %v181_v27 = vadd.f32 %v173_v14, %v97_v9  ;;  %v178_v28 = vadd.f32 %v170_v15, %v94_v7 }
  0x99   :  { %v179_v18 = vadd.f32 %v171_v23, %v95_v19 }
  0x9a   :  { %v188_v29 = vmax.f32 %v180_v21, 0.0  ;;  %v189_v30 = vmax.f32 %v181_v27, 0.0  ;;  %v186_v31 = vmax.f32 %v178_v28, 0.0 }
  0x9b   :  { %v187_v33 = vmax.f32 %v179_v18, 0.0 }
  0x9c   :  { %v195_v36 = vpack.c.bf16 %v189_v30, %v188_v29 }
  0x9d   :  { %v194_v37 = vpack.c.bf16 %v187_v33, %v186_v31  ;;  %v168_v38 = vpop.permute.xlu0 %167 }
  0x9e   :  { %199 = vst [vmem:[%s356_s6 + $0x8] sm:$0xff] %v195_v36  ;;  %v176_v41 = vadd.f32 %v168_v38, %v144_v32  ;;  %v177_v42 = vadd.f32 %v168_v38, %v145_v34 }
  0x9f   :  { %198 = vst [vmem:[%s356_s6] sm:$0xff] %v194_v37 }
  0xa0   :  { %v184_v24 = vadd.f32 %v176_v41, %v100_v39  ;;  %v185_v43 = vadd.f32 %v177_v42, %v101_v40 }
  0xa2   :  { %v192_v22 = vmax.f32 %v184_v24, 0.0  ;;  %v193_v44 = vmax.f32 %v185_v43, 0.0 }
  0xa4   :  { %v197_v45 = vpack.c.bf16 %v193_v44, %v192_v22 }
  0xa6   :  { %201 = vst [vmem:[%s356_s6 + $0x18] sm:$0xff] %v197_v45 }

// kernel: resnet_forward.32
= control target key start
LH: loop header
LB: loop body
LE: loop exit
PB: predicated region body
PF: predicated region fallthrough
CT: control target
= control target key end

     0   :  { %vm310_vm0 = vcmask 261120   ;;  %vm546_vm1 = vcmask 7168   ;;  %s1300_s0 = inlined_call_operand.vmem [shape: bf16[288,128], index: 0, kind: input, shape index: {}]   ;;  %s1301_s1 = inlined_call_operand.vmem [shape: bf16[128,288], index: 1, kind: input, shape index: {}]   ;;  %s1302_s2 = inlined_call_operand.vmem [shape: bf16[128,128], index: 2, kind: output, shape index: {0}]   ;;  %s1303_s3 = inlined_call_operand.vmem [shape: f32[1,256,1], index: 3, kind: output, shape index: {1}]  }
   0x1   :  { %v842_v0 = vld [vmem:[%s1300_s0 + $0x38] sm:$0xff]  ;;  %v852_v2 = vld [vmem:[%s1300_s0 + $0x88] sm:$0xff]  ;;  %v841_v3 = vld [vmem:[%s1300_s0 + $0x30] sm:$0xff] }
   0x2   :  { %v850_v1 = vld [vmem:[%s1300_s0 + $0x78] sm:$0xff]  ;;  %335 = vmatpush.bf16.msra.mxu0 %v842_v0  ;;  %900 = vmatpush.bf16.msra.mxu3 %v842_v0  ;;  %v849_v4 = vld [vmem:[%s1300_s0 + $0x70] sm:$0xff]  ;;  %v851_v5 = vld [vmem:[%s1300_s0 + $0x80] sm:$0xff] }
   0x3   :  { %384 = vmatpush.bf16.msra.mxu1 %v850_v1  ;;  %439 = vmatpush.bf16.msra.mxu2 %v852_v2  ;;  %v645_v6 = vld [vmem:[%s1301_s1 + $0x8] sm:$0xf]  ;;  %v813_v7 = vld [vmem:[%s1301_s1 + $0x10] sm:$0xf0]  ;;  %v839_v11 = vld [vmem:[%s1300_s0 + $0x20] sm:$0xff] }
   0x4   :  { %v646_v8 = vor.u32 %v813_v7, %v645_v6  ;;  %v840_v9 = vld [vmem:[%s1300_s0 + $0x28] sm:$0xff]  ;;  %v847_v12 = vld [vmem:[%s1300_s0 + $0x60] sm:$0xff]  ;;  %v838_v13 = vld [vmem:[%s1300_s0 + $0x18] sm:$0xff] }
   0x5   :  { %v848_v10 = vld [vmem:[%s1300_s0 + $0x68] sm:$0xff]  ;;  %v846_v14 = vld [vmem:[%s1300_s0 + $0x58] sm:$0xff]  ;;  %v837_v15 = vld [vmem:[%s1300_s0 + $0x10] sm:$0xff] }
   0x6   :  { %336 = vmatpush.bf16.msra.mxu0 %v841_v3  ;;  %901 = vmatpush.bf16.msra.mxu3 %v841_v3  ;;  %v845_v16 = vld [vmem:[%s1300_s0 + $0x50] sm:$0xff]  ;;  %v657_v17 = vld [vmem:[%s1301_s1 + $0x20] sm:$0xf]  ;;  %v816_v18 = vld [vmem:[%s1301_s1 + $0x28] sm:$0xf0] }
   0x7   :  { %385 = vmatpush.bf16.msra.mxu1 %v849_v4  ;;  %440 = vmatpush.bf16.msra.mxu2 %v851_v5  ;;  %v658_v19 = vor.u32 %v816_v18, %v657_v17  ;;  %v836_v20 = vld [vmem:[%s1300_s0 + $0x8] sm:$0xff]  ;;  %v835_v22 = vld [vmem:[%s1300_s0] sm:$0xff]  ;;  %v709_v26 = vld [vmem:[%s1301_s1 + $0x90] sm:$0xf] }
   0x8   :  { %v844_v21 = vld [vmem:[%s1300_s0 + $0x48] sm:$0xff]  ;;  %v843_v23 = vld [vmem:[%s1300_s0 + $0x40] sm:$0xff]  ;;  %v830_v27 = vld [vmem:[%s1301_s1 + $0x98] sm:$0xf0] }
   0x9   :  { %v637_v24 = vld [vmem:[%s1301_s1] sm:$0xf]  ;;  %v812_v25 = vld [vmem:[%s1301_s1 + $0x8] sm:$0xf0]  ;;  %v811_v28 = vld [vmem:[%s1301_s1 + $0x4] sm:$0xf]  ;;  %v710_v31 = vor.u32 %v830_v27, %v709_v26 }
   0xa   :  { %803 = vmatmul.msk.bf16.vlgmr.msra.gmra.mxu2 %vm310_vm0, %v646_v8  ;;  %337 = vmatpush.bf16.msra.mxu0 %v840_v9  ;;  %v639_v29 = vld [vmem:[%s1301_s1 + $0xc] sm:$0xf0]  ;;  %v638_v30 = vor.u32 %v812_v25, %v637_v24  ;;  %v669_v33 = vld [vmem:[%s1301_s1 + $0x38] sm:$0xf]  ;;  %v819_v34 = vld [vmem:[%s1301_s1 + $0x40] sm:$0xf0] }
   0xb   :  { %902 = vmatpush.bf16.msra.mxu3 %v840_v9  ;;  %386 = vmatpush.bf16.msra.mxu1 %v848_v10  ;;  %v642_v32 = vor.u32 %v811_v28, %v639_v29  ;;  %v670_v35 = vor.u32 %v819_v34, %v669_v33  ;;  %v649_v36 = vld [vmem:[%s1301_s1 + $0x18] sm:$0xf]  ;;  %v815_v37 = vld [vmem:[%s1301_s1 + $0x20] sm:$0xf0]  ;;  %v721_v38 = vld [vmem:[%s1301_s1 + $0xa8] sm:$0xf] }
   0xc   :  { %v833_v39 = vld [vmem:[%s1301_s1 + $0xb0] sm:$0xf0]  ;;  %v814_v40 = vld [vmem:[%s1301_s1 + $0x1c] sm:$0xf]  ;;  %v651_v41 = vld [vmem:[%s1301_s1 + $0x24] sm:$0xf0]  ;;  %v650_v42 = vor.u32 %v815_v37, %v649_v36 }
   0xd   :  { %v722_v43 = vor.u32 %v833_v39, %v721_v38  ;;  %v654_v44 = vor.u32 %v814_v40, %v651_v41  ;;  %v681_v45 = vld [vmem:[%s1301_s1 + $0x50] sm:$0xf]  ;;  %v822_v46 = vld [vmem:[%s1301_s1 + $0x58] sm:$0xf0]  ;;  %v817_v50 = vld [vmem:[%s1301_s1 + $0x34] sm:$0xf] }
   0xe   :  { %338 = vmatpush.bf16.msra.mxu0 %v839_v11  ;;  %v682_v47 = vor.u32 %v822_v46, %v681_v45  ;;  %v661_v48 = vld [vmem:[%s1301_s1 + $0x30] sm:$0xf]  ;;  %v818_v49 = vld [vmem:[%s1301_s1 + $0x38] sm:$0xf0]  ;;  %v663_v51 = vld [vmem:[%s1301_s1 + $0x3c] sm:$0xf0] }
   0xf   :  { %903 = vmatpush.bf16.msra.mxu3 %v839_v11  ;;  %387 = vmatpush.bf16.msra.mxu1 %v847_v12  ;;  %v829_v52 = vld [vmem:[%s1301_s1 + $0x94] sm:$0xf]  ;;  %v711_v53 = vld [vmem:[%s1301_s1 + $0x9c] sm:$0xf0]  ;;  %v662_v54 = vor.u32 %v818_v49, %v661_v48  ;;  %v666_v55 = vor.u32 %v817_v50, %v663_v51  ;;  %v693_v57 = vld [vmem:[%s1301_s1 + $0x68] sm:$0xf] }
  0x10   :  { %v714_v56 = vor.u32 %v829_v52, %v711_v53  ;;  %v825_v58 = vld [vmem:[%s1301_s1 + $0x70] sm:$0xf0]  ;;  %v673_v60 = vld [vmem:[%s1301_s1 + $0x48] sm:$0xf]  ;;  %v820_v62 = vld [vmem:[%s1301_s1 + $0x4c] sm:$0xf] }
  0x11   :  { %v694_v59 = vor.u32 %v825_v58, %v693_v57  ;;  %v821_v61 = vld [vmem:[%s1301_s1 + $0x50] sm:$0xf0]  ;;  %v675_v63 = vld [vmem:[%s1301_s1 + $0x54] sm:$0xf0]  ;;  %v832_v0 = vld [vmem:[%s1301_s1 + $0xac] sm:$0xf] }
  0x12   :  { %339 = vmatpush.bf16.msra.mxu0 %v838_v13  ;;  %v674_v2 = vor.u32 %v821_v61, %v673_v60  ;;  %v678_v3 = vor.u32 %v820_v62, %v675_v63  ;;  %v705_v5 = vld [vmem:[%s1301_s1 + $0x80] sm:$0xf]  ;;  %v828_v6 = vld [vmem:[%s1301_s1 + $0x88] sm:$0xf0]  ;;  %v687_v11 = vld [vmem:[%s1301_s1 + $0x6c] sm:$0xf0] }
  0x13   :  { %904 = vmatpush.bf16.msra.mxu3 %v838_v13  ;;  %388 = vmatpush.bf16.msra.mxu1 %v846_v14  ;;  %v706_v7 = vor.u32 %v828_v6, %v705_v5  ;;  %v685_v8 = vld [vmem:[%s1301_s1 + $0x60] sm:$0xf]  ;;  %v824_v9 = vld [vmem:[%s1301_s1 + $0x68] sm:$0xf0]  ;;  %v697_v17 = vld [vmem:[%s1301_s1 + $0x78] sm:$0xf] }
  0x14   :  { %v827_v18 = vld [vmem:[%s1301_s1 + $0x80] sm:$0xf0]  ;;  %v834_v24 = vld [vmem:[%s1301_s1 + $0xb8] sm:$0xf0] }
  0x16   :  { %340 = vmatpush.bf16.msra.mxu0 %v837_v15 }
  0x17   :  { %905 = vmatpush.bf16.msra.mxu3 %v837_v15  ;;  %389 = vmatpush.bf16.msra.mxu1 %v845_v16  ;;  %v831_v15 = vld [vmem:[%s1301_s1 + $0xa0] sm:$0xf0] }
  0x1a   :  { %804 = vmatmul.msk.bf16.gmra.mxu2 %vm310_vm0, %v658_v19  ;;  %341 = vmatpush.bf16.msra.mxu0 %v836_v20  ;;  %v826_v19 = vld [vmem:[%s1301_s1 + $0x7c] sm:$0xf] }
  0x1b   :  { %906 = vmatpush.bf16.msra.mxu3 %v836_v20  ;;  %390 = vmatpush.bf16.msra.mxu1 %v844_v21  ;;  %v699_v20 = vld [vmem:[%s1301_s1 + $0x84] sm:$0xf0] }
  0x1e   :  { %342 = vmatpush.bf16.msra.mxu0 %v835_v22 }
  0x1f   :  { %907 = vmatpush.bf16.msra.mxu3 %v835_v22  ;;  %391 = vmatpush.bf16.msra.mxu1 %v843_v23  ;;  %v702_v22 = vor.u32 %v826_v19, %v699_v20 }
  0x21   :  { %343 = vmatmul.bf16.vlgmr.msra.gmra.mxu0 %v638_v30 }
  0x22   :  { %373 = vmatmul.bf16.vlgmr.msra.gmra.mxu3 %v710_v31  ;;  %392 = vmatmul.bf16.vlgmr.msra.gmra.mxu1 %v642_v32 }
  0x23   :  { %908 = vmatpush.bf16.msrb.mxu3 %v850_v1  ;;  %v723_v1 = vld [vmem:[%s1301_s1 + $0xb4] sm:$0xf0] }
  0x27   :  { %909 = vmatpush.bf16.msrb.mxu3 %v849_v4  ;;  %v726_v4 = vor.u32 %v832_v0, %v723_v1 }
  0x2a   :  { %805 = vmatmul.msk.bf16.gmra.mxu2 %vm310_vm0, %v670_v35 }
  0x2b   :  { %910 = vmatpush.bf16.msrb.mxu3 %v848_v10  ;;  %v823_v10 = vld [vmem:[%s1301_s1 + $0x64] sm:$0xf] }
  0x2c   :  { %v690_v13 = vor.u32 %v823_v10, %v687_v11 }
  0x2f   :  { %911 = vmatpush.bf16.msrb.mxu3 %v847_v12  ;;  %v686_v12 = vor.u32 %v824_v9, %v685_v8 }
  0x31   :  { %348 = vmatmul.bf16.gmra.mxu0 %v650_v42 }
  0x32   :  { %378 = vmatmul.bf16.gmra.mxu3 %v722_v43  ;;  %397 = vmatmul.bf16.gmra.mxu1 %v654_v44 }
  0x33   :  { %912 = vmatpush.bf16.msrb.mxu3 %v846_v14  ;;  %v717_v14 = vld [vmem:[%s1301_s1 + $0x98] sm:$0xf] }
  0x37   :  { %913 = vmatpush.bf16.msrb.mxu3 %v845_v16  ;;  %v718_v16 = vor.u32 %v831_v15, %v717_v14 }
  0x3a   :  { %806 = vmatmul.msk.bf16.gmra.mxu2 %vm310_vm0, %v682_v47 }
  0x3b   :  { %914 = vmatpush.bf16.msrb.mxu3 %v844_v21  ;;  %v698_v21 = vor.u32 %v827_v18, %v697_v17 }
  0x3f   :  { %915 = vmatpush.bf16.msrb.mxu3 %v843_v23  ;;  %v729_v23 = vld [vmem:[%s1301_s1 + $0xb0] sm:$0xf] }
  0x40   :  { %v730_v25 = vor.u32 %v834_v24, %v729_v23 }
  0x41   :  { %353 = vmatmul.bf16.gmra.mxu0 %v662_v54 }
  0x42   :  { %402 = vmatmul.bf16.gmra.mxu1 %v666_v55  ;;  %422 = vmatmul.bf16.vlgmr.msrb.gmra.mxu3 %v714_v56 }
  0x4a   :  { %807 = vmatmul.msk.bf16.gmra.mxu2 %vm310_vm0, %v694_v59 }
  0x51   :  { %358 = vmatmul.bf16.gmra.mxu0 %v674_v2 }
  0x52   :  { %407 = vmatmul.bf16.gmra.mxu1 %v678_v3  ;;  %427 = vmatmul.bf16.gmra.mxu3 %v726_v4 }
  0x5a   :  { %808 = vmatmul.msk.bf16.gmra.mxu2 %vm310_vm0, %v706_v7 }
  0x61   :  { %363 = vmatmul.bf16.gmra.mxu0 %v686_v12 }
  0x62   :  { %412 = vmatmul.bf16.gmra.mxu1 %v690_v13 }
  0x6a   :  { %809 = vmatmul.msk.bf16.gmra.mxu2 %vm310_vm0, %v718_v16 }
  0x71   :  { %368 = vmatmul.bf16.gmra.mxu0 %v698_v21 }
  0x72   :  { %417 = vmatmul.bf16.gmra.mxu1 %v702_v22 }
  0x7a   :  { %810 = vmatmul.msk.bf16.gmra.mxu2 %vm310_vm0, %v730_v25 }
  0x8d   :  { %v442_v26 = vpop.f32.mrf.mxu2 }
  0x95   :  { %v444_v27 = vpop.f32.mrf.mxu2 }
  0x9d   :  { %v447_v28 = vpop.f32.mrf.mxu2 }
  0x9e   :  { %v344_v29 = vpop.f32.mrf.mxu0 }
  0x9f   :  { %v393_v30 = vpop.f32.mrf.mxu1 }
  0xa0   :  { %v394_v31 = vadd.f32 %v393_v30, %v344_v29 }
  0xa2   :  { %v443_v32 = vadd.f32 %v442_v26, %v394_v31 }
  0xa4   :  { %514 = vadd.xlane.f32.xlu0 %v443_v32  ;;  %v563_v33 = vmul.f32 %v443_v32, %v443_v32 }
  0xa5   :  { %v449_v34 = vpop.f32.mrf.mxu2  ;;  %v1145_v52 = vpop.f32.mrf.mxu3 }
  0xa6   :  { %579 = vadd.xlane.f32.xlu1 %v563_v33  ;;  %v346_v35 = vpop.f32.mrf.mxu0 }
  0xa7   :  { %v395_v36 = vpop.f32.mrf.mxu1 }
  0xa8   :  { %v396_v37 = vadd.f32 %v395_v36, %v346_v35 }
  0xaa   :  { %v445_v38 = vadd.f32 %v444_v27, %v396_v37 }
  0xac   :  { %v856_v39 = vpack.c.bf16 %v445_v38, %v443_v32  ;;  %516 = vadd.xlane.f32.xlu0 %v445_v38  ;;  %v564_v40 = vmul.f32 %v445_v38, %v445_v38 }
  0xad   :  { %v452_v41 = vpop.f32.mrf.mxu2  ;;  %v376_v60 = vpop.f32.mrf.mxu3 }
  0xae   :  { %857 = vst [vmem:[%s1302_s2] sm:$0xff] %v856_v39   ;;  %581 = vadd.xlane.f32.xlu2 %v564_v40  ;;  %v349_v42 = vpop.f32.mrf.mxu0 }
  0xaf   :  { %v398_v43 = vpop.f32.mrf.mxu1 }
  0xb0   :  { %v399_v44 = vadd.f32 %v398_v43, %v349_v42 }
  0xb2   :  { %v448_v45 = vadd.f32 %v447_v28, %v399_v44 }
  0xb4   :  { %518 = vadd.xlane.f32.xlu1 %v448_v45  ;;  %v565_v46 = vmul.f32 %v448_v45, %v448_v45 }
  0xb5   :  { %v454_v47 = vpop.f32.mrf.mxu2  ;;  %v1153_v7 = vpop.f32.mrf.mxu3 }
  0xb6   :  { %583 = vadd.xlane.f32.xlu0 %v565_v46  ;;  %v351_v48 = vpop.f32.mrf.mxu0 }
  0xb7   :  { %v400_v49 = vpop.f32.mrf.mxu1 }
  0xb8   :  { %v401_v50 = vadd.f32 %v400_v49, %v351_v48 }
  0xba   :  { %v450_v51 = vadd.f32 %v449_v34, %v401_v50 }
  0xbc   :  { %v861_v53 = vpack.c.bf16 %v450_v51, %v448_v45  ;;  %520 = vadd.xlane.f32.xlu1 %v450_v51  ;;  %v566_v59 = vmul.f32 %v450_v51, %v450_v51 }
  0xbd   :  { %v457_v54 = vpop.f32.mrf.mxu2  ;;  %v381_v16 = vpop.f32.mrf.mxu3 }
  0xbe   :  { %893 = vst [vmem:[%s1302_s2 + $0x8] sm:$0xff] %v861_v53   ;;  %v354_v55 = vpop.f32.mrf.mxu0 }
  0xbf   :  { %v403_v56 = vpop.f32.mrf.mxu1 }
  0xc0   :  { %v404_v57 = vadd.f32 %v403_v56, %v354_v55 }
  0xc2   :  { %v453_v58 = vadd.f32 %v452_v41, %v404_v57 }
  0xc4   :  { %585 = vadd.xlane.f32.xlu1 %v566_v59  ;;  %522 = vadd.xlane.f32.xlu2 %v453_v58  ;;  %v567_v2 = vmul.f32 %v453_v58, %v453_v58 }
  0xc5   :  { %v459_v61 = vpop.f32.mrf.mxu2  ;;  %v423_v25 = vpop.f32.mrf.mxu3 }
  0xc6   :  { %v356_v62 = vpop.f32.mrf.mxu0  ;;  %v424_v36 = vadd.f32 %v423_v25, %v1145_v52 }
  0xc7   :  { %v405_v63 = vpop.f32.mrf.mxu1 }
  0xc8   :  { %v406_v0 = vadd.f32 %v405_v63, %v356_v62 }
  0xca   :  { %v455_v1 = vadd.f32 %v454_v47, %v406_v0 }
  0xcc   :  { %v866_v3 = vpack.c.bf16 %v455_v1, %v453_v58  ;;  %587 = vadd.xlane.f32.xlu2 %v567_v2  ;;  %v568_v4 = vmul.f32 %v455_v1, %v455_v1 }
  0xcd   :  { %v462_v5 = vpop.f32.mrf.mxu2  ;;  %v425_v34 = vpop.f32.mrf.mxu3 }
  0xce   :  { %894 = vst [vmem:[%s1302_s2 + $0x10] sm:$0xff] %v866_v3   ;;  %589 = vadd.xlane.f32.xlu0 %v568_v4  ;;  %v359_v6 = vpop.f32.mrf.mxu0  ;;  %v426_v42 = vadd.f32 %v425_v34, %v376_v60 }
  0xcf   :  { %v408_v8 = vpop.f32.mrf.mxu1 }
  0xd0   :  { %v409_v9 = vadd.f32 %v408_v8, %v359_v6 }
  0xd2   :  { %v458_v10 = vadd.f32 %v457_v54, %v409_v9 }
  0xd4   :  { %524 = vadd.xlane.f32.xlu2 %v455_v1  ;;  %v569_v11 = vmul.f32 %v458_v10, %v458_v10 }
  0xd5   :  { %v464_v12 = vpop.f32.mrf.mxu2  ;;  %v428_v48 = vpop.f32.mrf.mxu3 }
  0xd6   :  { %526 = vadd.xlane.f32.xlu0 %v458_v10  ;;  %591 = vadd.xlane.f32.xlu1 %v569_v11  ;;  %v361_v13 = vpop.f32.mrf.mxu0  ;;  %v429_v57 = vadd.f32 %v428_v48, %v1153_v7 }
  0xd7   :  { %v410_v14 = vpop.f32.mrf.mxu1 }
  0xd8   :  { %v411_v15 = vadd.f32 %v410_v14, %v361_v13 }
  0xda   :  { %v460_v17 = vadd.f32 %v459_v61, %v411_v15 }
  0xdc   :  { %v871_v18 = vpack.c.bf16 %v460_v17, %v458_v10  ;;  %v570_v19 = vmul.f32 %v460_v17, %v460_v17 }
  0xdd   :  { %v467_v20 = vpop.f32.mrf.mxu2  ;;  %v430_v56 = vpop.f32.mrf.mxu3 }
  0xde   :  { %895 = vst [vmem:[%s1302_s2 + $0x18] sm:$0xff] %v871_v18   ;;  %528 = vadd.xlane.f32.xlu1 %v460_v17  ;;  %593 = vadd.xlane.f32.xlu2 %v570_v19  ;;  %v364_v21 = vpop.f32.mrf.mxu0  ;;  %v431_v58 = vadd.f32 %v430_v56, %v381_v16 }
  0xdf   :  { %v413_v22 = vpop.f32.mrf.mxu1 }
  0xe0   :  { %v414_v23 = vadd.f32 %v413_v22, %v364_v21 }
  0xe2   :  { %v463_v24 = vadd.f32 %v462_v5, %v414_v23 }
  0xe4   :  { %v571_v26 = vmul.f32 %v463_v24, %v463_v24 }
  0xe5   :  { %v469_v27 = vpop.f32.mrf.mxu2 }
  0xe6   :  { %530 = vadd.xlane.f32.xlu2 %v463_v24  ;;  %595 = vadd.xlane.f32.xlu0 %v571_v26  ;;  %v366_v28 = vpop.f32.mrf.mxu0 }
  0xe7   :  { %v415_v29 = vpop.f32.mrf.mxu1 }
  0xe8   :  { %v416_v30 = vadd.f32 %v415_v29, %v366_v28 }
  0xea   :  { %v465_v31 = vadd.f32 %v464_v12, %v416_v30 }
  0xec   :  { %v876_v32 = vpack.c.bf16 %v465_v31, %v463_v24  ;;  %v572_v33 = vmul.f32 %v465_v31, %v465_v31 }
  0xed   :  { %v472_v35 = vpop.f32.mrf.mxu2 }
  0xee   :  { %896 = vst [vmem:[%s1302_s2 + $0x20] sm:$0xff] %v876_v32   ;;  %532 = vadd.xlane.f32.xlu0 %v465_v31  ;;  %597 = vadd.xlane.f32.xlu1 %v572_v33  ;;  %v369_v37 = vpop.f32.mrf.mxu0  ;;  %v473_v39 = vadd.f32 %v472_v35, %v424_v36 }
  0xef   :  { %v418_v38 = vpop.f32.mrf.mxu1 }
  0xf0   :  { %v419_v40 = vadd.f32 %v418_v38, %v369_v37  ;;  %v575_v43 = vmul.f32 %v473_v39, %v473_v39 }
  0xf2   :  { %v468_v41 = vadd.f32 %v467_v20, %v419_v40 }
  0xf4   :  { %v573_v44 = vmul.f32 %v468_v41, %v468_v41 }
  0xf5   :  { %v474_v45 = vpop.f32.mrf.mxu2 }
  0xf6   :  { %v475_v46 = vadd.f32 %v474_v45, %v426_v42  ;;  %538 = vadd.xlane.f32.xlu0 %v473_v39  ;;  %603 = vadd.xlane.f32.xlu1 %v575_v43  ;;  %v371_v47 = vpop.f32.mrf.mxu0 }
  0xf7   :  { %599 = vadd.xlane.f32.xlu2 %v573_v44  ;;  %v420_v49 = vpop.f32.mrf.mxu1 }
  0xf8   :  { %v886_v50 = vpack.c.bf16 %v475_v46, %v473_v39  ;;  %v421_v51 = vadd.f32 %v420_v49, %v371_v47  ;;  %v576_v0 = vmul.f32 %v475_v46, %v475_v46 }
  0xfa   :  { %898 = vst [vmem:[%s1302_s2 + $0x30] sm:$0xff] %v886_v50   ;;  %v470_v52 = vadd.f32 %v469_v27, %v421_v51 }
  0xfc   :  { %v881_v53 = vpack.c.bf16 %v470_v52, %v468_v41  ;;  %v574_v54 = vmul.f32 %v470_v52, %v470_v52 }
  0xfd   :  { %v477_v55 = vpop.f32.mrf.mxu2 }
  0xfe   :  { %897 = vst [vmem:[%s1302_s2 + $0x28] sm:$0xff] %v881_v53   ;;  %534 = vadd.xlane.f32.xlu1 %v468_v41  ;;  %601 = vadd.xlane.f32.xlu0 %v574_v54  ;;  %v478_v59 = vadd.f32 %v477_v55, %v429_v57 }
  0xff   :  { %536 = vadd.xlane.f32.xlu2 %v470_v52 }
 0x100   :  { %v577_v1 = vmul.f32 %v478_v59, %v478_v59 }
 0x105   :  { %v479_v60 = vpop.f32.mrf.mxu2 }
 0x106   :  { %v480_v61 = vadd.f32 %v479_v60, %v431_v58  ;;  %540 = vadd.xlane.f32.xlu1 %v475_v46 }
 0x107   :  { %542 = vadd.xlane.f32.xlu2 %v478_v59 }
 0x108   :  { %v891_v62 = vpack.c.bf16 %v480_v61, %v478_v59  ;;  %544 = vadd.xlane.f32.xlu0 %v480_v61  ;;  %v578_v63 = vmul.f32 %v480_v61, %v480_v61 }
 0x10a   :  { %899 = vst [vmem:[%s1302_s2 + $0x38] sm:$0xff] %v891_v62  }
 0x10e   :  { %609 = vadd.xlane.f32.xlu1 %v578_v63 }
 0x10f   :  { %605 = vadd.xlane.f32.xlu2 %v576_v0 }
 0x110   :  { %607 = vadd.xlane.f32.xlu0 %v577_v1 }
 0x117   :  { %v515_v2 = vpop.xlane.xlu0 %514 }
 0x118   :  { %547 = vst.msk [vmem:[%s1303_s3] sm:$0xff] %vm546_vm1, %v515_v2 }
 0x119   :  { %v580_v3 = vpop.xlane.xlu1 %579 }
 0x11a   :  { %611 = vst.msk [vmem:[%s1303_s3 + $0x80] sm:$0xff] %vm546_vm1, %v580_v3 }
 0x11f   :  { %v517_v4 = vpop.xlane.xlu0 %516 }
 0x120   :  { %548 = vst.msk [vmem:[%s1303_s3 + $0x8] sm:$0xff] %vm546_vm1, %v517_v4 }
 0x121   :  { %v582_v5 = vpop.xlane.xlu2 %581 }
 0x122   :  { %612 = vst.msk [vmem:[%s1303_s3 + $0x88] sm:$0xff] %vm546_vm1, %v582_v5 }
 0x127   :  { %v519_v6 = vpop.xlane.xlu1 %518 }
 0x128   :  { %549 = vst.msk [vmem:[%s1303_s3 + $0x10] sm:$0xff] %vm546_vm1, %v519_v6 }
 0x129   :  { %v584_v7 = vpop.xlane.xlu0 %583 }
 0x12a   :  { %613 = vst.msk [vmem:[%s1303_s3 + $0x90] sm:$0xff] %vm546_vm1, %v584_v7 }
 0x12f   :  { %v521_v8 = vpop.xlane.xlu1 %520 }
 0x130   :  { %550 = vst.msk [vmem:[%s1303_s3 + $0x18] sm:$0xff] %vm546_vm1, %v521_v8 }
 0x137   :  { %v586_v9 = vpop.xlane.xlu1 %585  ;;  %v523_v10 = vpop.xlane.xlu2 %522 }
 0x138   :  { %614 = vst.msk [vmem:[%s1303_s3 + $0x98] sm:$0xff] %vm546_vm1, %v586_v9 }
 0x139   :  { %551 = vst.msk [vmem:[%s1303_s3 + $0x20] sm:$0xff] %vm546_vm1, %v523_v10 }
 0x13f   :  { %v588_v11 = vpop.xlane.xlu2 %587 }
 0x140   :  { %615 = vst.msk [vmem:[%s1303_s3 + $0xa0] sm:$0xff] %vm546_vm1, %v588_v11 }
 0x141   :  { %v590_v12 = vpop.xlane.xlu0 %589 }
 0x142   :  { %616 = vst.msk [vmem:[%s1303_s3 + $0xa8] sm:$0xff] %vm546_vm1, %v590_v12 }
 0x147   :  { %v525_v13 = vpop.xlane.xlu2 %524 }
 0x148   :  { %552 = vst.msk [vmem:[%s1303_s3 + $0x28] sm:$0xff] %vm546_vm1, %v525_v13 }
 0x149   :  { %v527_v14 = vpop.xlane.xlu0 %526  ;;  %v592_v15 = vpop.xlane.xlu1 %591 }
 0x14a   :  { %553 = vst.msk [vmem:[%s1303_s3 + $0x30] sm:$0xff] %vm546_vm1, %v527_v14 }
 0x14b   :  { %617 = vst.msk [vmem:[%s1303_s3 + $0xb0] sm:$0xff] %vm546_vm1, %v592_v15 }
 0x151   :  { %v529_v16 = vpop.xlane.xlu1 %528  ;;  %v594_v17 = vpop.xlane.xlu2 %593 }
 0x152   :  { %554 = vst.msk [vmem:[%s1303_s3 + $0x38] sm:$0xff] %vm546_vm1, %v529_v16 }
 0x153   :  { %618 = vst.msk [vmem:[%s1303_s3 + $0xb8] sm:$0xff] %vm546_vm1, %v594_v17 }
 0x159   :  { %v531_v18 = vpop.xlane.xlu2 %530  ;;  %v596_v19 = vpop.xlane.xlu0 %595 }
 0x15a   :  { %555 = vst.msk [vmem:[%s1303_s3 + $0x40] sm:$0xff] %vm546_vm1, %v531_v18 }
 0x15b   :  { %619 = vst.msk [vmem:[%s1303_s3 + $0xc0] sm:$0xff] %vm546_vm1, %v596_v19 }
 0x161   :  { %v533_v20 = vpop.xlane.xlu0 %532  ;;  %v598_v21 = vpop.xlane.xlu1 %597 }
 0x162   :  { %556 = vst.msk [vmem:[%s1303_s3 + $0x48] sm:$0xff] %vm546_vm1, %v533_v20 }
 0x163   :  { %620 = vst.msk [vmem:[%s1303_s3 + $0xc8] sm:$0xff] %vm546_vm1, %v598_v21 }
 0x169   :  { %v539_v22 = vpop.xlane.xlu0 %538  ;;  %v604_v23 = vpop.xlane.xlu1 %603 }
 0x16a   :  { %559 = vst.msk [vmem:[%s1303_s3 + $0x60] sm:$0xff] %vm546_vm1, %v539_v22  ;;  %v600_v24 = vpop.xlane.xlu2 %599 }
 0x16b   :  { %623 = vst.msk [vmem:[%s1303_s3 + $0xe0] sm:$0xff] %vm546_vm1, %v604_v23 }
 0x16c   :  { %621 = vst.msk [vmem:[%s1303_s3 + $0xd0] sm:$0xff] %vm546_vm1, %v600_v24 }
 0x171   :  { %v535_v25 = vpop.xlane.xlu1 %534  ;;  %v602_v26 = vpop.xlane.xlu0 %601 }
 0x172   :  { %557 = vst.msk [vmem:[%s1303_s3 + $0x50] sm:$0xff] %vm546_vm1, %v535_v25  ;;  %v537_v27 = vpop.xlane.xlu2 %536 }
 0x173   :  { %558 = vst.msk [vmem:[%s1303_s3 + $0x58] sm:$0xff] %vm546_vm1, %v537_v27 }
 0x174   :  { %622 = vst.msk [vmem:[%s1303_s3 + $0xd8] sm:$0xff] %vm546_vm1, %v602_v26 }
 0x179   :  { %v541_v28 = vpop.xlane.xlu1 %540 }
 0x17a   :  { %560 = vst.msk [vmem:[%s1303_s3 + $0x68] sm:$0xff] %vm546_vm1, %v541_v28  ;;  %v543_v29 = vpop.xlane.xlu2 %542 }
 0x17b   :  { %561 = vst.msk [vmem:[%s1303_s3 + $0x70] sm:$0xff] %vm546_vm1, %v543_v29  ;;  %v545_v30 = vpop.xlane.xlu0 %544 }
 0x17c   :  { %562 = vst.msk [vmem:[%s1303_s3 + $0x78] sm:$0xff] %vm546_vm1, %v545_v30 }
 0x181   :  { %v610_v31 = vpop.xlane.xlu1 %609 }
 0x182   :  { %626 = vst.msk [vmem:[%s1303_s3 + $0xf8] sm:$0xff] %vm546_vm1, %v610_v31  ;;  %v606_v32 = vpop.xlane.xlu2 %605 }
 0x183   :  { %624 = vst.msk [vmem:[%s1303_s3 + $0xe8] sm:$0xff] %vm546_vm1, %v606_v32  ;;  %v608_v33 = vpop.xlane.xlu0 %607 }
 0x184   :  { %625 = vst.msk [vmem:[%s1303_s3 + $0xf0] sm:$0xff] %vm546_vm1, %v608_v33 }

// kernel: resnet_forward.33
= control target key start
LH: loop header
LB: loop body
LE: loop exit
PB: predicated region body
PF: predicated region fallthrough
CT: control target
= control target key end

     0   :  { %v216_v0 = vmov 0   ;;  %s309_s1 = inlined_call_operand.vmem [shape: f32[64,1], index: 1, kind: input, shape index: {}]   ;;  %s310_s2 = inlined_call_operand.vmem [shape: f32[64,1], index: 2, kind: input, shape index: {}]   ;;  %s311_s0 = inlined_call_operand.vmem [shape: bf16[128,128], index: 0, kind: input, shape index: {}]   ;;  %s312_s3 = inlined_call_operand.vmem [shape: bf16[64,128], index: 3, kind: output, shape index: {}]  }
   0x1   :  { %215 = vset.pattern.permute.xlu2 %v216_v0  ;;  %214 = vset.pattern.permute.xlu1 %v216_v0  ;;  %v34_v1 = vld [vmem:[%s309_s1 + $0x20] sm:$0xff]  ;;  %v32_v2 = vld [vmem:[%s309_s1 + $0x10] sm:$0xff]  ;;  %v35_v4 = vld [vmem:[%s309_s1 + $0x28] sm:$0xff] }
   0x2   :  { %v30_v3 = vld [vmem:[%s309_s1] sm:$0xff]  ;;  %213 = vset.pattern.permute.xlu0 %v216_v0  ;;  %60 = vperm.xlu2 %215, %v34_v1   ;;  %v33_v5 = vld [vmem:[%s309_s1 + $0x18] sm:$0xff]  ;;  %v31_v6 = vld [vmem:[%s309_s1 + $0x8] sm:$0xff] }
   0x3   :  { %50 = vperm.xlu1 %214, %v32_v2   ;;  %40 = vperm.xlu0 %213, %v30_v3   ;;  %v86_v7 = vld [vmem:[%s310_s2] sm:$0xff]  ;;  %v37_v8 = vld [vmem:[%s309_s1 + $0x38] sm:$0xff]  ;;  %v36_v9 = vld [vmem:[%s309_s1 + $0x30] sm:$0xff] }
   0x4   :  { %v89_v10 = vld [vmem:[%s310_s2 + $0x18] sm:$0xff]  ;;  %v88_v11 = vld [vmem:[%s310_s2 + $0x10] sm:$0xff]  ;;  %v87_v12 = vld [vmem:[%s310_s2 + $0x8] sm:$0xff] }
   0x5   :  { %v92_v13 = vld [vmem:[%s310_s2 + $0x30] sm:$0xff]  ;;  %v91_v14 = vld [vmem:[%s310_s2 + $0x28] sm:$0xff]  ;;  %v90_v15 = vld [vmem:[%s310_s2 + $0x20] sm:$0xff] }
   0x6   :  { %v93_v16 = vld [vmem:[%s310_s2 + $0x38] sm:$0xff]  ;;  %v206_v24 = vld [vmem:[%s311_s0 + $0x8] sm:$0xff]   ;;  %v171_v25 = vld [vmem:[%s311_s0] sm:$0xff]  }
   0x7   :  { %v172_v26 = vunpack.c.l.bf16 %v171_v25  ;;  %v177_v27 = vunpack.c.h.bf16 %v206_v24  ;;  %v176_v30 = vunpack.c.l.bf16 %v206_v24  ;;  %v173_v33 = vunpack.c.h.bf16 %v171_v25  ;;  %v207_v35 = vld [vmem:[%s311_s0 + $0x10] sm:$0xff]   ;;  %v208_v50 = vld [vmem:[%s311_s0 + $0x18] sm:$0xff]  }
   0x8   :  { %v180_v44 = vunpack.c.l.bf16 %v207_v35  ;;  %v181_v45 = vunpack.c.h.bf16 %v207_v35  ;;  %v184_v55 = vunpack.c.l.bf16 %v208_v50  ;;  %v185_v60 = vunpack.c.h.bf16 %v208_v50 }
   0xa   :  { %65 = vperm.xlu2 %215, %v35_v4  }
   0xb   :  { %55 = vperm.xlu1 %214, %v33_v5   ;;  %45 = vperm.xlu0 %213, %v31_v6  }
  0x12   :  { %96 = vperm.xlu2 %215, %v86_v7  }
  0x13   :  { %75 = vperm.xlu1 %214, %v37_v8   ;;  %70 = vperm.xlu0 %213, %v36_v9  }
  0x1a   :  { %111 = vperm.xlu2 %215, %v89_v10  }
  0x1b   :  { %106 = vperm.xlu1 %214, %v88_v11   ;;  %101 = vperm.xlu0 %213, %v87_v12  }
  0x22   :  { %126 = vperm.xlu2 %215, %v92_v13  }
  0x23   :  { %121 = vperm.xlu1 %214, %v91_v14   ;;  %116 = vperm.xlu0 %213, %v90_v15  }
  0x2b   :  { %131 = vperm.xlu0 %213, %v93_v16  }
  0x5c   :  { %v61_v17 = vpop.permute.xlu2 %60 }
  0x5d   :  { %v82_v53 = vmul.f32 %v180_v44, %v61_v17 }
  0x64   :  { %v66_v20 = vpop.permute.xlu2 %65 }
  0x65   :  { %v83_v54 = vmul.f32 %v181_v45, %v66_v20 }
  0x6c   :  { %v97_v23 = vpop.permute.xlu2 %96 }
  0x74   :  { %v112_v34 = vpop.permute.xlu2 %111 }
  0x75   :  { %v51_v18 = vpop.permute.xlu1 %50  ;;  %v41_v19 = vpop.permute.xlu0 %40 }
  0x76   :  { %v78_v31 = vmul.f32 %v172_v26, %v41_v19  ;;  %v80_v36 = vmul.f32 %v176_v30, %v51_v18 }
  0x78   :  { %v134_v37 = vadd.f32 %v97_v23, %v78_v31 }
  0x7a   :  { %v142_v46 = vmax.f32 %v134_v37, 0.0 }
  0x7c   :  { %v127_v1 = vpop.permute.xlu2 %126 }
  0x7d   :  { %v56_v21 = vpop.permute.xlu1 %55  ;;  %v46_v22 = vpop.permute.xlu0 %45 }
  0x7e   :  { %v81_v32 = vmul.f32 %v177_v27, %v56_v21  ;;  %v79_v39 = vmul.f32 %v173_v33, %v46_v22 }
  0x80   :  { %v137_v38 = vadd.f32 %v112_v34, %v81_v32 }
  0x82   :  { %v145_v47 = vmax.f32 %v137_v38, 0.0 }
  0x85   :  { %v76_v28 = vpop.permute.xlu1 %75  ;;  %v71_v29 = vpop.permute.xlu0 %70 }
  0x86   :  { %v84_v61 = vmul.f32 %v184_v55, %v71_v29  ;;  %v85_v2 = vmul.f32 %v185_v60, %v76_v28 }
  0x88   :  { %v140_v3 = vadd.f32 %v127_v1, %v84_v61 }
  0x8a   :  { %v148_v6 = vmax.f32 %v140_v3, 0.0 }
  0x8d   :  { %v107_v40 = vpop.permute.xlu1 %106  ;;  %v102_v41 = vpop.permute.xlu0 %101 }
  0x8e   :  { %v136_v42 = vadd.f32 %v107_v40, %v80_v36  ;;  %v135_v43 = vadd.f32 %v102_v41, %v79_v39 }
  0x90   :  { %v144_v48 = vmax.f32 %v136_v42, 0.0  ;;  %v143_v49 = vmax.f32 %v135_v43, 0.0 }
  0x92   :  { %v194_v51 = vpack.c.bf16 %v145_v47, %v144_v48  ;;  %v189_v52 = vpack.c.bf16 %v143_v49, %v142_v46 }
  0x94   :  { %209 = vst [vmem:[%s312_s3 + $0x8] sm:$0xff] %v194_v51  }
  0x95   :  { %190 = vst [vmem:[%s312_s3] sm:$0xff] %v189_v52   ;;  %v122_v56 = vpop.permute.xlu1 %121  ;;  %v117_v57 = vpop.permute.xlu0 %116 }
  0x96   :  { %v139_v58 = vadd.f32 %v122_v56, %v83_v54  ;;  %v138_v59 = vadd.f32 %v117_v57, %v82_v53 }
  0x98   :  { %v147_v62 = vmax.f32 %v139_v58, 0.0  ;;  %v146_v63 = vmax.f32 %v138_v59, 0.0 }
  0x9a   :  { %v199_v0 = vpack.c.bf16 %v147_v62, %v146_v63 }
  0x9c   :  { %210 = vst [vmem:[%s312_s3 + $0x10] sm:$0xff] %v199_v0  }
  0x9d   :  { %v132_v4 = vpop.permute.xlu0 %131 }
  0x9e   :  { %v141_v5 = vadd.f32 %v132_v4, %v85_v2 }
  0xa0   :  { %v149_v7 = vmax.f32 %v141_v5, 0.0 }
  0xa2   :  { %v204_v8 = vpack.c.bf16 %v149_v7, %v148_v6 }
  0xa4   :  { %211 = vst [vmem:[%s312_s3 + $0x18] sm:$0xff] %v204_v8  }

// kernel: resnet_forward.34
= control target key start
LH: loop header
LB: loop body
LE: loop exit
PB: predicated region body
PF: predicated region fallthrough
CT: control target
= control target key end

     0   :  { %vm426_vm0 = vcmask 523264   ;;  %vm616_vm1 = vcmask 7168   ;;  %s1322_s0 = inlined_call_operand.vmem [shape: bf16[576,128], index: 0, kind: input, shape index: {}]   ;;  %s1323_s1 = inlined_call_operand.vmem [shape: bf16[64,576], index: 1, kind: input, shape index: {}]   ;;  %s1324_s2 = inlined_call_operand.vmem [shape: bf16[64,128], index: 2, kind: output, shape index: {0}]   ;;  %s1325_s3 = inlined_call_operand.vmem [shape: f32[1,128,1], index: 3, kind: output, shape index: {1}]  }
   0x1   :  { %v920_v0 = vld [vmem:[%s1322_s0 + $0x38] sm:$0xff]  ;;  %v919_v1 = vld [vmem:[%s1322_s0 + $0x30] sm:$0xff]  ;;  %v918_v4 = vld [vmem:[%s1322_s0 + $0x28] sm:$0xff] }
   0x2   :  { %972 = vmatpush.bf16.msra.mxu1 %v920_v0  ;;  %973 = vmatpush.bf16.msra.mxu2 %v920_v0  ;;  %v944_v2 = vld [vmem:[%s1322_s0 + $0xf8] sm:$0xff]  ;;  %v943_v3 = vld [vmem:[%s1322_s0 + $0xf0] sm:$0xff]  ;;  %v942_v5 = vld [vmem:[%s1322_s0 + $0xe8] sm:$0xff] }
   0x3   :  { %439 = vmatpush.bf16.msra.mxu0 %v920_v0  ;;  %526 = vmatpush.bf16.msra.mxu3 %v944_v2  ;;  %v917_v6 = vld [vmem:[%s1322_s0 + $0x20] sm:$0xff]  ;;  %v916_v8 = vld [vmem:[%s1322_s0 + $0x18] sm:$0xff]  ;;  %v915_v10 = vld [vmem:[%s1322_s0 + $0x10] sm:$0xff] }
   0x4   :  { %v941_v7 = vld [vmem:[%s1322_s0 + $0xe0] sm:$0xff]  ;;  %v940_v9 = vld [vmem:[%s1322_s0 + $0xd8] sm:$0xff]  ;;  %v939_v11 = vld [vmem:[%s1322_s0 + $0xd0] sm:$0xff] }
   0x5   :  { %v914_v12 = vld [vmem:[%s1322_s0 + $0x8] sm:$0xff]  ;;  %v913_v14 = vld [vmem:[%s1322_s0] sm:$0xff]  ;;  %v900_v16 = vld [vmem:[%s1323_s1 + $0x38] sm:$0xf0] }
   0x6   :  { %974 = vmatpush.bf16.msra.mxu1 %v919_v1  ;;  %975 = vmatpush.bf16.msra.mxu2 %v919_v1  ;;  %v938_v13 = vld [vmem:[%s1322_s0 + $0xc8] sm:$0xff]  ;;  %v727_v17 = vld [vmem:[%s1323_s1 + $0x78] sm:$0xf]  ;;  %v667_v21 = vld [vmem:[%s1323_s1] sm:$0xf] }
   0x7   :  { %440 = vmatpush.bf16.msra.mxu0 %v919_v1  ;;  %527 = vmatpush.bf16.msra.mxu3 %v943_v3  ;;  %v687_v15 = vld [vmem:[%s1323_s1 + $0x28] sm:$0xf]  ;;  %v910_v18 = vld [vmem:[%s1323_s1 + $0x88] sm:$0xf0]  ;;  %v936_v19 = vld [vmem:[%s1322_s0 + $0xb8] sm:$0xff] }
   0x8   :  { %v928_v20 = vld [vmem:[%s1322_s0 + $0x78] sm:$0xff]  ;;  %v937_v22 = vld [vmem:[%s1322_s0 + $0xc0] sm:$0xff]  ;;  %v688_v23 = vor.u32 %v900_v16, %v687_v15  ;;  %v728_v24 = vor.u32 %v910_v18, %v727_v17  ;;  %v895_v25 = vld [vmem:[%s1323_s1 + $0x10] sm:$0xf0] }
   0x9   :  { %v894_v26 = vld [vmem:[%s1323_s1 + $0xc] sm:$0xf]  ;;  %v677_v27 = vld [vmem:[%s1323_s1 + $0x1c] sm:$0xf0]  ;;  %v948_v28 = vld [vmem:[%s1322_s0 + $0x118] sm:$0xff]  ;;  %v668_v31 = vor.u32 %v895_v25, %v667_v21 }
   0xa   :  { %976 = vmatpush.bf16.msra.mxu1 %v918_v4  ;;  %977 = vmatpush.bf16.msra.mxu2 %v918_v4  ;;  %v935_v29 = vld [vmem:[%s1322_s0 + $0xb0] sm:$0xff]  ;;  %v680_v32 = vor.u32 %v894_v26, %v677_v27  ;;  %v934_v34 = vld [vmem:[%s1322_s0 + $0xa8] sm:$0xff]  ;;  %v933_v37 = vld [vmem:[%s1322_s0 + $0xa0] sm:$0xff] }
   0xb   :  { %441 = vmatpush.bf16.msra.mxu0 %v918_v4  ;;  %528 = vmatpush.bf16.msra.mxu3 %v942_v5  ;;  %v927_v30 = vld [vmem:[%s1322_s0 + $0x70] sm:$0xff]  ;;  %v926_v35 = vld [vmem:[%s1322_s0 + $0x68] sm:$0xff]  ;;  %v925_v38 = vld [vmem:[%s1322_s0 + $0x60] sm:$0xff] }
   0xc   :  { %v947_v33 = vld [vmem:[%s1322_s0 + $0x110] sm:$0xff]  ;;  %v946_v36 = vld [vmem:[%s1322_s0 + $0x108] sm:$0xff]  ;;  %v905_v40 = vld [vmem:[%s1323_s1 + $0x60] sm:$0xf0] }
   0xd   :  { %v707_v39 = vld [vmem:[%s1323_s1 + $0x50] sm:$0xf]  ;;  %v945_v41 = vld [vmem:[%s1322_s0 + $0x100] sm:$0xff]  ;;  %v932_v42 = vld [vmem:[%s1322_s0 + $0x98] sm:$0xff] }
   0xe   :  { %978 = vmatpush.bf16.msra.mxu1 %v917_v6  ;;  %979 = vmatpush.bf16.msra.mxu2 %v917_v6  ;;  %v924_v43 = vld [vmem:[%s1322_s0 + $0x58] sm:$0xff]  ;;  %v683_v44 = vld [vmem:[%s1323_s1 + $0x10] sm:$0xf]  ;;  %v708_v45 = vor.u32 %v905_v40, %v707_v39  ;;  %v897_v46 = vld [vmem:[%s1323_s1 + $0x20] sm:$0xf0] }
   0xf   :  { %442 = vmatpush.bf16.msra.mxu0 %v917_v6  ;;  %529 = vmatpush.bf16.msra.mxu3 %v941_v7  ;;  %v899_v47 = vld [vmem:[%s1323_s1 + $0x34] sm:$0xf]  ;;  %v697_v48 = vld [vmem:[%s1323_s1 + $0x44] sm:$0xf0]  ;;  %v684_v51 = vor.u32 %v897_v46, %v683_v44  ;;  %v929_v55 = vld [vmem:[%s1322_s0 + $0x80] sm:$0xff] }
  0x10   :  { %v931_v49 = vld [vmem:[%s1322_s0 + $0x90] sm:$0xff]  ;;  %v700_v52 = vor.u32 %v899_v47, %v697_v48  ;;  %v930_v53 = vld [vmem:[%s1322_s0 + $0x88] sm:$0xff]  ;;  %v921_v56 = vld [vmem:[%s1322_s0 + $0x40] sm:$0xff] }
  0x11   :  { %v923_v50 = vld [vmem:[%s1322_s0 + $0x50] sm:$0xff]  ;;  %v922_v54 = vld [vmem:[%s1322_s0 + $0x48] sm:$0xff]  ;;  %v896_v58 = vld [vmem:[%s1323_s1 + $0x18] sm:$0xf0] }
  0x12   :  { %980 = vmatpush.bf16.msra.mxu1 %v916_v8  ;;  %981 = vmatpush.bf16.msra.mxu2 %v916_v8  ;;  %v675_v57 = vld [vmem:[%s1323_s1 + $0x8] sm:$0xf]  ;;  %v893_v60 = vld [vmem:[%s1323_s1 + $0x4] sm:$0xf]  ;;  %v669_v61 = vld [vmem:[%s1323_s1 + $0x14] sm:$0xf0] }
  0x13   :  { %443 = vmatpush.bf16.msra.mxu0 %v916_v8  ;;  %530 = vmatpush.bf16.msra.mxu3 %v940_v9  ;;  %v676_v59 = vor.u32 %v896_v58, %v675_v57  ;;  %v703_v62 = vld [vmem:[%s1323_s1 + $0x38] sm:$0xf]  ;;  %v672_v63 = vor.u32 %v893_v60, %v669_v61  ;;  %v902_v0 = vld [vmem:[%s1323_s1 + $0x48] sm:$0xf0]  ;;  %v904_v1 = vld [vmem:[%s1323_s1 + $0x5c] sm:$0xf] }
  0x14   :  { %v717_v2 = vld [vmem:[%s1323_s1 + $0x6c] sm:$0xf0]  ;;  %v704_v3 = vor.u32 %v902_v0, %v703_v62  ;;  %v901_v6 = vld [vmem:[%s1323_s1 + $0x40] sm:$0xf0]  ;;  %v898_v8 = vld [vmem:[%s1323_s1 + $0x2c] sm:$0xf] }
  0x15   :  { %v720_v4 = vor.u32 %v904_v1, %v717_v2  ;;  %v695_v5 = vld [vmem:[%s1323_s1 + $0x30] sm:$0xf]  ;;  %v689_v9 = vld [vmem:[%s1323_s1 + $0x3c] sm:$0xf0]  ;;  %v715_v17 = vld [vmem:[%s1323_s1 + $0x58] sm:$0xf] }
  0x16   :  { %982 = vmatpush.bf16.msra.mxu1 %v915_v10  ;;  %983 = vmatpush.bf16.msra.mxu2 %v915_v10  ;;  %v696_v7 = vor.u32 %v901_v6, %v695_v5  ;;  %v906_v18 = vld [vmem:[%s1323_s1 + $0x68] sm:$0xf0]  ;;  %v709_v21 = vld [vmem:[%s1323_s1 + $0x64] sm:$0xf0]  ;;  %v735_v26 = vld [vmem:[%s1323_s1 + $0x80] sm:$0xf] }
  0x17   :  { %444 = vmatpush.bf16.msra.mxu0 %v915_v10  ;;  %531 = vmatpush.bf16.msra.mxu3 %v939_v11  ;;  %v723_v10 = vld [vmem:[%s1323_s1 + $0x60] sm:$0xf]  ;;  %v692_v11 = vor.u32 %v898_v8, %v689_v9  ;;  %v911_v27 = vld [vmem:[%s1323_s1 + $0x90] sm:$0xf0] }
  0x1a   :  { %984 = vmatpush.bf16.msra.mxu1 %v914_v12  ;;  %985 = vmatpush.bf16.msra.mxu2 %v914_v12 }
  0x1b   :  { %445 = vmatpush.bf16.msra.mxu0 %v914_v12  ;;  %532 = vmatpush.bf16.msra.mxu3 %v938_v13  ;;  %v907_v12 = vld [vmem:[%s1323_s1 + $0x70] sm:$0xf0]  ;;  %v909_v13 = vld [vmem:[%s1323_s1 + $0x84] sm:$0xf] }
  0x1c   :  { %v724_v15 = vor.u32 %v907_v12, %v723_v10 }
  0x1e   :  { %986 = vmatpush.bf16.msra.mxu1 %v913_v14  ;;  %987 = vmatpush.bf16.msra.mxu2 %v913_v14 }
  0x1f   :  { %446 = vmatpush.bf16.msra.mxu0 %v913_v14  ;;  %533 = vmatpush.bf16.msra.mxu3 %v937_v22  ;;  %v737_v14 = vld [vmem:[%s1323_s1 + $0x94] sm:$0xf0] }
  0x20   :  { %v740_v16 = vor.u32 %v909_v13, %v737_v14 }
  0x21   :  { %452 = vmatmul.bf16.vlgmr.msra.gmra.mxu1 %v688_v23  ;;  %462 = vmatmul.bf16.vlgmr.msra.gmra.mxu2 %v728_v24  ;;  %v743_v23 = vld [vmem:[%s1323_s1 + $0x88] sm:$0xf]  ;;  %v912_v24 = vld [vmem:[%s1323_s1 + $0x98] sm:$0xf0] }
  0x22   :  { %497 = vmatpush.bf16.msrb.mxu2 %v936_v19  ;;  %468 = vmatpush.bf16.msrb.mxu1 %v928_v20  ;;  %v716_v19 = vor.u32 %v906_v18, %v715_v17  ;;  %v903_v20 = vld [vmem:[%s1323_s1 + $0x54] sm:$0xf]  ;;  %v744_v25 = vor.u32 %v912_v24, %v743_v23 }
  0x23   :  { %559 = vmatpush.bf16.msrb.mxu0 %v948_v28  ;;  %534 = vmatmul.bf16.vlgmr.msra.gmra.mxu3 %v680_v32  ;;  %v712_v22 = vor.u32 %v903_v20, %v709_v21  ;;  %v736_v28 = vor.u32 %v911_v27, %v735_v26 }
  0x24   :  { %447 = vmatmul.bf16.vlgmr.msra.gmra.mxu0 %v668_v31 }
  0x26   :  { %498 = vmatpush.bf16.msrb.mxu2 %v935_v29  ;;  %469 = vmatpush.bf16.msrb.mxu1 %v927_v30  ;;  %v908_v29 = vld [vmem:[%s1323_s1 + $0x7c] sm:$0xf]  ;;  %v729_v30 = vld [vmem:[%s1323_s1 + $0x8c] sm:$0xf0] }
  0x27   :  { %560 = vmatpush.bf16.msrb.mxu0 %v947_v33  ;;  %v732_v31 = vor.u32 %v908_v29, %v729_v30 }
  0x2a   :  { %499 = vmatpush.bf16.msrb.mxu2 %v934_v34  ;;  %470 = vmatpush.bf16.msrb.mxu1 %v926_v35 }
  0x2b   :  { %561 = vmatpush.bf16.msrb.mxu0 %v946_v36 }
  0x2e   :  { %500 = vmatpush.bf16.msrb.mxu2 %v933_v37  ;;  %471 = vmatpush.bf16.msrb.mxu1 %v925_v38 }
  0x2f   :  { %562 = vmatpush.bf16.msrb.mxu0 %v945_v41 }
  0x31   :  { %457 = vmatmul.bf16.gmra.mxu1 %v708_v45 }
  0x32   :  { %501 = vmatpush.bf16.msrb.mxu2 %v932_v42  ;;  %472 = vmatpush.bf16.msrb.mxu1 %v924_v43 }
  0x33   :  { %539 = vmatmul.bf16.gmra.mxu3 %v700_v52 }
  0x34   :  { %889 = vmatmul.msk.bf16.vlgmr.msrb.gmra.mxu0 %vm426_vm0, %v684_v51 }
  0x36   :  { %502 = vmatpush.bf16.msrb.mxu2 %v931_v49  ;;  %473 = vmatpush.bf16.msrb.mxu1 %v923_v50 }
  0x3a   :  { %503 = vmatpush.bf16.msrb.mxu2 %v930_v53  ;;  %474 = vmatpush.bf16.msrb.mxu1 %v922_v54 }
  0x3e   :  { %504 = vmatpush.bf16.msrb.mxu2 %v929_v55  ;;  %475 = vmatpush.bf16.msrb.mxu1 %v921_v56 }
  0x41   :  { %505 = vmatmul.bf16.vlgmr.msrb.gmra.mxu2 %v676_v59  ;;  %476 = vmatmul.bf16.vlgmr.msrb.gmra.mxu1 %v672_v63 }
  0x43   :  { %544 = vmatmul.bf16.gmra.mxu3 %v720_v4 }
  0x44   :  { %890 = vmatmul.msk.bf16.gmra.mxu0 %vm426_vm0, %v704_v3 }
  0x51   :  { %510 = vmatmul.bf16.gmra.mxu2 %v696_v7  ;;  %481 = vmatmul.bf16.gmra.mxu1 %v692_v11 }
  0x53   :  { %549 = vmatmul.bf16.gmra.mxu3 %v740_v16 }
  0x54   :  { %891 = vmatmul.msk.bf16.gmra.mxu0 %vm426_vm0, %v724_v15 }
  0x61   :  { %515 = vmatmul.bf16.gmra.mxu2 %v716_v19  ;;  %486 = vmatmul.bf16.gmra.mxu1 %v712_v22 }
  0x64   :  { %892 = vmatmul.msk.bf16.gmra.mxu0 %vm426_vm0, %v744_v25 }
  0x71   :  { %520 = vmatmul.bf16.gmra.mxu2 %v736_v28  ;;  %491 = vmatmul.bf16.gmra.mxu1 %v732_v31 }
  0x9e   :  { %v453_v32 = vpop.f32.mrf.mxu1 }
  0xa1   :  { %v448_v33 = vpop.f32.mrf.mxu0 }
  0xa4   :  { %v1240_v37 = vpop.f32.mrf.mxu2 }
  0xa6   :  { %v455_v34 = vpop.f32.mrf.mxu1  ;;  %v535_v38 = vpop.f32.mrf.mxu3 }
  0xa9   :  { %v450_v35 = vpop.f32.mrf.mxu0 }
  0xac   :  { %v1242_v41 = vpop.f32.mrf.mxu2 }
  0xae   :  { %v458_v36 = vpop.f32.mrf.mxu1  ;;  %v537_v44 = vpop.f32.mrf.mxu3 }
  0xb1   :  { %v564_v40 = vpop.f32.mrf.mxu0 }
  0xb6   :  { %v460_v39 = vpop.f32.mrf.mxu1  ;;  %v540_v54 = vpop.f32.mrf.mxu3 }
  0xb9   :  { %v566_v46 = vpop.f32.mrf.mxu0 }
  0xbe   :  { %v477_v42 = vpop.f32.mrf.mxu1  ;;  %v542_v0 = vpop.f32.mrf.mxu3 }
  0xbf   :  { %v478_v43 = vadd.f32 %v477_v42, %v448_v33 }
  0xc1   :  { %v569_v56 = vpop.f32.mrf.mxu0 }
  0xc4   :  { %v506_v45 = vpop.f32.mrf.mxu2 }
  0xc5   :  { %v507_v47 = vadd.f32 %v506_v45, %v478_v43 }
  0xc6   :  { %v479_v49 = vpop.f32.mrf.mxu1  ;;  %v545_v10 = vpop.f32.mrf.mxu3 }
  0xc7   :  { %v536_v48 = vadd.f32 %v535_v38, %v507_v47  ;;  %v480_v51 = vadd.f32 %v479_v49, %v450_v35 }
  0xc9   :  { %v565_v50 = vadd.f32 %v564_v40, %v536_v48  ;;  %v571_v2 = vpop.f32.mrf.mxu0 }
  0xcb   :  { %600 = vadd.xlane.f32.xlu0 %v565_v50  ;;  %v625_v52 = vmul.f32 %v565_v50, %v565_v50 }
  0xcc   :  { %v508_v53 = vpop.f32.mrf.mxu2 }
  0xcd   :  { %v509_v55 = vadd.f32 %v508_v53, %v480_v51  ;;  %633 = vadd.xlane.f32.xlu2 %v625_v52 }
  0xce   :  { %v482_v58 = vpop.f32.mrf.mxu1  ;;  %v547_v23 = vpop.f32.mrf.mxu3 }
  0xcf   :  { %v538_v57 = vadd.f32 %v537_v44, %v509_v55  ;;  %v483_v60 = vadd.f32 %v482_v58, %v453_v32 }
  0xd1   :  { %v567_v59 = vadd.f32 %v566_v46, %v538_v57  ;;  %v574_v14 = vpop.f32.mrf.mxu0 }
  0xd3   :  { %602 = vadd.xlane.f32.xlu0 %v567_v59  ;;  %v952_v61 = vpack.c.bf16 %v567_v59, %v565_v50  ;;  %v626_v5 = vmul.f32 %v567_v59, %v567_v59 }
  0xd4   :  { %v511_v62 = vpop.f32.mrf.mxu2 }
  0xd5   :  { %953 = vst [vmem:[%s1324_s2] sm:$0xff] %v952_v61   ;;  %v512_v63 = vadd.f32 %v511_v62, %v483_v60 }
  0xd6   :  { %v484_v3 = vpop.f32.mrf.mxu1 }
  0xd7   :  { %v541_v1 = vadd.f32 %v540_v54, %v512_v63  ;;  %v485_v6 = vadd.f32 %v484_v3, %v455_v34  ;;  %v550_v34 = vpop.f32.mrf.mxu3 }
  0xd9   :  { %v570_v4 = vadd.f32 %v569_v56, %v541_v1  ;;  %v576_v26 = vpop.f32.mrf.mxu0 }
  0xdb   :  { %604 = vadd.xlane.f32.xlu1 %v570_v4  ;;  %635 = vadd.xlane.f32.xlu0 %v626_v5  ;;  %v627_v13 = vmul.f32 %v570_v4, %v570_v4 }
  0xdc   :  { %v513_v7 = vpop.f32.mrf.mxu2 }
  0xdd   :  { %v514_v8 = vadd.f32 %v513_v7, %v485_v6 }
  0xde   :  { %v487_v12 = vpop.f32.mrf.mxu1 }
  0xdf   :  { %v543_v9 = vadd.f32 %v542_v0, %v514_v8  ;;  %v488_v15 = vadd.f32 %v487_v12, %v458_v36 }
  0xe1   :  { %v572_v11 = vadd.f32 %v571_v2, %v543_v9  ;;  %v579_v38 = vpop.f32.mrf.mxu0 }
  0xe3   :  { %v957_v16 = vpack.c.bf16 %v572_v11, %v570_v4  ;;  %637 = vadd.xlane.f32.xlu1 %v627_v13  ;;  %v628_v17 = vmul.f32 %v572_v11, %v572_v11 }
  0xe4   :  { %v516_v18 = vpop.f32.mrf.mxu2 }
  0xe5   :  { %969 = vst [vmem:[%s1324_s2 + $0x8] sm:$0xff] %v957_v16   ;;  %v517_v19 = vadd.f32 %v516_v18, %v488_v15  ;;  %639 = vadd.xlane.f32.xlu2 %v628_v17 }
  0xe6   :  { %v489_v21 = vpop.f32.mrf.mxu1 }
  0xe7   :  { %v546_v20 = vadd.f32 %v545_v10, %v517_v19  ;;  %v490_v24 = vadd.f32 %v489_v21, %v460_v39 }
  0xe9   :  { %v575_v22 = vadd.f32 %v574_v14, %v546_v20  ;;  %v581_v48 = vpop.f32.mrf.mxu0 }
  0xeb   :  { %606 = vadd.xlane.f32.xlu1 %v572_v11  ;;  %v629_v25 = vmul.f32 %v575_v22, %v575_v22 }
  0xec   :  { %v518_v27 = vpop.f32.mrf.mxu2 }
  0xed   :  { %v519_v28 = vadd.f32 %v518_v27, %v490_v24  ;;  %608 = vadd.xlane.f32.xlu2 %v575_v22  ;;  %641 = vadd.xlane.f32.xlu0 %v629_v25 }
  0xee   :  { %v492_v30 = vpop.f32.mrf.mxu1 }
  0xef   :  { %v548_v29 = vadd.f32 %v547_v23, %v519_v28  ;;  %v493_v32 = vadd.f32 %v492_v30, %v1240_v37  ;;  %v552_v37 = vpop.f32.mrf.mxu3 }
  0xf1   :  { %v577_v31 = vadd.f32 %v576_v26, %v548_v29 }
  0xf3   :  { %v962_v33 = vpack.c.bf16 %v577_v31, %v575_v22  ;;  %v630_v52 = vmul.f32 %v577_v31, %v577_v31 }
  0xf4   :  { %v521_v35 = vpop.f32.mrf.mxu2 }
  0xf5   :  { %v522_v36 = vadd.f32 %v521_v35, %v493_v32  ;;  %970 = vst [vmem:[%s1324_s2 + $0x10] sm:$0xff] %v962_v33   ;;  %610 = vadd.xlane.f32.xlu2 %v577_v31 }
  0xf6   :  { %v494_v40 = vpop.f32.mrf.mxu1 }
  0xf7   :  { %v551_v39 = vadd.f32 %v550_v34, %v522_v36  ;;  %v495_v43 = vadd.f32 %v494_v40, %v1242_v41 }
  0xf9   :  { %v580_v42 = vadd.f32 %v579_v38, %v551_v39 }
  0xfb   :  { %612 = vadd.xlane.f32.xlu0 %v580_v42  ;;  %v631_v44 = vmul.f32 %v580_v42, %v580_v42 }
  0xfc   :  { %v523_v45 = vpop.f32.mrf.mxu2 }
  0xfd   :  { %v524_v46 = vadd.f32 %v523_v45, %v495_v43  ;;  %645 = vadd.xlane.f32.xlu2 %v631_v44 }
  0xff   :  { %v553_v47 = vadd.f32 %v552_v37, %v524_v46 }
 0x101   :  { %v582_v49 = vadd.f32 %v581_v48, %v553_v47 }
 0x103   :  { %v967_v50 = vpack.c.bf16 %v582_v49, %v580_v42  ;;  %614 = vadd.xlane.f32.xlu1 %v582_v49  ;;  %v632_v51 = vmul.f32 %v582_v49, %v582_v49 }
 0x105   :  { %971 = vst [vmem:[%s1324_s2 + $0x18] sm:$0xff] %v967_v50   ;;  %647 = vadd.xlane.f32.xlu0 %v632_v51 }
 0x10b   :  { %643 = vadd.xlane.f32.xlu1 %v630_v52 }
 0x13e   :  { %v601_v41 = vpop.xlane.xlu0 %600 }
 0x13f   :  { %617 = vst.msk [vmem:[%s1325_s3] sm:$0xff] %vm616_vm1, %v601_v41 }
 0x140   :  { %v634_v53 = vpop.xlane.xlu2 %633 }
 0x141   :  { %649 = vst.msk [vmem:[%s1325_s3 + $0x40] sm:$0xff] %vm616_vm1, %v634_v53 }
 0x146   :  { %v603_v54 = vpop.xlane.xlu0 %602 }
 0x147   :  { %618 = vst.msk [vmem:[%s1325_s3 + $0x8] sm:$0xff] %vm616_vm1, %v603_v54 }
 0x14e   :  { %v605_v55 = vpop.xlane.xlu1 %604  ;;  %v636_v56 = vpop.xlane.xlu0 %635 }
 0x14f   :  { %619 = vst.msk [vmem:[%s1325_s3 + $0x10] sm:$0xff] %vm616_vm1, %v605_v55 }
 0x150   :  { %650 = vst.msk [vmem:[%s1325_s3 + $0x48] sm:$0xff] %vm616_vm1, %v636_v56 }
 0x156   :  { %v638_v57 = vpop.xlane.xlu1 %637 }
 0x157   :  { %651 = vst.msk [vmem:[%s1325_s3 + $0x50] sm:$0xff] %vm616_vm1, %v638_v57 }
 0x158   :  { %v640_v58 = vpop.xlane.xlu2 %639 }
 0x159   :  { %652 = vst.msk [vmem:[%s1325_s3 + $0x58] sm:$0xff] %vm616_vm1, %v640_v58 }
 0x15e   :  { %v607_v59 = vpop.xlane.xlu1 %606 }
 0x15f   :  { %620 = vst.msk [vmem:[%s1325_s3 + $0x18] sm:$0xff] %vm616_vm1, %v607_v59 }
 0x160   :  { %v609_v60 = vpop.xlane.xlu2 %608  ;;  %v642_v61 = vpop.xlane.xlu0 %641 }
 0x161   :  { %621 = vst.msk [vmem:[%s1325_s3 + $0x20] sm:$0xff] %vm616_vm1, %v609_v60 }
 0x162   :  { %653 = vst.msk [vmem:[%s1325_s3 + $0x60] sm:$0xff] %vm616_vm1, %v642_v61 }
 0x168   :  { %v611_v62 = vpop.xlane.xlu2 %610 }
 0x169   :  { %622 = vst.msk [vmem:[%s1325_s3 + $0x28] sm:$0xff] %vm616_vm1, %v611_v62 }
 0x16e   :  { %v613_v63 = vpop.xlane.xlu0 %612 }
 0x16f   :  { %623 = vst.msk [vmem:[%s1325_s3 + $0x30] sm:$0xff] %vm616_vm1, %v613_v63 }
 0x170   :  { %v646_v0 = vpop.xlane.xlu2 %645 }
 0x171   :  { %655 = vst.msk [vmem:[%s1325_s3 + $0x70] sm:$0xff] %vm616_vm1, %v646_v0 }
 0x176   :  { %v615_v1 = vpop.xlane.xlu1 %614 }
 0x177   :  { %624 = vst.msk [vmem:[%s1325_s3 + $0x38] sm:$0xff] %vm616_vm1, %v615_v1 }
 0x178   :  { %v648_v2 = vpop.xlane.xlu0 %647 }
 0x179   :  { %656 = vst.msk [vmem:[%s1325_s3 + $0x78] sm:$0xff] %vm616_vm1, %v648_v2 }
 0x17e   :  { %v644_v3 = vpop.xlane.xlu1 %643 }
 0x17f   :  { %654 = vst.msk [vmem:[%s1325_s3 + $0x68] sm:$0xff] %vm616_vm1, %v644_v3 }

// kernel: resnet_forward.35
= control target key start
LH: loop header
LB: loop body
LE: loop exit
PB: predicated region body
PF: predicated region fallthrough
CT: control target
= control target key end

     0   :  { %v392_v0 = vmov 0   ;;  %s587_s2 = inlined_call_operand.vmem [shape: f32[64,1], index: 2, kind: input, shape index: {}]   ;;  %s588_s3 = inlined_call_operand.vmem [shape: f32[64,1], index: 3, kind: input, shape index: {}]   ;;  %s589_s4 = inlined_call_operand.vmem [shape: f32[64,1], index: 4, kind: input, shape index: {}]   ;;  %s590_s5 = inlined_call_operand.vmem [shape: f32[64,1], index: 5, kind: input, shape index: {}]   ;;  %s591_s0 = inlined_call_operand.vmem [shape: bf16[64,128], index: 0, kind: input, shape index: {}]   ;;  %s592_s1 = inlined_call_operand.vmem [shape: bf16[128,128], index: 1, kind: input, shape index: {}]   ;;  %s593_s6 = inlined_call_operand.vmem [shape: bf16[64,128], index: 6, kind: output, shape index: {}]  }
   0x1   :  { %391 = vset.pattern.permute.xlu2 %v392_v0  ;;  %390 = vset.pattern.permute.xlu1 %v392_v0  ;;  %v46_v1 = vld [vmem:[%s587_s2 + $0x20] sm:$0xff]  ;;  %v44_v2 = vld [vmem:[%s587_s2 + $0x10] sm:$0xff]  ;;  %v47_v4 = vld [vmem:[%s587_s2 + $0x28] sm:$0xff] }
   0x2   :  { %v42_v3 = vld [vmem:[%s587_s2] sm:$0xff]  ;;  %389 = vset.pattern.permute.xlu0 %v392_v0  ;;  %72 = vperm.xlu2 %391, %v46_v1   ;;  %v45_v5 = vld [vmem:[%s587_s2 + $0x18] sm:$0xff]  ;;  %v43_v6 = vld [vmem:[%s587_s2 + $0x8] sm:$0xff] }
   0x3   :  { %62 = vperm.xlu1 %390, %v44_v2   ;;  %52 = vperm.xlu0 %389, %v42_v3   ;;  %v98_v7 = vld [vmem:[%s588_s3] sm:$0xff]  ;;  %v49_v8 = vld [vmem:[%s587_s2 + $0x38] sm:$0xff]  ;;  %v48_v9 = vld [vmem:[%s587_s2 + $0x30] sm:$0xff] }
   0x4   :  { %v101_v10 = vld [vmem:[%s588_s3 + $0x18] sm:$0xff]  ;;  %v100_v11 = vld [vmem:[%s588_s3 + $0x10] sm:$0xff]  ;;  %v99_v12 = vld [vmem:[%s588_s3 + $0x8] sm:$0xff] }
   0x5   :  { %v104_v13 = vld [vmem:[%s588_s3 + $0x30] sm:$0xff]  ;;  %v103_v14 = vld [vmem:[%s588_s3 + $0x28] sm:$0xff]  ;;  %v102_v15 = vld [vmem:[%s588_s3 + $0x20] sm:$0xff] }
   0x6   :  { %v171_v16 = vld [vmem:[%s589_s4 + $0x8] sm:$0xff]  ;;  %v170_v17 = vld [vmem:[%s589_s4] sm:$0xff]  ;;  %v105_v18 = vld [vmem:[%s588_s3 + $0x38] sm:$0xff] }
   0x7   :  { %v174_v19 = vld [vmem:[%s589_s4 + $0x20] sm:$0xff]  ;;  %v173_v20 = vld [vmem:[%s589_s4 + $0x18] sm:$0xff]  ;;  %v172_v21 = vld [vmem:[%s589_s4 + $0x10] sm:$0xff] }
   0x8   :  { %v177_v22 = vld [vmem:[%s589_s4 + $0x38] sm:$0xff]  ;;  %v176_v23 = vld [vmem:[%s589_s4 + $0x30] sm:$0xff]  ;;  %v175_v24 = vld [vmem:[%s589_s4 + $0x28] sm:$0xff] }
   0x9   :  { %v228_v25 = vld [vmem:[%s590_s5 + $0x10] sm:$0xff]  ;;  %v227_v26 = vld [vmem:[%s590_s5 + $0x8] sm:$0xff]  ;;  %v226_v27 = vld [vmem:[%s590_s5] sm:$0xff] }
   0xa   :  { %77 = vperm.xlu2 %391, %v47_v4   ;;  %v231_v28 = vld [vmem:[%s590_s5 + $0x28] sm:$0xff]  ;;  %v230_v29 = vld [vmem:[%s590_s5 + $0x20] sm:$0xff]  ;;  %v229_v30 = vld [vmem:[%s590_s5 + $0x18] sm:$0xff] }
   0xb   :  { %67 = vperm.xlu1 %390, %v45_v5   ;;  %57 = vperm.xlu0 %389, %v43_v6   ;;  %v233_v31 = vld [vmem:[%s590_s5 + $0x38] sm:$0xff]  ;;  %v232_v32 = vld [vmem:[%s590_s5 + $0x30] sm:$0xff]  ;;  %v327_v55 = vld [vmem:[%s591_s0] sm:$0xff]  }
   0xc   :  { %v328_v56 = vunpack.c.l.bf16 %v327_v55  ;;  %v381_v57 = vld [vmem:[%s592_s1 + $0x20] sm:$0xff]   ;;  %v329_v60 = vunpack.c.h.bf16 %v327_v55  ;;  %v382_v62 = vld [vmem:[%s592_s1 + $0x28] sm:$0xff]   ;;  %v379_v1 = vld [vmem:[%s591_s0 + $0x10] sm:$0xff]  }
   0xd   :  { %v345_v63 = vunpack.c.h.bf16 %v381_v57  ;;  %v344_v0 = vunpack.c.l.bf16 %v381_v57  ;;  %v383_v3 = vld [vmem:[%s592_s1 + $0x30] sm:$0xff]   ;;  %v378_v4 = vld [vmem:[%s591_s0 + $0x8] sm:$0xff]   ;;  %v348_v5 = vunpack.c.l.bf16 %v382_v62 }
   0xe   :  { %v353_v6 = vunpack.c.h.bf16 %v383_v3 }
  0x12   :  { %108 = vperm.xlu2 %391, %v98_v7  }
  0x13   :  { %87 = vperm.xlu1 %390, %v49_v8   ;;  %82 = vperm.xlu0 %389, %v48_v9   ;;  %v337_v8 = vunpack.c.h.bf16 %v379_v1 }
  0x1a   :  { %123 = vperm.xlu2 %391, %v101_v10  }
  0x1b   :  { %118 = vperm.xlu1 %390, %v100_v11   ;;  %113 = vperm.xlu0 %389, %v99_v12   ;;  %v332_v11 = vunpack.c.l.bf16 %v378_v4 }
  0x22   :  { %138 = vperm.xlu2 %391, %v104_v13   ;;  %v333_v13 = vunpack.c.h.bf16 %v378_v4 }
  0x23   :  { %133 = vperm.xlu1 %390, %v103_v14   ;;  %128 = vperm.xlu0 %389, %v102_v15  }
  0x2a   :  { %185 = vperm.xlu2 %391, %v171_v16  }
  0x2b   :  { %180 = vperm.xlu1 %390, %v170_v17   ;;  %143 = vperm.xlu0 %389, %v105_v18  }
  0x32   :  { %200 = vperm.xlu2 %391, %v174_v19  }
  0x33   :  { %195 = vperm.xlu1 %390, %v173_v20   ;;  %190 = vperm.xlu0 %389, %v172_v21   ;;  %v336_v21 = vunpack.c.l.bf16 %v379_v1 }
  0x3a   :  { %215 = vperm.xlu2 %391, %v177_v22   ;;  %v352_v22 = vunpack.c.l.bf16 %v383_v3 }
  0x3b   :  { %210 = vperm.xlu1 %390, %v176_v23   ;;  %205 = vperm.xlu0 %389, %v175_v24   ;;  %v349_v23 = vunpack.c.h.bf16 %v382_v62 }
  0x42   :  { %246 = vperm.xlu2 %391, %v228_v25  }
  0x43   :  { %241 = vperm.xlu1 %390, %v227_v26   ;;  %236 = vperm.xlu0 %389, %v226_v27  }
  0x4a   :  { %261 = vperm.xlu2 %391, %v231_v28  }
  0x4b   :  { %256 = vperm.xlu1 %390, %v230_v29   ;;  %251 = vperm.xlu0 %389, %v229_v30   ;;  %v380_v30 = vld [vmem:[%s591_s0 + $0x18] sm:$0xff]  }
  0x53   :  { %271 = vperm.xlu1 %390, %v233_v31   ;;  %266 = vperm.xlu0 %389, %v232_v32  }
  0x5c   :  { %v524_v33 = vpop.permute.xlu2 %72 }
  0x64   :  { %v78_v34 = vpop.permute.xlu2 %77 }
  0x65   :  { %v95_v26 = vmul.f32 %v337_v8, %v78_v34 }
  0x6c   :  { %v109_v35 = vpop.permute.xlu2 %108 }
  0x74   :  { %v526_v38 = vpop.permute.xlu2 %123 }
  0x75   :  { %v63_v36 = vpop.permute.xlu1 %62  ;;  %v53_v37 = vpop.permute.xlu0 %52 }
  0x76   :  { %v90_v2 = vmul.f32 %v328_v56, %v53_v37  ;;  %v92_v27 = vmul.f32 %v332_v11, %v63_v36  ;;  %v340_v36 = vunpack.c.l.bf16 %v380_v30 }
  0x78   :  { %v146_v12 = vadd.f32 %v109_v35, %v90_v2 }
  0x7c   :  { %v532_v43 = vpop.permute.xlu2 %138 }
  0x7d   :  { %v68_v39 = vpop.permute.xlu1 %67  ;;  %v58_v40 = vpop.permute.xlu0 %57 }
  0x7e   :  { %v91_v7 = vmul.f32 %v329_v60, %v58_v40  ;;  %v93_v28 = vmul.f32 %v333_v13, %v68_v39  ;;  %v94_v40 = vmul.f32 %v336_v21, %v524_v33  ;;  %v384_v39 = vld [vmem:[%s592_s1 + $0x38] sm:$0xff]  }
  0x80   :  { %v149_v34 = vadd.f32 %v526_v38, %v93_v28  ;;  %v356_v38 = vunpack.c.l.bf16 %v384_v39 }
  0x84   :  { %v186_v46 = vpop.permute.xlu2 %185 }
  0x85   :  { %v528_v41 = vpop.permute.xlu1 %87  ;;  %v530_v42 = vpop.permute.xlu0 %82  ;;  %v219_v9 = vmul.f32 %v345_v63, %v186_v46 }
  0x86   :  { %v96_v63 = vmul.f32 %v340_v36, %v530_v42 }
  0x8c   :  { %v201_v49 = vpop.permute.xlu2 %200 }
  0x8d   :  { %v119_v44 = vpop.permute.xlu1 %118  ;;  %v114_v45 = vpop.permute.xlu0 %113 }
  0x8e   :  { %v147_v14 = vadd.f32 %v114_v45, %v91_v7  ;;  %v222_v45 = vmul.f32 %v352_v22, %v201_v49  ;;  %v148_v46 = vadd.f32 %v119_v44, %v92_v27  ;;  %v357_v49 = vunpack.c.h.bf16 %v384_v39 }
  0x94   :  { %v538_v52 = vpop.permute.xlu2 %215 }
  0x95   :  { %v134_v47 = vpop.permute.xlu1 %133  ;;  %v534_v48 = vpop.permute.xlu0 %128  ;;  %v225_v4 = vmul.f32 %v357_v49, %v538_v52 }
  0x96   :  { %v150_v56 = vadd.f32 %v534_v48, %v94_v40 }
  0x9c   :  { %v247_v61 = vpop.permute.xlu2 %246 }
  0x9d   :  { %v181_v50 = vpop.permute.xlu1 %180  ;;  %v536_v51 = vpop.permute.xlu0 %143 }
  0x9e   :  { %v218_v10 = vmul.f32 %v344_v0, %v181_v50  ;;  %v151_v50 = vadd.f32 %v134_v47, %v95_v26  ;;  %v341_v47 = vunpack.c.h.bf16 %v380_v30 }
  0xa0   :  { %v97_v3 = vmul.f32 %v341_v47, %v528_v41 }
  0xa2   :  { %v153_v11 = vadd.f32 %v536_v51, %v97_v3 }
  0xa4   :  { %v262_v29 = vpop.permute.xlu2 %261 }
  0xa5   :  { %v196_v53 = vpop.permute.xlu1 %195  ;;  %v191_v54 = vpop.permute.xlu0 %190 }
  0xa6   :  { %v220_v17 = vmul.f32 %v348_v5, %v191_v54  ;;  %v221_v54 = vmul.f32 %v349_v23, %v196_v53 }
  0xa8   :  { %v276_v31 = vadd.f32 %v247_v61, %v220_v17 }
  0xaa   :  { %v284_v60 = vadd.f32 %v276_v31, %v148_v46 }
  0xac   :  { %v292_v0 = vmax.f32 %v284_v60, 0.0 }
  0xad   :  { %v546_v58 = vpop.permute.xlu1 %210  ;;  %v206_v59 = vpop.permute.xlu0 %205 }
  0xae   :  { %v223_v18 = vmul.f32 %v353_v6, %v206_v59  ;;  %v224_v5 = vmul.f32 %v356_v38, %v546_v58 }
  0xb0   :  { %v279_v32 = vadd.f32 %v262_v29, %v223_v18 }
  0xb2   :  { %v287_v61 = vadd.f32 %v279_v32, %v151_v50 }
  0xb4   :  { %v295_v1 = vmax.f32 %v287_v61, 0.0 }
  0xb5   :  { %v242_v15 = vpop.permute.xlu1 %241  ;;  %v237_v16 = vpop.permute.xlu0 %236 }
  0xb6   :  { %v275_v19 = vadd.f32 %v242_v15, %v219_v9  ;;  %v274_v20 = vadd.f32 %v237_v16, %v218_v10  ;;  %v152_v10 = vadd.f32 %v532_v43, %v96_v63 }
  0xb8   :  { %v283_v24 = vadd.f32 %v275_v19, %v147_v14  ;;  %v282_v25 = vadd.f32 %v274_v20, %v146_v12 }
  0xba   :  { %v291_v35 = vmax.f32 %v283_v24, 0.0  ;;  %v290_v37 = vmax.f32 %v282_v25, 0.0 }
  0xbc   :  { %v361_v55 = vpack.c.bf16 %v291_v35, %v290_v37 }
  0xbd   :  { %v257_v57 = vpop.permute.xlu1 %256  ;;  %v252_v59 = vpop.permute.xlu0 %251 }
  0xbe   :  { %362 = vst [vmem:[%s593_s6] sm:$0xff] %v361_v55   ;;  %v278_v33 = vadd.f32 %v257_v57, %v222_v45  ;;  %v277_v44 = vadd.f32 %v252_v59, %v221_v54 }
  0xc0   :  { %v286_v53 = vadd.f32 %v278_v33, %v150_v56  ;;  %v285_v62 = vadd.f32 %v277_v44, %v149_v34 }
  0xc2   :  { %v294_v48 = vmax.f32 %v286_v53, 0.0  ;;  %v293_v2 = vmax.f32 %v285_v62, 0.0 }
  0xc4   :  { %v371_v6 = vpack.c.bf16 %v295_v1, %v294_v48  ;;  %v366_v7 = vpack.c.bf16 %v293_v2, %v292_v0 }
  0xc5   :  { %v272_v8 = vpop.permute.xlu1 %271  ;;  %v267_v9 = vpop.permute.xlu0 %266 }
  0xc6   :  { %386 = vst [vmem:[%s593_s6 + $0x10] sm:$0xff] %v371_v6   ;;  %v281_v42 = vadd.f32 %v272_v8, %v225_v4  ;;  %v280_v12 = vadd.f32 %v267_v9, %v224_v5 }
  0xc7   :  { %385 = vst [vmem:[%s593_s6 + $0x8] sm:$0xff] %v366_v7  }
  0xc8   :  { %v289_v41 = vadd.f32 %v281_v42, %v153_v11  ;;  %v288_v52 = vadd.f32 %v280_v12, %v152_v10 }
  0xca   :  { %v297_v58 = vmax.f32 %v289_v41, 0.0  ;;  %v296_v13 = vmax.f32 %v288_v52, 0.0 }
  0xcc   :  { %v376_v14 = vpack.c.bf16 %v297_v58, %v296_v13 }
  0xce   :  { %387 = vst [vmem:[%s593_s6 + $0x18] sm:$0xff] %v376_v14  }

</bundles_post_ra>
